<compile_context>
chip_gen: v7x
topology: tpu7x:2x2x1
jax: 0.10.0
libtpu: 0.0.40
codegen_flags: <defaults>
</compile_context>

<pallas_src>
import math
import jax
import jax.numpy as jnp
from jax.experimental import pallas as pl
from jax.experimental.pallas import tpu as pltpu

# ------------------------------ config --------------------------------------
_F32 = jnp.float32
_BF16 = jnp.bfloat16

LATENT = 256
N_LAYERS_MLP = 3
N_LAYERS_HEADS = 2

N_HARMONIC = 60
OMEGA0 = 1.0                          # TODO(synk): pytorch3d default may be 0.1
HARM_HALF = N_HARMONIC * 3            # 180 lanes per sin / cos half
HARMONIC_DIM = 2 * HARM_HALF          # 360
HASH_N_LEVELS = 16
HASH_F_PER_LEVEL = 2
HASH_DIM = HASH_N_LEVELS * HASH_F_PER_LEVEL   # 32
LOG2_HASHMAP = 19
HASHMAP_SIZE = 1 << LOG2_HASHMAP
BASE_RES = 16
FINEST_RES = 512
BOX_MIN, BOX_MAX = -1.0, 5.0          # HashEmbedder([-1, 5])


# ----------------------- generation-aware tiling defaults --------------------
def _tpu_vmem_capacity_bytes():
    try:
        return int(pltpu.get_tpu_info().vmem_capacity_bytes)
    except Exception:
        return 64 * 1024 * 1024        # conservative (v7x per-TC) fallback


_VMEM_CAP = _tpu_vmem_capacity_bytes()
_LARGE_VMEM = _VMEM_CAP >= 100 * 1024 * 1024          # v5e/v6e: 128 MiB; v7x: 64 MiB/TC
_VMEM_LIMIT = (64 if _LARGE_VMEM else 40) * 1024 * 1024
_TM_MAX = 2048 if _LARGE_VMEM else 1024


# --------------------------- plain-JAX encoders ------------------------------
def l2_normalize(x, eps=1e-12):
    n = jnp.sqrt(jnp.sum(x * x, axis=-1, keepdims=True))
    return x / jnp.maximum(n, eps)


def harmonic_freq_rows():
    """(3, 180) matrix F with F[c, c*60 + k] = OMEGA0 * 2^k, zero elsewhere.

    Lets the kernel (and the host-side direction branch) build phases as
    x0*F[0] + x1*F[1] + x2*F[2] with pure broadcasts (no gather/concat).
    """
    lane = jnp.arange(HARM_HALF)
    coord = lane // N_HARMONIC
    k = lane % N_HARMONIC
    freqs = (OMEGA0 * (2.0 ** k.astype(_F32))).astype(_F32)
    sel = coord[None, :] == jnp.arange(3)[:, None]
    return jnp.where(sel, freqs[None, :], 0.0).astype(_F32)


_HASH_PRIMES = jnp.array([1, 2654435761, 805459861], dtype=jnp.uint32)
_BOX_OFFSETS = jnp.array(
    [[i, j, k] for i in (0, 1) for j in (0, 1) for k in (0, 1)], dtype=jnp.int32
)  # (8, 3)


def _spatial_hash(coords):
    c = coords.astype(jnp.uint32)
    h = (c[..., 0] * _HASH_PRIMES[0]) ^ (c[..., 1] * _HASH_PRIMES[1]) ^ (
        c[..., 2] * _HASH_PRIMES[2]
    )
    return (h & jnp.uint32(HASHMAP_SIZE - 1)).astype(jnp.int32)


def hash_embed(x, tables):
    """Instant-NGP multiresolution hash encoding. x (N,3) -> (N, 32).

    # TODO(synk): the per-level hash-table gather + trilinear interpolation is
    # data-dependent gather; it stays in plain JAX (no clean Pallas TPU gather)
    # and is the likely end-to-end bottleneck for large N (profile it; a
    # per-level VMEM-streaming Pallas gather kernel is the next step).
    """
    b = math.exp((math.log(FINEST_RES) - math.log(BASE_RES)) / (HASH_N_LEVELS - 1))
    xc = jnp.clip(x, BOX_MIN, BOX_MAX)
    feats = []
    for lvl in range(HASH_N_LEVELS):
        res = math.floor(BASE_RES * (b ** lvl))
        grid = (BOX_MAX - BOX_MIN) / res
        bl = jnp.floor((xc - BOX_MIN) / grid).astype(jnp.int32)       # (N,3)
        vmin = bl.astype(_F32) * grid + BOX_MIN
        vmax = vmin + grid
        idx = _spatial_hash(bl[:, None, :] + _BOX_OFFSETS[None])      # (N,8)
        emb = tables[lvl][idx]                                        # (N,8,2)
        w = (x - vmin) / (vmax - vmin)                                # (N,3)
        w0, w1, w2 = w[:, 0:1], w[:, 1:2], w[:, 2:3]
        c00 = emb[:, 0] * (1 - w0) + emb[:, 4] * w0
        c01 = emb[:, 1] * (1 - w0) + emb[:, 5] * w0
        c10 = emb[:, 2] * (1 - w0) + emb[:, 6] * w0
        c11 = emb[:, 3] * (1 - w0) + emb[:, 7] * w0
        c0 = c00 * (1 - w1) + c10 * w1
        c1 = c01 * (1 - w1) + c11 * w1
        feats.append(c0 * (1 - w2) + c1 * w2)                         # (N,2)
    return jnp.concatenate(feats, axis=-1)                            # (N,32)


# --------------------- in-kernel harmonic embedding helpers ------------------
_TWO_PI = 6.283185307179586
_INV_TWO_PI = 0.15915494309189535
_HALF_PI = 1.5707963267948966
_TWO_OVER_PI = 0.6366197723675814


def _sincos(ph):
    """Branch-free sin/cos built only from mul/add/floor/select (VPU only).

    Explicit range reduction keeps the result finite and bounded even for the
    enormous phases (|x| * 2^59) this 60-frequency harmonic embedding produces
    (those high frequencies are rounding noise in f32 in the reference too).
    Hidden under the MXU matmuls.
    """
    for _ in range(2):                      # coarse reductions mod 2*pi
        n = jnp.floor(ph * _INV_TWO_PI + 0.5)
        ph = ph - n * _TWO_PI
    m = jnp.floor(ph * _TWO_OVER_PI + 0.5)  # final reduction mod pi/2
    r = ph - m * _HALF_PI                   # r in ~[-pi/4, pi/4]
    q = m - 4.0 * jnp.floor(m * 0.25)       # quadrant in {0,1,2,3}, exact
    r2 = r * r
    sin_r = r * (1.0 + r2 * (-1.0 / 6.0 + r2 * (1.0 / 120.0 + r2 * (-1.0 / 5040.0))))
    cos_r = 1.0 + r2 * (-0.5 + r2 * (1.0 / 24.0
                                     + r2 * (-1.0 / 720.0 + r2 * (1.0 / 40320.0))))
    sin_ph = jnp.where(q == 0.0, sin_r,
             jnp.where(q == 1.0, cos_r,
             jnp.where(q == 2.0, -sin_r, -cos_r)))
    cos_ph = jnp.where(q == 0.0, cos_r,
             jnp.where(q == 1.0, -sin_r,
             jnp.where(q == 2.0, -cos_r, sin_r)))
    return sin_ph, cos_ph


def _phases(xyz, fr):
    """(tm,3),(3,180) -> (tm,180) phases x_c * OMEGA0*2^k (coordinate-major)."""
    return (xyz[:, 0:1] * fr[0:1, :]
            + xyz[:, 1:2] * fr[1:2, :]
            + xyz[:, 2:3] * fr[2:3, :])


# ------------------------------ Pallas kernel --------------------------------
def hashnerf_kernel(hash_ref, pts_ref, dirb_ref,
                    fr_ref, w0h_ref, w0sc_ref, wh0l_ref, w_mid_ref,
                    fvec_ref, outmix_ref, out_ref):
    def dot(a, w):
        # bf16 x bf16 MXU matmul with f32 accumulation.
        return jnp.dot(a.astype(_BF16), w, preferred_element_type=_F32)

    def relu(v):
        return jnp.maximum(v, 0.0)

    def bias(j):                       # (1,256) f32 bias row j of fvec
        return fvec_ref[j:j + 1, :]

    # Harmonic embedding of the normalized points.  Sin/cos halves are consumed
    # directly against the matching halves of the layer-0 weights, so the
    # (tm, 360) embedding is never materialized.
    # TODO(synk): fusing [hash|sin] into one 212-lane MXU operand (one fewer
    # K-pass) needs an unaligned lane concat; skipped for lowering safety.
    ps, pc = _sincos(_phases(pts_ref[...], fr_ref[...]))

    # trunk MLP: Linear(392->256)+ReLU, then 3x (Linear(256->256)+ReLU)
    h = relu(dot(hash_ref[...], w0h_ref[...])
             + dot(ps, w0sc_ref[0]) + dot(pc, w0sc_ref[1]) + bias(0))
    h = relu(dot(h, w_mid_ref[0]) + bias(1))
    h = relu(dot(h, w_mid_ref[1]) + bias(2))
    h = relu(dot(h, w_mid_ref[2]) + bias(3))

    # color|alpha heads, layer 0 fused to one lane-dense (tm, 512) matmul.
    # The per-ray direction-harmonic contribution (incl. its bias) is
    # precomputed outside the kernel and streamed in as dirb.
    ca = relu(dot(h, wh0l_ref[...]) + dirb_ref[...].astype(_F32))
    c = ca[:, :LATENT]
    a = ca[:, LATENT:]

    c = relu(dot(c, w_mid_ref[3]) + bias(4))
    c = relu(dot(c, w_mid_ref[4]) + bias(5))
    a = relu(dot(a, w_mid_ref[5]) + bias(6))
    a = relu(dot(a, w_mid_ref[6]) + bias(7))

    # final 256->3 / 256->1 projections OFF the MXU: VPU multiplies + XLU lane
    # reduces (a 4-lane output wastes a full 256-wide MXU output pass).
    r0 = jnp.sum(c * fvec_ref[8:9, :], axis=-1, keepdims=True)
    r1 = jnp.sum(c * fvec_ref[9:10, :], axis=-1, keepdims=True)
    r2 = jnp.sum(c * fvec_ref[10:11, :], axis=-1, keepdims=True)
    r3 = jnp.sum(a * fvec_ref[11:12, :], axis=-1, keepdims=True)
    om = outmix_ref[...]               # rows 0..3 = one-hot columns, row 4 = bias
    logits = (r0 * om[0:1, :] + r1 * om[1:2, :] + r2 * om[2:3, :]
              + r3 * om[3:4, :] + om[4:5, :])
    out_ref[...] = jax.nn.sigmoid(logits)   # lanes 0..2 = color, lane 3 = alpha


# ------------------------------ kernel wrapper -------------------------------
def _round_up(x, m):
    return (x + m - 1) // m * m


def _pad_rows(x, n_pad):
    n = x.shape[0]
    if n == n_pad:
        return x
    pad = jnp.zeros((n_pad - n,) + x.shape[1:], x.dtype)
    return jnp.concatenate([x, pad], axis=0)


def _pick_tiling(n, tm_max=_TM_MAX):
    """Row tile + padded row count; keep >=2 grid steps so both v7x TCs work."""
    n128 = _round_up(n, 128)
    if n128 >= 2 * tm_max:
        tm = tm_max
    else:
        tm = max(128, n128 // 2)       # multiple of 64 >= 128 -> sublane-aligned
    n_pad = _round_up(n, tm)
    return tm, n_pad


def run_mlp(hash_feats, pts_normed, dirb, weights):
    """weights = (fr, w0h, w0sc, wh0l, w_mid, fvec, outmix) packed slabs."""
    n = hash_feats.shape[0]
    tm, n_pad = _pick_tiling(n)
    grid = (n_pad // tm,)

    hash_feats = _pad_rows(hash_feats.astype(_BF16), n_pad)
    pts_normed = _pad_rows(pts_normed.astype(_F32), n_pad)
    dirb = _pad_rows(dirb.astype(_BF16), n_pad)

    def row_spec(d):
        return pl.BlockSpec((tm, d), lambda i: (i, 0))

    def full_spec(w):
        zero = (0,) * w.ndim
        return pl.BlockSpec(w.shape, lambda i, _z=zero: _z)   # fetched once

    in_specs = ([row_spec(HASH_DIM), row_spec(3), row_spec(2 * LATENT)]
                + [full_spec(w) for w in weights])
    out_specs = pl.BlockSpec((tm, 4), lambda i: (i, 0))

    out = pl.pallas_call(
        hashnerf_kernel,
        out_shape=jax.ShapeDtypeStruct((n_pad, 4), _F32),
        grid_spec=pltpu.PrefetchScalarGridSpec(
            num_scalar_prefetch=0,
            grid=grid,
            in_specs=in_specs,
            out_specs=out_specs,
        ),
        compiler_params=pltpu.CompilerParams(
            dimension_semantics=("parallel",),
            vmem_limit_bytes=_VMEM_LIMIT,
        ),
    )(hash_feats, pts_normed, dirb, *weights)
    return out[:n, :3], out[:n, 3:4]          # color, alpha


# ------------------------------ params ---------------------------------------
def _linear(key, fan_in, fan_out):
    k1, k2 = jax.random.split(key)
    bd = 1.0 / math.sqrt(fan_in)
    w = jax.random.uniform(k1, (fan_in, fan_out), _F32, -bd, bd)
    b = jax.random.uniform(k2, (1, fan_out), _F32, -bd, bd)
    return w, b


def init_params(key):
    keys = iter(jax.random.split(key, 20))
    p = {}
    p["hash_tables"] = jax.random.uniform(
        next(keys), (HASH_N_LEVELS, HASHMAP_SIZE, HASH_F_PER_LEVEL), _F32, -1e-4, 1e-4
    )

    enc_size = HASH_DIM + HARMONIC_DIM   # 392
    head_in = LATENT + HARMONIC_DIM      # 616

    mlp = [_linear(next(keys), enc_size, LATENT)]
    for _ in range(N_LAYERS_MLP):
        mlp.append(_linear(next(keys), LATENT, LATENT))
    p["mlp"] = mlp

    def make_head(out_dim):
        layers = [_linear(next(keys), head_in, LATENT)]
        for _ in range(N_LAYERS_HEADS):
            layers.append(_linear(next(keys), LATENT, LATENT))
        layers.append(_linear(next(keys), LATENT, out_dim))
        return layers

    p["color"] = make_head(3)
    p["alpha"] = make_head(1)
    return p


def pack_weights(p):
    """Fuse / reorder torch-layout weights into the kernel's 7 packed slabs.

    Called ONCE outside the jitted per-step forward (bf16 casts + concats are
    not re-run every call, and the kernel's HBM inputs stay stable).
    """
    def bf(w):
        return w.astype(_BF16)

    fr = harmonic_freq_rows()                                   # (3,180) f32

    # trunk layer 0: fan-in order [hash(32) | sin(180) | cos(180)]
    w0, b0 = p["mlp"][0]
    w0h = bf(w0[:HASH_DIM])                                     # (32,256)
    w0sc = bf(jnp.stack([w0[HASH_DIM:HASH_DIM + HARM_HALF],
                         w0[HASH_DIM + HARM_HALF:]]))           # (2,180,256)

    mids = [w for w, _ in p["mlp"][1:]]
    bmids = [b0] + [b for _, b in p["mlp"][1:]]

    # heads layer 0, fused output columns: [0:256) = color, [256:512) = alpha
    wc0, bc0 = p["color"][0]
    wa0, ba0 = p["alpha"][0]
    wh0 = jnp.concatenate([wc0, wa0], axis=1)                   # (616,512)
    wh0l = bf(wh0[:LATENT])                                     # (256,512) in-kernel
    wdir = wh0[LATENT:]                                         # (360,512) host-side
    bh0 = jnp.concatenate([bc0, ba0], axis=1)                   # (1,512)   host-side

    for w, b in p["color"][1:1 + N_LAYERS_HEADS]:
        mids.append(w); bmids.append(b)
    for w, b in p["alpha"][1:1 + N_LAYERS_HEADS]:
        mids.append(w); bmids.append(b)
    w_mid = bf(jnp.stack(mids))                                 # (7,256,256)
    b_mid = jnp.concatenate(bmids, axis=0)                      # (8,256) f32

    # final projections as f32 rows (consumed on the VPU, not the MXU):
    # rows 8..10 = color weight columns, row 11 = alpha weight column.
    wc3, bc3 = p["color"][-1]
    wa3, ba3 = p["alpha"][-1]
    wout = jnp.concatenate([wc3, wa3], axis=1).T                # (4,256)
    fvec = jnp.concatenate([b_mid, wout], axis=0)               # (12,256)
    outmix = jnp.concatenate(
        [jnp.eye(4, dtype=_F32), jnp.concatenate([bc3, ba3], axis=1)], axis=0
    )                                                           # (5,4)

    kernel_weights = (fr, w0h, w0sc, wh0l, w_mid, fvec, outmix)
    return {"kernel": kernel_weights, "fr": fr, "wdir": wdir, "bh0": bh0}


# ------------------------------ forward --------------------------------------
def hashnerf_forward(origins, directions, lengths, hash_tables, packed):
    """origins (bs,3), directions (bs,3), lengths (bs,pts) -> (alpha, color)."""
    bs, pts = lengths.shape
    # ray_bundle_to_ray_points
    points_world = origins[:, None, :] + lengths[:, :, None] * directions[:, None, :]
    pts_flat = points_world.reshape(-1, 3)                        # (N, 3)

    hash_feats = hash_embed(pts_flat, hash_tables)                # (N, 32)
    pts_normed = l2_normalize(pts_flat)                           # (N, 3)

    # Per-ray direction branch hoisted out of the kernel: harmonic-embed the
    # bs normalized directions and push them through the head-layer-0
    # direction weights (+ bias) once per ray, then expand to per-sample rows
    # (~1 KiB/row of extra HBM input instead of ~22% of the kernel's MXU work).
    d = l2_normalize(directions)                                  # (bs, 3)
    ph = d @ packed["fr"]                                         # (bs, 180)
    demb = jnp.concatenate([jnp.sin(ph), jnp.cos(ph)], axis=-1)   # (bs, 360)
    dir_pre = demb @ packed["wdir"] + packed["bh0"]               # (bs, 512)
    dirb = jnp.repeat(dir_pre, pts, axis=0).astype(_BF16)         # (N, 512)

    color, alpha = run_mlp(hash_feats, pts_normed, dirb, packed["kernel"])
    return alpha.reshape(bs, pts, 1), color.reshape(bs, pts, 3)


# ------------------------------ main ------------------------------------------
if __name__ == "__main__":
    key = jax.random.PRNGKey(0)
    k1, k2, k3, kp = jax.random.split(key, 4)

    bs, pts = 8, 32                                   # 256 ray samples total
    origins = jax.random.uniform(k1, (bs, 3), _F32, -0.5, 0.5)
    directions = jax.random.normal(k2, (bs, 3), _F32)
    lengths = (
        jnp.broadcast_to(jnp.linspace(0.5, 4.0, pts, dtype=_F32), (bs, pts))
        + 0.01 * jax.random.uniform(k3, (bs, pts), _F32)
    )

    params = init_params(kp)
    packed = pack_weights(params)                     # packed once, outside jit
    fwd = jax.jit(hashnerf_forward)
    alpha, color = fwd(origins, directions, lengths, params["hash_tables"], packed)
    jax.block_until_ready((alpha, color))

    assert alpha.shape == (bs, pts, 1) and color.shape == (bs, pts, 3)
    assert bool(jnp.all(jnp.isfinite(alpha))) and bool(jnp.all(jnp.isfinite(color)))
    assert bool(jnp.all((alpha >= 0) & (alpha <= 1)))
    assert bool(jnp.all((color >= 0) & (color <= 1)))
    print("KERNEL_OK")
</pallas_src>

<mosaic_0001>
module attributes {stable_mosaic.version = 11 : i64} {
  func.func private @main(%arg0: i32) attributes {dimension_semantics = [#tpu.dimension_semantics<core_parallel>], iteration_bounds = array<i64: 2>, tpu.core_type = #tpu.core_type<sc_scalar_subcore>, window_params = []} {
    return
  }
}

module attributes {stable_mosaic.version = 11 : i64} {
  func.func private @main(%arg0: i32) attributes {dimension_semantics = [#tpu.dimension_semantics<core_parallel>], iteration_bounds = array<i64: 2>, tpu.core_type = #tpu.core_type<sc_scalar_subcore>, window_params = []} {
    return
  }
}

module attributes {stable_mosaic.version = 11 : i64} {
  func.func @hashnerf_kernel(%arg0: i32, %arg1: memref<128x32xbf16, #tpu.memory_space<vmem>>, %arg2: memref<128x3xf32, #tpu.memory_space<vmem>>, %arg3: memref<128x512xbf16, #tpu.memory_space<vmem>>, %arg4: memref<3x180xf32, #tpu.memory_space<vmem>>, %arg5: memref<32x256xbf16, #tpu.memory_space<vmem>>, %arg6: memref<2x180x256xbf16, #tpu.memory_space<vmem>>, %arg7: memref<256x512xbf16, #tpu.memory_space<vmem>>, %arg8: memref<7x256x256xbf16, #tpu.memory_space<vmem>>, %arg9: memref<12x256xf32, #tpu.memory_space<vmem>>, %arg10: memref<5x4xf32, #tpu.memory_space<vmem>>, %arg11: memref<128x4xf32, #tpu.memory_space<vmem>>) attributes {dimension_semantics = [#tpu.dimension_semantics<parallel>], iteration_bounds = array<i64: 2>, scalar_prefetch = 0 : i64, scratch_operands = 0 : i64, tpu.core_type = #tpu.core_type<tc>, window_params = [{transform_indices = @transform_0, window_bounds = array<i64: 128, 32>}, {transform_indices = @transform_1, window_bounds = array<i64: 128, 3>}, {transform_indices = @transform_2, window_bounds = array<i64: 128, 512>}, {pipeline_mode = #tpu.pipeline_mode<synchronous>, transform_indices = @transform_3, window_bounds = array<i64: 3, 180>}, {pipeline_mode = #tpu.pipeline_mode<synchronous>, transform_indices = @transform_4, window_bounds = array<i64: 32, 256>}, {pipeline_mode = #tpu.pipeline_mode<synchronous>, transform_indices = @transform_5, window_bounds = array<i64: 2, 180, 256>}, {pipeline_mode = #tpu.pipeline_mode<synchronous>, transform_indices = @transform_6, window_bounds = array<i64: 256, 512>}, {pipeline_mode = #tpu.pipeline_mode<synchronous>, transform_indices = @transform_7, window_bounds = array<i64: 7, 256, 256>}, {pipeline_mode = #tpu.pipeline_mode<synchronous>, transform_indices = @transform_8, window_bounds = array<i64: 12, 256>}, {pipeline_mode = #tpu.pipeline_mode<synchronous>, transform_indices = @transform_9, window_bounds = array<i64: 5, 4>}, {transform_indices = @transform_10, window_bounds = array<i64: 128, 4>}]} {
    %c0 = arith.constant 0 : index
    %c0_0 = arith.constant 0 : index
    %0 = vector.load %arg2[%c0, %c0_0] : memref<128x3xf32, #tpu.memory_space<vmem>>, vector<128x3xf32>
    %c0_1 = arith.constant 0 : index
    %c0_2 = arith.constant 0 : index
    %1 = vector.load %arg4[%c0_1, %c0_2] : memref<3x180xf32, #tpu.memory_space<vmem>>, vector<3x180xf32>
    %2 = vector.extract_strided_slice %0 {offsets = [0, 0], sizes = [128, 1], strides = [1, 1]} : vector<128x3xf32> to vector<128x1xf32>
    %3 = vector.extract_strided_slice %1 {offsets = [0, 0], sizes = [1, 180], strides = [1, 1]} : vector<3x180xf32> to vector<1x180xf32>
    %4 = vector.broadcast %2 : vector<128x1xf32> to vector<128x180xf32>
    %5 = vector.broadcast %3 : vector<1x180xf32> to vector<128x180xf32>
    %6 = arith.mulf %4, %5 : vector<128x180xf32>
    %7 = vector.extract_strided_slice %0 {offsets = [0, 1], sizes = [128, 1], strides = [1, 1]} : vector<128x3xf32> to vector<128x1xf32>
    %8 = vector.extract_strided_slice %1 {offsets = [1, 0], sizes = [1, 180], strides = [1, 1]} : vector<3x180xf32> to vector<1x180xf32>
    %9 = vector.broadcast %7 : vector<128x1xf32> to vector<128x180xf32>
    %10 = vector.broadcast %8 : vector<1x180xf32> to vector<128x180xf32>
    %11 = arith.mulf %9, %10 : vector<128x180xf32>
    %12 = arith.addf %6, %11 : vector<128x180xf32>
    %13 = vector.extract_strided_slice %0 {offsets = [0, 2], sizes = [128, 1], strides = [1, 1]} : vector<128x3xf32> to vector<128x1xf32>
    %14 = vector.extract_strided_slice %1 {offsets = [2, 0], sizes = [1, 180], strides = [1, 1]} : vector<3x180xf32> to vector<1x180xf32>
    %15 = vector.broadcast %13 : vector<128x1xf32> to vector<128x180xf32>
    %16 = vector.broadcast %14 : vector<1x180xf32> to vector<128x180xf32>
    %17 = arith.mulf %15, %16 : vector<128x180xf32>
    %18 = arith.addf %12, %17 : vector<128x180xf32>
    %cst = arith.constant 0.159154937 : f32
    %19 = vector.broadcast %cst : f32 to vector<128x180xf32>
    %20 = arith.mulf %18, %19 : vector<128x180xf32>
    %cst_3 = arith.constant 5.000000e-01 : f32
    %21 = vector.broadcast %cst_3 : f32 to vector<128x180xf32>
    %22 = arith.addf %20, %21 : vector<128x180xf32>
    %23 = math.floor %22 : vector<128x180xf32>
    %cst_4 = arith.constant 6.28318548 : f32
    %24 = vector.broadcast %cst_4 : f32 to vector<128x180xf32>
    %25 = arith.mulf %23, %24 : vector<128x180xf32>
    %26 = arith.subf %18, %25 : vector<128x180xf32>
    %cst_5 = arith.constant 0.159154937 : f32
    %27 = vector.broadcast %cst_5 : f32 to vector<128x180xf32>
    %28 = arith.mulf %26, %27 : vector<128x180xf32>
    %cst_6 = arith.constant 5.000000e-01 : f32
    %29 = vector.broadcast %cst_6 : f32 to vector<128x180xf32>
    %30 = arith.addf %28, %29 : vector<128x180xf32>
    %31 = math.floor %30 : vector<128x180xf32>
    %cst_7 = arith.constant 6.28318548 : f32
    %32 = vector.broadcast %cst_7 : f32 to vector<128x180xf32>
    %33 = arith.mulf %31, %32 : vector<128x180xf32>
    %34 = arith.subf %26, %33 : vector<128x180xf32>
    %cst_8 = arith.constant 0.636619746 : f32
    %35 = vector.broadcast %cst_8 : f32 to vector<128x180xf32>
    %36 = arith.mulf %34, %35 : vector<128x180xf32>
    %cst_9 = arith.constant 5.000000e-01 : f32
    %37 = vector.broadcast %cst_9 : f32 to vector<128x180xf32>
    %38 = arith.addf %36, %37 : vector<128x180xf32>
    %39 = math.floor %38 : vector<128x180xf32>
    %cst_10 = arith.constant 1.57079637 : f32
    %40 = vector.broadcast %cst_10 : f32 to vector<128x180xf32>
    %41 = arith.mulf %39, %40 : vector<128x180xf32>
    %42 = arith.subf %34, %41 : vector<128x180xf32>
    %cst_11 = arith.constant 2.500000e-01 : f32
    %43 = vector.broadcast %cst_11 : f32 to vector<128x180xf32>
    %44 = arith.mulf %39, %43 : vector<128x180xf32>
    %45 = math.floor %44 : vector<128x180xf32>
    %cst_12 = arith.constant 4.000000e+00 : f32
    %46 = vector.broadcast %cst_12 : f32 to vector<128x180xf32>
    %47 = arith.mulf %46, %45 : vector<128x180xf32>
    %48 = arith.subf %39, %47 : vector<128x180xf32>
    %49 = arith.mulf %42, %42 : vector<128x180xf32>
    %cst_13 = arith.constant -1.98412701E-4 : f32
    %50 = vector.broadcast %cst_13 : f32 to vector<128x180xf32>
    %51 = arith.mulf %49, %50 : vector<128x180xf32>
    %cst_14 = arith.constant 0.00833333377 : f32
    %52 = vector.broadcast %cst_14 : f32 to vector<128x180xf32>
    %53 = arith.addf %52, %51 : vector<128x180xf32>
    %54 = arith.mulf %49, %53 : vector<128x180xf32>
    %cst_15 = arith.constant -0.166666672 : f32
    %55 = vector.broadcast %cst_15 : f32 to vector<128x180xf32>
    %56 = arith.addf %55, %54 : vector<128x180xf32>
    %57 = arith.mulf %49, %56 : vector<128x180xf32>
    %cst_16 = arith.constant 1.000000e+00 : f32
    %58 = vector.broadcast %cst_16 : f32 to vector<128x180xf32>
    %59 = arith.addf %58, %57 : vector<128x180xf32>
    %60 = arith.mulf %42, %59 : vector<128x180xf32>
    %cst_17 = arith.constant 2.48015876E-5 : f32
    %61 = vector.broadcast %cst_17 : f32 to vector<128x180xf32>
    %62 = arith.mulf %49, %61 : vector<128x180xf32>
    %cst_18 = arith.constant -0.00138888892 : f32
    %63 = vector.broadcast %cst_18 : f32 to vector<128x180xf32>
    %64 = arith.addf %63, %62 : vector<128x180xf32>
    %65 = arith.mulf %49, %64 : vector<128x180xf32>
    %cst_19 = arith.constant 0.0416666679 : f32
    %66 = vector.broadcast %cst_19 : f32 to vector<128x180xf32>
    %67 = arith.addf %66, %65 : vector<128x180xf32>
    %68 = arith.mulf %49, %67 : vector<128x180xf32>
    %cst_20 = arith.constant -5.000000e-01 : f32
    %69 = vector.broadcast %cst_20 : f32 to vector<128x180xf32>
    %70 = arith.addf %69, %68 : vector<128x180xf32>
    %71 = arith.mulf %49, %70 : vector<128x180xf32>
    %cst_21 = arith.constant 1.000000e+00 : f32
    %72 = vector.broadcast %cst_21 : f32 to vector<128x180xf32>
    %73 = arith.addf %72, %71 : vector<128x180xf32>
    %cst_22 = arith.constant 0.000000e+00 : f32
    %74 = vector.broadcast %cst_22 : f32 to vector<128x180xf32>
    %75 = arith.cmpf oeq, %48, %74 : vector<128x180xf32>
    %cst_23 = arith.constant 1.000000e+00 : f32
    %76 = vector.broadcast %cst_23 : f32 to vector<128x180xf32>
    %77 = arith.cmpf oeq, %48, %76 : vector<128x180xf32>
    %cst_24 = arith.constant 2.000000e+00 : f32
    %78 = vector.broadcast %cst_24 : f32 to vector<128x180xf32>
    %79 = arith.cmpf oeq, %48, %78 : vector<128x180xf32>
    %cst_25 = arith.constant 0.000000e+00 : f32
    %80 = vector.broadcast %cst_25 : f32 to vector<128x180xf32>
    %81 = arith.subf %80, %60 : vector<128x180xf32>
    %cst_26 = arith.constant 0.000000e+00 : f32
    %82 = vector.broadcast %cst_26 : f32 to vector<128x180xf32>
    %83 = arith.subf %82, %73 : vector<128x180xf32>
    %84 = arith.select %79, %81, %83 : vector<128x180xi1>, vector<128x180xf32>
    %85 = arith.select %77, %73, %84 : vector<128x180xi1>, vector<128x180xf32>
    %86 = arith.select %75, %60, %85 : vector<128x180xi1>, vector<128x180xf32>
    %cst_27 = arith.constant 0.000000e+00 : f32
    %87 = vector.broadcast %cst_27 : f32 to vector<128x180xf32>
    %88 = arith.cmpf oeq, %48, %87 : vector<128x180xf32>
    %cst_28 = arith.constant 1.000000e+00 : f32
    %89 = vector.broadcast %cst_28 : f32 to vector<128x180xf32>
    %90 = arith.cmpf oeq, %48, %89 : vector<128x180xf32>
    %cst_29 = arith.constant 0.000000e+00 : f32
    %91 = vector.broadcast %cst_29 : f32 to vector<128x180xf32>
    %92 = arith.subf %91, %60 : vector<128x180xf32>
    %cst_30 = arith.constant 2.000000e+00 : f32
    %93 = vector.broadcast %cst_30 : f32 to vector<128x180xf32>
    %94 = arith.cmpf oeq, %48, %93 : vector<128x180xf32>
    %cst_31 = arith.constant 0.000000e+00 : f32
    %95 = vector.broadcast %cst_31 : f32 to vector<128x180xf32>
    %96 = arith.subf %95, %73 : vector<128x180xf32>
    %97 = arith.select %94, %96, %60 : vector<128x180xi1>, vector<128x180xf32>
    %98 = arith.select %90, %92, %97 : vector<128x180xi1>, vector<128x180xf32>
    %99 = arith.select %88, %73, %98 : vector<128x180xi1>, vector<128x180xf32>
    %c0_32 = arith.constant 0 : index
    %c0_33 = arith.constant 0 : index
    %100 = vector.load %arg1[%c0_32, %c0_33] : memref<128x32xbf16, #tpu.memory_space<vmem>>, vector<128x32xbf16>
    %c0_34 = arith.constant 0 : index
    %c0_35 = arith.constant 0 : index
    %101 = vector.load %arg5[%c0_34, %c0_35] : memref<32x256xbf16, #tpu.memory_space<vmem>>, vector<32x256xbf16>
    %cst_36 = arith.constant dense<0.000000e+00> : vector<128x256xf32>
    %102 = tpu.matmul %100, %101, %cst_36 {dimension_numbers = #tpu.dot_dimension_numbers<[1], [0], [0], [1], [0, 0, 1, 1], [], []>} : vector<128x32xbf16>, vector<32x256xbf16>, vector<128x256xf32> -> vector<128x256xf32>
    %c0_37 = arith.constant 0 : index
    %c0_38 = arith.constant 0 : index
    %c0_39 = arith.constant 0 : index
    %103 = vector.load %arg6[%c0_37, %c0_38, %c0_39] : memref<2x180x256xbf16, #tpu.memory_space<vmem>>, vector<1x180x256xbf16>
    %104 = vector.shape_cast %103 : vector<1x180x256xbf16> to vector<180x256xbf16>
    %105 = arith.truncf %86 : vector<128x180xf32> to vector<128x180xbf16>
    %cst_40 = arith.constant dense<0.000000e+00> : vector<128x256xf32>
    %106 = tpu.matmul %105, %104, %cst_40 {dimension_numbers = #tpu.dot_dimension_numbers<[1], [0], [0], [1], [0, 0, 1, 1], [], []>} : vector<128x180xbf16>, vector<180x256xbf16>, vector<128x256xf32> -> vector<128x256xf32>
    %107 = arith.addf %102, %106 : vector<128x256xf32>
    %c1 = arith.constant 1 : index
    %c0_41 = arith.constant 0 : index
    %c0_42 = arith.constant 0 : index
    %108 = vector.load %arg6[%c1, %c0_41, %c0_42] : memref<2x180x256xbf16, #tpu.memory_space<vmem>>, vector<1x180x256xbf16>
    %109 = vector.shape_cast %108 : vector<1x180x256xbf16> to vector<180x256xbf16>
    %110 = arith.truncf %99 : vector<128x180xf32> to vector<128x180xbf16>
    %cst_43 = arith.constant dense<0.000000e+00> : vector<128x256xf32>
    %111 = tpu.matmul %110, %109, %cst_43 {dimension_numbers = #tpu.dot_dimension_numbers<[1], [0], [0], [1], [0, 0, 1, 1], [], []>} : vector<128x180xbf16>, vector<180x256xbf16>, vector<128x256xf32> -> vector<128x256xf32>
    %112 = arith.addf %107, %111 : vector<128x256xf32>
    %c0_44 = arith.constant 0 : index
    %c0_45 = arith.constant 0 : index
    %113 = vector.load %arg9[%c0_44, %c0_45] : memref<12x256xf32, #tpu.memory_space<vmem>>, vector<1x256xf32>
    %114 = vector.broadcast %113 : vector<1x256xf32> to vector<128x256xf32>
    %115 = arith.addf %112, %114 : vector<128x256xf32>
    %cst_46 = arith.constant 0.000000e+00 : f32
    %116 = vector.broadcast %cst_46 : f32 to vector<128x256xf32>
    %117 = arith.maximumf %115, %116 : vector<128x256xf32>
    %c0_47 = arith.constant 0 : index
    %c0_48 = arith.constant 0 : index
    %c0_49 = arith.constant 0 : index
    %118 = vector.load %arg8[%c0_47, %c0_48, %c0_49] : memref<7x256x256xbf16, #tpu.memory_space<vmem>>, vector<1x256x256xbf16>
    %119 = vector.shape_cast %118 : vector<1x256x256xbf16> to vector<256x256xbf16>
    %120 = arith.truncf %117 : vector<128x256xf32> to vector<128x256xbf16>
    %cst_50 = arith.constant dense<0.000000e+00> : vector<128x256xf32>
    %121 = tpu.matmul %120, %119, %cst_50 {dimension_numbers = #tpu.dot_dimension_numbers<[1], [0], [0], [1], [0, 0, 1, 1], [], []>} : vector<128x256xbf16>, vector<256x256xbf16>, vector<128x256xf32> -> vector<128x256xf32>
    %c1_51 = arith.constant 1 : index
    %c0_52 = arith.constant 0 : index
    %122 = vector.load %arg9[%c1_51, %c0_52] : memref<12x256xf32, #tpu.memory_space<vmem>>, vector<1x256xf32>
    %123 = vector.broadcast %122 : vector<1x256xf32> to vector<128x256xf32>
    %124 = arith.addf %121, %123 : vector<128x256xf32>
    %cst_53 = arith.constant 0.000000e+00 : f32
    %125 = vector.broadcast %cst_53 : f32 to vector<128x256xf32>
    %126 = arith.maximumf %124, %125 : vector<128x256xf32>
    %c1_54 = arith.constant 1 : index
    %c0_55 = arith.constant 0 : index
    %c0_56 = arith.constant 0 : index
    %127 = vector.load %arg8[%c1_54, %c0_55, %c0_56] : memref<7x256x256xbf16, #tpu.memory_space<vmem>>, vector<1x256x256xbf16>
    %128 = vector.shape_cast %127 : vector<1x256x256xbf16> to vector<256x256xbf16>
    %129 = arith.truncf %126 : vector<128x256xf32> to vector<128x256xbf16>
    %cst_57 = arith.constant dense<0.000000e+00> : vector<128x256xf32>
    %130 = tpu.matmul %129, %128, %cst_57 {dimension_numbers = #tpu.dot_dimension_numbers<[1], [0], [0], [1], [0, 0, 1, 1], [], []>} : vector<128x256xbf16>, vector<256x256xbf16>, vector<128x256xf32> -> vector<128x256xf32>
    %c2 = arith.constant 2 : index
    %c0_58 = arith.constant 0 : index
    %131 = vector.load %arg9[%c2, %c0_58] : memref<12x256xf32, #tpu.memory_space<vmem>>, vector<1x256xf32>
    %132 = vector.broadcast %131 : vector<1x256xf32> to vector<128x256xf32>
    %133 = arith.addf %130, %132 : vector<128x256xf32>
    %cst_59 = arith.constant 0.000000e+00 : f32
    %134 = vector.broadcast %cst_59 : f32 to vector<128x256xf32>
    %135 = arith.maximumf %133, %134 : vector<128x256xf32>
    %c2_60 = arith.constant 2 : index
    %c0_61 = arith.constant 0 : index
    %c0_62 = arith.constant 0 : index
    %136 = vector.load %arg8[%c2_60, %c0_61, %c0_62] : memref<7x256x256xbf16, #tpu.memory_space<vmem>>, vector<1x256x256xbf16>
    %137 = vector.shape_cast %136 : vector<1x256x256xbf16> to vector<256x256xbf16>
    %138 = arith.truncf %135 : vector<128x256xf32> to vector<128x256xbf16>
    %cst_63 = arith.constant dense<0.000000e+00> : vector<128x256xf32>
    %139 = tpu.matmul %138, %137, %cst_63 {dimension_numbers = #tpu.dot_dimension_numbers<[1], [0], [0], [1], [0, 0, 1, 1], [], []>} : vector<128x256xbf16>, vector<256x256xbf16>, vector<128x256xf32> -> vector<128x256xf32>
    %c3 = arith.constant 3 : index
    %c0_64 = arith.constant 0 : index
    %140 = vector.load %arg9[%c3, %c0_64] : memref<12x256xf32, #tpu.memory_space<vmem>>, vector<1x256xf32>
    %141 = vector.broadcast %140 : vector<1x256xf32> to vector<128x256xf32>
    %142 = arith.addf %139, %141 : vector<128x256xf32>
    %cst_65 = arith.constant 0.000000e+00 : f32
    %143 = vector.broadcast %cst_65 : f32 to vector<128x256xf32>
    %144 = arith.maximumf %142, %143 : vector<128x256xf32>
    %c0_66 = arith.constant 0 : index
    %c0_67 = arith.constant 0 : index
    %145 = vector.load %arg7[%c0_66, %c0_67] : memref<256x512xbf16, #tpu.memory_space<vmem>>, vector<256x512xbf16>
    %146 = arith.truncf %144 : vector<128x256xf32> to vector<128x256xbf16>
    %cst_68 = arith.constant dense<0.000000e+00> : vector<128x512xf32>
    %147 = tpu.matmul %146, %145, %cst_68 {dimension_numbers = #tpu.dot_dimension_numbers<[1], [0], [0], [1], [0, 0, 1, 1], [], []>} : vector<128x256xbf16>, vector<256x512xbf16>, vector<128x512xf32> -> vector<128x512xf32>
    %c0_69 = arith.constant 0 : index
    %c0_70 = arith.constant 0 : index
    %148 = vector.load %arg3[%c0_69, %c0_70] : memref<128x512xbf16, #tpu.memory_space<vmem>>, vector<128x512xbf16>
    %149 = arith.extf %148 : vector<128x512xbf16> to vector<128x512xf32>
    %150 = arith.addf %147, %149 : vector<128x512xf32>
    %cst_71 = arith.constant 0.000000e+00 : f32
    %151 = vector.broadcast %cst_71 : f32 to vector<128x512xf32>
    %152 = arith.maximumf %150, %151 : vector<128x512xf32>
    %153 = vector.extract_strided_slice %152 {offsets = [0, 0], sizes = [128, 256], strides = [1, 1]} : vector<128x512xf32> to vector<128x256xf32>
    %154 = vector.extract_strided_slice %152 {offsets = [0, 256], sizes = [128, 256], strides = [1, 1]} : vector<128x512xf32> to vector<128x256xf32>
    %c3_72 = arith.constant 3 : index
    %c0_73 = arith.constant 0 : index
    %c0_74 = arith.constant 0 : index
    %155 = vector.load %arg8[%c3_72, %c0_73, %c0_74] : memref<7x256x256xbf16, #tpu.memory_space<vmem>>, vector<1x256x256xbf16>
    %156 = vector.shape_cast %155 : vector<1x256x256xbf16> to vector<256x256xbf16>
    %157 = arith.truncf %153 : vector<128x256xf32> to vector<128x256xbf16>
    %cst_75 = arith.constant dense<0.000000e+00> : vector<128x256xf32>
    %158 = tpu.matmul %157, %156, %cst_75 {dimension_numbers = #tpu.dot_dimension_numbers<[1], [0], [0], [1], [0, 0, 1, 1], [], []>} : vector<128x256xbf16>, vector<256x256xbf16>, vector<128x256xf32> -> vector<128x256xf32>
    %c4 = arith.constant 4 : index
    %c0_76 = arith.constant 0 : index
    %159 = vector.load %arg9[%c4, %c0_76] : memref<12x256xf32, #tpu.memory_space<vmem>>, vector<1x256xf32>
    %160 = vector.broadcast %159 : vector<1x256xf32> to vector<128x256xf32>
    %161 = arith.addf %158, %160 : vector<128x256xf32>
    %cst_77 = arith.constant 0.000000e+00 : f32
    %162 = vector.broadcast %cst_77 : f32 to vector<128x256xf32>
    %163 = arith.maximumf %161, %162 : vector<128x256xf32>
    %c4_78 = arith.constant 4 : index
    %c0_79 = arith.constant 0 : index
    %c0_80 = arith.constant 0 : index
    %164 = vector.load %arg8[%c4_78, %c0_79, %c0_80] : memref<7x256x256xbf16, #tpu.memory_space<vmem>>, vector<1x256x256xbf16>
    %165 = vector.shape_cast %164 : vector<1x256x256xbf16> to vector<256x256xbf16>
    %166 = arith.truncf %163 : vector<128x256xf32> to vector<128x256xbf16>
    %cst_81 = arith.constant dense<0.000000e+00> : vector<128x256xf32>
    %167 = tpu.matmul %166, %165, %cst_81 {dimension_numbers = #tpu.dot_dimension_numbers<[1], [0], [0], [1], [0, 0, 1, 1], [], []>} : vector<128x256xbf16>, vector<256x256xbf16>, vector<128x256xf32> -> vector<128x256xf32>
    %c5 = arith.constant 5 : index
    %c0_82 = arith.constant 0 : index
    %168 = vector.load %arg9[%c5, %c0_82] : memref<12x256xf32, #tpu.memory_space<vmem>>, vector<1x256xf32>
    %169 = vector.broadcast %168 : vector<1x256xf32> to vector<128x256xf32>
    %170 = arith.addf %167, %169 : vector<128x256xf32>
    %cst_83 = arith.constant 0.000000e+00 : f32
    %171 = vector.broadcast %cst_83 : f32 to vector<128x256xf32>
    %172 = arith.maximumf %170, %171 : vector<128x256xf32>
    %c5_84 = arith.constant 5 : index
    %c0_85 = arith.constant 0 : index
    %c0_86 = arith.constant 0 : index
    %173 = vector.load %arg8[%c5_84, %c0_85, %c0_86] : memref<7x256x256xbf16, #tpu.memory_space<vmem>>, vector<1x256x256xbf16>
    %174 = vector.shape_cast %173 : vector<1x256x256xbf16> to vector<256x256xbf16>
    %175 = arith.truncf %154 : vector<128x256xf32> to vector<128x256xbf16>
    %cst_87 = arith.constant dense<0.000000e+00> : vector<128x256xf32>
    %176 = tpu.matmul %175, %174, %cst_87 {dimension_numbers = #tpu.dot_dimension_numbers<[1], [0], [0], [1], [0, 0, 1, 1], [], []>} : vector<128x256xbf16>, vector<256x256xbf16>, vector<128x256xf32> -> vector<128x256xf32>
    %c6 = arith.constant 6 : index
    %c0_88 = arith.constant 0 : index
    %177 = vector.load %arg9[%c6, %c0_88] : memref<12x256xf32, #tpu.memory_space<vmem>>, vector<1x256xf32>
    %178 = vector.broadcast %177 : vector<1x256xf32> to vector<128x256xf32>
    %179 = arith.addf %176, %178 : vector<128x256xf32>
    %cst_89 = arith.constant 0.000000e+00 : f32
    %180 = vector.broadcast %cst_89 : f32 to vector<128x256xf32>
    %181 = arith.maximumf %179, %180 : vector<128x256xf32>
    %c6_90 = arith.constant 6 : index
    %c0_91 = arith.constant 0 : index
    %c0_92 = arith.constant 0 : index
    %182 = vector.load %arg8[%c6_90, %c0_91, %c0_92] : memref<7x256x256xbf16, #tpu.memory_space<vmem>>, vector<1x256x256xbf16>
    %183 = vector.shape_cast %182 : vector<1x256x256xbf16> to vector<256x256xbf16>
    %184 = arith.truncf %181 : vector<128x256xf32> to vector<128x256xbf16>
    %cst_93 = arith.constant dense<0.000000e+00> : vector<128x256xf32>
    %185 = tpu.matmul %184, %183, %cst_93 {dimension_numbers = #tpu.dot_dimension_numbers<[1], [0], [0], [1], [0, 0, 1, 1], [], []>} : vector<128x256xbf16>, vector<256x256xbf16>, vector<128x256xf32> -> vector<128x256xf32>
    %c7 = arith.constant 7 : index
    %c0_94 = arith.constant 0 : index
    %186 = vector.load %arg9[%c7, %c0_94] : memref<12x256xf32, #tpu.memory_space<vmem>>, vector<1x256xf32>
    %187 = vector.broadcast %186 : vector<1x256xf32> to vector<128x256xf32>
    %188 = arith.addf %185, %187 : vector<128x256xf32>
    %cst_95 = arith.constant 0.000000e+00 : f32
    %189 = vector.broadcast %cst_95 : f32 to vector<128x256xf32>
    %190 = arith.maximumf %188, %189 : vector<128x256xf32>
    %c8 = arith.constant 8 : index
    %c0_96 = arith.constant 0 : index
    %191 = vector.load %arg9[%c8, %c0_96] : memref<12x256xf32, #tpu.memory_space<vmem>>, vector<1x256xf32>
    %192 = vector.broadcast %191 : vector<1x256xf32> to vector<128x256xf32>
    %193 = arith.mulf %172, %192 : vector<128x256xf32>
    %cst_97 = arith.constant dense<0.000000e+00> : vector<128xf32>
    %194 = vector.multi_reduction <add>, %193, %cst_97 [1] : vector<128x256xf32> to vector<128xf32>
    %195 = vector.shape_cast %194 : vector<128xf32> to vector<128x1xf32>
    %c9 = arith.constant 9 : index
    %c0_98 = arith.constant 0 : index
    %196 = vector.load %arg9[%c9, %c0_98] : memref<12x256xf32, #tpu.memory_space<vmem>>, vector<1x256xf32>
    %197 = vector.broadcast %196 : vector<1x256xf32> to vector<128x256xf32>
    %198 = arith.mulf %172, %197 : vector<128x256xf32>
    %cst_99 = arith.constant dense<0.000000e+00> : vector<128xf32>
    %199 = vector.multi_reduction <add>, %198, %cst_99 [1] : vector<128x256xf32> to vector<128xf32>
    %200 = vector.shape_cast %199 : vector<128xf32> to vector<128x1xf32>
    %c10 = arith.constant 10 : index
    %c0_100 = arith.constant 0 : index
    %201 = vector.load %arg9[%c10, %c0_100] : memref<12x256xf32, #tpu.memory_space<vmem>>, vector<1x256xf32>
    %202 = vector.broadcast %201 : vector<1x256xf32> to vector<128x256xf32>
    %203 = arith.mulf %172, %202 : vector<128x256xf32>
    %cst_101 = arith.constant dense<0.000000e+00> : vector<128xf32>
    %204 = vector.multi_reduction <add>, %203, %cst_101 [1] : vector<128x256xf32> to vector<128xf32>
    %205 = vector.shape_cast %204 : vector<128xf32> to vector<128x1xf32>
    %c11 = arith.constant 11 : index
    %c0_102 = arith.constant 0 : index
    %206 = vector.load %arg9[%c11, %c0_102] : memref<12x256xf32, #tpu.memory_space<vmem>>, vector<1x256xf32>
    %207 = vector.broadcast %206 : vector<1x256xf32> to vector<128x256xf32>
    %208 = arith.mulf %190, %207 : vector<128x256xf32>
    %cst_103 = arith.constant dense<0.000000e+00> : vector<128xf32>
    %209 = vector.multi_reduction <add>, %208, %cst_103 [1] : vector<128x256xf32> to vector<128xf32>
    %210 = vector.shape_cast %209 : vector<128xf32> to vector<128x1xf32>
    %c0_104 = arith.constant 0 : index
    %c0_105 = arith.constant 0 : index
    %211 = vector.load %arg10[%c0_104, %c0_105] : memref<5x4xf32, #tpu.memory_space<vmem>>, vector<5x4xf32>
    %212 = vector.extract_strided_slice %211 {offsets = [0, 0], sizes = [1, 4], strides = [1, 1]} : vector<5x4xf32> to vector<1x4xf32>
    %213 = vector.broadcast %195 : vector<128x1xf32> to vector<128x4xf32>
    %214 = vector.broadcast %212 : vector<1x4xf32> to vector<128x4xf32>
    %215 = arith.mulf %213, %214 : vector<128x4xf32>
    %216 = vector.extract_strided_slice %211 {offsets = [1, 0], sizes = [1, 4], strides = [1, 1]} : vector<5x4xf32> to vector<1x4xf32>
    %217 = vector.broadcast %200 : vector<128x1xf32> to vector<128x4xf32>
    %218 = vector.broadcast %216 : vector<1x4xf32> to vector<128x4xf32>
    %219 = arith.mulf %217, %218 : vector<128x4xf32>
    %220 = arith.addf %215, %219 : vector<128x4xf32>
    %221 = vector.extract_strided_slice %211 {offsets = [2, 0], sizes = [1, 4], strides = [1, 1]} : vector<5x4xf32> to vector<1x4xf32>
    %222 = vector.broadcast %205 : vector<128x1xf32> to vector<128x4xf32>
    %223 = vector.broadcast %221 : vector<1x4xf32> to vector<128x4xf32>
    %224 = arith.mulf %222, %223 : vector<128x4xf32>
    %225 = arith.addf %220, %224 : vector<128x4xf32>
    %226 = vector.extract_strided_slice %211 {offsets = [3, 0], sizes = [1, 4], strides = [1, 1]} : vector<5x4xf32> to vector<1x4xf32>
    %227 = vector.broadcast %210 : vector<128x1xf32> to vector<128x4xf32>
    %228 = vector.broadcast %226 : vector<1x4xf32> to vector<128x4xf32>
    %229 = arith.mulf %227, %228 : vector<128x4xf32>
    %230 = arith.addf %225, %229 : vector<128x4xf32>
    %231 = vector.extract_strided_slice %211 {offsets = [4, 0], sizes = [1, 4], strides = [1, 1]} : vector<5x4xf32> to vector<1x4xf32>
    %232 = vector.broadcast %231 : vector<1x4xf32> to vector<128x4xf32>
    %233 = arith.addf %230, %232 : vector<128x4xf32>
    %234 = arith.negf %233 : vector<128x4xf32>
    %235 = math.exp %234 : vector<128x4xf32>
    %cst_106 = arith.constant 1.000000e+00 : f32
    %236 = vector.broadcast %cst_106 : f32 to vector<128x4xf32>
    %237 = arith.addf %236, %235 : vector<128x4xf32>
    %238 = arith.divf %236, %237 : vector<128x4xf32>
    %c0_107 = arith.constant 0 : index
    %c0_108 = arith.constant 0 : index
    %239 = vector.load %arg11[%c0_107, %c0_108] : memref<128x4xf32, #tpu.memory_space<vmem>>, vector<128x4xf32>
    tpu.vector_store %arg11[%c0_107, %c0_108], %238 {strides = array<i32>} : memref<128x4xf32, #tpu.memory_space<vmem>>, vector<128x4xf32>,
    return
  }
  func.func @transform_0(%arg0: i32) -> (i32, i32) {
    %c0_i32 = arith.constant 0 : i32
    %c0_i32_0 = arith.constant 0 : i32
    return %arg0, %c0_i32 : i32, i32
  }
  func.func @transform_1(%arg0: i32) -> (i32, i32) {
    %c0_i32 = arith.constant 0 : i32
    %c0_i32_0 = arith.constant 0 : i32
    return %arg0, %c0_i32 : i32, i32
  }
  func.func @transform_2(%arg0: i32) -> (i32, i32) {
    %c0_i32 = arith.constant 0 : i32
    %c0_i32_0 = arith.constant 0 : i32
    return %arg0, %c0_i32 : i32, i32
  }
  func.func @transform_3(%arg0: i32) -> (i32, i32) {
    %c0_i32 = arith.constant 0 : i32
    %c0_i32_0 = arith.constant 0 : i32
    %c0_i32_1 = arith.constant 0 : i32
    return %c0_i32, %c0_i32_0 : i32, i32
  }
  func.func @transform_4(%arg0: i32) -> (i32, i32) {
    %c0_i32 = arith.constant 0 : i32
    %c0_i32_0 = arith.constant 0 : i32
    %c0_i32_1 = arith.constant 0 : i32
    return %c0_i32, %c0_i32_0 : i32, i32
  }
  func.func @transform_5(%arg0: i32) -> (i32, i32, i32) {
    %c0_i32 = arith.constant 0 : i32
    %c0_i32_0 = arith.constant 0 : i32
    %c0_i32_1 = arith.constant 0 : i32
    %c0_i32_2 = arith.constant 0 : i32
    return %c0_i32, %c0_i32_0, %c0_i32_1 : i32, i32, i32
  }
  func.func @transform_6(%arg0: i32) -> (i32, i32) {
    %c0_i32 = arith.constant 0 : i32
    %c0_i32_0 = arith.constant 0 : i32
    %c0_i32_1 = arith.constant 0 : i32
    return %c0_i32, %c0_i32_0 : i32, i32
  }
  func.func @transform_7(%arg0: i32) -> (i32, i32, i32) {
    %c0_i32 = arith.constant 0 : i32
    %c0_i32_0 = arith.constant 0 : i32
    %c0_i32_1 = arith.constant 0 : i32
    %c0_i32_2 = arith.constant 0 : i32
    return %c0_i32, %c0_i32_0, %c0_i32_1 : i32, i32, i32
  }
  func.func @transform_8(%arg0: i32) -> (i32, i32) {
    %c0_i32 = arith.constant 0 : i32
    %c0_i32_0 = arith.constant 0 : i32
    %c0_i32_1 = arith.constant 0 : i32
    return %c0_i32, %c0_i32_0 : i32, i32
  }
  func.func @transform_9(%arg0: i32) -> (i32, i32) {
    %c0_i32 = arith.constant 0 : i32
    %c0_i32_0 = arith.constant 0 : i32
    %c0_i32_1 = arith.constant 0 : i32
    return %c0_i32, %c0_i32_0 : i32, i32
  }
  func.func @transform_10(%arg0: i32) -> (i32, i32) {
    %c0_i32 = arith.constant 0 : i32
    %c0_i32_0 = arith.constant 0 : i32
    return %arg0, %c0_i32 : i32, i32
  }
}

</mosaic_0001>

<bundles_post_ra>
// kernel: hashnerf_forward.1
= control target key start
LH: loop header
LB: loop body
LE: loop exit
PB: predicated region body
PF: predicated region fallthrough
CT: control target
= control target key end

     0   :  { %s8728_s13 = smov 0   ;;  %s12995_s0 = inlined_call_operand.vmem [shape: bf16[256,32], index: 0, kind: input, shape index: {}]   ;;  %s12996_s1 = inlined_call_operand.vmem [shape: f32[256,3], index: 1, kind: input, shape index: {}]   ;;  %s12997_s2 = inlined_call_operand.vmem [shape: bf16[256,512], index: 2, kind: input, shape index: {}]   ;;  %s12998_s3 = inlined_call_operand.vmem [shape: f32[3,180], index: 3, kind: input, shape index: {}]   ;;  %s12999_s4 = inlined_call_operand.vmem [shape: bf16[32,256], index: 4, kind: input, shape index: {}]   ;;  %s13000_s5 = inlined_call_operand.vmem [shape: bf16[2,180,256], index: 5, kind: input, shape index: {}]   ;;  %s13001_s6 = inlined_call_operand.vmem [shape: bf16[256,512], index: 6, kind: input, shape index: {}]   ;;  %s13002_s7 = inlined_call_operand.vmem [shape: bf16[7,256,256], index: 7, kind: input, shape index: {}]   ;;  %s13003_s8 = inlined_call_operand.vmem [shape: f32[12,256], index: 8, kind: input, shape index: {}]   ;;  %s13004_s9 = inlined_call_operand.vmem [shape: f32[5,4], index: 9, kind: input, shape index: {}]   ;;  %s13005_s10 = inlined_call_operand.vmem [shape: f32[256,4], index: 10, kind: output, shape index: {}]  }
   0x1 LB: > { %s7314_s14 = sadd.s32 4294967295, %s8668_s13   ;;  %p7318_p0 = scmp.ge.s32.totalorder %s8668_s13, 1  ;;  %s8668_s13 = sphi %s8728_s13, %s20_s13  }
   0x2   : > { %p336_p1 = scmp.lt.s32.totalorder %s8668_s13, 3 }
   0x4   : > { %p337_p2 = pnand %p7318_p0, %p336_p1 }
   0x6   : > { %340 = sbr.rel (%p337_p2) target bundleno = 2489 (0x9b9), region = 60 }
   0xd   : > { %s7319_s15 = sshll.u32 %s7314_s14, 4  ;;  %v8670_v0 = vmov 2   ;;  %v8671_v1 = vmov 1   ;;  %v13007_v6 = vmov 0   ;;  %v8082_v11 = vld [vmem:[%s13000_s5 + $0x4] ss:$8 sps:$4 sm:$0xff]   ;;  %v509_v45 = vlaneseq }
   0xe   : > { %8055 = vset.pattern.permute.xlu0 %v8670_v0  ;;  %8054 = vset.pattern.permute.xlu1 %v8671_v1  ;;  %p386_p3 = scmp.lt.s32.totalorder %s7319_s15, 31  ;;  %v8084_v13 = vld [vmem:[%s13000_s5] ss:$8 sps:$4 sm:$0xff]   ;;  %v8085_v16 = vld [vmem:[%s13000_s5 + $0x14] ss:$8 sps:$4 sm:$0xff]   ;;  %vm13220_vm0 = vcmask 1041408  }
   0xf   : > { %2529 = vmatprep.subr.bf16.mxu0 %v8082_v11  ;;  %v8087_v17 = vld [vmem:[%s13000_s5 + $0x10] ss:$8 sps:$4 sm:$0xff]   ;;  %v8088_v20 = vld [vmem:[%s13000_s5 + $0x24] ss:$8 sps:$4 sm:$0xff]   ;;  %v8090_v21 = vld [vmem:[%s13000_s5 + $0x20] ss:$8 sps:$4 sm:$0xff]  }
  0x10   : > { %s13549_s15 = smov (!%p386_p3, %s7319_s15), 31  ;;  %2530 = vmatpush1.bf16.msra.mxu0 %v8084_v13  ;;  %v8091_v22 = vld [vmem:[%s13000_s5 + $0x34] ss:$8 sps:$4 sm:$0xff]   ;;  %v8093_v24 = vld [vmem:[%s13000_s5 + $0x30] ss:$8 sps:$4 sm:$0xff]   ;;  %v8895_v46 = vshrl.u32 %v509_v45, 7 }
  0x11   : > { %s7322_s16 = sshll.u32 %s13549_s15, 3  ;;  %s7320_s20 = sshll.u32 %s13549_s15, 2  ;;  %2531 = vmatprep.subr.bf16.mxu0 %v8085_v16  ;;  %v8094_v25 = vld [vmem:[%s13000_s5 + $0x44] ss:$8 sps:$4 sm:$0xff]   ;;  %v8096_v27 = vld [vmem:[%s13000_s5 + $0x40] ss:$8 sps:$4 sm:$0xff]  }
  0x12   : > { %s8746_s19 = scalar_lea.vmem %s12996_s1, %s7322_s16  ;;  %s8756_s23 = scalar_lea.vmem %s12995_s0, %s7320_s20  ;;  %v8097_v28 = vld [vmem:[%s13000_s5 + $0x54] ss:$8 sps:$4 sm:$0xff]   ;;  %v8099_v29 = vld [vmem:[%s13000_s5 + $0x50] ss:$8 sps:$4 sm:$0xff]   ;;  %v8100_v31 = vld [vmem:[%s13000_s5 + $0x64] ss:$8 sps:$4 sm:$0xff]  }
  0x13   : > { %v411_v2 = vld [vmem:[%s8746_s19] sm:$0xff]  ;;  %v413_v3 = vld [vmem:[%s8746_s19 + $0x10] sm:$0xff]  ;;  %v412_v4 = vld [vmem:[%s8746_s19 + $0x8] sm:$0xff]  ;;  %13249 = vst [vmem:[#allocation2_spill] sm:$0xff] %v8895_v46  ;;  %v8899_v49 = vsub.s32 1, %v8895_v46  ;;  %v629_v50 = vsub.s32 5, %v8895_v46  ;;  %s12954_s18 = scalar_lea.vmem %s13005_s10, %s7322_s16 }
  0x14   : > { %706 = vperm.xlu0 %8055, %v411_v2   ;;  %560 = vperm.xlu1 %8054, %v411_v2   ;;  %v415_v5 = vld [vmem:[%s8746_s19 + $0x20] sm:$0xff]  ;;  %v414_v7 = vld [vmem:[%s8746_s19 + $0x18] sm:$0xff]  ;;  %v416_v8 = vld [vmem:[%s8746_s19 + $0x28] sm:$0xff]  ;;  %v8907_v52 = vsub.s32 0, %v8895_v46  ;;  %v13006_v53 = vsub.s32 4, %v8895_v46  ;;  %v8911_v54 = vsub.s32 2, %v8895_v46 }
  0x15   : > { %v418_v9 = vld [vmem:[%s8746_s19 + $0x38] sm:$0xff]  ;;  %v8767_v10 = vld [vmem:[%s8746_s19 + $0x48] sm:$0xff]  ;;  %v417_v14 = vld [vmem:[%s8746_s19 + $0x30] sm:$0xff]  ;;  %2532 = vmatpush1.bf16.msra.mxu0 %v8087_v17  ;;  %13250 = vst [vmem:[#allocation3_spill] sm:$0xff] %v8899_v49  ;;  %v775_v55 = vsub.s32 6, %v8895_v46  ;;  %vm13242_vm1 = vcmask 424960  }
  0x16   : > { %v8774_v12 = vld [vmem:[%s8746_s19 + $0x58] sm:$0xff]  ;;  %v419_v15 = vld [vmem:[%s8746_s19 + $0x40] sm:$0xff]  ;;  %v8793_v18 = vld [vmem:[%s8746_s19 + $0x50] sm:$0xff]  ;;  %2533 = vmatprep.subr.bf16.mxu0 %v8088_v20  ;;  %13251 = vst [vmem:[#allocation4_spill] sm:$0xff] %v8907_v52 }
  0x17   : > { %v8796_v19 = vld [vmem:[%s8746_s19 + $0x60] sm:$0xff]  ;;  %v8811_v23 = vld [vmem:[%s8746_s19 + $0x68] sm:$0xff]  ;;  %v8822_v26 = vld [vmem:[%s8746_s19 + $0x78] sm:$0xff]  ;;  %13252 = vst [vmem:[#allocation5_spill] sm:$0xff] %v8911_v54 }
  0x18   : > { %714 = vperm.xlu0 %8055, %v413_v3   ;;  %564 = vperm.xlu1 %8054, %v412_v4   ;;  %v8837_v30 = vld [vmem:[%s8746_s19 + $0x70] sm:$0xff]  ;;  %v8102_v32 = vld [vmem:[%s13000_s5 + $0x60] ss:$8 sps:$4 sm:$0xff]   ;;  %v8106_v35 = vld [vmem:[%s13000_s5 + $0x84] ss:$8 sps:$4 sm:$0xff]  }
  0x19   : > { %2534 = vmatpush1.bf16.msra.mxu0 %v8090_v21  ;;  %v8103_v33 = vld [vmem:[%s13000_s5 + $0x74] ss:$8 sps:$4 sm:$0xff]   ;;  %v8105_v34 = vld [vmem:[%s13000_s5 + $0x70] ss:$8 sps:$4 sm:$0xff]   ;;  %v8108_v36 = vld [vmem:[%s13000_s5 + $0x80] ss:$8 sps:$4 sm:$0xff]  }
  0x1a   : > { %2535 = vmatprep.subr.bf16.mxu0 %v8091_v22  ;;  %v8109_v37 = vld [vmem:[%s13000_s5 + $0x94] ss:$8 sps:$4 sm:$0xff]   ;;  %v8111_v38 = vld [vmem:[%s13000_s5 + $0x90] ss:$8 sps:$4 sm:$0xff]   ;;  %v8112_v39 = vld [vmem:[%s13000_s5 + $0xa4] ss:$8 sps:$4 sm:$0xff]  }
  0x1b   : > { %v8114_v40 = vld [vmem:[%s13000_s5 + $0xa0] ss:$8 sps:$4 sm:$0xff]   ;;  %v2365_v41 = vld [vmem:[%s13000_s5 + $0xb0] sm:$0x33] }
  0x1c   : > { %722 = vperm.xlu0 %8055, %v415_v5   ;;  %8056 = vset.pattern.permute.xlu1 %v8670_v0  ;;  %v7351_v42 = vcombine.high %v2365_v41, %v2365_v41  ;;  %v7350_v43 = vcombine.low %v2365_v41, %v2365_v41  ;;  %v427_v51 = vld [vmem:[%s12998_s3] sm:$0x77] }
  0x1d   : > { %710 = vperm.xlu1 %8056, %v412_v4   ;;  %2536 = vmatpush1.bf16.msra.mxu0 %v8093_v24  ;;  %v626_v58 = vrot.slane %v427_v51, %v8899_v49  ;;  %v630_v59 = vrot.slane %v427_v51, %v629_v50  ;;  %v512_v60 = vrot.slane %v427_v51, %v8907_v52 }
  0x1e   : > { %2537 = vmatprep.subr.bf16.mxu0 %v8094_v25  ;;  %v2524_v44 = vsel %vm13220_vm0, %v7350_v43, 0  ;;  %v516_v61 = vrot.slane %v427_v51, %v13006_v53  ;;  %v772_v62 = vrot.slane %v427_v51, %v8911_v54  ;;  %v776_v63 = vrot.slane %v427_v51, %v775_v55 }
  0x20   : > { %8062 = vset.pattern.permute.xlu0 %v13007_v6 }
  0x21   : > { %430 = vperm.xlu0 %8062, %v411_v2   ;;  %8057 = vset.pattern.permute.xlu1 %v13007_v6 }
  0x22   : > { %440 = vperm.xlu1 %8057, %v413_v3   ;;  %2538 = vmatpush1.bf16.msra.mxu0 %v8096_v27 }
  0x23   : > { %2539 = vmatprep.subr.bf16.mxu0 %v8097_v28 }
  0x25   : > { %435 = vperm.xlu0 %8062, %v412_v4   ;;  %v8927_v4 = vrot.slane %v630_v59, %v8899_v49 }
  0x26   : > { %8058 = vset.pattern.permute.xlu1 %v8671_v1  ;;  %2540 = vmatpush1.bf16.msra.mxu0 %v8099_v29 }
  0x27   : > { %568 = vperm.xlu1 %8058, %v413_v3   ;;  %2541 = vmatprep.subr.bf16.mxu0 %v8100_v31  ;;  %v8924_v3 = vrot.slane %v626_v58, %v8899_v49 }
  0x29   : > { %445 = vperm.xlu0 %8062, %v414_v7  }
  0x2a   : > { %2542 = vmatpush1.bf16.msra.mxu0 %v8102_v32 }
  0x2b   : > { %572 = vperm.xlu1 %8058, %v414_v7   ;;  %2543 = vmatprep.subr.bf16.mxu0 %v8103_v33 }
  0x2d   : > { %455 = vperm.xlu0 %8062, %v416_v8  }
  0x2e   : > { %2544 = vmatpush1.bf16.msra.mxu0 %v8105_v34 }
  0x2f   : > { %8059 = vset.pattern.permute.xlu1 %v8670_v0  ;;  %2545 = vmatprep.subr.bf16.mxu0 %v8106_v35 }
  0x30   : > { %718 = vperm.xlu1 %8059, %v414_v7   ;;  %v8934_v7 = vrot.slane %v516_v61, %v8907_v52 }
  0x31   : > { %465 = vperm.xlu0 %8062, %v418_v9  }
  0x32   : > { %2546 = vmatpush1.bf16.msra.mxu0 %v8108_v36 }
  0x33   : > { %2547 = vmatprep.subr.bf16.mxu0 %v8109_v37 }
  0x34   : > { %8060 = vset.pattern.permute.xlu1 %v13007_v6 }
  0x35   : > { %450 = vperm.xlu1 %8060, %v415_v5   ;;  %475 = vperm.xlu0 %8062, %v8767_v10  }
  0x36   : > { %2548 = vmatpush1.bf16.msra.mxu0 %v8111_v38 }
  0x37   : > { %2549 = vmatprep.subr.bf16.mxu0 %v8112_v39 }
  0x39   : > { %8061 = vset.pattern.permute.xlu1 %v8671_v1  ;;  %485 = vperm.xlu0 %8062, %v8774_v12  }
  0x3a   : > { %576 = vperm.xlu1 %8061, %v415_v5   ;;  %2550 = vmatpush1.bf16.msra.mxu0 %v8114_v40 }
  0x3b   : > { %7352 = vmatprep.subr.msk.bf16.mxu0 %vm13220_vm0, %v7351_v42 }
  0x3d   : > { %8071 = vset.pattern.permute.xlu0 %v8670_v0 }
  0x3e   : > { %580 = vperm.xlu1 %8061, %v416_v8   ;;  %730 = vperm.xlu0 %8071, %v417_v14  }
  0x3f   : > { %2552 = vmatpush1.bf16.msra.mxu0 %v2524_v44 }
  0x42   : > { %8063 = vset.pattern.permute.xlu1 %v8670_v0  ;;  %738 = vperm.xlu0 %8071, %v419_v15  }
  0x43   : > { %726 = vperm.xlu1 %8063, %v416_v8   ;;  %v8937_v8 = vrot.slane %v772_v62, %v8911_v54 }
  0x46   : > { %746 = vperm.xlu0 %8071, %v8793_v18  }
  0x47   : > { %8064 = vset.pattern.permute.xlu1 %v13007_v6 }
  0x48   : > { %460 = vperm.xlu1 %8064, %v417_v14  }
  0x4a   : > { %754 = vperm.xlu0 %8071, %v8796_v19  }
  0x4c   : > { %8065 = vset.pattern.permute.xlu1 %v8671_v1 }
  0x4d   : > { %584 = vperm.xlu1 %8065, %v417_v14  }
  0x4e   : > { %8076 = vset.pattern.permute.xlu0 %v13007_v6 }
  0x4f   : > { %495 = vperm.xlu0 %8076, %v8811_v23  }
  0x51   : > { %588 = vperm.xlu1 %8065, %v418_v9  }
  0x53   : > { %505 = vperm.xlu0 %8076, %v8822_v26  }
  0x55   : > { %8066 = vset.pattern.permute.xlu1 %v8670_v0 }
  0x56   : > { %734 = vperm.xlu1 %8066, %v418_v9   ;;  %v8940_v9 = vrot.slane %v776_v63, %v8911_v54 }
  0x57   : > { %8080 = vset.pattern.permute.xlu0 %v8670_v0 }
  0x58   : > { %762 = vperm.xlu0 %8080, %v8837_v30  }
  0x5a   : > { %8067 = vset.pattern.permute.xlu1 %v13007_v6 }
  0x5b   : > { %470 = vperm.xlu1 %8067, %v419_v15  }
  0x5f   : > { %8068 = vset.pattern.permute.xlu1 %v8671_v1 }
  0x60   : > { %592 = vperm.xlu1 %8068, %v419_v15  }
  0x64   : > { %596 = vperm.xlu1 %8068, %v8767_v10  }
  0x68   : > { %8069 = vset.pattern.permute.xlu1 %v8670_v0 }
  0x69   : > { %742 = vperm.xlu1 %8069, %v8767_v10  }
  0x6d   : > { %8070 = vset.pattern.permute.xlu1 %v13007_v6 }
  0x6e   : > { %480 = vperm.xlu1 %8070, %v8793_v18  }
  0x72   : > { %8072 = vset.pattern.permute.xlu1 %v8671_v1 }
  0x73   : > { %600 = vperm.xlu1 %8072, %v8793_v18  }
  0x77   : > { %604 = vperm.xlu1 %8072, %v8774_v12  }
  0x7b   : > { %8073 = vset.pattern.permute.xlu1 %v8670_v0 }
  0x7c   : > { %750 = vperm.xlu1 %8073, %v8774_v12  }
  0x80   : > { %8074 = vset.pattern.permute.xlu1 %v13007_v6 }
  0x81   : > { %490 = vperm.xlu1 %8074, %v8796_v19  }
  0x85   : > { %8075 = vset.pattern.permute.xlu1 %v8671_v1 }
  0x86   : > { %608 = vperm.xlu1 %8075, %v8796_v19  }
  0x8a   : > { %612 = vperm.xlu1 %8075, %v8811_v23  }
  0x8e   : > { %8077 = vset.pattern.permute.xlu1 %v8670_v0 }
  0x8f   : > { %758 = vperm.xlu1 %8077, %v8811_v23  }
  0x93   : > { %8078 = vset.pattern.permute.xlu1 %v13007_v6  ;;  %v561_v47 = vpop.permute.xlu1 %560  ;;  %v707_v48 = vpop.permute.xlu0 %706 }
  0x94   : > { %500 = vperm.xlu1 %8078, %v8837_v30   ;;  %v641_v10 = vmul.f32 %v8924_v3, %v561_v47  ;;  %v642_v11 = vmul.f32 %v8927_v4, %v561_v47  ;;  %v787_v13 = vmul.f32 %v8937_v8, %v707_v48  ;;  %v788_v14 = vmul.f32 %v8940_v9, %v707_v48 }
  0x97   : > { %v565_v56 = vpop.permute.xlu1 %564  ;;  %v715_v57 = vpop.permute.xlu0 %714 }
  0x98   : > { %8079 = vset.pattern.permute.xlu1 %v8671_v1  ;;  %v8931_v1 = vrot.slane %v512_v60, %v8907_v52  ;;  %v643_v20 = vmul.f32 %v8924_v3, %v565_v56  ;;  %v644_v21 = vmul.f32 %v8927_v4, %v565_v56  ;;  %v791_v28 = vmul.f32 %v8937_v8, %v715_v57 }
  0x99   : > { %616 = vperm.xlu1 %8079, %v8837_v30  }
  0x9b   : > { %v8921_v2 = vpop.permute.xlu0 %722 }
  0x9c   : > { %v711_v5 = vpop.permute.xlu1 %710 }
  0x9d   : > { %620 = vperm.xlu1 %8079, %v8822_v26   ;;  %v789_v29 = vmul.f32 %v8937_v8, %v711_v5 }
  0xa0   : > { %v431_v12 = vpop.permute.xlu0 %430 }
  0xa1   : > { %v527_v15 = vmul.f32 %v8931_v1, %v431_v12  ;;  %v528_v16 = vmul.f32 %v8934_v7, %v431_v12  ;;  %8081 = vset.pattern.permute.xlu1 %v8670_v0  ;;  %v441_v17 = vpop.permute.xlu1 %440  ;;  %v792_v0 = vmul.f32 %v8940_v9, %v715_v57 }
  0xa2   : > { %766 = vperm.xlu1 %8081, %v8822_v26   ;;  %v790_v26 = vmul.f32 %v8940_v9, %v711_v5  ;;  %v531_v35 = vmul.f32 %v8931_v1, %v441_v17  ;;  %v532_v36 = vmul.f32 %v8934_v7, %v441_v17 }
  0xa3   : > { %v673_v18 = vadd.f32 %v641_v10, %v527_v15  ;;  %v674_v19 = vadd.f32 %v642_v11, %v528_v16 }
  0xa4   : > { %v436_v22 = vpop.permute.xlu0 %435 }
  0xa5   : > { %v819_v23 = vadd.f32 %v787_v13, %v673_v18  ;;  %v820_v24 = vadd.f32 %v788_v14, %v674_v19  ;;  %v529_v25 = vmul.f32 %v8931_v1, %v436_v22  ;;  %v530_v27 = vmul.f32 %v8934_v7, %v436_v22 }
  0xa6   : > { %v569_v30 = vpop.permute.xlu1 %568 }
  0xa7   : > { %v851_v31 = vmul.f32 0.15915494, %v819_v23  ;;  %v852_v32 = vmul.f32 0.15915494, %v820_v24  ;;  %v675_v33 = vadd.f32 %v643_v20, %v529_v25  ;;  %v676_v34 = vadd.f32 %v644_v21, %v530_v27 }
  0xa8   : > { %v645_v37 = vmul.f32 %v8924_v3, %v569_v30  ;;  %v646_v38 = vmul.f32 %v8927_v4, %v569_v30  ;;  %v446_v39 = vpop.permute.xlu0 %445 }
  0xa9   : > { %v883_v40 = vadd.f32 0.5, %v851_v31  ;;  %v884_v41 = vadd.f32 0.5, %v852_v32  ;;  %v821_v42 = vadd.f32 %v789_v29, %v675_v33  ;;  %v822_v43 = vadd.f32 %v790_v26, %v676_v34 }
  0xaa   : > { %v677_v44 = vadd.f32 %v645_v37, %v531_v35  ;;  %v678_v45 = vadd.f32 %v646_v38, %v532_v36  ;;  %v533_v47 = vmul.f32 %v8931_v1, %v446_v39  ;;  %v534_v48 = vmul.f32 %v8934_v7, %v446_v39  ;;  %v573_v50 = vpop.permute.xlu1 %572 }
  0xab   : > { %v915_v51 = vfloor.f32 %v883_v40  ;;  %v916_v55 = vfloor.f32 %v884_v41  ;;  %v853_v56 = vmul.f32 0.15915494, %v821_v42  ;;  %v854_v57 = vmul.f32 0.15915494, %v822_v43 }
  0xac   : > { %v823_v58 = vadd.f32 %v791_v28, %v677_v44  ;;  %v824_v59 = vadd.f32 %v792_v0, %v678_v45  ;;  %v647_v60 = vmul.f32 %v8924_v3, %v573_v50  ;;  %v648_v61 = vmul.f32 %v8927_v4, %v573_v50 }
  0xad   : > { %v947_v62 = vmul.f32 6.2831855, %v915_v51  ;;  %v948_v63 = vmul.f32 6.2831855, %v916_v55  ;;  %v885_v5 = vadd.f32 0.5, %v853_v56  ;;  %v886_v10 = vadd.f32 0.5, %v854_v57 }
  0xae   : > { %v855_v11 = vmul.f32 0.15915494, %v823_v58  ;;  %v856_v12 = vmul.f32 0.15915494, %v824_v59  ;;  %v679_v13 = vadd.f32 %v647_v60, %v533_v47  ;;  %v680_v0 = vadd.f32 %v648_v61, %v534_v48 }
  0xaf   : > { %v979_v14 = vsub.f32 %v819_v23, %v947_v62  ;;  %v980_v15 = vsub.f32 %v820_v24, %v948_v63  ;;  %v917_v16 = vfloor.f32 %v885_v5  ;;  %v918_v17 = vfloor.f32 %v886_v10  ;;  %v719_v18 = vpop.permute.xlu1 %718 }
  0xb0   : > { %v887_v19 = vadd.f32 0.5, %v855_v11  ;;  %v888_v20 = vadd.f32 0.5, %v856_v12  ;;  %v793_v21 = vmul.f32 %v8937_v8, %v719_v18  ;;  %v794_v22 = vmul.f32 %v8940_v9, %v719_v18 }
  0xb1   : > { %v1011_v25 = vmul.f32 0.15915494, %v979_v14  ;;  %v1012_v27 = vmul.f32 0.15915494, %v980_v15  ;;  %v949_v28 = vmul.f32 6.2831855, %v917_v16  ;;  %v795_v16 = vmul.f32 %v8937_v8, %v8921_v2 }
  0xb2   : > { %v950_v29 = vmul.f32 6.2831855, %v918_v17  ;;  %v919_v26 = vfloor.f32 %v887_v19  ;;  %v920_v30 = vfloor.f32 %v888_v20  ;;  %v825_v31 = vadd.f32 %v793_v21, %v679_v13 }
  0xb3   : > { %v1043_v32 = vadd.f32 0.5, %v1011_v25  ;;  %v981_v23 = vsub.f32 %v821_v42, %v949_v28  ;;  %v826_v24 = vadd.f32 %v794_v22, %v680_v0  ;;  %v1044_v38 = vadd.f32 0.5, %v1012_v27 }
  0xb4   : > { %v982_v33 = vsub.f32 %v822_v43, %v950_v29  ;;  %v951_v34 = vmul.f32 6.2831855, %v919_v26  ;;  %v952_v35 = vmul.f32 6.2831855, %v920_v30  ;;  %v857_v36 = vmul.f32 0.15915494, %v825_v31  ;;  %v451_v37 = vpop.permute.xlu1 %450  ;;  %v456_v43 = vpop.permute.xlu0 %455 }
  0xb5   : > { %v1013_v39 = vmul.f32 0.15915494, %v981_v23  ;;  %v858_v40 = vmul.f32 0.15915494, %v826_v24  ;;  %v1075_v48 = vfloor.f32 %v1043_v32  ;;  %v1076_v60 = vfloor.f32 %v1044_v38 }
  0xb6   : > { %v1014_v41 = vmul.f32 0.15915494, %v982_v33  ;;  %v8968_v44 = vsub.f32 %v823_v58, %v951_v34  ;;  %v984_v45 = vsub.f32 %v824_v59, %v952_v35  ;;  %v889_v47 = vadd.f32 0.5, %v857_v36 }
  0xb7   : > { %v1045_v50 = vadd.f32 0.5, %v1013_v39  ;;  %v890_v56 = vadd.f32 0.5, %v858_v40  ;;  %v1107_v62 = vmul.f32 6.2831855, %v1075_v48  ;;  %v1108_v59 = vmul.f32 6.2831855, %v1076_v60 }
  0xb8   : > { %v1046_v51 = vadd.f32 0.5, %v1014_v41  ;;  %v1016_v55 = vmul.f32 0.15915494, %v984_v45  ;;  %v921_v42 = vfloor.f32 %v889_v47  ;;  %v1015_v61 = vmul.f32 0.15915494, %v8968_v44  ;;  %v8973_v17 = vpop.permute.xlu0 %465 }
  0xb9   : > { %v577_v57 = vpop.permute.xlu1 %576  ;;  %v1077_v63 = vfloor.f32 %v1045_v50  ;;  %v922_v11 = vfloor.f32 %v890_v56  ;;  %v8975_v18 = vsub.f32 %v979_v14, %v1107_v62  ;;  %v535_v27 = vmul.f32 %v8931_v1, %v451_v37 }
  0xba   : > { %v1078_v5 = vfloor.f32 %v1046_v51  ;;  %v1048_v10 = vadd.f32 0.5, %v1016_v55  ;;  %v953_v58 = vmul.f32 6.2831855, %v921_v42  ;;  %v1047_v13 = vadd.f32 0.5, %v1015_v61 }
  0xbb   : > { %v1109_v19 = vmul.f32 6.2831855, %v1077_v63  ;;  %v954_v22 = vmul.f32 6.2831855, %v922_v11  ;;  %v649_v28 = vmul.f32 %v8924_v3, %v577_v57  ;;  %v8981_v0 = vsub.f32 %v980_v15, %v1108_v59 }
  0xbc   : > { %v1110_v20 = vmul.f32 6.2831855, %v1078_v5  ;;  %v1080_v21 = vfloor.f32 %v1048_v10  ;;  %v8977_v25 = vsub.f32 %v825_v31, %v953_v58  ;;  %v1079_v29 = vfloor.f32 %v1047_v13 }
  0xbd   : > { %v581_v12 = vpop.permute.xlu1 %580  ;;  %v796_v30 = vmul.f32 %v8940_v9, %v8921_v2  ;;  %v536_v14 = vmul.f32 %v8934_v7, %v451_v37  ;;  %v650_v32 = vmul.f32 %v8927_v4, %v577_v57  ;;  %v681_v34 = vadd.f32 %v649_v28, %v535_v27  ;;  %v8997_v2 = vpop.permute.xlu0 %475 }
  0xbe   : > { %v1171_v35 = vmul.f32 0.63661975, %v8975_v18  ;;  %v8988_v31 = vsub.f32 %v981_v23, %v1109_v19  ;;  %v8990_v36 = vsub.f32 %v982_v33, %v1110_v20  ;;  %v1112_v38 = vmul.f32 6.2831855, %v1080_v21 }
  0xbf   : > { %v8992_v39 = vsub.f32 %v826_v24, %v954_v22  ;;  %v1017_v15 = vmul.f32 0.15915494, %v8977_v25  ;;  %v682_v40 = vadd.f32 %v650_v32, %v536_v14  ;;  %v8995_v41 = vadd.f32 %v795_v16, %v681_v34 }
  0xc0   : > { %v1172_v37 = vmul.f32 0.63661975, %v8981_v0  ;;  %v1111_v47 = vmul.f32 6.2831855, %v1079_v29  ;;  %v537_v48 = vmul.f32 %v8931_v1, %v456_v43  ;;  %v651_v23 = vmul.f32 %v8924_v3, %v581_v12 }
  0xc1   : > { %v828_v50 = vadd.f32 %v796_v30, %v682_v40  ;;  %v859_v33 = vmul.f32 0.15915494, %v8995_v41  ;;  %v538_v24 = vmul.f32 %v8934_v7, %v456_v43  ;;  %v652_v51 = vmul.f32 %v8927_v4, %v581_v12  ;;  %v9015_v16 = vpop.permute.xlu0 %485 }
  0xc2   : > { %v727_v26 = vpop.permute.xlu1 %726  ;;  %v1173_v56 = vmul.f32 0.63661975, %v8988_v31  ;;  %v1174_v42 = vmul.f32 0.63661975, %v8990_v36  ;;  %v9007_v57 = vsub.f32 %v984_v45, %v1112_v38  ;;  %v1203_v60 = vadd.f32 0.5, %v1171_v35 }
  0xc3   : > { %v1018_v61 = vmul.f32 0.15915494, %v8992_v39  ;;  %v1049_v62 = vadd.f32 0.5, %v1017_v15  ;;  %v860_v63 = vmul.f32 0.15915494, %v828_v50  ;;  %v1204_v5 = vadd.f32 0.5, %v1172_v37 }
  0xc4   : > { %v891_v10 = vadd.f32 0.5, %v859_v33  ;;  %v683_v11 = vadd.f32 %v651_v23, %v537_v48  ;;  %v797_v58 = vmul.f32 %v8937_v8, %v727_v26  ;;  %v9012_v43 = vsub.f32 %v8968_v44, %v1111_v47 }
  0xc5   : > { %v892_v12 = vadd.f32 0.5, %v860_v63  ;;  %v684_v59 = vadd.f32 %v652_v51, %v538_v24  ;;  %v798_v13 = vmul.f32 %v8940_v9, %v727_v26  ;;  %v1205_v45 = vadd.f32 0.5, %v1173_v56  ;;  %v731_v56 = vpop.permute.xlu0 %730 }
  0xc6   : > { %v1206_v19 = vadd.f32 0.5, %v1174_v42  ;;  %v1176_v20 = vmul.f32 0.63661975, %v9007_v57  ;;  %v829_v21 = vadd.f32 %v797_v58, %v683_v11  ;;  %v1050_v27 = vadd.f32 0.5, %v1018_v61 }
  0xc7   : > { %v461_v55 = vpop.permute.xlu1 %460  ;;  %v1081_v28 = vfloor.f32 %v1049_v62  ;;  %v924_v29 = vfloor.f32 %v892_v12  ;;  %v830_v30 = vadd.f32 %v798_v13, %v684_v59  ;;  %v9018_v14 = vfloor.f32 %v1203_v60 }
  0xc8   : > { %v923_v44 = vfloor.f32 %v891_v10  ;;  %v861_v32 = vmul.f32 0.15915494, %v829_v21  ;;  %v9020_v34 = vfloor.f32 %v1204_v5  ;;  %v1175_v26 = vmul.f32 0.63661975, %v9012_v43 }
  0xc9   : > { %v956_v35 = vmul.f32 6.2831855, %v924_v29  ;;  %v862_v38 = vmul.f32 0.15915494, %v830_v30  ;;  %v9023_v15 = vfloor.f32 %v1205_v45  ;;  %v9025_v40 = vfloor.f32 %v1206_v19 }
  0xca   : > { %v1208_v37 = vadd.f32 0.5, %v1176_v20  ;;  %v893_v47 = vadd.f32 0.5, %v861_v32  ;;  %v1082_v23 = vfloor.f32 %v1050_v27  ;;  %v1113_v33 = vmul.f32 6.2831855, %v1081_v28 }
  0xcb   : > { %v9027_v24 = vsub.f32 %v828_v50, %v956_v35  ;;  %v894_v51 = vadd.f32 0.5, %v862_v38  ;;  %v955_v42 = vmul.f32 6.2831855, %v923_v44  ;;  %v539_v61 = vmul.f32 %v8931_v1, %v461_v55 }
  0xcc   : > { %v585_v22 = vpop.permute.xlu1 %584  ;;  %v925_v60 = vfloor.f32 %v893_v47  ;;  %v540_v10 = vmul.f32 %v8934_v7, %v461_v55  ;;  %v9034_v58 = vfloor.f32 %v1208_v37  ;;  %v799_v59 = vmul.f32 %v8937_v8, %v731_v56 }
  0xcd   : > { %v653_v62 = vmul.f32 %v8924_v3, %v585_v22  ;;  %v1020_v63 = vmul.f32 0.15915494, %v9027_v24  ;;  %v926_v5 = vfloor.f32 %v894_v51  ;;  %v654_v11 = vmul.f32 %v8927_v4, %v585_v22 }
  0xce   : > { %v957_v12 = vmul.f32 6.2831855, %v925_v60  ;;  %v1114_v13 = vmul.f32 6.2831855, %v1082_v23  ;;  %v541_v27 = vmul.f32 %v8931_v1, %v8973_v17  ;;  %v800_v28 = vmul.f32 %v8940_v9, %v731_v56 }
  0xcf   : > { %v685_v50 = vadd.f32 %v653_v62, %v539_v61  ;;  %v1052_v45 = vadd.f32 0.5, %v1020_v63  ;;  %v958_v19 = vmul.f32 6.2831855, %v926_v5  ;;  %v686_v20 = vadd.f32 %v654_v11, %v540_v10 }
  0xd0   : > { %v589_v48 = vpop.permute.xlu1 %588  ;;  %v9042_v22 = vsub.f32 %v8995_v41, %v955_v42  ;;  %v542_v32 = vmul.f32 %v8934_v7, %v8973_v17  ;;  %v9048_v37 = vsub.f32 %v8977_v25, %v1113_v33  ;;  %v9050_v47 = vsub.f32 %v829_v21, %v957_v12 }
  0xd1   : > { %v831_v29 = vadd.f32 %v799_v59, %v685_v50  ;;  %v655_v55 = vmul.f32 %v8924_v3, %v589_v48  ;;  %v990_v35 = vsub.f32 %v830_v30, %v958_v19  ;;  %v656_v38 = vmul.f32 %v8927_v4, %v589_v48 }
  0xd2   : > { %v832_v23 = vadd.f32 %v800_v28, %v686_v20  ;;  %v1272_v56 = vmul.f32 1.5707964, %v9034_v58  ;;  %v9054_v60 = vsub.f32 %v8992_v39, %v1114_v13  ;;  %v1084_v41 = vfloor.f32 %v1052_v45 }
  0xd3   : > { %v863_v51 = vmul.f32 0.15915494, %v831_v29  ;;  %v1022_v42 = vmul.f32 0.15915494, %v990_v35  ;;  %v687_v17 = vadd.f32 %v655_v55, %v541_v27  ;;  %v1019_v48 = vmul.f32 0.15915494, %v9042_v22 }
  0xd4   : > { %v864_v61 = vmul.f32 0.15915494, %v832_v23  ;;  %v688_v33 = vadd.f32 %v656_v38, %v542_v32  ;;  %v1021_v63 = vmul.f32 0.15915494, %v9050_v47  ;;  %v1207_v12 = vadd.f32 0.5, %v1175_v26 }
  0xd5   : > { %v735_v44 = vpop.permute.xlu1 %734  ;;  %v895_v62 = vadd.f32 0.5, %v863_v51  ;;  %v1054_v25 = vadd.f32 0.5, %v1022_v42  ;;  %v1116_v50 = vmul.f32 6.2831855, %v1084_v41  ;;  %v1177_v45 = vmul.f32 0.63661975, %v9048_v37 }
  0xd6   : > { %v801_v30 = vmul.f32 %v8937_v8, %v735_v44  ;;  %v802_v21 = vmul.f32 %v8940_v9, %v735_v44  ;;  %v896_v5 = vadd.f32 0.5, %v864_v61  ;;  %v9062_v28 = vsub.f32 %v9007_v57, %v1272_v56 }
  0xd7   : > { %v927_v10 = vfloor.f32 %v895_v62  ;;  %v1086_v59 = vfloor.f32 %v1054_v25  ;;  %v1178_v55 = vmul.f32 0.63661975, %v9054_v60  ;;  %v1051_v44 = vadd.f32 0.5, %v1019_v48 }
  0xd8   : > { %v833_v11 = vadd.f32 %v801_v30, %v687_v17  ;;  %v834_v13 = vadd.f32 %v802_v21, %v688_v33  ;;  %v928_v19 = vfloor.f32 %v896_v5  ;;  %v1053_v38 = vadd.f32 0.5, %v1021_v63 }
  0xd9   : > { %v959_v20 = vmul.f32 6.2831855, %v927_v10  ;;  %v9065_v26 = vfloor.f32 %v1207_v12  ;;  %v9068_v41 = vsub.f32 %v9027_v24, %v1116_v50  ;;  %v1118_v62 = vmul.f32 6.2831855, %v1086_v59 }
  0xda   : > { %v471_v39 = vpop.permute.xlu1 %470  ;;  %v865_v27 = vmul.f32 0.15915494, %v833_v11  ;;  %v866_v32 = vmul.f32 0.15915494, %v834_v13  ;;  %v960_v51 = vmul.f32 6.2831855, %v928_v19  ;;  %v9072_v48 = vmul.f32 %v9062_v28, %v9062_v28 }
  0xdb   : > { %v991_v42 = vsub.f32 %v831_v29, %v959_v20  ;;  %v1209_v30 = vadd.f32 0.5, %v1177_v45  ;;  %v1210_v21 = vadd.f32 0.5, %v1178_v55  ;;  %v1083_v63 = vfloor.f32 %v1051_v44 }
  0xdc   : > { %v897_v61 = vadd.f32 0.5, %v865_v27  ;;  %v898_v17 = vadd.f32 0.5, %v866_v32  ;;  %v992_v25 = vsub.f32 %v832_v23, %v960_v51  ;;  %v1085_v5 = vfloor.f32 %v1053_v38 }
  0xdd   : > { %v1023_v33 = vmul.f32 0.15915494, %v991_v42  ;;  %v1180_v24 = vmul.f32 0.63661975, %v9068_v41  ;;  %v9075_v50 = vsub.f32 %v990_v35, %v1118_v62  ;;  %v543_v32 = vmul.f32 %v8931_v1, %v471_v39 }
  0xde   : > { %v929_v57 = vfloor.f32 %v897_v61  ;;  %v930_v29 = vfloor.f32 %v898_v17  ;;  %v1024_v10 = vmul.f32 0.15915494, %v992_v25  ;;  %v9081_v55 = vfloor.f32 %v1210_v21  ;;  %v739_v61 = vpop.permute.xlu0 %738 }
  0xdf   : > { %v593_v56 = vpop.permute.xlu1 %592  ;;  %v1055_v12 = vadd.f32 0.5, %v1023_v33  ;;  %v544_v38 = vmul.f32 %v8934_v7, %v471_v39  ;;  %v1115_v17 = vmul.f32 6.2831855, %v1083_v63  ;;  %v9092_v39 = vmul.f32 %v8931_v1, %v8997_v2 }
  0xe0   : > { %v961_v19 = vmul.f32 6.2831855, %v929_v57  ;;  %v962_v59 = vmul.f32 6.2831855, %v930_v29  ;;  %v657_v23 = vmul.f32 %v8924_v3, %v593_v56  ;;  %v1056_v45 = vadd.f32 0.5, %v1024_v10 }
  0xe1   : > { %v1087_v20 = vfloor.f32 %v1055_v12  ;;  %v658_v51 = vmul.f32 %v8927_v4, %v593_v56  ;;  %v1212_v57 = vadd.f32 0.5, %v1180_v24  ;;  %v1117_v29 = vmul.f32 6.2831855, %v1085_v5 }
  0xe2   : > { %v9078_v27 = vsub.f32 %v833_v11, %v961_v19  ;;  %v994_v44 = vsub.f32 %v834_v13, %v962_v59  ;;  %v1088_v35 = vfloor.f32 %v1056_v45  ;;  %v689_v33 = vadd.f32 %v657_v23, %v543_v32 }
  0xe3   : > { %v690_v11 = vadd.f32 %v658_v51, %v544_v38  ;;  %v1182_v12 = vmul.f32 0.63661975, %v9075_v50  ;;  %v1119_v19 = vmul.f32 6.2831855, %v1087_v20  ;;  %v803_v13 = vmul.f32 %v8937_v8, %v739_v61 }
  0xe4   : > { %v1025_v62 = vmul.f32 0.15915494, %v9078_v27  ;;  %v1026_v10 = vmul.f32 0.15915494, %v994_v44  ;;  %v1120_v21 = vmul.f32 6.2831855, %v1088_v35  ;;  %v9088_v59 = vfloor.f32 %v1209_v30 }
  0xe5   : > { %v804_v63 = vmul.f32 %v8940_v9, %v739_v61  ;;  %v9096_v24 = vsub.f32 %v9042_v22, %v1115_v17  ;;  %v835_v45 = vadd.f32 %v803_v13, %v689_v33  ;;  %v1274_v20 = vmul.f32 1.5707964, %v9081_v55 }
  0xe6   : > { %v1058_v56 = vadd.f32 0.5, %v1026_v10  ;;  %v1152_v5 = vsub.f32 %v992_v25, %v1120_v21  ;;  %v1057_v23 = vadd.f32 0.5, %v1025_v62  ;;  %v9100_v32 = vsub.f32 %v9050_v47, %v1117_v29 }
  0xe7   : > { %13253 = vst [vmem:[#allocation6_spill] sm:$0xff] %v9096_v24  ;;  %v836_v38 = vadd.f32 %v804_v63, %v690_v11  ;;  %v9102_v51 = vfloor.f32 %v1212_v57  ;;  %v1214_v35 = vadd.f32 0.5, %v1182_v12  ;;  %v9104_v53 = vsub.f32 %v991_v42, %v1119_v19 }
  0xe8   : > { %13254 = vst [vmem:[#allocation7_spill] sm:$0xff] %v9100_v32  ;;  %v1090_v30 = vfloor.f32 %v1058_v56  ;;  %v1184_v10 = vmul.f32 0.63661975, %v1152_v5  ;;  %v9108_v22 = vmul.f32 %v8934_v7, %v8997_v2  ;;  %v867_v61 = vmul.f32 0.15915494, %v835_v45 }
  0xe9   : > { %13255 = vst [vmem:[#allocation8_spill] sm:$0xff] %v9102_v51  ;;  %v868_v17 = vmul.f32 0.15915494, %v836_v38  ;;  %v9111_v62 = vmul.f32 0.25, %v9081_v55  ;;  %v1179_v47 = vmul.f32 0.63661975, %v9096_v24  ;;  %v1089_v29 = vfloor.f32 %v1057_v23 }
  0xea   : > { %v1122_v25 = vmul.f32 6.2831855, %v1090_v30  ;;  %v1216_v33 = vadd.f32 0.5, %v1184_v10  ;;  %v1181_v57 = vmul.f32 0.63661975, %v9100_v32  ;;  %v899_v42 = vadd.f32 0.5, %v867_v61 }
  0xeb   : > { %v900_v12 = vadd.f32 0.5, %v868_v17  ;;  %v1276_v19 = vmul.f32 1.5707964, %v9102_v51  ;;  %v9118_v2 = vfloor.f32 %v1214_v35  ;;  %v1183_v21 = vmul.f32 0.63661975, %v9104_v53 }
  0xec   : > { %v9115_v11 = vsub.f32 %v994_v44, %v1122_v25  ;;  %v9121_v13 = vfloor.f32 %v1216_v33  ;;  %v931_v63 = vfloor.f32 %v899_v42  ;;  %v1268_v23 = vmul.f32 1.5707964, %v9020_v34 }
  0xed   : > { %13256 = vst [vmem:[#allocation9_spill] sm:$0xff] %v9118_v2  ;;  %v932_v30 = vfloor.f32 %v900_v12  ;;  %v9127_v44 = vmul.f32 %v8931_v1, %v9015_v16  ;;  %v1121_v25 = vmul.f32 6.2831855, %v1089_v29  ;;  %v1270_v35 = vmul.f32 1.5707964, %v9025_v40 }
  0xee   : > { %13257 = vst [vmem:[#allocation10_spill] sm:$0xff] %v9121_v13  ;;  %v1186_v56 = vmul.f32 0.63661975, %v9115_v11  ;;  %v1280_v10 = vmul.f32 1.5707964, %v9121_v13  ;;  %v9132_v61 = vsub.f32 %v9054_v60, %v1274_v20  ;;  %v1211_v46 = vadd.f32 0.5, %v1179_v47 }
  0xef   : > { %v963_v33 = vmul.f32 6.2831855, %v931_v63  ;;  %v964_v6 = vmul.f32 6.2831855, %v932_v30  ;;  %v9135_v42 = vsub.f32 %v9068_v41, %v1276_v19  ;;  %v1213_v12 = vadd.f32 0.5, %v1181_v57 }
  0xf0   : > { %v1218_v17 = vadd.f32 0.5, %v1186_v56  ;;  %v9137_v54 = vsub.f32 %v1152_v5, %v1280_v10  ;;  %v1278_v49 = vmul.f32 1.5707964, %v9118_v2  ;;  %v1215_v52 = vadd.f32 0.5, %v1183_v21 }
  0xf1   : > { %13258 = vst [vmem:[#allocation11_spill] sm:$0xff] %v9135_v42  ;;  %v996_v32 = vsub.f32 %v836_v38, %v964_v6  ;;  %v9141_v29 = vsub.f32 %v8981_v0, %v1268_v23  ;;  %v9146_v20 = vmul.f32 %v8934_v7, %v9015_v16  ;;  %v9149_v47 = vsub.f32 %v9078_v27, %v1121_v25 }
  0xf2   : > { %v9152_v41 = vsub.f32 %v8990_v36, %v1270_v35  ;;  %v9156_v5 = vmul.f32 %v9132_v61, %v9132_v61  ;;  %v9159_v6 = vmul.f32 0.25, %v9118_v2  ;;  %v9161_v0 = vfloor.f32 %v1218_v17 }
  0xf3   : > { %13259 = vst [vmem:[#allocation12_spill] sm:$0xff] %v9146_v20  ;;  %v9163_v38 = vsub.f32 %v835_v45, %v963_v33  ;;  %v9165_v57 = vfloor.f32 %v1211_v46  ;;  %v9167_v16 = vfloor.f32 %v1213_v12  ;;  %v9171_v27 = vmul.f32 %v9137_v54, %v9137_v54 }
  0xf4   : > { %13260 = vst [vmem:[#allocation13_spill] sm:$0xff] %v9159_v6  ;;  %v1028_v36 = vmul.f32 0.15915494, %v996_v32  ;;  %v9175_v19 = vmul.f32 %v9135_v42, %v9135_v42  ;;  %v9178_v21 = vsub.f32 %v9075_v50, %v1278_v49  ;;  %v9180_v56 = vfloor.f32 %v1215_v52 }
  0xf5   : > { %13261 = vst [vmem:[#allocation14_spill] sm:$0xff] %v9165_v57  ;;  %13262 = vst [vmem:[#allocation15_spill] sm:$0xff] %v9167_v16  ;;  %v9184_v46 = vmul.f32 %v9141_v29, %v9141_v29  ;;  %v1185_v45 = vmul.f32 0.63661975, %v9149_v47  ;;  %v1332_v30 = vmul.f32 0.25, %v9020_v34  ;;  %v9190_v23 = vmul.f32 %v9152_v41, %v9152_v41 }
  0xf6   : > { %13263 = vst [vmem:[#allocation16_spill] sm:$0xff] %v9175_v19  ;;  %13264 = vst [vmem:[#allocation17_spill] sm:$0xff] %v9178_v21  ;;  %v1060_v63 = vadd.f32 0.5, %v1028_v36  ;;  %v1282_v49 = vmul.f32 1.5707964, %v9161_v0  ;;  %v9201_v12 = vmul.f32 %v9178_v21, %v9178_v21  ;;  %v1334_v10 = vmul.f32 0.25, %v9025_v40 }
  0xf7   : > { %13265 = vst [vmem:[#allocation18_spill] sm:$0xff] %v9180_v56  ;;  %v1027_v52 = vmul.f32 0.15915494, %v9163_v38  ;;  %v1492_v50 = vmul.f32 -0.0001984127, %v9184_v46  ;;  %v1217_v24 = vadd.f32 0.5, %v1185_v45  ;;  %v1364_v57 = vfloor.f32 %v1332_v30 }
  0xf8   : > { %v1504_v25 = vmul.f32 -0.0001984127, %v9171_v27  ;;  %v1092_v35 = vfloor.f32 %v1060_v63  ;;  %v1494_v17 = vmul.f32 -0.0001984127, %v9190_v23  ;;  %v1716_v33 = vmul.f32 2.4801588e-05, %v9184_v46 }
  0xf9   : > { %13266 = vst [vmem:[#allocation19_spill] sm:$0xff] %v9201_v12  ;;  %v1279_v36 = vmul.f32 1.5707964, %v9180_v56  ;;  %v1524_v60 = vadd.f32 0.008333334, %v1492_v50  ;;  %v9206_v2 = vsub.f32 %v9115_v11, %v1282_v49  ;;  %v1059_v63 = vadd.f32 0.5, %v1027_v52 }
  0xfa   : > { %v1124_v16 = vmul.f32 6.2831855, %v1092_v35  ;;  %v1526_v42 = vadd.f32 0.008333334, %v1494_v17  ;;  %v1718_v51 = vmul.f32 2.4801588e-05, %v9190_v23  ;;  %v1366_v45 = vfloor.f32 %v1334_v10 }
  0xfb   : > { %v1556_v6 = vmul.f32 %v1524_v60, %v9184_v46  ;;  %v1536_v19 = vadd.f32 0.008333334, %v1504_v25  ;;  %v1748_v12 = vadd.f32 -0.0013888889, %v1716_v33  ;;  %v1344_v50 = vmul.f32 0.25, %v9121_v13 }
  0xfc   : > { %v9210_v21 = vsub.f32 %v996_v32, %v1124_v16  ;;  %v1558_v56 = vmul.f32 %v1526_v42, %v9190_v23  ;;  %v1750_v30 = vadd.f32 -0.0013888889, %v1718_v51  ;;  %v9214_v17 = vfloor.f32 %v1217_v24 }
  0xfd   : > { %v1588_v35 = vadd.f32 -0.16666667, %v1556_v6  ;;  %v1396_v11 = vmul.f32 4.0, %v1364_v57  ;;  %v1780_v52 = vmul.f32 %v1748_v12, %v9184_v46  ;;  %v9219_v60 = vmul.f32 %v9206_v2, %v9206_v2 }
  0xfe   : > { %13267 = vst [vmem:[#allocation20_spill] sm:$0xff] %v9214_v17  ;;  %v1590_v49 = vadd.f32 -0.16666667, %v1558_v56  ;;  %v1091_v32 = vfloor.f32 %v1059_v63  ;;  %v1782_v42 = vmul.f32 %v1750_v30, %v9190_v23  ;;  %v1568_v25 = vmul.f32 %v1536_v19, %v9171_v27 }
  0xff   : > { %v1620_v16 = vmul.f32 %v1588_v35, %v9184_v46  ;;  %v1188_v6 = vmul.f32 0.63661975, %v9210_v21  ;;  %v1812_v51 = vadd.f32 0.041666668, %v1780_v52  ;;  %v9227_v57 = vsub.f32 %v9104_v53, %v1279_v36 }
 0x100   : > { %v1622_v24 = vmul.f32 %v1590_v49, %v9190_v23  ;;  %v1376_v56 = vfloor.f32 %v1344_v50  ;;  %v1398_v10 = vmul.f32 4.0, %v1366_v45  ;;  %v1814_v33 = vadd.f32 0.041666668, %v1782_v42 }
 0x101   : > { %13268 = vst [vmem:[#allocation21_spill] sm:$0xff] %v9227_v57  ;;  %v1281_v12 = vmul.f32 1.5707964, %v9214_v17  ;;  %v9231_v63 = vmul.f32 0.25, %v9161_v0  ;;  %v1652_v35 = vadd.f32 1.0, %v1620_v16  ;;  %v1844_v30 = vmul.f32 %v1812_v51, %v9184_v46 }
 0x102   : > { %v1506_v19 = vmul.f32 -0.0001984127, %v9219_v60  ;;  %v1123_v13 = vmul.f32 6.2831855, %v1091_v32  ;;  %v1654_v20 = vadd.f32 1.0, %v1622_v24  ;;  %v1846_v49 = vmul.f32 %v1814_v33, %v9190_v23 }
 0x103   : > { %v1600_v52 = vadd.f32 -0.16666667, %v1568_v25  ;;  %v1220_v53 = vadd.f32 0.5, %v1188_v6  ;;  %v1428_v36 = vsub.f32 %v9020_v34, %v1396_v11  ;;  %v1876_v50 = vadd.f32 -0.5, %v1844_v30 }
 0x104   : > { %v9237_v45 = vmul.f32 4.0, %v1376_v56  ;;  %v9241_v42 = vmul.f32 %v9227_v57, %v9227_v57  ;;  %v1430_v16 = vsub.f32 %v9025_v40, %v1398_v10  ;;  %v1878_v51 = vadd.f32 -0.5, %v1846_v49 }
 0x105   : > { %v9245_v17 = vsub.f32 %v9149_v47, %v1281_v12  ;;  %v1684_v25 = vmul.f32 %v1652_v35, %v9141_v29  ;;  %v1908_v6 = vmul.f32 %v1876_v50, %v9184_v46  ;;  %v1538_v34 = vadd.f32 0.008333334, %v1506_v19  ;;  %v597_v29 = vpop.permute.xlu1 %596 }
 0x106   : > { %13269 = vst [vmem:[#allocation22_spill] sm:$0xff] %v9241_v42  ;;  %v9251_v11 = vsub.f32 %v9163_v38, %v1123_v13  ;;  %v1686_v24 = vmul.f32 %v1654_v20, %v9152_v41  ;;  %v1910_v56 = vmul.f32 %v1878_v51, %v9190_v23  ;;  %v1632_v40 = vmul.f32 %v1600_v52, %v9171_v27 }
 0x107   : > { %13270 = vst [vmem:[#allocation23_spill] sm:$0xff] %v9245_v17  ;;  %v9256_v10 = vfloor.f32 %v1220_v53  ;;  %v1940_v47 = vadd.f32 1.0, %v1908_v6  ;;  %vm1972_vm2 = vcmp.eq.f32.partialorder %v1428_v36, 0.0  ;;  %vm1974_vm3 = vcmp.eq.f32.partialorder %v1430_v16, 0.0 }
 0x108   : > { %v1942_v33 = vadd.f32 1.0, %v1910_v56  ;;  %vm2004_vm4 = vcmp.eq.f32.partialorder %v1428_v36, 1.0  ;;  %vm2006_vm5 = vcmp.eq.f32.partialorder %v1430_v16, 1.0  ;;  %vm2036_vm6 = vcmp.eq.f32.partialorder %v1428_v36, 2.0 }
 0x109   : > { %v2068_v46 = vsub.f32 0.0, %v1684_v25  ;;  %v2100_v13 = vsub.f32 0.0, %v1940_v47  ;;  %v1267_v38 = vmul.f32 1.5707964, %v9018_v14  ;;  %vm2038_vm7 = vcmp.eq.f32.partialorder %v1430_v16, 2.0 }
 0x10a   : > { %v2070_v20 = vsub.f32 0.0, %v1686_v24  ;;  %v2102_v41 = vsub.f32 0.0, %v1942_v33  ;;  %v1269_v23 = vmul.f32 1.5707964, %v9023_v15  ;;  %v1331_v19 = vmul.f32 0.25, %v9018_v14 }
 0x10b   : > { %v2132_v12 = vsel %vm2036_vm6, %v2068_v46, %v2100_v13  ;;  %v2228_v35 = vsel %vm2036_vm6, %v2100_v13, %v1684_v25  ;;  %v9261_v30 = vsub.f32 %v8975_v18, %v1267_v38  ;;  %v1333_v32 = vmul.f32 0.25, %v9023_v15 }
 0x10c   : > { %v2134_v49 = vsel %vm2038_vm7, %v2070_v20, %v2102_v41  ;;  %v2164_v52 = vsel %vm2004_vm4, %v1940_v47, %v2132_v12  ;;  %v2230_v53 = vsel %vm2038_vm7, %v2102_v41, %v1686_v24  ;;  %v2260_v50 = vsel %vm2004_vm4, %v2068_v46, %v2228_v35  ;;  %v743_v46 = vpop.permute.xlu1 %742 }
 0x10d   : > { %v2166_v51 = vsel %vm2006_vm5, %v1942_v33, %v2134_v49  ;;  %v2196_v6 = vsel %vm1972_vm2, %v1684_v25, %v2164_v52  ;;  %v2262_v56 = vsel %vm2006_vm5, %v2070_v20, %v2230_v53  ;;  %v9272_v18 = vsel %vm1972_vm2, %v1940_v47, %v2260_v50 }
 0x10e   : > { %v2198_v13 = vsel %vm1974_vm3, %v1686_v24, %v2166_v51  ;;  %13271 = vst [vmem:[#allocation24_spill] sm:$0xff] %v9272_v18  ;;  %v9275_v38 = vsel %vm1974_vm3, %v1942_v33, %v2262_v56  ;;  %v9278_v41 = vsub.f32 %v8988_v31, %v1269_v23  ;;  %v1570_v12 = vmul.f32 %v1538_v34, %v9219_v60 }
 0x10f   : > { %13272 = vst [vmem:[#allocation25_spill] sm:$0xff] %v9275_v38  ;;  %v1284_v25 = vmul.f32 1.5707964, %v9256_v10  ;;  %v2367_v35 = vpack.c.bf16 %v2198_v13, %v2196_v6  ;;  %v659_v20 = vmul.f32 %v8924_v3, %v597_v29  ;;  %v9285_v24 = vmul.f32 %v9245_v17, %v9245_v17 }
 0x110   : > { %v1187_v36 = vmul.f32 0.63661975, %v9251_v11  ;;  %v1459_v16 = vmul.f32 %v9261_v30, %v9261_v30  ;;  %v1461_v31 = vmul.f32 %v9278_v41, %v9278_v41  ;;  %v1664_v47 = vadd.f32 1.0, %v1632_v40 }
 0x111   : > { %13273 = vst [vmem:[#allocation26_spill] sm:$0xff] %v9285_v24  ;;  %7353 = vmatprep.mubr.msk.bf16.mxu0 %vm13242_vm1, %v2367_v35  ;;  %v1363_v34 = vfloor.f32 %v1331_v19  ;;  %v1365_v33 = vfloor.f32 %v1333_v32  ;;  %v805_v23 = vmul.f32 %v8937_v8, %v743_v46  ;;  %v660_v50 = vmul.f32 %v8927_v4, %v597_v29 }
 0x112   : > { %v1491_v49 = vmul.f32 -0.0001984127, %v1459_v16  ;;  %v1493_v52 = vmul.f32 -0.0001984127, %v1461_v31  ;;  %v1715_v53 = vmul.f32 2.4801588e-05, %v1459_v16  ;;  %v9296_v6 = vsub.f32 %v9210_v21, %v1284_v25 }
 0x113   : > { %v1602_v51 = vadd.f32 -0.16666667, %v1570_v12  ;;  %v1717_v56 = vmul.f32 2.4801588e-05, %v1461_v31  ;;  %v691_v13 = vadd.f32 %v659_v20, %v9092_v39  ;;  %v806_v19 = vmul.f32 %v8940_v9, %v743_v46 }
 0x114   : > { %v1523_v38 = vadd.f32 0.008333334, %v1491_v49  ;;  %v1525_v40 = vadd.f32 0.008333334, %v1493_v52  ;;  %v1747_v18 = vadd.f32 -0.0013888889, %v1715_v53  ;;  %v692_v12 = vadd.f32 %v660_v50, %v9108_v22 }
 0x115   : > { %v1395_v32 = vmul.f32 4.0, %v1363_v34  ;;  %v1397_v35 = vmul.f32 4.0, %v1365_v33  ;;  %v1749_v17 = vadd.f32 -0.0013888889, %v1717_v56  ;;  %v9300_v57 = vadd.f32 %v805_v23, %v691_v13 }
 0x116   : > { %v1555_v24 = vmul.f32 %v1523_v38, %v1459_v16  ;;  %v1557_v42 = vmul.f32 %v1525_v40, %v1461_v31  ;;  %v1779_v29 = vmul.f32 %v1747_v18, %v1459_v16  ;;  %v9304_v21 = vmul.f32 %v1664_v47, %v9137_v54 }
 0x117   : > { %v9306_v25 = vadd.f32 0.5, %v1187_v36  ;;  %v9310_v39 = vmul.f32 %v9296_v6, %v9296_v6  ;;  %v1781_v46 = vmul.f32 %v1749_v17, %v1461_v31  ;;  %v838_v23 = vadd.f32 %v806_v19, %v692_v12 }
 0x118   : > { %13274 = vst [vmem:[#allocation27_spill] sm:$0xff] %v9304_v21  ;;  %v1587_v20 = vadd.f32 -0.16666667, %v1555_v24  ;;  %v1589_v34 = vadd.f32 -0.16666667, %v1557_v42  ;;  %v1427_v38 = vsub.f32 %v9018_v14, %v1395_v32  ;;  %v1429_v18 = vsub.f32 %v9023_v15, %v1397_v35 }
 0x119   : > { %v1811_v33 = vadd.f32 0.041666668, %v1779_v29  ;;  %v1813_v49 = vadd.f32 0.041666668, %v1781_v46  ;;  %v869_v22 = vmul.f32 0.15915494, %v9300_v57  ;;  %v9316_v53 = vmul.f32 %v1602_v51, %v9219_v60 }
 0x11a   : > { %v1619_v54 = vmul.f32 %v1587_v20, %v1459_v16  ;;  %v1621_v47 = vmul.f32 %v1589_v34, %v1461_v31  ;;  %v870_v52 = vmul.f32 0.15915494, %v838_v23  ;;  %v9319_v17 = vmul.f32 -0.0001984127, %v9310_v39 }
 0x11b   : > { %v1843_v36 = vmul.f32 %v1811_v33, %v1459_v16  ;;  %v1845_v42 = vmul.f32 %v1813_v49, %v1461_v31  ;;  %v901_v24 = vadd.f32 0.5, %v869_v22  ;;  %vm1971_vm8 = vcmp.eq.f32.partialorder %v1427_v38, 0.0 }
 0x11c   : > { %v1651_v50 = vadd.f32 1.0, %v1619_v54  ;;  %v1653_v56 = vadd.f32 1.0, %v1621_v47  ;;  %v902_v13 = vadd.f32 0.5, %v870_v52  ;;  %vm2003_vm9 = vcmp.eq.f32.partialorder %v1427_v38, 1.0 }
 0x11d   : > { %v1875_v14 = vadd.f32 -0.5, %v1843_v36  ;;  %v1877_v15 = vadd.f32 -0.5, %v1845_v42  ;;  %v933_v40 = vfloor.f32 %v901_v24  ;;  %vm1973_vm10 = vcmp.eq.f32.partialorder %v1429_v18, 0.0 }
 0x11e   : > { %v1683_v19 = vmul.f32 %v1651_v50, %v9261_v30  ;;  %v1685_v32 = vmul.f32 %v1653_v56, %v9278_v41  ;;  %v934_v51 = vfloor.f32 %v902_v13  ;;  %vm2005_vm11 = vcmp.eq.f32.partialorder %v1429_v18, 1.0 }
 0x11f   : > { %v1907_v35 = vmul.f32 %v1875_v14, %v1459_v16  ;;  %v1909_v29 = vmul.f32 %v1877_v15, %v1461_v31  ;;  %vm2035_vm12 = vcmp.eq.f32.partialorder %v1427_v38, 2.0  ;;  %v1496_v12 = vmul.f32 -0.0001984127, %v9072_v48 }
 0x120   : > { %vm2037_vm13 = vcmp.eq.f32.partialorder %v1429_v18, 2.0  ;;  %v965_v20 = vmul.f32 6.2831855, %v933_v40  ;;  %v966_v34 = vmul.f32 6.2831855, %v934_v51  ;;  %v2067_v49 = vsub.f32 0.0, %v1683_v19 }
 0x121   : > { %v1939_v46 = vadd.f32 1.0, %v1907_v35  ;;  %v1941_v33 = vadd.f32 1.0, %v1909_v29  ;;  %v1498_v22 = vmul.f32 -0.0001984127, %v9156_v5  ;;  %v1528_v54 = vadd.f32 0.008333334, %v1496_v12 }
 0x122   : > { %v2069_v30 = vsub.f32 0.0, %v1685_v32  ;;  %v998_v41 = vsub.f32 %v838_v23, %v966_v34  ;;  %v1720_v16 = vmul.f32 2.4801588e-05, %v9072_v48  ;;  %v1722_v42 = vmul.f32 2.4801588e-05, %v9156_v5 }
 0x123   : > { %v2099_v47 = vsub.f32 0.0, %v1939_v46  ;;  %v2101_v36 = vsub.f32 0.0, %v1941_v33  ;;  %v1530_v31 = vadd.f32 0.008333334, %v1498_v22  ;;  %v1560_v52 = vmul.f32 %v1528_v54, %v9072_v48 }
 0x124   : > { %v1030_v56 = vmul.f32 0.15915494, %v998_v41  ;;  %v1752_v14 = vadd.f32 -0.0013888889, %v1720_v16  ;;  %v1336_v12 = vmul.f32 0.25, %v9034_v58 }
 0x125   : > { %v2131_v24 = vsel %vm2035_vm12, %v2067_v49, %v2099_v47  ;;  %v2227_v50 = vsel %vm2035_vm12, %v2099_v47, %v1683_v19  ;;  %v2133_v13 = vsel %vm2037_vm13, %v2069_v30, %v2101_v36  ;;  %v2229_v23 = vsel %vm2037_vm13, %v2101_v36, %v1685_v32 }
 0x126   : > { %v2163_v15 = vsel %vm2003_vm9, %v1939_v46, %v2131_v24  ;;  %v2259_v40 = vsel %vm2003_vm9, %v2067_v49, %v2227_v50  ;;  %v2165_v35 = vsel %vm2005_vm11, %v1941_v33, %v2133_v13  ;;  %v2261_v51 = vsel %vm2005_vm11, %v2069_v30, %v2229_v23 }
 0x127   : > { %v9337_v29 = vsel %vm1971_vm8, %v1939_v46, %v2259_v40  ;;  %v2195_v34 = vsel %vm1971_vm8, %v1683_v19, %v2163_v15  ;;  %v2197_v22 = vsel %vm1973_vm10, %v1685_v32, %v2165_v35  ;;  %v9343_v54 = vsel %vm1973_vm10, %v1941_v33, %v2261_v51 }
 0x128   : > { %13275 = vst [vmem:[#allocation28_spill] sm:$0xff] %v9337_v29  ;;  %13276 = vst [vmem:[#allocation29_spill] sm:$0xff] %v9343_v54  ;;  %v1062_v47 = vadd.f32 0.5, %v1030_v56  ;;  %v2366_v16 = vpack.c.bf16 %v2197_v22, %v2195_v34  ;;  %v1562_v36 = vmul.f32 %v1530_v31, %v9156_v5  ;;  %v1592_v30 = vadd.f32 -0.16666667, %v1560_v52 }
 0x129   : > { %v9349_v46 = vsub.f32 %v9300_v57, %v965_v20  ;;  %v1754_v50 = vadd.f32 -0.0013888889, %v1722_v42  ;;  %v1784_v38 = vmul.f32 %v1752_v14, %v9072_v48  ;;  %v9353_v19 = vfloor.f32 %v9306_v25 }
 0x12a   : > { %v1094_v24 = vfloor.f32 %v1062_v47  ;;  %2562 = vmatmul.mubr.bf16.vlgmr.msra.gmra.mrb[0].mxu0 %v2366_v16  ;;  %v1368_v18 = vfloor.f32 %v1336_v12  ;;  %v1594_v32 = vadd.f32 -0.16666667, %v1562_v36  ;;  %v1624_v33 = vmul.f32 %v1592_v30, %v9072_v48 }
 0x12b   : > { %v13277_v56 = vfloor.f32 %v9231_v63  ;;  %v1786_v57 = vmul.f32 %v1754_v50, %v9156_v5  ;;  %v1816_v20 = vadd.f32 0.041666668, %v1784_v38  ;;  %v1666_v42 = vadd.f32 1.0, %v9316_v53 }
 0x12c   : > { %v1126_v31 = vmul.f32 6.2831855, %v1094_v24  ;;  %v1540_v25 = vadd.f32 0.008333334, %v9319_v17  ;;  %v1626_v14 = vmul.f32 %v1594_v32, %v9156_v5  ;;  %v1029_v15 = vmul.f32 0.15915494, %v9349_v46 }
 0x12d   : > { %v9358_v13 = vmul.f32 4.0, %v13277_v56  ;;  %v1818_v40 = vadd.f32 0.041666668, %v1786_v57  ;;  %v1848_v63 = vmul.f32 %v1816_v20, %v9072_v48  ;;  %v1283_v35 = vmul.f32 1.5707964, %v9353_v19 }
 0x12e   : > { %v9366_v23 = vsub.f32 %v998_v41, %v1126_v31  ;;  %v9371_v51 = vmul.f32 0.25, %v9256_v10  ;;  %v1400_v12 = vmul.f32 4.0, %v1368_v18  ;;  %v1656_v34 = vadd.f32 1.0, %v1624_v33 }
 0x12f   : > { %v1658_v22 = vadd.f32 1.0, %v1626_v14  ;;  %v1850_v17 = vmul.f32 %v1818_v40, %v9156_v5  ;;  %v1880_v47 = vadd.f32 -0.5, %v1848_v63  ;;  %v1572_v16 = vmul.f32 %v1540_v25, %v9310_v39 }
 0x130   : > { %v1190_v53 = vmul.f32 0.63661975, %v9366_v23  ;;  %v13278_v41 = vfloor.f32 %v9111_v62  ;;  %v1271_v30 = vmul.f32 1.5707964, %v9065_v26  ;;  %v1273_v24 = vmul.f32 1.5707964, %v9088_v59 }
 0x131   : > { %v9381_v50 = vmul.f32 %v1666_v42, %v9206_v2  ;;  %v1061_v38 = vadd.f32 0.5, %v1029_v15  ;;  %v1882_v18 = vadd.f32 -0.5, %v1850_v17  ;;  %v1912_v32 = vmul.f32 %v1880_v47, %v9072_v48 }
 0x132   : > { %v1402_v36 = vmul.f32 4.0, %v13278_v41  ;;  %v9385_v33 = vsub.f32 %v9034_v58, %v1400_v12  ;;  %v9388_v56 = vmul.f32 %v1656_v34, %v9062_v28  ;;  %v9391_v62 = vsub.f32 %v9012_v43, %v1271_v30 }
 0x133   : > { %13279 = vst [vmem:[#allocation30_spill] sm:$0xff] %v9381_v50  ;;  %v9394_v31 = vsub.f32 %v9048_v37, %v1273_v24  ;;  %v1222_v57 = vadd.f32 0.5, %v1190_v53  ;;  %v9397_v2 = vmul.f32 %v1658_v22, %v9132_v61  ;;  %v1914_v20 = vmul.f32 %v1882_v18, %v9156_v5  ;;  %v481_v37 = vpop.permute.xlu1 %480 }
 0x134   : > { %13280 = vst [vmem:[#allocation31_spill] sm:$0xff] %v9385_v33  ;;  %13281 = vst [vmem:[#allocation32_spill] sm:$0xff] %v9388_v56  ;;  %v9400_v42 = vadd.f32 1.0, %v1912_v32  ;;  %v1604_v48 = vadd.f32 -0.16666667, %v1572_v16  ;;  %v9403_v58 = vsub.f32 %v9081_v55, %v1402_v36  ;;  %v9407_v28 = vmul.f32 %v9391_v62, %v9391_v62 }
 0x135   : > { %13282 = vst [vmem:[#allocation33_spill] sm:$0xff] %v9397_v2  ;;  %v9411_v43 = vmul.f32 %v9394_v31, %v9394_v31  ;;  %v1093_v25 = vfloor.f32 %v1061_v38  ;;  %v9413_v61 = vadd.f32 1.0, %v1914_v20  ;;  %v1335_v5 = vmul.f32 0.25, %v9065_v26 }
 0x136   : > { %13283 = vst [vmem:[#allocation34_spill] sm:$0xff] %v9400_v42  ;;  %13284 = vst [vmem:[#allocation35_spill] sm:$0xff] %v9403_v58  ;;  %v1337_v14 = vmul.f32 0.25, %v9088_v59  ;;  %vm13206_vm14 = vcmp.eq.f32.partialorder %v9385_v33, 0.0  ;;  %v13039_v55 = vsub.f32 0.0, %v9388_v56  ;;  %v13041_v15 = vsub.f32 0.0, %v9400_v42 }
 0x137   : > { %13285 = vst [vmem:[#allocation36_spill] sm:$0xff] %v9413_v61  ;;  %v1495_v40 = vmul.f32 -0.0001984127, %v9407_v28  ;;  %v9421_v63 = vfloor.f32 %v1222_v57  ;;  %vm13218_vm15 = vcmp.eq.f32.partialorder %v9385_v33, 2.0  ;;  %v13040_v12 = vsub.f32 0.0, %v9397_v2  ;;  %v601_v24 = vpop.permute.xlu1 %600 }
 0x138   : > { %v13042_v34 = vsub.f32 0.0, %v9413_v61  ;;  %vm13209_vm2 = vcmp.eq.f32.partialorder %v9385_v33, 1.0  ;;  %vm13219_vm3 = vcmp.eq.f32.partialorder %v9403_v58, 2.0  ;;  %v2136_v53 = vsel %vm13218_vm15, %v13039_v55, %v13041_v15 }
 0x139   : > { %v1497_v22 = vmul.f32 -0.0001984127, %v9411_v43  ;;  %vm13210_vm4 = vcmp.eq.f32.partialorder %v9403_v58, 1.0  ;;  %v1367_v47 = vfloor.f32 %v1335_v5  ;;  %v1369_v16 = vfloor.f32 %v1337_v14 }
 0x13a   : > { %v2138_v17 = vsel %vm13219_vm3, %v13040_v12, %v13042_v34  ;;  %vm13208_vm5 = vcmp.eq.f32.partialorder %v9403_v58, 0.0  ;;  %v2168_v41 = vsel %vm13209_vm2, %v9400_v42, %v2136_v53  ;;  %v1527_v30 = vadd.f32 0.008333334, %v1495_v40  ;;  %v13315_v42 = vld [vmem:[#allocation7_spill] sm:$0xff] }
 0x13b   : > { %v2170_v36 = vsel %vm13210_vm4, %v9413_v61, %v2138_v17  ;;  %v1286_v38 = vmul.f32 1.5707964, %v9421_v63  ;;  %v2200_v18 = vsel %vm13206_vm14, %v9388_v56, %v2168_v41  ;;  %v1529_v57 = vadd.f32 0.008333334, %v1497_v22 }
 0x13c   : > { %v2202_v32 = vsel %vm13208_vm5, %v9397_v2, %v2170_v36  ;;  %v1559_v5 = vmul.f32 %v1527_v30, %v9407_v28  ;;  %v1719_v14 = vmul.f32 2.4801588e-05, %v9407_v28  ;;  %v1721_v53 = vmul.f32 2.4801588e-05, %v9411_v43 }
 0x13d   : > { %v2369_v20 = vpack.c.bf16 %v2202_v32, %v2200_v18  ;;  %v9460_v40 = vsub.f32 %v9251_v11, %v1283_v35  ;;  %v1399_v17 = vmul.f32 4.0, %v1367_v47  ;;  %v1401_v49 = vmul.f32 4.0, %v1369_v16 }
 0x13e   : > { %v1561_v55 = vmul.f32 %v1529_v57, %v9411_v43  ;;  %v1591_v36 = vadd.f32 -0.16666667, %v1559_v5  ;;  %v1751_v22 = vadd.f32 -0.0013888889, %v1719_v14  ;;  %v1753_v18 = vadd.f32 -0.0013888889, %v1721_v53  ;;  %v747_v57 = vpop.permute.xlu0 %746 }
 0x13f   : > { %13286 = vst [vmem:[#allocation37_spill] sm:$0xff] %v9460_v40  ;;  %7354 = vmatprep.mubr.msk.bf16.mxu0 %vm13242_vm1, %v2369_v20  ;;  %v1636_v32 = vmul.f32 %v1604_v48, %v9310_v39  ;;  %v1125_v12 = vmul.f32 6.2831855, %v1093_v25  ;;  %v9468_v11 = vsub.f32 %v9366_v23, %v1286_v38  ;;  %v605_v20 = vpop.permute.xlu1 %604  ;;  %v9474_v5 = vsub.f32 %v9065_v26, %v1399_v17 }
 0x140   : > { %v1593_v15 = vadd.f32 -0.16666667, %v1561_v55  ;;  %v1623_v35 = vmul.f32 %v1591_v36, %v9407_v28  ;;  %v1783_v47 = vmul.f32 %v1751_v22, %v9407_v28  ;;  %v1785_v16 = vmul.f32 %v1753_v18, %v9411_v43 }
 0x141   : > { %13287 = vst [vmem:[#allocation38_spill] sm:$0xff] %v9474_v5  ;;  %v9477_v14 = vsub.f32 %v9088_v59, %v1401_v49  ;;  %v547_v25 = vmul.f32 %v8931_v1, %v481_v37  ;;  %v661_v53 = vmul.f32 %v8924_v3, %v601_v24  ;;  %v548_v22 = vmul.f32 %v8934_v7, %v481_v37 }
 0x142   : > { %v1625_v48 = vmul.f32 %v1593_v15, %v9411_v43  ;;  %v1655_v23 = vadd.f32 1.0, %v1623_v35  ;;  %v1815_v55 = vadd.f32 0.041666668, %v1783_v47  ;;  %v1817_v38 = vadd.f32 0.041666668, %v1785_v16 }
 0x143   : > { %13288 = vst [vmem:[#allocation39_spill] sm:$0xff] %v9477_v14  ;;  %v662_v18 = vmul.f32 %v8927_v4, %v601_v24  ;;  %v807_v26 = vmul.f32 %v8937_v8, %v747_v57  ;;  %v9485_v17 = vadd.f32 1.0, %v1636_v32  ;;  %v693_v15 = vadd.f32 %v661_v53, %v547_v25 }
 0x144   : > { %v1657_v36 = vadd.f32 1.0, %v1625_v48  ;;  %v1847_v59 = vmul.f32 %v1815_v55, %v9407_v28  ;;  %v1849_v49 = vmul.f32 %v1817_v38, %v9411_v43  ;;  %v9490_v35 = vsub.f32 %v9349_v46, %v1125_v12  ;;  %v751_v55 = vpop.permute.xlu1 %750 }
 0x145   : > { %v9494_v47 = vmul.f32 %v9468_v11, %v9468_v11  ;;  %v694_v16 = vadd.f32 %v662_v18, %v548_v22  ;;  %v808_v37 = vmul.f32 %v8940_v9, %v747_v57  ;;  %v9498_v24 = vmul.f32 %v1655_v23, %v9391_v62 }
 0x146   : > { %v1879_v32 = vadd.f32 -0.5, %v1847_v59  ;;  %v1881_v48 = vadd.f32 -0.5, %v1849_v49  ;;  %v839_v34 = vadd.f32 %v807_v26, %v693_v15  ;;  %v9501_v38 = vmul.f32 %v1657_v36, %v9394_v31  ;;  %v13293_v49 = vld [vmem:[#allocation12_spill] sm:$0xff] }
 0x147   : > { %13289 = vst [vmem:[#allocation40_spill] sm:$0xff] %v9498_v24  ;;  %vm13061_vm6 = vcmp.eq.f32.partialorder %v9474_v5, 0.0  ;;  %vm13062_vm7 = vcmp.eq.f32.partialorder %v9477_v14, 0.0  ;;  %vm13063_vm8 = vcmp.eq.f32.partialorder %v9474_v5, 1.0  ;;  %v840_v46 = vadd.f32 %v808_v37, %v694_v16 }
 0x148   : > { %13290 = vst [vmem:[#allocation41_spill] sm:$0xff] %v9501_v38  ;;  %v663_v12 = vmul.f32 %v8924_v3, %v605_v20  ;;  %v1911_v57 = vmul.f32 %v1879_v32, %v9407_v28  ;;  %v1913_v62 = vmul.f32 %v1881_v48, %v9411_v43  ;;  %v871_v25 = vmul.f32 0.15915494, %v839_v34 }
 0x149   : > { %v664_v23 = vmul.f32 %v8927_v4, %v605_v20  ;;  %vm13105_vm9 = vcmp.eq.f32.partialorder %v9474_v5, 2.0  ;;  %v872_v31 = vmul.f32 0.15915494, %v840_v46  ;;  %v809_v36 = vmul.f32 %v8937_v8, %v751_v55 }
 0x14a   : > { %v695_v53 = vadd.f32 %v663_v12, %v9127_v44  ;;  %v9513_v22 = vadd.f32 1.0, %v1911_v57  ;;  %v9515_v18 = vadd.f32 1.0, %v1913_v62  ;;  %v13043_v26 = vsub.f32 0.0, %v9498_v24 }
 0x14b   : > { %v903_v59 = vadd.f32 0.5, %v871_v25  ;;  %v904_v28 = vadd.f32 0.5, %v872_v31  ;;  %v696_v43 = vadd.f32 %v664_v23, %v13293_v49  ;;  %v810_v15 = vmul.f32 %v8940_v9, %v751_v55 }
 0x14c   : > { %13291 = vst [vmem:[#allocation42_spill] sm:$0xff] %v9513_v22  ;;  %13292 = vst [vmem:[#allocation43_spill] sm:$0xff] %v9515_v18  ;;  %v841_v20 = vadd.f32 %v809_v36, %v695_v53  ;;  %v13044_v16 = vsub.f32 0.0, %v9501_v38  ;;  %v13045_v37 = vsub.f32 0.0, %v9513_v22  ;;  %v13046_v44 = vsub.f32 0.0, %v9515_v18 }
 0x14d   : > { %v935_v32 = vfloor.f32 %v903_v59  ;;  %vm13207_vm10 = vcmp.eq.f32.partialorder %v9477_v14, 2.0  ;;  %v936_v48 = vfloor.f32 %v904_v28  ;;  %v842_v12 = vadd.f32 %v810_v15, %v696_v43 }
 0x14e   : > { %v873_v57 = vmul.f32 0.15915494, %v841_v20  ;;  %vm13064_vm11 = vcmp.eq.f32.partialorder %v9477_v14, 1.0  ;;  %v2135_v55 = vsel %vm13105_vm9, %v13043_v26, %v13045_v37  ;;  %v2137_v62 = vsel %vm13207_vm10, %v13044_v16, %v13046_v44  ;;  %v13294_v16 = vld [vmem:[#allocation16_spill] sm:$0xff]  ;;  %v13295_v44 = vld [vmem:[#allocation19_spill] sm:$0xff] }
 0x14f   : > { %v967_v25 = vmul.f32 6.2831855, %v935_v32  ;;  %v2167_v23 = vsel %vm13063_vm8, %v9513_v22, %v2135_v55  ;;  %v2169_v31 = vsel %vm13064_vm11, %v9515_v18, %v2137_v62  ;;  %v968_v53 = vmul.f32 6.2831855, %v936_v48 }
 0x150   : > { %v874_v36 = vmul.f32 0.15915494, %v842_v12  ;;  %v2199_v59 = vsel %vm13061_vm6, %v9498_v24, %v2167_v23  ;;  %v2201_v28 = vsel %vm13062_vm7, %v9501_v38, %v2169_v31  ;;  %v905_v43 = vadd.f32 0.5, %v873_v57 }
 0x151   : > { %v9549_v49 = vsub.f32 %v839_v34, %v967_v25  ;;  %v1189_v15 = vmul.f32 0.63661975, %v9490_v35  ;;  %v2368_v32 = vpack.c.bf16 %v2201_v28, %v2199_v59  ;;  %v1000_v55 = vsub.f32 %v840_v46, %v968_v53 }
 0x152   : > { %v906_v26 = vadd.f32 0.5, %v874_v36  ;;  %v937_v48 = vfloor.f32 %v905_v43  ;;  %v1500_v37 = vmul.f32 -0.0001984127, %v13294_v16  ;;  %v1502_v30 = vmul.f32 -0.0001984127, %v13295_v44 }
 0x153   : > { %v1031_v62 = vmul.f32 0.15915494, %v9549_v49  ;;  %v1510_v23 = vmul.f32 -0.0001984127, %v9494_v47  ;;  %2572 = vmatmul.mubr.bf16.gmra.mrb[4].mxu0 %v2368_v32  ;;  %v1032_v52 = vmul.f32 0.15915494, %v1000_v55  ;;  %v9559_v57 = vmul.f32 %v9460_v40, %v9460_v40 }
 0x154   : > { %v938_v31 = vfloor.f32 %v906_v26  ;;  %v1724_v34 = vmul.f32 2.4801588e-05, %v13294_v16  ;;  %v969_v25 = vmul.f32 6.2831855, %v937_v48  ;;  %v1532_v53 = vadd.f32 0.008333334, %v1500_v37 }
 0x155   : > { %v1063_v46 = vadd.f32 0.5, %v1031_v62  ;;  %v9563_v36 = vmul.f32 %v9485_v17, %v9296_v6  ;;  %v1064_v59 = vadd.f32 0.5, %v1032_v52  ;;  %v1534_v43 = vadd.f32 0.008333334, %v1502_v30  ;;  %v13297_v32 = vld [vmem:[#allocation8_spill] sm:$0xff] }
 0x156   : > { %v970_v28 = vmul.f32 6.2831855, %v938_v31  ;;  %v9565_v41 = vsub.f32 %v841_v20, %v969_v25  ;;  %v1340_v26 = vmul.f32 0.25, %v13297_v32  ;;  %v1564_v29 = vmul.f32 %v1532_v53, %v13294_v16 }
 0x157   : > { %13296 = vst [vmem:[#allocation12_spill] sm:$0xff] %v9563_v36  ;;  %v1726_v54 = vmul.f32 2.4801588e-05, %v13295_v44  ;;  %v1096_v5 = vfloor.f32 %v1064_v59  ;;  %v1566_v62 = vmul.f32 %v1534_v43, %v13295_v44  ;;  %v1756_v37 = vadd.f32 -0.0013888889, %v1724_v34 }
 0x158   : > { %v1002_v22 = vsub.f32 %v842_v12, %v970_v28  ;;  %v1221_v48 = vadd.f32 0.5, %v1189_v15  ;;  %v1095_v24 = vfloor.f32 %v1063_v46  ;;  %v1033_v6 = vmul.f32 0.15915494, %v9565_v41  ;;  %v13299_v15 = vld [vmem:[#allocation13_spill] sm:$0xff] }
 0x159   : > { %v1596_v52 = vadd.f32 -0.16666667, %v1564_v29  ;;  %v1128_v17 = vmul.f32 6.2831855, %v1096_v5  ;;  %v1598_v20 = vadd.f32 -0.16666667, %v1566_v62  ;;  %v1788_v31 = vmul.f32 %v1756_v37, %v13294_v16 }
 0x15a   : > { %v1034_v30 = vmul.f32 0.15915494, %v1002_v22  ;;  %v1542_v25 = vadd.f32 0.008333334, %v1510_v23  ;;  %v1065_v14 = vadd.f32 0.5, %v1033_v6  ;;  %v1372_v53 = vfloor.f32 %v1340_v26 }
 0x15b   : > { %v1758_v18 = vadd.f32 -0.0013888889, %v1726_v54  ;;  %v1160_v38 = vsub.f32 %v1000_v55, %v1128_v17  ;;  %v1628_v12 = vmul.f32 %v1596_v52, %v13294_v16  ;;  %v1820_v28 = vadd.f32 0.041666668, %v1788_v31 }
 0x15c   : > { %v1066_v59 = vadd.f32 0.5, %v1034_v30  ;;  %v9574_v34 = vfloor.f32 %v1221_v48  ;;  %v13300_v46 = vfloor.f32 %v13299_v15  ;;  %v1630_v29 = vmul.f32 %v1598_v20, %v13295_v44  ;;  %v13301_v20 = vld [vmem:[#allocation9_spill] sm:$0xff] }
 0x15d   : > { %v1790_v5 = vmul.f32 %v1758_v18, %v13295_v44  ;;  %v1127_v62 = vmul.f32 6.2831855, %v1095_v24  ;;  %v1192_v37 = vmul.f32 0.63661975, %v1160_v38  ;;  %v1852_v26 = vmul.f32 %v1820_v28, %v13294_v16 }
 0x15e   : > { %13298 = vst [vmem:[#allocation16_spill] sm:$0xff] %v9574_v34  ;;  %v1406_v43 = vmul.f32 4.0, %v13300_v46  ;;  %v1098_v23 = vfloor.f32 %v1066_v59  ;;  %v1574_v54 = vmul.f32 %v1542_v25, %v9494_v47  ;;  %v1097_v55 = vfloor.f32 %v1065_v14 }
 0x15f   : > { %v1404_v6 = vmul.f32 4.0, %v1372_v53  ;;  %v1822_v52 = vadd.f32 0.041666668, %v1790_v5  ;;  %v1224_v17 = vadd.f32 0.5, %v1192_v37  ;;  %v1660_v30 = vadd.f32 1.0, %v1628_v12 }
 0x160   : > { %v1130_v48 = vmul.f32 6.2831855, %v1098_v23  ;;  %v1884_v31 = vadd.f32 -0.5, %v1852_v26  ;;  %v9583_v15 = vmul.f32 0.25, %v9421_v63  ;;  %v9586_v46 = vsub.f32 %v13301_v20, %v1406_v43 }
 0x161   : > { %v1662_v24 = vadd.f32 1.0, %v1630_v29  ;;  %v1854_v18 = vmul.f32 %v1822_v52, %v13295_v44  ;;  %v9590_v59 = vsub.f32 %v9549_v49, %v1127_v62  ;;  %v9592_v25 = vfloor.f32 %v1224_v17  ;;  %v13305_v29 = vld [vmem:[#allocation11_spill] sm:$0xff]  ;;  %v13308_v62 = vld [vmem:[#allocation17_spill] sm:$0xff] }
 0x162   : > { %13302 = vst [vmem:[#allocation19_spill] sm:$0xff] %v9586_v46  ;;  %v1162_v14 = vsub.f32 %v1002_v22, %v1130_v48  ;;  %v1916_v53 = vmul.f32 %v1884_v31, %v13294_v16  ;;  %v1606_v28 = vadd.f32 -0.16666667, %v1574_v54  ;;  %v1129_v12 = vmul.f32 6.2831855, %v1097_v55 }
 0x163   : > { %13303 = vst [vmem:[#allocation8_spill] sm:$0xff] %v9592_v25  ;;  %v9596_v5 = vsub.f32 %v13297_v32, %v1404_v6  ;;  %v1886_v37 = vadd.f32 -0.5, %v1854_v18  ;;  %v1288_v43 = vmul.f32 1.5707964, %v9592_v25  ;;  %v9600_v26 = vmul.f32 %v1660_v30, %v13305_v29 }
 0x164   : > { %v1194_v23 = vmul.f32 0.63661975, %v1162_v14  ;;  %v9602_v52 = vadd.f32 1.0, %v1916_v53  ;;  %v1285_v49 = vmul.f32 1.5707964, %v9574_v34  ;;  %v1382_v22 = vfloor.f32 %v9583_v15  ;;  %v13311_v53 = vld [vmem:[#allocation14_spill] sm:$0xff] }
 0x165   : > { %13304 = vst [vmem:[#allocation13_spill] sm:$0xff] %v9596_v5  ;;  %13306 = vst [vmem:[#allocation9_spill] sm:$0xff] %v9600_v26  ;;  %v9607_v16 = vmul.f32 %v1662_v24, %v13308_v62  ;;  %v1918_v54 = vmul.f32 %v1886_v37, %v13295_v44  ;;  %v1191_v32 = vmul.f32 0.63661975, %v9590_v59  ;;  %v9611_v55 = vsub.f32 %v1160_v38, %v1288_v43  ;;  %v8117_v44 = vld [vmem:[%s12999_s4] ss:$8 sps:$4 sm:$0xff]  }
 0x166   : > { %13307 = vst [vmem:[#allocation11_spill] sm:$0xff] %v9602_v52  ;;  %v1226_v6 = vadd.f32 0.5, %v1194_v23  ;;  %vm13101_vm12 = vcmp.eq.f32.partialorder %v9586_v46, 0.0  ;;  %v1638_v17 = vmul.f32 %v1606_v28, %v9494_v47  ;;  %v9616_v48 = vsub.f32 %v9565_v41, %v1129_v12  ;;  %v8119_v38 = vld [vmem:[%s12999_s4 + $0x4] ss:$8 sps:$4 sm:$0xff]  }
 0x167   : > { %13309 = vst [vmem:[#allocation17_spill] sm:$0xff] %v9607_v16  ;;  %v9618_v30 = vadd.f32 1.0, %v1918_v54  ;;  %vm13102_vm13 = vcmp.eq.f32.partialorder %v9596_v5, 1.0  ;;  %v9629_v31 = vmul.f32 %v9611_v55, %v9611_v55  ;;  %v13065_v41 = vsub.f32 0.0, %v9600_v26  ;;  %2727 = vmatprep.subr.bf16.mxu0 %v8119_v38  ;;  %v13312_v62 = vld [vmem:[#allocation15_spill] sm:$0xff] }
 0x168   : > { %v9631_v15 = vfloor.f32 %v1226_v6  ;;  %v13066_v20 = vsub.f32 0.0, %v9602_v52  ;;  %vm13104_vm6 = vcmp.eq.f32.partialorder %v9596_v5, 2.0  ;;  %v13067_v24 = vsub.f32 0.0, %v9607_v16  ;;  %2728 = vmatpush1.bf16.msra.mxu0 %v8117_v44 }
 0x169   : > { %13310 = vst [vmem:[#allocation44_spill] sm:$0xff] %v9618_v30  ;;  %v13068_v18 = vsub.f32 0.0, %v9618_v30  ;;  %v1275_v28 = vmul.f32 1.5707964, %v13311_v53  ;;  %v1512_v12 = vmul.f32 -0.0001984127, %v9629_v31 }
 0x16a   : > { %v1290_v37 = vmul.f32 1.5707964, %v9631_v15  ;;  %vm13185_vm7 = vcmp.eq.f32.partialorder %v9586_v46, 2.0  ;;  %v2140_v43 = vsel %vm13104_vm6, %v13065_v41, %v13066_v20  ;;  %vm13103_vm8 = vcmp.eq.f32.partialorder %v9586_v46, 1.0  ;;  %v491_v41 = vpop.permute.xlu1 %490 }
 0x16b   : > { %v2142_v23 = vsel %vm13185_vm7, %v13067_v24, %v13068_v18  ;;  %v2172_v29 = vsel %vm13102_vm13, %v9602_v52, %v2140_v43  ;;  %v1277_v54 = vmul.f32 1.5707964, %v13312_v62  ;;  %v1223_v6 = vadd.f32 0.5, %v1191_v32  ;;  %v13313_v18 = vld [vmem:[#allocation6_spill] sm:$0xff] }
 0x16c   : > { %vm13100_vm11 = vcmp.eq.f32.partialorder %v9596_v5, 0.0  ;;  %v2174_v44 = vsel %vm13103_vm8, %v9618_v30, %v2142_v23  ;;  %v1339_v38 = vmul.f32 0.25, %v13311_v53  ;;  %v1544_v20 = vadd.f32 0.008333334, %v1512_v12 }
 0x16d   : > { %v2204_v24 = vsel %vm13100_vm11, %v9600_v26, %v2172_v29  ;;  %v2206_v43 = vsel %vm13101_vm12, %v9607_v16, %v2174_v44  ;;  %v9671_v32 = vsub.f32 %v13313_v18, %v1275_v28  ;;  %v9674_v52 = vsub.f32 %v9490_v35, %v1285_v49 }
 0x16e   : > { %v1670_v33 = vadd.f32 1.0, %v1638_v17  ;;  %v9676_v23 = vsub.f32 %v1162_v14, %v1290_v37  ;;  %v2371_v30 = vpack.c.bf16 %v2206_v43, %v2204_v24  ;;  %v1193_v12 = vmul.f32 0.63661975, %v9616_v48 }
 0x16f   : > { %13314 = vst [vmem:[#allocation14_spill] sm:$0xff] %v9674_v52  ;;  %v9680_v56 = vsub.f32 %v13315_v42, %v1277_v54  ;;  %v1341_v29 = vmul.f32 0.25, %v13312_v62  ;;  %v9685_v44 = vmul.f32 %v9671_v32, %v9671_v32  ;;  %v13316_v18 = vfloor.f32 %v9371_v51 }
 0x170   : > { %v9692_v14 = vmul.f32 4.0, %v1382_v22  ;;  %7355 = vmatprep.mubr.msk.bf16.mxu0 %vm13242_vm1, %v2371_v30  ;;  %v1371_v49 = vfloor.f32 %v1339_v38  ;;  %v9695_v17 = vfloor.f32 %v1223_v6  ;;  %v1576_v42 = vmul.f32 %v1544_v20, %v9629_v31  ;;  %v609_v6 = vpop.permute.xlu1 %608 }
 0x171   : > { %v9689_v28 = vmul.f32 4.0, %v13316_v18  ;;  %v9700_v24 = vmul.f32 %v9680_v56, %v9680_v56  ;;  %v1499_v37 = vmul.f32 -0.0001984127, %v9685_v44  ;;  %v9705_v51 = vmul.f32 %v9674_v52, %v9674_v52 }
 0x172   : > { %13317 = vst [vmem:[#allocation15_spill] sm:$0xff] %v9695_v17  ;;  %v9709_v22 = vmul.f32 %v9676_v23, %v9676_v23  ;;  %v1373_v30 = vfloor.f32 %v1341_v29  ;;  %v1723_v54 = vmul.f32 2.4801588e-05, %v9685_v44  ;;  %v9713_v20 = vmul.f32 %v1670_v33, %v9468_v11 }
 0x173   : > { %v1225_v38 = vadd.f32 0.5, %v1193_v12  ;;  %v1501_v43 = vmul.f32 -0.0001984127, %v9700_v24  ;;  %v1531_v18 = vadd.f32 0.008333334, %v1499_v37  ;;  %v1403_v35 = vmul.f32 4.0, %v1371_v49  ;;  %v755_v37 = vpop.permute.xlu0 %754 }
 0x174   : > { %13318 = vst [vmem:[#allocation6_spill] sm:$0xff] %v9713_v20  ;;  %v1725_v5 = vmul.f32 2.4801588e-05, %v9700_v24  ;;  %v1755_v26 = vadd.f32 -0.0013888889, %v1723_v54  ;;  %v551_v46 = vmul.f32 %v8931_v1, %v491_v41  ;;  %v1405_v11 = vmul.f32 4.0, %v1373_v30 }
 0x175   : > { %v9719_v16 = vmul.f32 1.5707964, %v9695_v17  ;;  %v1608_v29 = vadd.f32 -0.16666667, %v1576_v42  ;;  %v1533_v58 = vadd.f32 0.008333334, %v1501_v43  ;;  %v1563_v61 = vmul.f32 %v1531_v18, %v9685_v44 }
 0x176   : > { %v1514_v33 = vmul.f32 -0.0001984127, %v9709_v22  ;;  %v1757_v12 = vadd.f32 -0.0013888889, %v1725_v5  ;;  %v1787_v2 = vmul.f32 %v1755_v26, %v9685_v44  ;;  %v9725_v49 = vmul.f32 0.25, %v9592_v25  ;;  %v613_v5 = vpop.permute.xlu1 %612 }
 0x177   : > { %v9727_v54 = vfloor.f32 %v1225_v38  ;;  %v1565_v52 = vmul.f32 %v1533_v58, %v9700_v24  ;;  %v1595_v17 = vadd.f32 -0.16666667, %v1563_v61  ;;  %v9731_v42 = vsub.f32 %v13311_v53, %v1403_v35 }
 0x178   : > { %v1789_v43 = vmul.f32 %v1757_v12, %v9700_v24  ;;  %v1819_v18 = vadd.f32 0.041666668, %v1787_v2  ;;  %v552_v30 = vmul.f32 %v8934_v7, %v491_v41  ;;  %v9736_v26 = vmul.f32 %v1608_v29, %v9629_v31 }
 0x179   : > { %13319 = vst [vmem:[#allocation7_spill] sm:$0xff] %v9731_v42  ;;  %v1597_v40 = vadd.f32 -0.16666667, %v1565_v52  ;;  %v1627_v25 = vmul.f32 %v1595_v17, %v9685_v44  ;;  %v811_v38 = vmul.f32 %v8937_v8, %v755_v37  ;;  %v9740_v34 = vadd.f32 0.008333334, %v1514_v33  ;;  %v496_v52 = vpop.permute.xlu0 %495 }
 0x17a   : > { %v9743_v58 = vsub.f32 %v13312_v62, %v1405_v11  ;;  %v1821_v61 = vadd.f32 0.041666668, %v1789_v43  ;;  %v1851_v53 = vmul.f32 %v1819_v18, %v9685_v44  ;;  %v665_v35 = vmul.f32 %v8924_v3, %v609_v6 }
 0x17b   : > { %v1629_v2 = vmul.f32 %v1597_v40, %v9700_v24  ;;  %v1659_v41 = vadd.f32 1.0, %v1627_v25  ;;  %v666_v29 = vmul.f32 %v8927_v4, %v609_v6  ;;  %vm13116_vm11 = vcmp.eq.f32.partialorder %v9731_v42, 1.0 }
 0x17c   : > { %13320 = vst [vmem:[#allocation45_spill] sm:$0xff] %v9743_v58  ;;  %v1853_v17 = vmul.f32 %v1821_v61, %v9700_v24  ;;  %v1883_v12 = vadd.f32 -0.5, %v1851_v53  ;;  %v812_v33 = vmul.f32 %v8940_v9, %v755_v37  ;;  %vm13114_vm12 = vcmp.eq.f32.partialorder %v9731_v42, 0.0  ;;  %v759_v61 = vpop.permute.xlu1 %758  ;;  %v8120_v37 = vld [vmem:[%s12999_s4 + $0x10] ss:$8 sps:$4 sm:$0xff]  }
 0x17d   : > { %v1661_v62 = vadd.f32 1.0, %v1629_v2  ;;  %vm13118_vm13 = vcmp.eq.f32.partialorder %v9731_v42, 2.0  ;;  %v697_v11 = vadd.f32 %v665_v35, %v551_v46  ;;  %v698_v40 = vadd.f32 %v666_v29, %v552_v30  ;;  %v8122_v46 = vld [vmem:[%s12999_s4 + $0x14] ss:$8 sps:$4 sm:$0xff]  }
 0x17e   : > { %v9755_v25 = vmul.f32 %v1659_v41, %v9671_v32  ;;  %v1885_v43 = vadd.f32 -0.5, %v1853_v17  ;;  %v1915_v6 = vmul.f32 %v1883_v12, %v9685_v44  ;;  %vm13117_vm8 = vcmp.eq.f32.partialorder %v9743_v58, 1.0  ;;  %2729 = vmatprep.subr.bf16.mxu0 %v8122_v46 }
 0x17f   : > { %v553_v18 = vmul.f32 %v8931_v1, %v496_v52  ;;  %v9767_v30 = vmul.f32 %v1661_v62, %v9680_v56  ;;  %vm13115_vm6 = vcmp.eq.f32.partialorder %v9743_v58, 0.0  ;;  %v843_v32 = vadd.f32 %v811_v38, %v697_v11  ;;  %2730 = vmatpush1.bf16.msra.mxu0 %v8120_v37 }
 0x180   : > { %13321 = vst [vmem:[#allocation46_spill] sm:$0xff] %v9755_v25  ;;  %v844_v44 = vadd.f32 %v812_v33, %v698_v40  ;;  %v554_v53 = vmul.f32 %v8934_v7, %v496_v52  ;;  %v1917_v2 = vmul.f32 %v1885_v43, %v9700_v24  ;;  %v9772_v41 = vadd.f32 1.0, %v1915_v6 }
 0x181   : > { %13322 = vst [vmem:[#allocation47_spill] sm:$0xff] %v9767_v30  ;;  %v667_v35 = vmul.f32 %v8924_v3, %v613_v5  ;;  %v668_v29 = vmul.f32 %v8927_v4, %v613_v5  ;;  %vm13119_vm9 = vcmp.eq.f32.partialorder %v9743_v58, 2.0  ;;  %v875_v17 = vmul.f32 0.15915494, %v843_v32 }
 0x182   : > { %13323 = vst [vmem:[#allocation48_spill] sm:$0xff] %v9772_v41  ;;  %v876_v56 = vmul.f32 0.15915494, %v844_v44  ;;  %v813_v12 = vmul.f32 %v8937_v8, %v759_v61  ;;  %v9778_v38 = vadd.f32 1.0, %v1917_v2  ;;  %v13106_v52 = vsub.f32 0.0, %v9755_v25 }
 0x183   : > { %v13108_v24 = vsub.f32 0.0, %v9772_v41  ;;  %v699_v33 = vadd.f32 %v667_v35, %v553_v18  ;;  %v907_v62 = vadd.f32 0.5, %v875_v17  ;;  %v700_v40 = vadd.f32 %v668_v29, %v554_v53 }
 0x184   : > { %13324 = vst [vmem:[#allocation49_spill] sm:$0xff] %v9778_v38  ;;  %v908_v11 = vadd.f32 0.5, %v876_v56  ;;  %v814_v5 = vmul.f32 %v8940_v9, %v759_v61  ;;  %v13107_v43 = vsub.f32 0.0, %v9767_v30  ;;  %v13109_v6 = vsub.f32 0.0, %v9778_v38 }
 0x185   : > { %v2139_v37 = vsel %vm13118_vm13, %v13106_v52, %v13108_v24  ;;  %v845_v46 = vadd.f32 %v813_v12, %v699_v33  ;;  %v939_v2 = vfloor.f32 %v907_v62  ;;  %v1728_v56 = vmul.f32 2.4801588e-05, %v9171_v27 }
 0x186   : > { %v2171_v18 = vsel %vm13116_vm11, %v9772_v41, %v2139_v37  ;;  %v940_v53 = vfloor.f32 %v908_v11  ;;  %v846_v35 = vadd.f32 %v814_v5, %v700_v40  ;;  %v2141_v61 = vsel %vm13119_vm9, %v13107_v43, %v13109_v6 }
 0x187   : > { %v2203_v29 = vsel %vm13114_vm12, %v9755_v25, %v2171_v18  ;;  %v877_v17 = vmul.f32 0.15915494, %v845_v46  ;;  %v2173_v12 = vsel %vm13117_vm8, %v9778_v38, %v2141_v61  ;;  %v971_v33 = vmul.f32 6.2831855, %v939_v2 }
 0x188   : > { %v972_v62 = vmul.f32 6.2831855, %v940_v53  ;;  %v878_v11 = vmul.f32 0.15915494, %v846_v35  ;;  %v2205_v40 = vsel %vm13115_vm6, %v9767_v30, %v2173_v12  ;;  %v1730_v37 = vmul.f32 2.4801588e-05, %v9219_v60 }
 0x189   : > { %v909_v5 = vadd.f32 0.5, %v877_v17  ;;  %v1760_v52 = vadd.f32 -0.0013888889, %v1728_v56  ;;  %v2370_v43 = vpack.c.bf16 %v2205_v40, %v2203_v29  ;;  %v9811_v18 = vsub.f32 %v843_v32, %v971_v33 }
 0x18a   : > { %v9813_v24 = vsub.f32 %v844_v44, %v972_v62  ;;  %v910_v6 = vadd.f32 0.5, %v878_v11  ;;  %v9817_v61 = vsub.f32 %v9590_v59, %v9719_v16  ;;  %v1762_v53 = vadd.f32 -0.0013888889, %v1730_v37 }
 0x18b   : > { %v941_v2 = vfloor.f32 %v909_v5  ;;  %v1792_v42 = vmul.f32 %v1760_v52, %v9171_v27  ;;  %v1289_v12 = vmul.f32 1.5707964, %v9727_v54  ;;  %v1354_v17 = vmul.f32 0.25, %v9631_v15  ;;  %2582 = vmatmul.mubr.bf16.gmra.mrb[8].mxu0 %v2370_v43 }
 0x18c   : > { %v1036_v29 = vmul.f32 0.15915494, %v9813_v24  ;;  %v942_v32 = vfloor.f32 %v910_v6  ;;  %v1672_v44 = vadd.f32 1.0, %v9736_v26  ;;  %v1578_v56 = vmul.f32 %v9740_v34, %v9709_v22 }
 0x18d   : > { %v1794_v59 = vmul.f32 %v1762_v53, %v9219_v60  ;;  %v1824_v16 = vadd.f32 0.041666668, %v1792_v42  ;;  %v1384_v52 = vfloor.f32 %v9725_v49  ;;  %v1035_v62 = vmul.f32 0.15915494, %v9811_v18 }
 0x18e   : > { %v974_v11 = vmul.f32 6.2831855, %v942_v32  ;;  %v1068_v40 = vadd.f32 0.5, %v1036_v29  ;;  %v973_v43 = vmul.f32 6.2831855, %v941_v2  ;;  %v9833_v26 = vmul.f32 %v9817_v61, %v9817_v61 }
 0x18f   : > { %v1826_v5 = vadd.f32 0.041666668, %v1794_v59  ;;  %v1856_v6 = vmul.f32 %v1824_v16, %v9171_v27  ;;  %v9836_v34 = vsub.f32 %v9616_v48, %v1289_v12  ;;  %v1386_v42 = vfloor.f32 %v1354_v17  ;;  %v13326_v16 = vld [vmem:[#allocation10_spill] sm:$0xff] }
 0x190   : > { %v1006_v37 = vsub.f32 %v846_v35, %v974_v11  ;;  %v9839_v53 = vmul.f32 %v1672_v44, %v9611_v55  ;;  %v1610_v49 = vadd.f32 -0.16666667, %v1578_v56  ;;  %v1067_v2 = vadd.f32 0.5, %v1035_v62 }
 0x191   : > { %v1858_v32 = vmul.f32 %v1826_v5, %v9219_v60  ;;  %v1888_v29 = vadd.f32 -0.5, %v1856_v6  ;;  %v9844_v33 = vsub.f32 %v13326_v16, %v9237_v45  ;;  %v9848_v41 = vsub.f32 %v9161_v0, %v9358_v13  ;;  %v9884_v16 = vpop.permute.xlu1 %500 }
 0x192   : > { %13325 = vst [vmem:[#allocation50_spill] sm:$0xff] %v9839_v53  ;;  %v1038_v59 = vmul.f32 0.15915494, %v1006_v37  ;;  %v1100_v48 = vfloor.f32 %v1068_v40  ;;  %v9850_v12 = vsub.f32 %v845_v46, %v973_v43  ;;  %v9853_v17 = vmul.f32 4.0, %v1384_v52 }
 0x193   : > { %13327 = vst [vmem:[#allocation10_spill] sm:$0xff] %v9844_v33  ;;  %13328 = vst [vmem:[#allocation51_spill] sm:$0xff] %v9848_v41  ;;  %v1890_v35 = vadd.f32 -0.5, %v1858_v32  ;;  %v1920_v55 = vmul.f32 %v1888_v29, %v9171_v27  ;;  %v9855_v44 = vmul.f32 4.0, %v1386_v42  ;;  %v9859_v56 = vmul.f32 %v9836_v34, %v9836_v34  ;;  %v13331_v42 = vld [vmem:[#allocation18_spill] sm:$0xff] }
 0x194   : > { %v1070_v45 = vadd.f32 0.5, %v1038_v59  ;;  %v1642_v0 = vmul.f32 %v1610_v49, %v9709_v22  ;;  %v1099_v11 = vfloor.f32 %v1067_v2  ;;  %vm13142_vm12 = vcmp.eq.f32.partialorder %v9844_v33, 0.0  ;;  %v13332_v49 = vld [vmem:[#allocation20_spill] sm:$0xff] }
 0x195   : > { %v1922_v13 = vmul.f32 %v1890_v35, %v9219_v60  ;;  %v9864_v46 = vadd.f32 1.0, %v1920_v55  ;;  %vm13143_vm6 = vcmp.eq.f32.partialorder %v9848_v41, 0.0  ;;  %v1132_v27 = vmul.f32 6.2831855, %v1100_v48 }
 0x196   : > { %v1102_v40 = vfloor.f32 %v1070_v45  ;;  %v1037_v52 = vmul.f32 0.15915494, %v9850_v12  ;;  %vm13146_vm11 = vcmp.eq.f32.partialorder %v9844_v33, 2.0  ;;  %v1343_v60 = vmul.f32 0.25, %v13331_v42 }
 0x197   : > { %13329 = vst [vmem:[#allocation52_spill] sm:$0xff] %v9864_v46  ;;  %v9869_v43 = vadd.f32 1.0, %v1922_v13  ;;  %v13120_v5 = vsub.f32 0.0, %v9864_v46  ;;  %v1345_v32 = vmul.f32 0.25, %v13332_v49  ;;  %vm13144_vm8 = vcmp.eq.f32.partialorder %v9844_v33, 1.0  ;;  %v617_v33 = vpop.permute.xlu1 %616 }
 0x198   : > { %v1134_v6 = vmul.f32 6.2831855, %v1102_v40  ;;  %vm13145_vm13 = vcmp.eq.f32.partialorder %v9848_v41, 1.0  ;;  %v13333_v2 = vsub.f32 0.0, %v9304_v21  ;;  %v1131_v48 = vmul.f32 6.2831855, %v1099_v11 }
 0x199   : > { %13330 = vst [vmem:[#allocation53_spill] sm:$0xff] %v9869_v43  ;;  %v13123_v29 = vsub.f32 0.0, %v9869_v43  ;;  %vm13147_vm9 = vcmp.eq.f32.partialorder %v9848_v41, 2.0  ;;  %v9891_v45 = vsub.f32 %v9813_v24, %v1132_v27  ;;  %v1069_v13 = vadd.f32 0.5, %v1037_v52  ;;  %v13336_v52 = vld [vmem:[#allocation26_spill] sm:$0xff] }
 0x19a   : > { %v2144_v59 = vsel %vm13146_vm11, %v13333_v2, %v13120_v5  ;;  %v1166_v35 = vsub.f32 %v1006_v37, %v1134_v6  ;;  %v13334_v40 = vsub.f32 0.0, %v9381_v50  ;;  %v13335_v5 = vld [vmem:[#allocation22_spill] sm:$0xff]  ;;  %v1375_v62 = vfloor.f32 %v1343_v60 }
 0x19b   : > { %v2176_v55 = vsel %vm13144_vm8, %v9864_v46, %v2144_v59  ;;  %v1503_v11 = vmul.f32 -0.0001984127, %v13335_v5  ;;  %v1377_v59 = vfloor.f32 %v1345_v32  ;;  %v1505_v46 = vmul.f32 -0.0001984127, %v13336_v52 }
 0x19c   : > { %v2146_v2 = vsel %vm13147_vm9, %v13334_v40, %v13123_v29  ;;  %v1198_v37 = vmul.f32 0.63661975, %v1166_v35  ;;  %v2208_v24 = vsel %vm13142_vm12, %v9304_v21, %v2176_v55  ;;  %v9911_v29 = vsub.f32 %v9811_v18, %v1131_v48 }
 0x19d   : > { %v2178_v6 = vsel %vm13145_vm13, %v9869_v43, %v2146_v2  ;;  %v1535_v40 = vadd.f32 0.008333334, %v1503_v11  ;;  %v1727_v2 = vmul.f32 2.4801588e-05, %v13335_v5  ;;  %v1101_v60 = vfloor.f32 %v1069_v13 }
 0x19e   : > { %v2210_v27 = vsel %vm13143_vm6, %v9381_v50, %v2178_v6  ;;  %v1230_v25 = vadd.f32 0.5, %v1198_v37  ;;  %v1537_v32 = vadd.f32 0.008333334, %v1505_v46  ;;  %v1729_v55 = vmul.f32 2.4801588e-05, %v13336_v52  ;;  %v506_v50 = vpop.permute.xlu0 %505 }
 0x19f   : > { %v2373_v58 = vpack.c.bf16 %v2210_v27, %v2208_v24  ;;  %v1567_v43 = vmul.f32 %v1535_v40, %v13335_v5  ;;  %v1196_v21 = vmul.f32 0.63661975, %v9891_v45  ;;  %v1407_v11 = vmul.f32 4.0, %v1375_v62 }
 0x1a0   : > { %v9917_v6 = vfloor.f32 %v1230_v25  ;;  %v1759_v18 = vadd.f32 -0.0013888889, %v1727_v2  ;;  %v1409_v48 = vmul.f32 4.0, %v1377_v59  ;;  %v1569_v37 = vmul.f32 %v1537_v32, %v13336_v52 }
 0x1a1   : > { %7356 = vmatprep.mubr.msk.bf16.mxu0 %vm13242_vm1, %v2373_v58  ;;  %v1599_v24 = vadd.f32 -0.16666667, %v1567_v43  ;;  %v1761_v27 = vadd.f32 -0.0013888889, %v1729_v55  ;;  %v1674_v13 = vadd.f32 1.0, %v1642_v0  ;;  %v1228_v62 = vadd.f32 0.5, %v1196_v21 }
 0x1a2   : > { %v1195_v46 = vmul.f32 0.63661975, %v9911_v29  ;;  %v1294_v40 = vmul.f32 1.5707964, %v9917_v6  ;;  %v1791_v41 = vmul.f32 %v1759_v18, %v13335_v5  ;;  %v1133_v38 = vmul.f32 6.2831855, %v1101_v60  ;;  %v621_v60 = vpop.permute.xlu1 %620 }
 0x1a3   : > { %v1601_v25 = vadd.f32 -0.16666667, %v1569_v37  ;;  %v1631_v30 = vmul.f32 %v1599_v24, %v13335_v5  ;;  %v1793_v58 = vmul.f32 %v1761_v27, %v13336_v52  ;;  %v9929_v43 = vsub.f32 %v13331_v42, %v1407_v11 }
 0x1a4   : > { %v9926_v59 = vsub.f32 %v1166_v35, %v1294_v40  ;;  %v1823_v0 = vadd.f32 0.041666668, %v1791_v41  ;;  %v9932_v2 = vsub.f32 %v13332_v49, %v1409_v48  ;;  %v9936_v37 = vmul.f32 %v1674_v13, %v9676_v23  ;;  %v13338_v35 = vld [vmem:[#allocation21_spill] sm:$0xff]  ;;  %v763_v13 = vpop.permute.xlu0 %762 }
 0x1a5   : > { %13337 = vst [vmem:[#allocation18_spill] sm:$0xff] %v9929_v43  ;;  %v1633_v32 = vmul.f32 %v1601_v25, %v13336_v52  ;;  %v1663_v55 = vadd.f32 1.0, %v1631_v30  ;;  %v1825_v18 = vadd.f32 0.041666668, %v1793_v58  ;;  %v9938_v24 = vadd.f32 0.5, %v1195_v46 }
 0x1a6   : > { %v1855_v21 = vmul.f32 %v1823_v0, %v13335_v5  ;;  %v555_v42 = vmul.f32 %v8931_v1, %v9884_v16  ;;  %v9944_v41 = vsub.f32 %v9850_v12, %v1133_v38  ;;  %v9950_v48 = vfloor.f32 %v1228_v62  ;;  %v13340_v38 = vld [vmem:[#allocation23_spill] sm:$0xff] }
 0x1a7   : > { %v1665_v49 = vadd.f32 1.0, %v1633_v32  ;;  %v9947_v11 = vmul.f32 %v1663_v55, %v13338_v35  ;;  %v1857_v30 = vmul.f32 %v1825_v18, %v13336_v52  ;;  %v9954_v23 = vmul.f32 %v9926_v59, %v9926_v59  ;;  %v767_v18 = vpop.permute.xlu1 %766 }
 0x1a8   : > { %v1887_v27 = vadd.f32 -0.5, %v1855_v21  ;;  %vm13155_vm12 = vcmp.eq.f32.partialorder %v9929_v43, 1.0  ;;  %vm13153_vm6 = vcmp.eq.f32.partialorder %v9929_v43, 0.0  ;;  %vm13156_vm8 = vcmp.eq.f32.partialorder %v9932_v2, 1.0 }
 0x1a9   : > { %13339 = vst [vmem:[#allocation20_spill] sm:$0xff] %v9947_v11  ;;  %v1889_v46 = vadd.f32 -0.5, %v1857_v30  ;;  %vm13159_vm13 = vcmp.eq.f32.partialorder %v9929_v43, 2.0  ;;  %vm13182_vm11 = vcmp.eq.f32.partialorder %v9932_v2, 2.0  ;;  %v9962_v12 = vmul.f32 %v1665_v49, %v13340_v38 }
 0x1aa   : > { %v1919_v40 = vmul.f32 %v1887_v27, %v13335_v5  ;;  %vm13154_vm9 = vcmp.eq.f32.partialorder %v9932_v2, 0.0  ;;  %v556_v25 = vmul.f32 %v8934_v7, %v9884_v16  ;;  %v669_v58 = vmul.f32 %v8924_v3, %v617_v33 }
 0x1ab   : > { %v1921_v62 = vmul.f32 %v1889_v46, %v13336_v52  ;;  %v670_v32 = vmul.f32 %v8927_v4, %v617_v33  ;;  %v815_v55 = vmul.f32 %v8937_v8, %v763_v13  ;;  %v557_v5 = vmul.f32 %v8931_v1, %v506_v50 }
 0x1ac   : > { %v9973_v21 = vadd.f32 1.0, %v1919_v40  ;;  %v701_v49 = vadd.f32 %v669_v58, %v555_v42  ;;  %v816_v35 = vmul.f32 %v8940_v9, %v763_v13  ;;  %v671_v27 = vmul.f32 %v8924_v3, %v621_v60 }
 0x1ad   : > { %v9977_v30 = vadd.f32 1.0, %v1921_v62  ;;  %v702_v16 = vadd.f32 %v670_v32, %v556_v25  ;;  %v672_v52 = vmul.f32 %v8927_v4, %v621_v60  ;;  %v558_v33 = vmul.f32 %v8934_v7, %v506_v50 }
 0x1ae   : > { %13341 = vst [vmem:[#allocation22_spill] sm:$0xff] %v9973_v21  ;;  %v13149_v46 = vsub.f32 0.0, %v9973_v21  ;;  %v847_v38 = vadd.f32 %v815_v55, %v701_v49  ;;  %v817_v40 = vmul.f32 %v8937_v8, %v767_v18  ;;  %v13148_v0 = vsub.f32 0.0, %v9962_v12  ;;  %v8125_v8 = vld [vmem:[%s13000_s5 + $0xbc] ss:$8 sps:$4 sm:$0xff]  }
 0x1af   : > { %v13150_v1 = vsub.f32 0.0, %v9977_v30  ;;  %v848_v42 = vadd.f32 %v816_v35, %v702_v16  ;;  %v703_v13 = vadd.f32 %v671_v27, %v557_v5  ;;  %v13342_v25 = vsub.f32 0.0, %v9947_v11  ;;  %3025 = vmatprep.subr.bf16.mxu0 %v8125_v8 }
 0x1b0   : > { %v879_v4 = vmul.f32 0.15915494, %v847_v38  ;;  %v704_v60 = vadd.f32 %v672_v52, %v558_v33  ;;  %v818_v7 = vmul.f32 %v8940_v9, %v767_v18  ;;  %v1518_v55 = vmul.f32 -0.0001984127, %v9954_v23 }
 0x1b1   : > { %v2143_v3 = vsel %vm13159_vm13, %v13342_v25, %v13149_v46  ;;  %v2145_v50 = vsel %vm13182_vm11, %v13148_v0, %v13150_v1  ;;  %v880_v62 = vmul.f32 0.15915494, %v848_v42  ;;  %v849_v32 = vadd.f32 %v817_v40, %v703_v13 }
 0x1b2   : > { %v2175_v58 = vsel %vm13155_vm12, %v9973_v21, %v2143_v3  ;;  %v2177_v9 = vsel %vm13156_vm8, %v9977_v30, %v2145_v50  ;;  %v911_v5 = vadd.f32 0.5, %v879_v4  ;;  %v850_v16 = vadd.f32 %v818_v7, %v704_v60 }
 0x1b3   : > { %v2207_v18 = vsel %vm13153_vm6, %v9947_v11, %v2175_v58  ;;  %v2209_v49 = vsel %vm13154_vm9, %v9962_v12, %v2177_v9  ;;  %v912_v35 = vadd.f32 0.5, %v880_v62  ;;  %v881_v27 = vmul.f32 0.15915494, %v849_v32 }
 0x1b4   : > { %v1292_v52 = vmul.f32 1.5707964, %v9950_v48  ;;  %v1197_v33 = vmul.f32 0.63661975, %v9944_v41  ;;  %v2372_v40 = vpack.c.bf16 %v2209_v49, %v2207_v18  ;;  %v943_v13 = vfloor.f32 %v911_v5 }
 0x1b5   : > { %v944_v3 = vfloor.f32 %v912_v35  ;;  %v882_v50 = vmul.f32 0.15915494, %v850_v16  ;;  %v913_v58 = vadd.f32 0.5, %v881_v27  ;;  %v10019_v4 = vfloor.f32 %v9938_v24 }
 0x1b6   : > { %v1550_v8 = vadd.f32 0.008333334, %v1518_v55  ;;  %2592 = vmatmul.mubr.bf16.gmra.mrb[12].mxu0 %v2372_v40  ;;  %v975_v9 = vmul.f32 6.2831855, %v943_v13  ;;  %v1732_v60 = vmul.f32 2.4801588e-05, %v9310_v39  ;;  %v10024_v18 = vsub.f32 %v9891_v45, %v1292_v52 }
 0x1b7   : > { %v976_v7 = vmul.f32 6.2831855, %v944_v3  ;;  %v914_v62 = vadd.f32 0.5, %v882_v50  ;;  %v945_v0 = vfloor.f32 %v913_v58  ;;  %v1734_v46 = vmul.f32 2.4801588e-05, %v9494_v47 }
 0x1b8   : > { %v1229_v5 = vadd.f32 0.5, %v1197_v33  ;;  %v1007_v49 = vsub.f32 %v847_v38, %v975_v9  ;;  %v1764_v35 = vadd.f32 -0.0013888889, %v1732_v60  ;;  %v10027_v55 = vmul.f32 0.25, %v9950_v48 }
 0x1b9   : > { %v1008_v27 = vsub.f32 %v848_v42, %v976_v7  ;;  %v946_v1 = vfloor.f32 %v914_v62  ;;  %v977_v24 = vmul.f32 6.2831855, %v945_v0  ;;  %v1766_v25 = vadd.f32 -0.0013888889, %v1734_v46 }
 0x1ba   : > { %v1582_v40 = vmul.f32 %v1550_v8, %v9954_v23  ;;  %v1039_v13 = vmul.f32 0.15915494, %v1007_v49  ;;  %v1796_v3 = vmul.f32 %v1764_v35, %v9310_v39  ;;  %v10034_v38 = vmul.f32 %v10024_v18, %v10024_v18 }
 0x1bb   : > { %v1040_v50 = vmul.f32 0.15915494, %v1008_v27  ;;  %v978_v58 = vmul.f32 6.2831855, %v946_v1  ;;  %v1009_v43 = vsub.f32 %v849_v32, %v977_v24  ;;  %v1798_v45 = vmul.f32 %v1766_v25, %v9494_v47 }
 0x1bc   : > { %v10036_v42 = vfloor.f32 %v1229_v5  ;;  %v1071_v0 = vadd.f32 0.5, %v1039_v13  ;;  %v1828_v46 = vadd.f32 0.041666668, %v1796_v3  ;;  %v1614_v60 = vadd.f32 -0.16666667, %v1582_v40 }
 0x1bd   : > { %v1072_v52 = vadd.f32 0.5, %v1040_v50  ;;  %v1010_v33 = vsub.f32 %v850_v16, %v978_v58  ;;  %v1041_v9 = vmul.f32 0.15915494, %v1009_v43  ;;  %v1830_v8 = vadd.f32 0.041666668, %v1798_v45 }
 0x1be   : > { %v1103_v7 = vfloor.f32 %v1071_v0  ;;  %v10040_v1 = vsub.f32 %v9256_v10, %v9689_v28  ;;  %v1860_v32 = vmul.f32 %v1828_v46, %v9310_v39  ;;  %v1293_v24 = vmul.f32 1.5707964, %v10036_v42 }
 0x1bf   : > { %v1104_v25 = vfloor.f32 %v1072_v52  ;;  %v1042_v62 = vmul.f32 0.15915494, %v1010_v33  ;;  %v1073_v35 = vadd.f32 0.5, %v1041_v9  ;;  %v1862_v5 = vmul.f32 %v1830_v8, %v9494_v47 }
 0x1c0   : > { %13343 = vst [vmem:[#allocation26_spill] sm:$0xff] %v10040_v1  ;;  %v1135_v13 = vmul.f32 6.2831855, %v1103_v7  ;;  %v10047_v16 = vsub.f32 %v9421_v63, %v9692_v14  ;;  %v1892_v40 = vadd.f32 -0.5, %v1860_v32  ;;  %v10050_v28 = vmul.f32 0.25, %v9917_v6 }
 0x1c1   : > { %v1136_v3 = vmul.f32 6.2831855, %v1104_v25  ;;  %v1074_v50 = vadd.f32 0.5, %v1042_v62  ;;  %v1105_v58 = vfloor.f32 %v1073_v35  ;;  %v1894_v10 = vadd.f32 -0.5, %v1862_v5 }
 0x1c2   : > { %13344 = vst [vmem:[#allocation21_spill] sm:$0xff] %v10047_v16  ;;  %v1646_v45 = vmul.f32 %v1614_v60, %v9954_v23  ;;  %v1924_v0 = vmul.f32 %v1892_v40, %v9310_v39  ;;  %vm13179_vm6 = vcmp.eq.f32.partialorder %v10040_v1, 1.0  ;;  %v10056_v14 = vsub.f32 %v1007_v49, %v1135_v13 }
 0x1c3   : > { %v1168_v46 = vsub.f32 %v1008_v27, %v1136_v3  ;;  %v1106_v52 = vfloor.f32 %v1074_v50  ;;  %v1137_v9 = vmul.f32 6.2831855, %v1105_v58  ;;  %v1926_v63 = vmul.f32 %v1894_v10, %v9494_v47 }
 0x1c4   : > { %v10058_v8 = vadd.f32 1.0, %v1924_v0  ;;  %vm13180_vm9 = vcmp.eq.f32.partialorder %v10047_v16, 1.0  ;;  %v1507_v7 = vmul.f32 -0.0001984127, %v9559_v57  ;;  %vm13157_vm12 = vcmp.eq.f32.partialorder %v10040_v1, 2.0 }
 0x1c5   : > { %v1200_v32 = vmul.f32 0.63661975, %v1168_v46  ;;  %v1138_v25 = vmul.f32 6.2831855, %v1106_v52  ;;  %v10062_v60 = vsub.f32 %v1009_v43, %v1137_v9  ;;  %v10064_v39 = vadd.f32 1.0, %v1926_v63 }
 0x1c6   : > { %13345 = vst [vmem:[#allocation23_spill] sm:$0xff] %v10058_v8  ;;  %v13158_v27 = vsub.f32 0.0, %v10058_v8  ;;  %v1509_v47 = vmul.f32 -0.0001984127, %v9705_v51  ;;  %v1539_v49 = vadd.f32 0.008333334, %v1507_v7 }
 0x1c7   : > { %13346 = vst [vmem:[#allocation54_spill] sm:$0xff] %v10064_v39  ;;  %v1232_v62 = vadd.f32 0.5, %v1200_v32  ;;  %v1170_v35 = vsub.f32 %v1010_v33, %v1138_v25  ;;  %vm13181_vm8 = vcmp.eq.f32.partialorder %v10047_v16, 2.0  ;;  %v13160_v5 = vsub.f32 0.0, %v10064_v39  ;;  %v13349_v7 = vld [vmem:[#allocation16_spill] sm:$0xff] }
 0x1c8   : > { %v1199_v13 = vmul.f32 0.63661975, %v10056_v14  ;;  %v1201_v43 = vmul.f32 0.63661975, %v10062_v60  ;;  %v13347_v40 = vsub.f32 0.0, %v9563_v36  ;;  %v13348_v33 = vsub.f32 0.0, %v9713_v20 }
 0x1c9   : > { %v1541_v50 = vadd.f32 0.008333334, %v1509_v47  ;;  %v10079_v58 = vfloor.f32 %v1232_v62  ;;  %v1202_v10 = vmul.f32 0.63661975, %v1170_v35  ;;  %v1347_v52 = vmul.f32 0.25, %v9353_v19 }
 0x1ca   : > { %v2148_v3 = vsel %vm13157_vm12, %v13347_v40, %v13158_v27  ;;  %v2150_v0 = vsel %vm13181_vm8, %v13348_v33, %v13160_v5  ;;  %v1349_v32 = vmul.f32 0.25, %v13349_v7  ;;  %v1571_v25 = vmul.f32 %v1539_v49, %v9559_v57 }
 0x1cb   : > { %v2180_v9 = vsel %vm13179_vm6, %v10058_v8, %v2148_v3  ;;  %v2182_v63 = vsel %vm13180_vm9, %v10064_v39, %v2150_v0  ;;  %v1296_v47 = vmul.f32 1.5707964, %v10079_v58  ;;  %v1234_v62 = vadd.f32 0.5, %v1202_v10 }
 0x1cc   : > { %vm13178_vm12 = vcmp.eq.f32.partialorder %v10047_v16, 0.0  ;;  %v1573_v40 = vmul.f32 %v1541_v50, %v9705_v51  ;;  %v1231_v33 = vadd.f32 0.5, %v1199_v13  ;;  %v1233_v27 = vadd.f32 0.5, %v1201_v43 }
 0x1cd   : > { %vm13177_vm13 = vcmp.eq.f32.partialorder %v10040_v1, 0.0  ;;  %v2214_v3 = vsel %vm13178_vm12, %v9713_v20, %v2182_v63  ;;  %v1678_v0 = vadd.f32 1.0, %v1646_v45  ;;  %v10103_v5 = vsub.f32 %v1168_v46, %v1296_v47 }
 0x1ce   : > { %v10105_v8 = vfloor.f32 %v1234_v62  ;;  %v2212_v49 = vsel %vm13177_vm13, %v9563_v36, %v2180_v9  ;;  %v1379_v21 = vfloor.f32 %v1347_v52  ;;  %v1381_v50 = vfloor.f32 %v1349_v32 }
 0x1cf   : > { %v2375_v10 = vpack.c.bf16 %v2214_v3, %v2212_v49  ;;  %v1603_v13 = vadd.f32 -0.16666667, %v1571_v25  ;;  %v10111_v43 = vsub.f32 %v9944_v41, %v1293_v24  ;;  %v10115_v11 = vmul.f32 %v10103_v5, %v10103_v5 }
 0x1d0   : > { %v1298_v45 = vmul.f32 1.5707964, %v10105_v8  ;;  %v1605_v46 = vadd.f32 -0.16666667, %v1573_v40  ;;  %v1390_v63 = vfloor.f32 %v10050_v28  ;;  %v10119_v47 = vfloor.f32 %v1231_v33 }
 0x1d1   : > { %v10121_v62 = vfloor.f32 %v1233_v27  ;;  %7357 = vmatprep.mubr.msk.bf16.mxu0 %vm13242_vm1, %v2375_v10  ;;  %v1731_v52 = vmul.f32 2.4801588e-05, %v9559_v57  ;;  %v10126_v41 = vmul.f32 %v1678_v0, %v9926_v59  ;;  %v1520_v24 = vmul.f32 -0.0001984127, %v10115_v11 }
 0x1d2   : > { %v10129_v9 = vsub.f32 %v1170_v35, %v1298_v45  ;;  %v1733_v32 = vmul.f32 2.4801588e-05, %v9705_v51  ;;  %v1411_v25 = vmul.f32 4.0, %v1379_v21  ;;  %v1413_v40 = vmul.f32 4.0, %v1381_v50 }
 0x1d3   : > { %v1635_v28 = vmul.f32 %v1603_v13, %v9559_v57  ;;  %v1763_v33 = vadd.f32 -0.0013888889, %v1731_v52  ;;  %v1552_v27 = vadd.f32 0.008333334, %v1520_v24  ;;  %v1637_v49 = vmul.f32 %v1605_v46, %v9705_v51 }
 0x1d4   : > { %v10135_v3 = vmul.f32 %v10129_v9, %v10129_v9  ;;  %v1765_v59 = vadd.f32 -0.0013888889, %v1733_v32  ;;  %v1295_v0 = vmul.f32 1.5707964, %v10119_v47  ;;  %v10140_v35 = vmul.f32 0.25, %v10079_v58 }
 0x1d5   : > { %v1297_v10 = vmul.f32 1.5707964, %v10121_v62  ;;  %v1795_v21 = vmul.f32 %v1763_v33, %v9559_v57  ;;  %v10146_v50 = vmul.f32 %v10111_v43, %v10111_v43  ;;  %v1584_v13 = vmul.f32 %v1552_v27, %v10115_v11 }
 0x1d6   : > { %v1522_v45 = vmul.f32 -0.0001984127, %v10135_v3  ;;  %v1797_v46 = vmul.f32 %v1765_v59, %v9705_v51  ;;  %v10151_v52 = vmul.f32 4.0, %v1390_v63  ;;  %v1667_v32 = vadd.f32 1.0, %v1635_v28 }
 0x1d7   : > { %v1827_v1 = vadd.f32 0.041666668, %v1795_v21  ;;  %v10155_v36 = vsub.f32 %v9353_v19, %v1411_v25  ;;  %v10158_v33 = vsub.f32 %v13349_v7, %v1413_v40  ;;  %v1669_v16 = vadd.f32 1.0, %v1637_v49  ;;  %v13351_v40 = vld [vmem:[#allocation37_spill] sm:$0xff] }
 0x1d8   : > { %v1829_v39 = vadd.f32 0.041666668, %v1797_v46  ;;  %v10161_v27 = vsub.f32 %v10056_v14, %v1295_v0  ;;  %v10165_v63 = vsub.f32 %v10062_v60, %v1297_v10  ;;  %v1616_v28 = vadd.f32 -0.16666667, %v1584_v13  ;;  %v13352_v46 = vld [vmem:[#allocation14_spill] sm:$0xff] }
 0x1d9   : > { %13350 = vst [vmem:[#allocation16_spill] sm:$0xff] %v10155_v36  ;;  %v1859_v59 = vmul.f32 %v1827_v1, %v9559_v57  ;;  %v1554_v21 = vadd.f32 0.008333334, %v1522_v45  ;;  %v1736_v25 = vmul.f32 2.4801588e-05, %v9629_v31  ;;  %v10171_v7 = vmul.f32 0.25, %v10105_v8 }
 0x1da   : > { %v1861_v19 = vmul.f32 %v1829_v39, %v9705_v51  ;;  %v10174_v49 = vmul.f32 %v1667_v32, %v13351_v40  ;;  %v1738_v0 = vmul.f32 2.4801588e-05, %v9709_v22  ;;  %v10178_v60 = vmul.f32 %v1669_v16, %v13352_v46 }
 0x1db   : > { %v1891_v14 = vadd.f32 -0.5, %v1859_v59  ;;  %vm13188_vm13 = vcmp.eq.f32.partialorder %v10155_v36, 1.0  ;;  %v1768_v1 = vadd.f32 -0.0013888889, %v1736_v25  ;;  %vm13193_vm12 = vcmp.eq.f32.partialorder %v10155_v36, 0.0 }
 0x1dc   : > { %v1893_v10 = vadd.f32 -0.5, %v1861_v19  ;;  %vm13194_vm6 = vcmp.eq.f32.partialorder %v10158_v33, 0.0  ;;  %vm13204_vm9 = vcmp.eq.f32.partialorder %v10158_v33, 1.0  ;;  %vm13183_vm8 = vcmp.eq.f32.partialorder %v10155_v36, 2.0 }
 0x1dd   : > { %v1923_v39 = vmul.f32 %v1891_v14, %v9559_v57  ;;  %v1770_v13 = vadd.f32 -0.0013888889, %v1738_v0  ;;  %v1648_v45 = vmul.f32 %v1616_v28, %v10115_v11  ;;  %v1586_v16 = vmul.f32 %v1554_v21, %v10135_v3  ;;  %v13353_v57 = vld [vmem:[#allocation8_spill] sm:$0xff] }
 0x1de   : > { %v1925_v32 = vmul.f32 %v1893_v10, %v9705_v51  ;;  %v1800_v59 = vmul.f32 %v1768_v1, %v9629_v31  ;;  %vm13189_vm11 = vcmp.eq.f32.partialorder %v10158_v33, 2.0  ;;  %v10195_v25 = vsub.f32 %v13353_v57, %v9853_v17  ;;  %v13355_v1 = vld [vmem:[#allocation15_spill] sm:$0xff] }
 0x1df   : > { %v10190_v19 = vadd.f32 1.0, %v1923_v39  ;;  %v1802_v40 = vmul.f32 %v1770_v13, %v9709_v22  ;;  %v13184_v28 = vsub.f32 0.0, %v10174_v49  ;;  %v13187_v21 = vsub.f32 0.0, %v10178_v60 }
 0x1e0   : > { %13354 = vst [vmem:[#allocation37_spill] sm:$0xff] %v10195_v25  ;;  %v10198_v14 = vadd.f32 1.0, %v1925_v32  ;;  %v1832_v0 = vadd.f32 0.041666668, %v1800_v59  ;;  %v10205_v46 = vsub.f32 %v9631_v15, %v9855_v44  ;;  %v1351_v39 = vmul.f32 0.25, %v13355_v1 }
 0x1e1   : > { %v13186_v51 = vsub.f32 0.0, %v10190_v19  ;;  %v1834_v10 = vadd.f32 0.041666668, %v1802_v40  ;;  %v10208_v17 = vadd.f32 1.0, %v1648_v45  ;;  %v1618_v57 = vadd.f32 -0.16666667, %v1586_v16 }
 0x1e2   : > { %v13190_v13 = vsub.f32 0.0, %v10198_v14  ;;  %v1864_v32 = vmul.f32 %v1832_v0, %v9629_v31  ;;  %v1353_v44 = vmul.f32 0.25, %v9727_v54  ;;  %v1511_v40 = vmul.f32 -0.0001984127, %v9833_v26 }
 0x1e3   : > { %v2147_v59 = vsel %vm13183_vm8, %v13184_v28, %v13186_v51  ;;  %v1866_v15 = vmul.f32 %v1834_v10, %v9709_v22  ;;  %vm13201_vm8 = vcmp.eq.f32.partialorder %v10195_v25, 1.0  ;;  %vm13202_vm7 = vcmp.eq.f32.partialorder %v10205_v46, 1.0 }
 0x1e4   : > { %v2149_v45 = vsel %vm13189_vm11, %v13187_v21, %v13190_v13  ;;  %v2179_v16 = vsel %vm13188_vm13, %v10190_v19, %v2147_v59  ;;  %v1896_v0 = vadd.f32 -0.5, %v1864_v32  ;;  %v1383_v51 = vfloor.f32 %v1351_v39 }
 0x1e5   : > { %v2181_v10 = vsel %vm13204_vm9, %v10198_v14, %v2149_v45  ;;  %v1898_v28 = vadd.f32 -0.5, %v1866_v15  ;;  %v2211_v20 = vsel %vm13193_vm12, %v10174_v49, %v2179_v16  ;;  %vm13199_vm13 = vcmp.eq.f32.partialorder %v10195_v25, 0.0 }
 0x1e6   : > { %v2213_v21 = vsel %vm13194_vm6, %v10178_v60, %v2181_v10  ;;  %v1928_v32 = vmul.f32 %v1896_v0, %v9629_v31  ;;  %vm13200_vm11 = vcmp.eq.f32.partialorder %v10205_v46, 0.0  ;;  %v1513_v59 = vmul.f32 -0.0001984127, %v9859_v56 }
 0x1e7   : > { %v2374_v15 = vpack.c.bf16 %v2213_v21, %v2211_v20  ;;  %v1930_v45 = vmul.f32 %v1898_v28, %v9709_v22  ;;  %v1385_v39 = vfloor.f32 %v1353_v44  ;;  %v1543_v13 = vadd.f32 0.008333334, %v1511_v40 }
 0x1e8   : > { %v1650_v24 = vmul.f32 %v1618_v57, %v10135_v3  ;;  %v10247_v16 = vadd.f32 1.0, %v1928_v32  ;;  %v1545_v36 = vadd.f32 0.008333334, %v1513_v59  ;;  %v1735_v10 = vmul.f32 2.4801588e-05, %v9833_v26 }
 0x1e9   : > { %2602 = vmatmul.mubr.bf16.gmra.mrb[16].mxu0 %v2374_v15  ;;  %v10250_v31 = vadd.f32 1.0, %v1930_v45  ;;  %vm13203_vm12 = vcmp.eq.f32.partialorder %v10195_v25, 2.0  ;;  %v1575_v0 = vmul.f32 %v1543_v13, %v9833_v26  ;;  %v1737_v20 = vmul.f32 2.4801588e-05, %v9859_v56 }
 0x1ea   : > { %13356 = vst [vmem:[#allocation14_spill] sm:$0xff] %v10247_v16  ;;  %v13195_v22 = vsub.f32 0.0, %v10247_v16  ;;  %v1415_v28 = vmul.f32 4.0, %v1383_v51  ;;  %v1577_v21 = vmul.f32 %v1545_v36, %v9859_v56  ;;  %v1767_v57 = vadd.f32 -0.0013888889, %v1735_v10 }
 0x1eb   : > { %v13196_v44 = vsub.f32 0.0, %v10250_v31  ;;  %v1417_v40 = vmul.f32 4.0, %v1385_v39  ;;  %v1607_v32 = vadd.f32 -0.16666667, %v1575_v0  ;;  %v1769_v59 = vadd.f32 -0.0013888889, %v1737_v20 }
 0x1ec   : > { %vm13205_vm6 = vcmp.eq.f32.partialorder %v10205_v46, 2.0  ;;  %v13357_v15 = vsub.f32 0.0, %v9839_v53  ;;  %v1609_v45 = vadd.f32 -0.16666667, %v1577_v21  ;;  %v1799_v51 = vmul.f32 %v1767_v57, %v9833_v26 }
 0x1ed   : > { %v13358_v36 = vsub.f32 0.0, %v9936_v37  ;;  %v1639_v0 = vmul.f32 %v1607_v32, %v9833_v26  ;;  %v1801_v20 = vmul.f32 %v1769_v59, %v9859_v56  ;;  %v10281_v57 = vsub.f32 %v13355_v1, %v1415_v28 }
 0x1ee   : > { %v2152_v13 = vsel %vm13203_vm12, %v13357_v15, %v13195_v22  ;;  %v1641_v15 = vmul.f32 %v1609_v45, %v9859_v56  ;;  %v1831_v22 = vadd.f32 0.041666668, %v1799_v51  ;;  %v10291_v59 = vsub.f32 %v9727_v54, %v1417_v40 }
 0x1ef   : > { %v2154_v39 = vsel %vm13205_vm6, %v13358_v36, %v13196_v44  ;;  %v2184_v10 = vsel %vm13201_vm8, %v10247_v16, %v2152_v13  ;;  %v1833_v13 = vadd.f32 0.041666668, %v1801_v20  ;;  %v1671_v1 = vadd.f32 1.0, %v1639_v0 }
 0x1f0   : > { %v2186_v21 = vsel %vm13202_vm7, %v10250_v31, %v2154_v39  ;;  %v2216_v36 = vsel %vm13199_vm13, %v9839_v53, %v2184_v10  ;;  %v1863_v28 = vmul.f32 %v1831_v22, %v9833_v26  ;;  %v10297_v45 = vmul.f32 %v10208_v17, %v10103_v5 }
 0x1f1   : > { %v2218_v32 = vsel %vm13200_vm11, %v9936_v37, %v2186_v21  ;;  %v10299_v51 = vadd.f32 1.0, %v1650_v24  ;;  %v1673_v10 = vadd.f32 1.0, %v1641_v15  ;;  %v1865_v25 = vmul.f32 %v1833_v13, %v9859_v56 }
 0x1f2   : > { %v2377_v44 = vpack.c.bf16 %v2218_v32, %v2216_v36  ;;  %v1895_v54 = vadd.f32 -0.5, %v1863_v28  ;;  %v1388_v40 = vfloor.f32 %v10027_v55  ;;  %v1516_v20 = vmul.f32 -0.0001984127, %v10034_v38 }
 0x1f3   : > { %v1740_v0 = vmul.f32 2.4801588e-05, %v10034_v38  ;;  %v1897_v21 = vadd.f32 -0.5, %v1865_v25  ;;  %vm2023_vm13 = vcmp.eq.f32.partialorder %v10281_v57, 1.0  ;;  %vm2025_vm11 = vcmp.eq.f32.partialorder %v10291_v59, 1.0 }
 0x1f4   : > { %7358 = vmatprep.mubr.msk.bf16.mxu0 %vm13242_vm1, %v2377_v44  ;;  %v1742_v5 = vmul.f32 2.4801588e-05, %v9954_v23  ;;  %v10310_v24 = vmul.f32 %v1671_v1, %v9817_v61  ;;  %v1927_v17 = vmul.f32 %v1895_v54, %v9833_v26  ;;  %vm1991_vm8 = vcmp.eq.f32.partialorder %v10281_v57, 0.0 }
 0x1f5   : > { %v1548_v22 = vadd.f32 0.008333334, %v1516_v20  ;;  %v1772_v55 = vadd.f32 -0.0013888889, %v1740_v0  ;;  %v10315_v44 = vmul.f32 %v1673_v10, %v9836_v34  ;;  %v1929_v25 = vmul.f32 %v1897_v21, %v9859_v56 }
 0x1f6   : > { %vm2055_vm7 = vcmp.eq.f32.partialorder %v10281_v57, 2.0  ;;  %v1774_v15 = vadd.f32 -0.0013888889, %v1742_v5  ;;  %v10319_v36 = vadd.f32 1.0, %v1927_v17  ;;  %v1420_v32 = vmul.f32 4.0, %v1388_v40 }
 0x1f7   : > { %v1580_v61 = vmul.f32 %v1548_v22, %v10034_v38  ;;  %v1804_v13 = vmul.f32 %v1772_v55, %v10034_v38  ;;  %v10323_v26 = vadd.f32 1.0, %v1929_v25  ;;  %vm2057_vm12 = vcmp.eq.f32.partialorder %v10291_v59, 2.0 }
 0x1f8   : > { %v10328_v34 = vsub.f32 %v9917_v6, %v10151_v52  ;;  %v1806_v56 = vmul.f32 %v1774_v15, %v9954_v23  ;;  %v13212_v1 = vsub.f32 0.0, %v10310_v24  ;;  %v13217_v28 = vsub.f32 0.0, %v10319_v36 }
 0x1f9   : > { %v1612_v10 = vadd.f32 -0.16666667, %v1580_v61  ;;  %v1836_v54 = vadd.f32 0.041666668, %v1804_v13  ;;  %v13211_v40 = vsub.f32 0.0, %v10315_v44  ;;  %v13213_v20 = vsub.f32 0.0, %v10323_v26 }
 0x1fa   : > { %v1838_v0 = vadd.f32 0.041666668, %v1806_v56  ;;  %v1291_v21 = vmul.f32 1.5707964, %v10019_v4  ;;  %v2151_v6 = vsel %vm2055_vm7, %v13212_v1, %v13217_v28  ;;  %v10343_v52 = vsub.f32 %v9950_v48, %v1420_v32 }
 0x1fb   : > { %v1644_v5 = vmul.f32 %v1612_v10, %v10034_v38  ;;  %v1868_v17 = vmul.f32 %v1836_v54, %v10034_v38  ;;  %v2153_v22 = vsel %vm2057_vm12, %v13211_v40, %v13213_v20  ;;  %v2183_v55 = vsel %vm2023_vm13, %v10319_v36, %v2151_v6 }
 0x1fc   : > { %v1870_v25 = vmul.f32 %v1838_v0, %v9954_v23  ;;  %v10358_v48 = vsub.f32 %v9911_v29, %v1291_v21  ;;  %vm1993_vm9 = vcmp.eq.f32.partialorder %v10291_v59, 0.0  ;;  %v2185_v15 = vsel %vm2025_vm11, %v10323_v26, %v2153_v22  ;;  %v8174_v59 = vld [vmem:[%s13002_s7 + $0x20] ss:$8 sps:$4 sm:$0xff]  }
 0x1fd   : > { %v1676_v32 = vadd.f32 1.0, %v1644_v5  ;;  %v1900_v61 = vadd.f32 -0.5, %v1868_v17  ;;  %v2215_v13 = vsel %vm1991_vm8, %v10310_v24, %v2183_v55  ;;  %v2217_v56 = vsel %vm1993_vm9, %v10315_v44, %v2185_v15 }
 0x1fe   : > { %v1902_v10 = vadd.f32 -0.5, %v1870_v25  ;;  %vm13223_vm6 = vcmp.eq.f32.partialorder %v10328_v34, 1.0  ;;  %v1355_v29 = vmul.f32 0.25, %v10019_v4  ;;  %v2376_v54 = vpack.c.bf16 %v2217_v56, %v2215_v13 }
 0x1ff   : > { %v10373_v0 = vmul.f32 %v1676_v32, %v10024_v18  ;;  %v1932_v21 = vmul.f32 %v1900_v61, %v10034_v38  ;;  %vm13221_vm14 = vcmp.eq.f32.partialorder %v10328_v34, 0.0  ;;  %v1483_v6 = vmul.f32 %v10358_v48, %v10358_v48 }
 0x200   : > { %v1934_v5 = vmul.f32 %v1902_v10, %v9954_v23  ;;  %vm13222_vm10 = vcmp.eq.f32.partialorder %v10343_v52, 0.0  ;;  %vm13227_vm5 = vcmp.eq.f32.partialorder %v10343_v52, 1.0  ;;  %v1517_v17 = vmul.f32 -0.0001984127, %v10146_v50  ;;  %2612 = vmatmul.mubr.bf16.gmra.mrb[20].mxu0 %v2376_v54 }
 0x201   : > { %v10383_v22 = vadd.f32 1.0, %v1932_v21  ;;  %v1357_v18 = vmul.f32 0.25, %v10036_v42  ;;  %v1515_v55 = vmul.f32 -0.0001984127, %v1483_v6  ;;  %v1739_v38 = vmul.f32 2.4801588e-05, %v1483_v6 }
 0x202   : > { %v10386_v25 = vadd.f32 1.0, %v1934_v5  ;;  %vm2060_vm2 = vcmp.eq.f32.partialorder %v10343_v52, 2.0  ;;  %v1387_v15 = vfloor.f32 %v1355_v29  ;;  %v1549_v32 = vadd.f32 0.008333334, %v1517_v17 }
 0x203   : > { %v13214_v23 = vsub.f32 0.0, %v10373_v0  ;;  %v13215_v61 = vsub.f32 0.0, %v10383_v22  ;;  %v1547_v13 = vadd.f32 0.008333334, %v1515_v55  ;;  %v1741_v56 = vmul.f32 2.4801588e-05, %v10146_v50 }
 0x204   : > { %vm2062_vm4 = vcmp.eq.f32.partialorder %v10328_v34, 2.0  ;;  %v13216_v10 = vsub.f32 0.0, %v10386_v25  ;;  %v1581_v54 = vmul.f32 %v1549_v32, %v10146_v50  ;;  %v1771_v21 = vadd.f32 -0.0013888889, %v1739_v38 }
 0x205   : > { %v2156_v29 = vsel %vm2060_vm2, %v13214_v23, %v13215_v61  ;;  %v1389_v5 = vfloor.f32 %v1357_v18  ;;  %v1579_v17 = vmul.f32 %v1547_v13, %v1483_v6  ;;  %v1773_v40 = vadd.f32 -0.0013888889, %v1741_v56 }
 0x206   : > { %v13359_v55 = vsub.f32 0.0, %v10126_v41  ;;  %v2188_v38 = vsel %vm13227_vm5, %v10383_v22, %v2156_v29  ;;  %v1613_v32 = vadd.f32 -0.16666667, %v1581_v54  ;;  %v1803_v20 = vmul.f32 %v1771_v21, %v1483_v6 }
 0x207   : > { %v1419_v18 = vmul.f32 4.0, %v1387_v15  ;;  %v1611_v13 = vadd.f32 -0.16666667, %v1579_v17  ;;  %v1805_v56 = vmul.f32 %v1773_v40, %v10146_v50  ;;  %v2220_v61 = vsel %vm13222_vm10, %v10373_v0, %v2188_v38 }
 0x208   : > { %v2158_v1 = vsel %vm2062_vm4, %v13359_v55, %v13216_v10  ;;  %v1645_v29 = vmul.f32 %v1613_v32, %v10146_v50  ;;  %v1835_v54 = vadd.f32 0.041666668, %v1803_v20  ;;  %v1421_v10 = vmul.f32 4.0, %v1389_v5 }
 0x209   : > { %v2190_v23 = vsel %vm13223_vm6, %v10386_v25, %v2158_v1  ;;  %v1643_v28 = vmul.f32 %v1611_v13, %v1483_v6  ;;  %v1837_v39 = vadd.f32 0.041666668, %v1805_v56  ;;  %v13360_v1 = vfloor.f32 %v10140_v35 }
 0x20a   : > { %v2222_v55 = vsel %vm13221_vm14, %v10126_v41, %v2190_v23  ;;  %v10425_v40 = vmul.f32 %v10161_v27, %v10161_v27  ;;  %v10429_v17 = vmul.f32 %v10165_v63, %v10165_v63  ;;  %v1867_v38 = vmul.f32 %v1835_v54, %v1483_v6 }
 0x20b   : > { %v2379_v21 = vpack.c.bf16 %v2222_v55, %v2220_v61  ;;  %v1424_v15 = vmul.f32 4.0, %v13360_v1  ;;  %v10433_v23 = vmul.f32 %v10299_v51, %v10129_v9  ;;  %v1675_v20 = vadd.f32 1.0, %v1643_v28 }
 0x20c   : > { %v1677_v61 = vadd.f32 1.0, %v1645_v29  ;;  %v1869_v35 = vmul.f32 %v1837_v39, %v10146_v50  ;;  %v10438_v5 = vsub.f32 %v10019_v4, %v1419_v18  ;;  %v1899_v32 = vadd.f32 -0.5, %v1867_v38 }
 0x20d   : > { %7359 = vmatprep.mubr.msk.bf16.mxu0 %vm13242_vm1, %v2379_v21  ;;  %v1744_v13 = vmul.f32 2.4801588e-05, %v10115_v11  ;;  %v1746_v56 = vmul.f32 2.4801588e-05, %v10135_v3  ;;  %v13233_v55 = vsub.f32 0.0, %v10297_v45  ;;  %v13361_v54 = vfloor.f32 %v10171_v7 }
 0x20e   : > { %v10446_v51 = vsub.f32 %v10036_v42, %v1421_v10  ;;  %v1901_v28 = vadd.f32 -0.5, %v1869_v35  ;;  %v10449_v29 = vmul.f32 %v1675_v20, %v10358_v48  ;;  %v1931_v39 = vmul.f32 %v1899_v32, %v1483_v6 }
 0x20f   : > { %v1426_v9 = vmul.f32 4.0, %v13361_v54  ;;  %v1776_v4 = vadd.f32 -0.0013888889, %v1744_v13  ;;  %v1778_v18 = vadd.f32 -0.0013888889, %v1746_v56  ;;  %v13234_v21 = vsub.f32 0.0, %v10433_v23 }
 0x210   : > { %v10453_v1 = vmul.f32 %v1677_v61, %v10111_v43  ;;  %v1933_v38 = vmul.f32 %v1901_v28, %v10146_v50  ;;  %v10457_v7 = vsub.f32 %v10079_v58, %v1424_v15  ;;  %v10459_v54 = vadd.f32 1.0, %v1931_v39 }
 0x211   : > { %vm13231_vm15 = vcmp.eq.f32.partialorder %v10438_v5, 0.0  ;;  %v1808_v42 = vmul.f32 %v1776_v4, %v10115_v11  ;;  %v1810_v48 = vmul.f32 %v1778_v18, %v10135_v3  ;;  %vm13226_vm3 = vcmp.eq.f32.partialorder %v10438_v5, 1.0 }
 0x212   : > { %v10464_v6 = vadd.f32 1.0, %v1933_v38  ;;  %vm13224_vm0 = vcmp.eq.f32.partialorder %v10438_v5, 2.0  ;;  %vm13225_vm14 = vcmp.eq.f32.partialorder %v10446_v51, 2.0  ;;  %v13229_v43 = vsub.f32 0.0, %v10449_v29 }
 0x213   : > { %v13237_v58 = vsub.f32 0.0, %v10459_v54  ;;  %v1840_v50 = vadd.f32 0.041666668, %v1808_v42  ;;  %v1842_v10 = vadd.f32 0.041666668, %v1810_v48  ;;  %v13228_v15 = vsub.f32 0.0, %v10453_v1 }
 0x214   : > { %v13232_v20 = vsub.f32 0.0, %v10464_v6  ;;  %v10474_v61 = vsub.f32 %v10105_v8, %v1426_v9  ;;  %v1519_v35 = vmul.f32 -0.0001984127, %v10425_v40  ;;  %v1521_v28 = vmul.f32 -0.0001984127, %v10429_v17 }
 0x215   : > { %v2155_v32 = vsel %vm13224_vm0, %v13229_v43, %v13237_v58  ;;  %v1872_v13 = vmul.f32 %v1840_v50, %v10115_v11  ;;  %v1874_v56 = vmul.f32 %v1842_v10, %v10135_v3  ;;  %vm13230_vm10 = vcmp.eq.f32.partialorder %v10446_v51, 0.0 }
 0x216   : > { %vm2029_vm6 = vcmp.eq.f32.partialorder %v10446_v51, 1.0  ;;  %v2157_v8 = vsel %vm13225_vm14, %v13228_v15, %v13232_v20  ;;  %v2187_v9 = vsel %vm13226_vm3, %v10459_v54, %v2155_v32  ;;  %vm13246_vm0 = vcmp.eq.f32.partialorder %v10457_v7, 1.0 }
 0x217   : > { %v2189_v39 = vsel %vm2029_vm6, %v10464_v6, %v2157_v8  ;;  %v1904_v4 = vadd.f32 -0.5, %v1872_v13  ;;  %v1906_v18 = vadd.f32 -0.5, %v1874_v56  ;;  %v2219_v38 = vsel %vm13231_vm15, %v10449_v29, %v2187_v9 }
 0x218   : > { %v2221_v42 = vsel %vm13230_vm10, %v10453_v1, %v2189_v39  ;;  %vm13244_vm14 = vcmp.eq.f32.partialorder %v10457_v7, 0.0  ;;  %vm13243_vm3 = vcmp.eq.f32.partialorder %v10474_v61, 0.0  ;;  %vm13245_vm5 = vcmp.eq.f32.partialorder %v10474_v61, 1.0 }
 0x219   : > { %v1551_v48 = vadd.f32 0.008333334, %v1519_v35  ;;  %v2378_v50 = vpack.c.bf16 %v2221_v42, %v2219_v38  ;;  %v1936_v10 = vmul.f32 %v1904_v4, %v10115_v11  ;;  %v1938_v32 = vmul.f32 %v1906_v18, %v10135_v3  ;;  %v13362_v18 = vld [vmem:[#allocation24_spill] sm:$0xff]  ;;  %v13363_v38 = vld [vmem:[#allocation25_spill] sm:$0xff] }
 0x21a   : > { %v1553_v13 = vadd.f32 0.008333334, %v1521_v28  ;;  %v1359_v56 = vmul.f32 0.25, %v10119_v47  ;;  %v1743_v9 = vmul.f32 2.4801588e-05, %v10425_v40  ;;  %v1361_v35 = vmul.f32 0.25, %v10121_v62 }
 0x21b   : > { %v1583_v8 = vmul.f32 %v1551_v48, %v10425_v40  ;;  %v1745_v39 = vmul.f32 2.4801588e-05, %v10429_v17  ;;  %2622 = vmatmul.mubr.bf16.gmra.mrb[24].mxu0 %v2378_v50  ;;  %v10516_v15 = vadd.f32 1.0, %v1936_v10  ;;  %v10518_v43 = vadd.f32 1.0, %v1938_v32 }
 0x21c   : > { %v1585_v11 = vmul.f32 %v1553_v13, %v10429_v17  ;;  %v1775_v3 = vadd.f32 -0.0013888889, %v1743_v9  ;;  %vm2064_vm10 = vcmp.eq.f32.partialorder %v10457_v7, 2.0  ;;  %vm13247_vm15 = vcmp.eq.f32.partialorder %v10474_v61, 2.0 }
 0x21d   : > { %v1615_v4 = vadd.f32 -0.16666667, %v1583_v8  ;;  %v1777_v28 = vadd.f32 -0.0013888889, %v1745_v39  ;;  %v13236_v48 = vsub.f32 0.0, %v10516_v15  ;;  %v13235_v50 = vsub.f32 0.0, %v10518_v43 }
 0x21e   : > { %v1617_v10 = vadd.f32 -0.16666667, %v1585_v11  ;;  %v1807_v20 = vmul.f32 %v1775_v3, %v10425_v40  ;;  %v1391_v39 = vfloor.f32 %v1359_v56  ;;  %v13371_v57 = vsub.f32 0.0, %v10373_v0 }
 0x21f   : > { %v1647_v32 = vmul.f32 %v1615_v4, %v10425_v40  ;;  %v1809_v13 = vmul.f32 %v1777_v28, %v10429_v17  ;;  %v2160_v8 = vsel %vm2064_vm10, %v13233_v55, %v13236_v48  ;;  %v2162_v9 = vsel %vm13247_vm15, %v13234_v21, %v13235_v50 }
 0x220   : > { %v1649_v11 = vmul.f32 %v1617_v10, %v10429_v17  ;;  %v2192_v4 = vsel %vm13246_vm0, %v10516_v15, %v2160_v8  ;;  %v2194_v3 = vsel %vm13245_vm5, %v10518_v43, %v2162_v9  ;;  %v1393_v28 = vfloor.f32 %v1361_v35 }
 0x221   : > { %v1839_v42 = vadd.f32 0.041666668, %v1807_v20  ;;  %v2224_v55 = vsel %vm13244_vm14, %v10297_v45, %v2192_v4  ;;  %v2226_v56 = vsel %vm13243_vm3, %v10433_v23, %v2194_v3  ;;  %v1841_v21 = vadd.f32 0.041666668, %v1809_v13  ;;  %v8168_v3 = vld [vmem:[%s13002_s7] ss:$8 sps:$4 sm:$0xff]  }
 0x222   : > { %v2381_v10 = vpack.c.bf16 %v2226_v56, %v2224_v55  ;;  %v1679_v50 = vadd.f32 1.0, %v1647_v32  ;;  %v1423_v8 = vmul.f32 4.0, %v1391_v39  ;;  %v1681_v58 = vadd.f32 1.0, %v1649_v11  ;;  %v8166_v11 = vld [vmem:[%s13002_s7 + $0x4] ss:$8 sps:$4 sm:$0xff]  }
 0x223   : > { %v1871_v48 = vmul.f32 %v1839_v42, %v10425_v40  ;;  %v1873_v16 = vmul.f32 %v1841_v21, %v10429_v17  ;;  %v1425_v20 = vmul.f32 4.0, %v1393_v28  ;;  %v8169_v28 = vld [vmem:[%s13002_s7 + $0x14] ss:$8 sps:$4 sm:$0xff]   ;;  %v13364_v56 = vmov 0   ;;  %3467 = vmatprep.subr.bf16.mxu1 %v8166_v11 }
 0x224   : > { %7360 = vmatprep.mubr.msk.bf16.mxu0 %vm13242_vm1, %v2381_v10  ;;  %v10560_v4 = vmul.f32 %v1679_v50, %v10161_v27  ;;  %v10564_v13 = vsub.f32 %v10119_v47, %v1423_v8  ;;  %v10567_v55 = vmul.f32 %v1681_v58, %v10165_v63  ;;  %3468 = vmatpush1.bf16.msra.mxu1 %v8168_v3  ;;  %v8171_v10 = vld [vmem:[%s13002_s7 + $0x10] ss:$8 sps:$4 sm:$0xff]   ;;  %v8126_v8 = vld [vmem:[%s8756_s23] sm:$0xff]  }
 0x225   : > { %v1903_v35 = vadd.f32 -0.5, %v1871_v48  ;;  %v1905_v9 = vadd.f32 -0.5, %v1873_v16  ;;  %v10571_v21 = vsub.f32 %v10121_v62, %v1425_v20  ;;  %3469 = vmatprep.subr.bf16.mxu1 %v8169_v28  ;;  %v8123_v20 = vld [vmem:[%s13000_s5 + $0xb8] ss:$8 sps:$4 sm:$0xff]  }
 0x226   : > { %v2095_v27 = vsub.f32 0.0, %v10560_v4  ;;  %vm2063_vm1 = vcmp.eq.f32.partialorder %v10564_v13, 2.0  ;;  %v2097_v47 = vsub.f32 0.0, %v10567_v55  ;;  %vm2031_vm3 = vcmp.eq.f32.partialorder %v10564_v13, 1.0 }
 0x227   : > { %v1935_v53 = vmul.f32 %v1903_v35, %v10425_v40  ;;  %v1937_v42 = vmul.f32 %v1905_v9, %v10429_v17  ;;  %vm2065_vm14 = vcmp.eq.f32.partialorder %v10571_v21, 2.0  ;;  %vm2033_vm5 = vcmp.eq.f32.partialorder %v10571_v21, 1.0 }
 0x228   : > { %vm1999_vm0 = vcmp.eq.f32.partialorder %v10564_v13, 0.0  ;;  %vm13248_vm15 = vcmp.eq.f32.partialorder %v10571_v21, 0.0  ;;  %v13365_v35 = vsub.f32 0.0, %v10319_v36  ;;  %3470 = vmatpush1.bf16.msra.mxu1 %v8171_v10  ;;  %v8180_v13 = vld [vmem:[%s13002_s7 + $0x40] ss:$8 sps:$4 sm:$0xff]  }
 0x229   : > { %v10573_v32 = vadd.f32 1.0, %v1935_v53  ;;  %v10575_v48 = vadd.f32 1.0, %v1937_v42  ;;  %v8129_v42 = vld [vmem:[%s13000_s5 + $0xcc] ss:$8 sps:$4 sm:$0xff]  }
 0x22a   : > { %v2247_v9 = vsel %vm2055_vm7, %v13365_v35, %v10310_v24  ;;  %v8172_v35 = vld [vmem:[%s13002_s7 + $0x24] ss:$8 sps:$4 sm:$0xff]   ;;  %vm13376_vm7 = vcmp.eq.f32.partialorder %v10438_v5, 2.0 }
 0x22b   : > { %v2127_v16 = vsub.f32 0.0, %v10573_v32  ;;  %v2129_v63 = vsub.f32 0.0, %v10575_v48  ;;  %3471 = vmatprep.subr.bf16.mxu1 %v8172_v35  ;;  %v8136_v35 = vld [vmem:[%s13000_s5 + $0xec] ss:$8 sps:$4 sm:$0xff]  }
 0x22c   : > { %3472 = vmatpush1.bf16.msra.mxu1 %v8174_v59  ;;  %v8184_v59 = vld [vmem:[%s13002_s7 + $0x64] ss:$8 sps:$4 sm:$0xff]  }
 0x22d   : > { %v2159_v53 = vsel %vm2063_vm1, %v2095_v27, %v2127_v16  ;;  %v2161_v62 = vsel %vm2065_vm14, %v2097_v47, %v2129_v63 }
 0x22e   : > { %v2191_v40 = vsel %vm2031_vm3, %v10573_v32, %v2159_v53  ;;  %v2193_v17 = vsel %vm2033_vm5, %v10575_v48, %v2161_v62  ;;  %v13366_v53 = vsub.f32 0.0, %v10323_v26 }
 0x22f   : > { %v2223_v58 = vsel %vm1999_vm0, %v10560_v4, %v2191_v40  ;;  %v2225_v50 = vsel %vm13248_vm15, %v10567_v55, %v2193_v17  ;;  %vm2702_vm15 = vcmask 261120   ;;  %v13367_v40 = vsub.f32 0.0, %v10310_v24 }
 0x230   : > { %v2380_v39 = vpack.c.bf16 %v2225_v50, %v2223_v58  ;;  %v2249_v62 = vsel %vm2057_vm12, %v13366_v53, %v10315_v44  ;;  %v13368_v58 = vsub.f32 0.0, %v10383_v22  ;;  %v13370_v24 = vsub.f32 0.0, %v10386_v25 }
 0x231   : > { %v2279_v17 = vsel %vm2023_vm13, %v13367_v40, %v2247_v9  ;;  %v13373_v9 = vsub.f32 0.0, %v10126_v41  ;;  %v13375_v53 = vsub.f32 0.0, %v10459_v54  ;;  %vm13382_vm12 = vcmp.eq.f32.partialorder %v10438_v5, 1.0 }
 0x232   : > { %2632 = vmatmul.mubr.bf16.gmra.mrb[28].mxu0 %v2380_v39  ;;  %v2252_v50 = vsel %vm2060_vm2, %v13368_v58, %v10373_v0  ;;  %v13369_v39 = vsub.f32 0.0, %v10315_v44  ;;  %v10657_v3 = vsel %vm1991_vm8, %v10319_v36, %v2279_v17  ;;  %v2254_v28 = vsel %vm2062_vm4, %v13370_v24, %v10126_v41  ;;  %v8175_v58 = vld [vmem:[%s13002_s7 + $0x34] ss:$8 sps:$4 sm:$0xff]  }
 0x233   : > { %2759 = vmatprep.mubr.bf16.mxu0 %v13364_v56  ;;  %vm13372_vm2 = vcmp.eq.f32.partialorder %v10343_v52, 1.0  ;;  %vm13374_vm4 = vcmp.eq.f32.partialorder %v10328_v34, 1.0  ;;  %vm13377_vm8 = vcmp.eq.f32.partialorder %v10343_v52, 0.0  ;;  %v13379_v17 = vsub.f32 0.0, %v10464_v6  ;;  %3473 = vmatprep.subr.bf16.mxu1 %v8175_v58  ;;  %v8190_v58 = vld [vmem:[%s13002_s7 + $0x84] ss:$8 sps:$4 sm:$0xff]  }
 0x234   : > { %v2281_v11 = vsel %vm2025_vm11, %v13369_v39, %v2249_v62  ;;  %v2284_v36 = vsel %vm13372_vm2, %v13371_v57, %v2252_v50  ;;  %v2286_v10 = vsel %vm13374_vm4, %v13373_v9, %v2254_v28  ;;  %vm13380_vm11 = vcmp.eq.f32.partialorder %v10446_v51, 2.0 }
 0x235   : > { %v10671_v44 = vsel %vm1993_vm9, %v10323_v26, %v2281_v11  ;;  %v8127_v26 = vld [vmem:[%s13000_s5 + $0xc8] ss:$8 sps:$4 sm:$0xff]   ;;  %v10698_v0 = vsel %vm13377_vm8, %v10383_v22, %v2284_v36  ;;  %vm13378_vm9 = vcmp.eq.f32.partialorder %v10328_v34, 0.0  ;;  %v2253_v52 = vsel %vm13380_vm11, %v13379_v17, %v10453_v1  ;;  %v8187_v17 = vld [vmem:[%s13002_s7 + $0x74] ss:$8 sps:$4 sm:$0xff]  }
 0x236   : > { %v2874_v41 = vpack.c.bf16 %v10671_v44, %v10657_v3  ;;  %v10703_v62 = vsel %vm13378_vm9, %v10386_v25, %v2286_v10  ;;  %v13381_v22 = vsub.f32 0.0, %v10449_v29  ;;  %v13383_v25 = vsub.f32 0.0, %v10516_v15  ;;  %v8183_v10 = vld [vmem:[%s13002_s7 + $0x50] ss:$8 sps:$4 sm:$0xff]   ;;  %v8216_v44 = vld [vmem:[%s13002_s7 + $0x104] ss:$8 sps:$4 sm:$0xff]  }
 0x237   : > { %v2877_v40 = vpack.c.bf16 %v10703_v62, %v10698_v0  ;;  %v13384_v50 = vsub.f32 0.0, %v10453_v1  ;;  %vm13385_vm13 = vcmp.eq.f32.partialorder %v10438_v5, 0.0  ;;  %v13386_v11 = vsub.f32 0.0, %v10518_v43  ;;  %v8130_v1 = vld [vmem:[%s8756_s23 + $0x8] sm:$0xff]   ;;  %v8213_v3 = vld [vmem:[%s13002_s7 + $0xf0] ss:$8 sps:$4 sm:$0xff]  }
 0x238   : > { %vm13387_vm2 = vcmp.eq.f32.partialorder %v10474_v61, 2.0  ;;  %v13388_v28 = vsub.f32 0.0, %v10297_v45  ;;  %v13391_v5 = vsub.f32 0.0, %v10433_v23  ;;  %vm13392_vm4 = vcmp.eq.f32.partialorder %v10474_v61, 1.0  ;;  %v13543_v0 = vld [vmem:[#allocation4_spill] sm:$0xff] }
 0x239   : > { %v2285_v39 = vsel %vm2029_vm6, %v13384_v50, %v2253_v52  ;;  %v2258_v24 = vsel %vm13387_vm2, %v13386_v11, %v10433_v23  ;;  %vm13390_vm6 = vcmp.eq.f32.partialorder %v10446_v51, 0.0  ;;  %v8177_v51 = vld [vmem:[%s13002_s7 + $0x30] ss:$8 sps:$4 sm:$0xff]   ;;  %vm13394_vm8 = vcmp.eq.f32.partialorder %v10474_v61, 0.0  ;;  %v8147_v52 = vld [vmem:[%s13000_s5 + $0x11c] ss:$8 sps:$4 sm:$0xff]  }
 0x23a   : > { %7373 = vmatmul.mubr.msk.bf16.vlgmr.msra.gmra.mrb[0].mxu0 %vm2702_vm15, %v8126_v8  ;;  %v2251_v8 = vsel %vm13376_vm7, %v13375_v53, %v10449_v29  ;;  %v10749_v36 = vsel %vm13390_vm6, %v10464_v6, %v2285_v39  ;;  %vm13393_vm7 = vcmp.eq.f32.partialorder %v10457_v7, 0.0  ;;  %v8131_v23 = vld [vmem:[%s13000_s5 + $0xd8] ss:$8 sps:$4 sm:$0xff]   ;;  %3474 = vmatpush1.bf16.msra.mxu1 %v8177_v51  ;;  %v8149_v39 = vld [vmem:[%s13000_s5 + $0x128] ss:$8 sps:$4 sm:$0xff]   ;;  %vm13409_vm9 = vcmask 424960  }
 0x23b   : > { %3026 = vmatpush1.bf16.msra.mxu0 %v8123_v20  ;;  %2769 = vmatprep.mubr.bf16.mxu0 %v13364_v56  ;;  %v8133_v20 = vld [vmem:[%s13000_s5 + $0xdc] ss:$8 sps:$4 sm:$0xff]   ;;  %v2283_v34 = vsel %vm13382_vm12, %v13381_v22, %v2251_v8  ;;  %v8138_v53 = vld [vmem:[%s13000_s5 + $0xf8] ss:$8 sps:$4 sm:$0xff]   ;;  %v8144_v8 = vld [vmem:[%s13000_s5 + $0x10c] ss:$8 sps:$4 sm:$0xff]  }
 0x23c   : > { %3027 = vmatprep.subr.bf16.mxu0 %v8129_v42  ;;  %v2256_v42 = vsel %vm2064_vm10, %v13383_v25, %v10297_v45  ;;  %v10734_v29 = vsel %vm13385_vm13, %v10459_v54, %v2283_v34  ;;  %vm13389_vm10 = vcmp.eq.f32.partialorder %v10457_v7, 1.0  ;;  %v2290_v54 = vsel %vm13392_vm4, %v13391_v5, %v2258_v24  ;;  %v8141_v22 = vld [vmem:[%s8756_s23 + $0x18] sm:$0xff]   ;;  %v8192_v50 = vld [vmem:[%s13002_s7 + $0x80] ss:$8 sps:$4 sm:$0xff]   ;;  %v8158_v5 = vld [vmem:[%s13000_s5 + $0x14c] ss:$8 sps:$4 sm:$0xff]  }
 0x23d   : > { %v2288_v57 = vsel %vm13389_vm10, %v13388_v28, %v2256_v42  ;;  %v2255_v45 = vsel %vm2063_vm1, %v2127_v16, %v10560_v4  ;;  %v2876_v7 = vpack.c.bf16 %v10749_v36, %v10734_v29  ;;  %v10776_v6 = vsel %vm13394_vm8, %v10518_v43, %v2290_v54  ;;  %v8189_v34 = vld [vmem:[%s13002_s7 + $0x70] ss:$8 sps:$4 sm:$0xff]   ;;  %v8151_v42 = vld [vmem:[%s13000_s5 + $0x12c] ss:$8 sps:$4 sm:$0xff]   ;;  %v8155_v24 = vld [vmem:[%s13000_s5 + $0x13c] ss:$8 sps:$4 sm:$0xff]  }
 0x23e   : > { %v10758_v9 = vsel %vm13393_vm7, %v10516_v15, %v2288_v57  ;;  %v2257_v15 = vsel %vm2065_vm14, %v2129_v63, %v10567_v55  ;;  %v2287_v16 = vsel %vm2031_vm3, %v2095_v27, %v2255_v45  ;;  %v8178_v27 = vld [vmem:[%s13002_s7 + $0x44] ss:$8 sps:$4 sm:$0xff]   ;;  %vm13395_vm1 = vcmp.eq.f32.partialorder %v10571_v21, 0.0  ;;  %v8181_v21 = vld [vmem:[%s13002_s7 + $0x54] ss:$8 sps:$4 sm:$0xff]   ;;  %vm13441_vm8 = vmmov %vm13409_vm9 }
 0x23f   : > { %3028 = vmatpush1.bf16.msra.mxu0 %v8127_v26  ;;  %v2879_v43 = vpack.c.bf16 %v10776_v6, %v10758_v9  ;;  %v2289_v61 = vsel %vm2033_vm5, %v2097_v47, %v2257_v15  ;;  %v10799_v4 = vsel %vm1999_vm0, %v10573_v32, %v2287_v16  ;;  %v8134_v32 = vld [vmem:[%s13000_s5 + $0xe8] ss:$8 sps:$4 sm:$0xff]   ;;  %3475 = vmatprep.subr.bf16.mxu1 %v8178_v27  ;;  %v8145_v25 = vld [vmem:[%s13000_s5 + $0x118] ss:$8 sps:$4 sm:$0xff]   ;;  %v8193_v11 = vld [vmem:[%s13002_s7 + $0x94] ss:$8 sps:$4 sm:$0xff]  }
 0x240   : > { %3029 = vmatprep.subr.bf16.mxu0 %v8133_v20  ;;  %v10807_v63 = vsel %vm13395_vm1, %v10575_v48, %v2289_v61  ;;  %v8140_v48 = vld [vmem:[%s13000_s5 + $0xfc] ss:$8 sps:$4 sm:$0xff]   ;;  %v8137_v47 = vld [vmem:[%s8756_s23 + $0x10] sm:$0xff]   ;;  %3476 = vmatpush1.bf16.msra.mxu1 %v8180_v13  ;;  %v8186_v26 = vld [vmem:[%s13002_s7 + $0x60] ss:$8 sps:$4 sm:$0xff]   ;;  %vm13396_vm0 = vcmask 1041408  }
 0x241   : > { %v2878_v55 = vpack.c.bf16 %v10807_v63, %v10799_v4  ;;  %3477 = vmatprep.subr.bf16.mxu1 %v8181_v21  ;;  %v8142_v20 = vld [vmem:[%s13000_s5 + $0x108] ss:$8 sps:$4 sm:$0xff]   ;;  %v8148_v28 = vld [vmem:[%s8756_s23 + $0x20] sm:$0xff]   ;;  %vm13397_vm14 = vmmov %vm13396_vm0 }
 0x242   : > { %7374 = vmatmul.mubr.msk.bf16.gmra.mrb[4].mxu0 %vm2702_vm15, %v8130_v1  ;;  %v8195_v57 = vld [vmem:[%s13002_s7 + $0x90] ss:$8 sps:$4 sm:$0xff]   ;;  %v8196_v54 = vld [vmem:[%s13002_s7 + $0xa4] ss:$8 sps:$4 sm:$0xff]   ;;  %v8198_v45 = vld [vmem:[%s13002_s7 + $0xa0] ss:$8 sps:$4 sm:$0xff]  }
 0x243   : > { %3030 = vmatpush1.bf16.msra.mxu0 %v8131_v23  ;;  %2779 = vmatprep.mubr.bf16.mxu0 %v13364_v56  ;;  %v8153_v1 = vld [vmem:[%s13000_s5 + $0x138] ss:$8 sps:$4 sm:$0xff]   ;;  %v8156_v51 = vld [vmem:[%s13000_s5 + $0x148] ss:$8 sps:$4 sm:$0xff]   ;;  %v8199_v23 = vld [vmem:[%s13002_s7 + $0xb4] ss:$8 sps:$4 sm:$0xff]  }
 0x244   : > { %3031 = vmatprep.subr.bf16.mxu0 %v8136_v35  ;;  %3478 = vmatpush1.bf16.msra.mxu1 %v8183_v10  ;;  %v8162_v15 = vld [vmem:[%s13000_s5 + $0x15c] ss:$8 sps:$4 sm:$0xff]   ;;  %v7403_v16 = vld [vmem:[%s13000_s5 + $0x168] sm:$0x33]  ;;  %v8201_v61 = vld [vmem:[%s13002_s7 + $0xb0] ss:$8 sps:$4 sm:$0xff]  }
 0x245   : > { %3479 = vmatprep.subr.bf16.mxu1 %v8184_v59  ;;  %v8152_v35 = vld [vmem:[%s8756_s23 + $0x28] sm:$0xff]   ;;  %v8160_v27 = vld [vmem:[%s13000_s5 + $0x158] ss:$8 sps:$4 sm:$0xff]   ;;  %v7427_v13 = vcombine.high %v7403_v16, %v7403_v16 }
 0x246   : > { %v8202_v21 = vld [vmem:[%s13002_s7 + $0xc4] ss:$8 sps:$4 sm:$0xff]   ;;  %v13398_v59 = vld [vmem:[#allocation33_spill] sm:$0xff] }
 0x247   : > { %3032 = vmatpush1.bf16.msra.mxu0 %v8134_v32  ;;  %v7426_v32 = vcombine.low %v7403_v16, %v7403_v16 }
 0x248   : > { %3033 = vmatprep.subr.bf16.mxu0 %v8140_v48  ;;  %3480 = vmatpush1.bf16.msra.mxu1 %v8186_v26  ;;  %v8204_v48 = vld [vmem:[%s13002_s7 + $0xc0] ss:$8 sps:$4 sm:$0xff]   ;;  %v13399_v26 = vld [vmem:[#allocation36_spill] sm:$0xff] }
 0x249   : > { %3481 = vmatprep.subr.bf16.mxu1 %v8187_v17  ;;  %v3020_v10 = vsel %vm13397_vm14, %v7426_v32, 0  ;;  %v13401_v17 = vld [vmem:[#allocation35_spill] sm:$0xff]  ;;  %v13429_v32 = vld [vmem:[#allocation38_spill] sm:$0xff] }
 0x24a   : > { %7375 = vmatmul.mubr.msk.bf16.gmra.mrb[8].mxu0 %vm2702_vm15, %v8137_v47  ;;  %v8205_v47 = vld [vmem:[%s13002_s7 + $0xd4] ss:$8 sps:$4 sm:$0xff]   ;;  %vm13402_vm3 = vcmp.eq.f32.partialorder %v13401_v17, 2.0  ;;  %vm13411_vm11 = vcmp.eq.f32.partialorder %v13401_v17, 1.0  ;;  %vm13414_vm12 = vcmp.eq.f32.partialorder %v13401_v17, 0.0  ;;  %vm13430_vm6 = vcmp.eq.f32.partialorder %v13429_v32, 2.0 }
 0x24b   : > { %3034 = vmatpush1.bf16.msra.mxu0 %v8138_v53  ;;  %2789 = vmatprep.mubr.bf16.mxu0 %v13364_v56  ;;  %v8159_v53 = vld [vmem:[%s8756_s23 + $0x30] sm:$0xff]   ;;  %v13439_v17 = vld [vmem:[#allocation13_spill] sm:$0xff] }
 0x24c   : > { %3035 = vmatprep.subr.bf16.mxu0 %v8144_v8  ;;  %3482 = vmatpush1.bf16.msra.mxu1 %v8189_v34  ;;  %v8163_v8 = vld [vmem:[%s8756_s23 + $0x38] sm:$0xff]   ;;  %v13404_v34 = vld [vmem:[#allocation34_spill] sm:$0xff]  ;;  %vm13440_vm7 = vcmp.eq.f32.partialorder %v13439_v17, 2.0  ;;  %s7946_s23 = sshll.u32 %s13549_s15, 4 }
 0x24d   : > { %3483 = vmatprep.subr.bf16.mxu1 %v8190_v58  ;;  %s11845_s19 = scalar_lea.vmem %s12997_s2, %s7946_s23 }
 0x24f   : > { %3036 = vmatpush1.bf16.msra.mxu0 %v8142_v20  ;;  %v13400_v20 = vsub.f32 0.0, %v13399_v26 }
 0x250   : > { %3037 = vmatprep.subr.bf16.mxu0 %v8147_v52  ;;  %3484 = vmatpush1.bf16.msra.mxu1 %v8192_v50  ;;  %v13408_v50 = vpack.c.bf16 %v13363_v38, %v13362_v18  ;;  %v13418_v18 = vld [vmem:[#allocation39_spill] sm:$0xff] }
 0x251   : > { %3485 = vmatprep.subr.bf16.mxu1 %v8193_v11  ;;  %v2234_v52 = vsel %vm13402_vm3, %v13400_v20, %v13398_v59  ;;  %vm13419_vm13 = vcmp.eq.f32.partialorder %v13418_v18, 2.0  ;;  %vm13435_vm4 = vcmp.eq.f32.partialorder %v13418_v18, 1.0  ;;  %vm13446_vm14 = vcmp.eq.f32.partialorder %v13418_v18, 0.0 }
 0x252   : > { %7376 = vmatmul.mubr.msk.bf16.gmra.mrb[12].mxu0 %vm2702_vm15, %v8141_v22  ;;  %v13403_v22 = vld [vmem:[#allocation32_spill] sm:$0xff]  ;;  %vm13448_vm3 = vcmp.eq.f32.partialorder %v13439_v17, 1.0 }
 0x253   : > { %2799 = vmatprep.mubr.bf16.mxu0 %v13364_v56  ;;  %3038 = vmatpush1.bf16.msra.mxu0 %v8145_v25  ;;  %v13405_v25 = vsub.f32 0.0, %v13404_v34  ;;  %v13412_v11 = vsub.f32 0.0, %v13403_v22 }
 0x254   : > { %3039 = vmatprep.subr.bf16.mxu0 %v8151_v42  ;;  %3486 = vmatpush1.bf16.msra.mxu1 %v8195_v57  ;;  %v13406_v42 = vld [vmem:[#allocation31_spill] sm:$0xff]  ;;  %v13415_v57 = vld [vmem:[#allocation41_spill] sm:$0xff] }
 0x255   : > { %3487 = vmatprep.subr.bf16.mxu1 %v8196_v54  ;;  %vm13407_vm5 = vcmp.eq.f32.partialorder %v13406_v42, 2.0  ;;  %vm13420_vm2 = vcmp.eq.f32.partialorder %v13406_v42, 0.0 }
 0x256   : > { %v2232_v58 = vsel %vm13407_vm5, %v13405_v25, %v13403_v22 }
 0x257   : > { %3040 = vmatpush1.bf16.msra.mxu0 %v8149_v39 }
 0x258   : > { %3041 = vmatprep.subr.bf16.mxu0 %v8155_v24  ;;  %3488 = vmatpush1.bf16.msra.mxu1 %v8198_v45  ;;  %v13421_v45 = vld [vmem:[#allocation17_spill] sm:$0xff] }
 0x259   : > { %3489 = vmatprep.subr.bf16.mxu1 %v8199_v23  ;;  %v13442_v22 = vsub.f32 0.0, %v13421_v45 }
 0x25a   : > { %7377 = vmatmul.mubr.msk.bf16.gmra.mrb[16].mxu0 %vm2702_vm15, %v8148_v28 }
 0x25b   : > { %2809 = vmatprep.mubr.bf16.mxu0 %v13364_v56  ;;  %3042 = vmatpush1.bf16.msra.mxu0 %v8153_v1  ;;  %v13416_v1 = vld [vmem:[#allocation43_spill] sm:$0xff] }
 0x25c   : > { %3043 = vmatprep.subr.bf16.mxu0 %v8158_v5  ;;  %3490 = vmatpush1.bf16.msra.mxu1 %v8201_v61  ;;  %v13417_v5 = vsub.f32 0.0, %v13416_v1  ;;  %v13426_v61 = vld [vmem:[#allocation40_spill] sm:$0xff] }
 0x25d   : > { %3491 = vmatprep.subr.bf16.mxu1 %v8202_v21  ;;  %v13444_v25 = vsub.f32 0.0, %v13426_v61 }
 0x25e   : > { %v2233_v38 = vsel %vm13419_vm13, %v13417_v5, %v13415_v57  ;;  %v13454_v5 = vld [vmem:[#allocation45_spill] sm:$0xff] }
 0x25f   : > { %3044 = vmatpush1.bf16.msra.mxu0 %v8156_v51  ;;  %v13422_v51 = vld [vmem:[#allocation44_spill] sm:$0xff] }
 0x260   : > { %3045 = vmatprep.subr.bf16.mxu0 %v8162_v15  ;;  %3492 = vmatpush1.bf16.msra.mxu1 %v8204_v48  ;;  %v13423_v23 = vsub.f32 0.0, %v13422_v51  ;;  %v13424_v15 = vld [vmem:[#allocation19_spill] sm:$0xff]  ;;  %v13431_v48 = vld [vmem:[#allocation29_spill] sm:$0xff] }
 0x261   : > { %3493 = vmatprep.subr.bf16.mxu1 %v8205_v47  ;;  %vm13425_vm10 = vcmp.eq.f32.partialorder %v13424_v15, 2.0  ;;  %v13432_v47 = vld [vmem:[#allocation28_spill] sm:$0xff]  ;;  %vm13443_vm1 = vcmp.eq.f32.partialorder %v13424_v15, 1.0  ;;  %vm13449_vm5 = vcmp.eq.f32.partialorder %v13424_v15, 0.0  ;;  %v13460_v15 = vld [vmem:[#allocation51_spill] sm:$0xff] }
 0x262   : > { %7378 = vmatmul.mubr.msk.bf16.gmra.mrb[20].mxu0 %vm2702_vm15, %v8152_v35  ;;  %v2238_v16 = vsel %vm13425_vm10, %v13423_v23, %v13421_v45  ;;  %v13458_v45 = vld [vmem:[#allocation53_spill] sm:$0xff] }
 0x263   : > { %2819 = vmatprep.mubr.bf16.mxu0 %v13364_v56  ;;  %3046 = vmatpush1.bf16.msra.mxu0 %v8160_v27  ;;  %v13427_v27 = vld [vmem:[#allocation42_spill] sm:$0xff]  ;;  %v13459_v23 = vsub.f32 0.0, %v13458_v45 }
 0x264   : > { %7428 = vmatprep.subr.msk.bf16.mxu0 %vm13396_vm0, %v7427_v13  ;;  %v13428_v13 = vsub.f32 0.0, %v13427_v27  ;;  %vm13445_vm0 = vcmp.eq.f32.partialorder %v13429_v32, 1.0 }
 0x266   : > { %v2231_v21 = vsel %vm13430_vm6, %v13428_v13, %v13426_v61  ;;  %v13463_v61 = vld [vmem:[#allocation48_spill] sm:$0xff]  ;;  %v13465_v13 = vld [vmem:[#allocation7_spill] sm:$0xff]  ;;  %vm13474_vm6 = vmmov %vm13441_vm8 }
 0x267   : > { %3048 = vmatpush1.bf16.msra.mxu0 %v3020_v10  ;;  %v13433_v10 = vpack.c.bf16 %v13431_v48, %v13432_v47  ;;  %vm13466_vm13 = vcmp.eq.f32.partialorder %v13465_v13, 2.0  ;;  %v13469_v47 = vld [vmem:[#allocation27_spill] sm:$0xff] }
 0x26a   : > { %7379 = vmatmul.mubr.msk.bf16.gmra.mrb[24].mxu0 %vm2702_vm15, %v8159_v53  ;;  %v13434_v53 = vsub.f32 0.0, %v13415_v57 }
 0x26b   : > { %2829 = vmatprep.mubr.bf16.mxu0 %v13364_v56  ;;  %v13410_v56 = vsub.f32 0.0, %v13398_v59  ;;  %v13436_v59 = vld [vmem:[#allocation9_spill] sm:$0xff] }
 0x26d   : > { %v2266_v39 = vsel %vm13411_vm11, %v13410_v56, %v2234_v52  ;;  %vm13455_vm11 = vcmp.eq.f32.partialorder %v13454_v5, 2.0 }
 0x26e   : > { %v2298_v28 = vsel %vm13414_vm12, %v13399_v26, %v2266_v39  ;;  %v13437_v26 = vld [vmem:[#allocation11_spill] sm:$0xff]  ;;  %vm13461_vm12 = vcmp.eq.f32.partialorder %v13460_v15, 2.0 }
 0x26f   : > { %v13438_v20 = vsub.f32 0.0, %v13437_v26 }
 0x271   : > { %v2236_v52 = vsel %vm13440_vm7, %v13438_v20, %v13436_v59  ;;  %vm13478_vm7 = vcmp.eq.f32.partialorder %v13465_v13, 1.0 }
 0x272   : > { %7380 = vmatmul.mubr.msk.bf16.gmra.mrb[28].mxu0 %vm2702_vm15, %v8163_v8  ;;  %vm13413_vm15 = vcmp.eq.f32.partialorder %v13406_v42, 1.0  ;;  %v2265_v8 = vsel %vm13435_vm4, %v13434_v53, %v2233_v38  ;;  %v2263_v42 = vsel %vm13445_vm0, %v13444_v25, %v2231_v21  ;;  %vm13476_vm4 = vcmp.eq.f32.partialorder %v13460_v15, 1.0 }
 0x273   : > { %7429 = vmatprep.mubr.msk.bf16.mxu0 %vm13409_vm9, %v13408_v50  ;;  %v2264_v24 = vsel %vm13413_vm15, %v13412_v11, %v2232_v58  ;;  %v2297_v58 = vsel %vm13446_vm14, %v13416_v1, %v2265_v8  ;;  %v13447_v50 = vsub.f32 0.0, %v13436_v59  ;;  %vm13450_vm9 = vcmp.eq.f32.partialorder %v13429_v32, 0.0  ;;  %v13472_v8 = vld [vmem:[#allocation10_spill] sm:$0xff] }
 0x274   : > { %v2296_v54 = vsel %vm13420_vm2, %v13404_v34, %v2264_v24  ;;  %v2270_v34 = vsel %vm13443_vm1, %v13442_v22, %v2238_v16  ;;  %v2295_v11 = vsel %vm13450_vm9, %v13427_v27, %v2263_v42  ;;  %v13451_v24 = vld [vmem:[#allocation47_spill] sm:$0xff]  ;;  %vm13456_vm15 = vcmp.eq.f32.partialorder %v13439_v17, 0.0 }
 0x275   : > { %v2867_v35 = vpack.c.bf16 %v2298_v28, %v2296_v54  ;;  %v2268_v56 = vsel %vm13448_vm3, %v13447_v50, %v2236_v52  ;;  %v2302_v39 = vsel %vm13449_vm5, %v13422_v51, %v2270_v34  ;;  %v13452_v28 = vld [vmem:[#allocation49_spill] sm:$0xff]  ;;  %v2866_v1 = vpack.c.bf16 %v2297_v58, %v2295_v11  ;;  %v13457_v54 = vld [vmem:[#allocation30_spill] sm:$0xff] }
 0x276   : > { %v13453_v57 = vsub.f32 0.0, %v13452_v28  ;;  %v2300_v38 = vsel %vm13456_vm15, %v13437_v26, %v2268_v56  ;;  %v2242_v51 = vsel %vm13461_vm12, %v13459_v23, %v13457_v54  ;;  %v13464_v27 = vsub.f32 0.0, %v13463_v61  ;;  %v13495_v23 = vld [vmem:[#allocation18_spill] sm:$0xff] }
 0x277   : > { %v2869_v16 = vpack.c.bf16 %v2302_v39, %v2300_v38  ;;  %v13467_v21 = vsub.f32 0.0, %v13451_v24  ;;  %vm13468_vm2 = vcmp.eq.f32.partialorder %v13454_v5, 1.0  ;;  %vm13473_vm10 = vcmp.eq.f32.partialorder %v13472_v8, 2.0  ;;  %v13492_v38 = vld [vmem:[#allocation20_spill] sm:$0xff] }
 0x278   : > { %v2237_v18 = vsel %vm13455_vm11, %v13453_v57, %v13451_v24  ;;  %v13475_v26 = vsub.f32 0.0, %v13457_v54  ;;  %v13480_v34 = vsub.f32 0.0, %v13469_v47  ;;  %vm13481_vm1 = vcmp.eq.f32.partialorder %v13472_v8, 1.0  ;;  %v13487_v24 = vld [vmem:[#allocation6_spill] sm:$0xff] }
 0x279   : > { %v2269_v48 = vsel %vm13468_vm2, %v13467_v21, %v2237_v18  ;;  %vm13482_vm0 = vcmp.eq.f32.partialorder %v13460_v15, 0.0  ;;  %vm13483_vm14 = vcmp.eq.f32.partialorder %v13465_v13, 0.0  ;;  %v13484_v50 = vsub.f32 0.0, %v9977_v30  ;;  %v13493_v54 = vld [vmem:[#allocation22_spill] sm:$0xff] }
 0x27a   : > { %3058 = vmatmul.mubr.bf16.vlgmr.msra.gmra.mrb[0].mxu0 %v13433_v10  ;;  %v13470_v10 = vld [vmem:[#allocation52_spill] sm:$0xff]  ;;  %v2274_v20 = vsel %vm13476_vm4, %v13475_v26, %v2242_v51  ;;  %vm13485_vm3 = vcmp.eq.f32.partialorder %v9932_v2, 2.0  ;;  %vm13486_vm5 = vcmp.eq.f32.partialorder %v13472_v8, 0.0  ;;  %vm13496_vm11 = vcmp.eq.f32.partialorder %v13495_v23, 2.0  ;;  %v13502_v13 = vld [vmem:[#allocation26_spill] sm:$0xff] }
 0x27b   : > { %7430 = vmatprep.mubr.msk.bf16.mxu0 %vm13441_vm8, %v2867_v35  ;;  %v13462_v35 = vld [vmem:[#allocation46_spill] sm:$0xff]  ;;  %v13471_v53 = vsub.f32 0.0, %v13470_v10  ;;  %vm13479_vm8 = vcmp.eq.f32.partialorder %v13454_v5, 0.0  ;;  %v2306_v42 = vsel %vm13482_vm0, %v13458_v45, %v2274_v20  ;;  %v2241_v56 = vsel %vm13485_vm3, %v13484_v50, %v9962_v12  ;;  %v13490_v5 = vld [vmem:[#allocation21_spill] sm:$0xff] }
 0x27c   : > { %v2235_v32 = vsel %vm13466_vm13, %v13464_v27, %v13462_v35  ;;  %v13477_v17 = vsub.f32 0.0, %v13462_v35  ;;  %v2301_v22 = vsel %vm13479_vm8, %v13452_v28, %v2269_v48  ;;  %v13488_v28 = vld [vmem:[#allocation54_spill] sm:$0xff]  ;;  %vm13491_vm9 = vcmp.eq.f32.partialorder %v13490_v5, 2.0  ;;  %v13499_v35 = vld [vmem:[#allocation12_spill] sm:$0xff]  ;;  %vm13504_vm13 = vmmov %vm13474_vm6 }
 0x27d   : > { %v2240_v59 = vsel %vm13473_vm10, %v13471_v53, %v13469_v47  ;;  %v13489_v57 = vsub.f32 0.0, %v13488_v28  ;;  %v13494_v45 = vsub.f32 0.0, %v13493_v54  ;;  %v13497_v51 = vsub.f32 0.0, %v9962_v12 }
 0x27e   : > { %v2267_v52 = vsel %vm13478_vm7, %v13477_v17, %v2235_v32  ;;  %v2272_v25 = vsel %vm13481_vm1, %v13480_v34, %v2240_v59  ;;  %vm13498_vm15 = vcmp.eq.f32.partialorder %v9932_v2, 1.0  ;;  %vm13503_vm12 = vcmp.eq.f32.partialorder %v13502_v13, 2.0 }
 0x27f   : > { %v2299_v58 = vsel %vm13483_vm14, %v13463_v61, %v2267_v52  ;;  %v2304_v11 = vsel %vm13486_vm5, %v13470_v10, %v2272_v25  ;;  %v2246_v18 = vsel %vm13491_vm9, %v13489_v57, %v13487_v24  ;;  %v2239_v15 = vsel %vm13496_vm11, %v13494_v45, %v13492_v38  ;;  %v13500_v61 = vld [vmem:[#allocation23_spill] sm:$0xff]  ;;  %vm13529_vm11 = vmmov %vm13504_vm13 }
 0x280   : > { %v2868_v39 = vpack.c.bf16 %v2301_v22, %v2299_v58  ;;  %v13501_v27 = vsub.f32 0.0, %v13500_v61  ;;  %v13505_v21 = vsub.f32 0.0, %v13487_v24  ;;  %vm13506_vm2 = vcmp.eq.f32.partialorder %v13490_v5, 1.0 }
 0x281   : > { %v13507_v47 = vsub.f32 0.0, %v13492_v38  ;;  %vm13508_vm10 = vcmp.eq.f32.partialorder %v13495_v23, 1.0  ;;  %v13510_v53 = vsub.f32 0.0, %v13499_v35  ;;  %vm13511_vm4 = vcmp.eq.f32.partialorder %v13502_v13, 1.0 }
 0x282   : > { %3068 = vmatmul.mubr.bf16.gmra.mrb[4].mxu0 %v2866_v1  ;;  %v2871_v1 = vpack.c.bf16 %v2306_v42, %v2304_v11  ;;  %v2244_v32 = vsel %vm13503_vm12, %v13501_v27, %v13499_v35  ;;  %v2278_v48 = vsel %vm13506_vm2, %v13505_v21, %v2246_v18  ;;  %vm13512_vm7 = vcmp.eq.f32.partialorder %v13490_v5, 0.0  ;;  %v13520_v42 = vld [vmem:[#allocation16_spill] sm:$0xff]  ;;  %v13525_v11 = vld [vmem:[#allocation14_spill] sm:$0xff] }
 0x283   : > { %7431 = vmatprep.mubr.msk.bf16.mxu0 %vm13474_vm6, %v2869_v16  ;;  %v2273_v16 = vsel %vm13498_vm15, %v13497_v51, %v2241_v56  ;;  %v2271_v12 = vsel %vm13508_vm10, %v13507_v47, %v2239_v15  ;;  %vm13509_vm6 = vcmp.eq.f32.partialorder %v9932_v2, 0.0  ;;  %v2276_v8 = vsel %vm13511_vm4, %v13510_v53, %v2244_v32  ;;  %v8214_v21 = vld [vmem:[%s13002_s7 + $0x100] ss:$8 sps:$4 sm:$0xff]  }
 0x284   : > { %v2305_v10 = vsel %vm13509_vm6, %v9977_v30, %v2273_v16  ;;  %v2310_v59 = vsel %vm13512_vm7, %v13488_v28, %v2278_v48  ;;  %vm13513_vm8 = vcmp.eq.f32.partialorder %v13495_v23, 0.0  ;;  %v13514_v20 = vsub.f32 0.0, %v10198_v14  ;;  %v13527_v28 = vld [vmem:[#allocation37_spill] sm:$0xff]  ;;  %vm13540_vm7 = vmmov %vm13529_vm11 }
 0x285   : > { %v2303_v26 = vsel %vm13513_vm8, %v13493_v54, %v2271_v12  ;;  %vm13515_vm1 = vcmp.eq.f32.partialorder %v10158_v33, 2.0  ;;  %vm13516_vm0 = vcmp.eq.f32.partialorder %v13502_v13, 0.0  ;;  %v13517_v52 = vsub.f32 0.0, %v10250_v31  ;;  %vm13541_vm8 = vmmov %vm13540_vm7  ;;  %v8219_v12 = vld [vmem:[%s13002_s7 + $0x114] ss:$8 sps:$4 sm:$0xff]  }
 0x286   : > { %v2245_v2 = vsel %vm13515_vm1, %v13514_v20, %v10178_v60  ;;  %v2870_v30 = vpack.c.bf16 %v2305_v10, %v2303_v26  ;;  %v2308_v17 = vsel %vm13516_vm0, %v13500_v61, %v2276_v8  ;;  %vm13518_vm14 = vcmp.eq.f32.partialorder %v10205_v46, 2.0  ;;  %vm13542_vm1 = vmmov %vm13540_vm7  ;;  %v8217_v20 = vld [vmem:[%s13002_s7 + $0x110] ss:$8 sps:$4 sm:$0xff]  }
 0x287   : > { %v2250_v22 = vsel %vm13518_vm14, %v13517_v52, %v9936_v37  ;;  %v2873_v34 = vpack.c.bf16 %v2310_v59, %v2308_v17  ;;  %v13519_v25 = vsub.f32 0.0, %v10190_v19  ;;  %vm13521_vm3 = vcmp.eq.f32.partialorder %v13520_v42, 2.0  ;;  %v8222_v17 = vld [vmem:[%s13002_s7 + $0x124] ss:$8 sps:$4 sm:$0xff]  }
 0x288   : > { %v13522_v50 = vsub.f32 0.0, %v10178_v60  ;;  %vm13523_vm5 = vcmp.eq.f32.partialorder %v10158_v33, 1.0  ;;  %v13526_v24 = vsub.f32 0.0, %v13525_v11  ;;  %vm13528_vm9 = vcmp.eq.f32.partialorder %v13527_v28, 2.0 }
 0x289   : > { %v2243_v58 = vsel %vm13521_vm3, %v13519_v25, %v10174_v49  ;;  %v13530_v5 = vsub.f32 0.0, %v9936_v37  ;;  %vm13531_vm15 = vcmp.eq.f32.partialorder %v10205_v46, 1.0  ;;  %vm13533_vm12 = vcmp.eq.f32.partialorder %v13520_v42, 1.0 }
 0x28a   : > { %3078 = vmatmul.mubr.bf16.gmra.mrb[8].mxu0 %v2868_v39  ;;  %v2277_v56 = vsel %vm13523_vm5, %v13522_v50, %v2245_v2  ;;  %v13524_v39 = vld [vmem:[#allocation50_spill] sm:$0xff]  ;;  %vm13536_vm2 = vcmp.eq.f32.partialorder %v13527_v28, 1.0  ;;  %vm13537_vm10 = vcmp.eq.f32.partialorder %v10205_v46, 0.0  ;;  %vm13538_vm6 = vcmp.eq.f32.partialorder %v13520_v42, 0.0 }
 0x28b   : > { %7432 = vmatprep.mubr.msk.bf16.mxu0 %vm13504_vm13, %v2871_v1  ;;  %v2248_v57 = vsel %vm13528_vm9, %v13526_v24, %v13524_v39  ;;  %v2282_v18 = vsel %vm13531_vm15, %v13530_v5, %v2250_v22  ;;  %v13532_v1 = vsub.f32 0.0, %v10174_v49  ;;  %vm13534_vm13 = vcmp.eq.f32.partialorder %v10158_v33, 0.0  ;;  %v8210_v46 = vld [vmem:[%s13002_s7 + $0xe0] ss:$8 sps:$4 sm:$0xff]  }
 0x28c   : > { %v2309_v38 = vsel %vm13534_vm13, %v10198_v14, %v2277_v56  ;;  %v13535_v54 = vsub.f32 0.0, %v13524_v39  ;;  %v2314_v37 = vsel %vm13537_vm10, %v10250_v31, %v2282_v18  ;;  %vm13539_vm4 = vcmp.eq.f32.partialorder %v13527_v28, 0.0  ;;  %v8208_v14 = vld [vmem:[%s13002_s7 + $0xe4] ss:$8 sps:$4 sm:$0xff]   ;;  %v8211_v31 = vld [vmem:[%s13002_s7 + $0xf4] ss:$8 sps:$4 sm:$0xff]  }
 0x28d   : > { %v2275_v60 = vsel %vm13533_vm12, %v13532_v1, %v2243_v58  ;;  %v8220_v58 = vld [vmem:[%s13002_s7 + $0x120] ss:$8 sps:$4 sm:$0xff]   ;;  %v8225_v39 = vld [vmem:[%s13002_s7 + $0x134] ss:$8 sps:$4 sm:$0xff]   ;;  %v8223_v18 = vld [vmem:[%s13002_s7 + $0x130] ss:$8 sps:$4 sm:$0xff]  }
 0x28e   : > { %v2280_v45 = vsel %vm13536_vm2, %v13535_v54, %v2248_v57  ;;  %v2307_v49 = vsel %vm13538_vm6, %v10190_v19, %v2275_v60  ;;  %v8207_v19 = vld [vmem:[%s13002_s7 + $0xd0] ss:$8 sps:$4 sm:$0xff]   ;;  %vm7217_vm0 = vcmask 31744  }
 0x28f   : > { %v2872_v23 = vpack.c.bf16 %v2309_v38, %v2307_v49  ;;  %v2312_v15 = vsel %vm13539_vm4, %v13525_v11, %v2280_v45  ;;  %3494 = vmatpush1.bf16.msra.mxu1 %v8207_v19  ;;  %v8228_v38 = vld [vmem:[%s13002_s7 + $0x144] ss:$8 sps:$4 sm:$0xff]  }
 0x290   : > { %v2875_v33 = vpack.c.bf16 %v2314_v37, %v2312_v15  ;;  %3495 = vmatprep.subr.bf16.mxu1 %v8208_v14  ;;  %v8226_v15 = vld [vmem:[%s13002_s7 + $0x140] ss:$8 sps:$4 sm:$0xff]   ;;  %v8231_v14 = vld [vmem:[%s13002_s7 + $0x154] ss:$8 sps:$4 sm:$0xff]  }
 0x292   : > { %3088 = vmatmul.mubr.bf16.gmra.mrb[12].mxu0 %v2870_v30 }
 0x293   : > { %7433 = vmatprep.mubr.msk.bf16.mxu0 %vm13529_vm11, %v2873_v34  ;;  %3496 = vmatpush1.bf16.msra.mxu1 %v8210_v46 }
 0x294   : > { %3497 = vmatprep.subr.bf16.mxu1 %v8211_v31 }
 0x297   : > { %3498 = vmatpush1.bf16.msra.mxu1 %v8213_v3 }
 0x298   : > { %3834 = vmatprep.subr.bf16.mxu1 %v8216_v44 }
 0x29a   : > { %3098 = vmatmul.mubr.bf16.gmra.mrb[16].mxu0 %v2872_v23 }
 0x29b   : > { %7434 = vmatprep.mubr.msk.bf16.mxu0 %vm13540_vm7, %v2875_v33 }
 0x2a2   : > { %3108 = vmatmul.mubr.bf16.gmra.mrb[20].mxu0 %v2874_v41  ;;  %v3170_v41 = vld [vmem:[%s13003_s8] ss:$8 sm:$0x3] }
 0x2a3   : > { %7435 = vmatprep.mubr.msk.bf16.mxu0 %vm13541_vm8, %v2877_v40  ;;  %v11201_v62 = vrot.slane %v3170_v41, %v13543_v0  ;;  %v13544_v40 = vld [vmem:[#allocation3_spill] sm:$0xff] }
 0x2a4   : > { %v11204_v29 = vrot.slane %v3170_v41, %v13544_v40 }
 0x2aa   : > { %3118 = vmatmul.mubr.bf16.gmra.mrb[24].mxu0 %v2876_v7 }
 0x2ab   : > { %7436 = vmatprep.mubr.msk.bf16.mxu0 %vm13542_vm1, %v2879_v43 }
 0x2b2   : > { %3128 = vmatmul.mubr.bf16.gmra.mrb[28].mxu0 %v2878_v55 }
 0x34d   : > { %v3059_v36 = vpop.f32.mrb[0].mxu0 }
 0x34e   : > { %v3182_v9 = vadd.f32 %v11201_v62, %v3059_v36  ;;  %v3061_v7 = vpop.f32.mrb[1].mxu0  ;;  %v8229_v36 = vld [vmem:[%s13002_s7 + $0x150] ss:$8 sps:$4 sm:$0xff]  }
 0x34f   : > { %v3183_v6 = vadd.f32 %v11204_v29, %v3061_v7  ;;  %v3063_v43 = vpop.f32.mrb[2].mxu0 }
 0x350   : > { %v3184_v4 = vadd.f32 %v11201_v62, %v3063_v43  ;;  %v3065_v63 = vpop.f32.mrb[3].mxu0  ;;  %v3214_v51 = vmax.f32 %v3182_v9, 0.0 }
 0x351   : > { %v3185_v55 = vadd.f32 %v11204_v29, %v3065_v63  ;;  %v3215_v35 = vmax.f32 %v3183_v6, 0.0  ;;  %v8234_v6 = vld [vmem:[%s13002_s7 + $0x164] ss:$8 sps:$4 sm:$0xff]  }
 0x352   : > { %v3216_v16 = vmax.f32 %v3184_v4, 0.0 }
 0x353   : > { %v3217_v61 = vmax.f32 %v3185_v55, 0.0 }
 0x354   : > { %v3278_v27 = vpack.c.bf16 %v3216_v16, %v3214_v51  ;;  %v8232_v16 = vld [vmem:[%s13002_s7 + $0x160] ss:$8 sps:$4 sm:$0xff]  }
 0x355   : > { %v3069_v13 = vpop.f32.mrb[4].mxu0  ;;  %v3279_v32 = vpack.c.bf16 %v3217_v61, %v3215_v35 }
 0x356   : > { %v3186_v48 = vadd.f32 %v11201_v62, %v3069_v13  ;;  %v3071_v47 = vpop.f32.mrb[5].mxu0 }
 0x357   : > { %v3187_v10 = vadd.f32 %v11204_v29, %v3071_v47  ;;  %v3073_v53 = vpop.f32.mrb[6].mxu0  ;;  %3499 = vmatprep.mubr.bf16.mxu1 %v3279_v32 }
 0x358   : > { %v3188_v8 = vadd.f32 %v11201_v62, %v3073_v53  ;;  %v3075_v59 = vpop.f32.mrb[7].mxu0  ;;  %3500 = vmatmul.mubr.bf16.vlgmr.msra.gmra.mrb[0].mxu1 %v3278_v27  ;;  %v3218_v2 = vmax.f32 %v3186_v48, 0.0  ;;  %v8237_v27 = vld [vmem:[%s13002_s7 + $0x174] ss:$8 sps:$4 sm:$0xff]  }
 0x359   : > { %v3189_v26 = vadd.f32 %v11204_v29, %v3075_v59  ;;  %3835 = vmatpush1.bf16.msra.mxu1 %v8214_v21  ;;  %v3219_v52 = vmax.f32 %v3187_v10, 0.0 }
 0x35a   : > { %v3220_v30 = vmax.f32 %v3188_v8, 0.0  ;;  %3836 = vmatprep.subr.bf16.mxu1 %v8219_v12  ;;  %v8235_v12 = vld [vmem:[%s13002_s7 + $0x170] ss:$8 sps:$4 sm:$0xff]   ;;  %v8240_v8 = vld [vmem:[%s13002_s7 + $0x184] ss:$8 sps:$4 sm:$0xff]  }
 0x35b   : > { %v3221_v22 = vmax.f32 %v3189_v26, 0.0 }
 0x35c   : > { %v3280_v34 = vpack.c.bf16 %v3220_v30, %v3218_v2 }
 0x35d   : > { %v3281_v25 = vpack.c.bf16 %v3221_v22, %v3219_v52  ;;  %v3079_v42 = vpop.f32.mrb[8].mxu0  ;;  %3837 = vmatpush1.bf16.msra.mxu1 %v8217_v20 }
 0x35e   : > { %v3190_v50 = vadd.f32 %v11201_v62, %v3079_v42  ;;  %v3081_v56 = vpop.f32.mrb[9].mxu0  ;;  %3838 = vmatprep.subr.bf16.mxu1 %v8222_v17  ;;  %v8238_v17 = vld [vmem:[%s13002_s7 + $0x180] ss:$8 sps:$4 sm:$0xff]  }
 0x35f   : > { %v3191_v11 = vadd.f32 %v11204_v29, %v3081_v56  ;;  %v3083_v24 = vpop.f32.mrb[10].mxu0  ;;  %3509 = vmatprep.mubr.bf16.mxu1 %v3281_v25 }
 0x360   : > { %v3192_v28 = vadd.f32 %v11201_v62, %v3083_v24  ;;  %v3085_v57 = vpop.f32.mrb[11].mxu0  ;;  %3510 = vmatmul.mubr.bf16.gmra.mrb[4].mxu1 %v3280_v34  ;;  %v3222_v1 = vmax.f32 %v3190_v50, 0.0  ;;  %v8243_v34 = vld [vmem:[%s13002_s7 + $0x194] ss:$8 sps:$4 sm:$0xff]  }
 0x361   : > { %v3193_v5 = vadd.f32 %v11204_v29, %v3085_v57  ;;  %3839 = vmatpush1.bf16.msra.mxu1 %v8220_v58  ;;  %v3223_v54 = vmax.f32 %v3191_v11, 0.0 }
 0x362   : > { %v3224_v60 = vmax.f32 %v3192_v28, 0.0  ;;  %3840 = vmatprep.subr.bf16.mxu1 %v8225_v39  ;;  %v8241_v39 = vld [vmem:[%s13002_s7 + $0x190] ss:$8 sps:$4 sm:$0xff]   ;;  %v8246_v28 = vld [vmem:[%s13002_s7 + $0x1a4] ss:$8 sps:$4 sm:$0xff]  }
 0x363   : > { %v3225_v45 = vmax.f32 %v3193_v5, 0.0 }
 0x364   : > { %v3282_v37 = vpack.c.bf16 %v3224_v60, %v3222_v1 }
 0x365   : > { %v3283_v49 = vpack.c.bf16 %v3225_v45, %v3223_v54  ;;  %v3089_v23 = vpop.f32.mrb[12].mxu0  ;;  %3841 = vmatpush1.bf16.msra.mxu1 %v8223_v18 }
 0x366   : > { %v3194_v33 = vadd.f32 %v11201_v62, %v3089_v23  ;;  %v3091_v19 = vpop.f32.mrb[13].mxu0  ;;  %3842 = vmatprep.subr.bf16.mxu1 %v8228_v38  ;;  %v8244_v38 = vld [vmem:[%s13002_s7 + $0x1a0] ss:$8 sps:$4 sm:$0xff]  }
 0x367   : > { %v3195_v46 = vadd.f32 %v11204_v29, %v3091_v19  ;;  %v3093_v31 = vpop.f32.mrb[14].mxu0  ;;  %3519 = vmatprep.mubr.bf16.mxu1 %v3283_v49 }
 0x368   : > { %v3196_v3 = vadd.f32 %v11201_v62, %v3093_v31  ;;  %v3095_v44 = vpop.f32.mrb[15].mxu0  ;;  %3520 = vmatmul.mubr.bf16.gmra.mrb[8].mxu1 %v3282_v37  ;;  %v3226_v9 = vmax.f32 %v3194_v33, 0.0  ;;  %v8249_v37 = vld [vmem:[%s13002_s7 + $0x1b4] ss:$8 sps:$4 sm:$0xff]  }
 0x369   : > { %v3197_v41 = vadd.f32 %v11204_v29, %v3095_v44  ;;  %3843 = vmatpush1.bf16.msra.mxu1 %v8226_v15  ;;  %v3227_v43 = vmax.f32 %v3195_v46, 0.0 }
 0x36a   : > { %v3228_v7 = vmax.f32 %v3196_v3, 0.0  ;;  %3844 = vmatprep.subr.bf16.mxu1 %v8231_v14  ;;  %v8247_v14 = vld [vmem:[%s13002_s7 + $0x1b0] ss:$8 sps:$4 sm:$0xff]   ;;  %v8252_v3 = vld [vmem:[%s13002_s7 + $0x1c4] ss:$8 sps:$4 sm:$0xff]  }
 0x36b   : > { %v3229_v4 = vmax.f32 %v3197_v41, 0.0 }
 0x36c   : > { %v3284_v63 = vpack.c.bf16 %v3228_v7, %v3226_v9 }
 0x36d   : > { %v3285_v55 = vpack.c.bf16 %v3229_v4, %v3227_v43  ;;  %v3099_v51 = vpop.f32.mrb[16].mxu0  ;;  %3845 = vmatpush1.bf16.msra.mxu1 %v8229_v36 }
 0x36e   : > { %v3198_v35 = vadd.f32 %v11201_v62, %v3099_v51  ;;  %v3101_v61 = vpop.f32.mrb[17].mxu0  ;;  %3846 = vmatprep.subr.bf16.mxu1 %v8234_v6  ;;  %v8250_v6 = vld [vmem:[%s13002_s7 + $0x1c0] ss:$8 sps:$4 sm:$0xff]  }
 0x36f   : > { %v3199_v13 = vadd.f32 %v11204_v29, %v3101_v61  ;;  %v3103_v32 = vpop.f32.mrb[18].mxu0  ;;  %3529 = vmatprep.mubr.bf16.mxu1 %v3285_v55 }
 0x370   : > { %v3200_v21 = vadd.f32 %v11201_v62, %v3103_v32  ;;  %v3105_v48 = vpop.f32.mrb[19].mxu0  ;;  %3530 = vmatmul.mubr.bf16.gmra.mrb[12].mxu1 %v3284_v63  ;;  %v3230_v10 = vmax.f32 %v3198_v35, 0.0  ;;  %v8255_v63 = vld [vmem:[%s13002_s7 + $0x1d4] ss:$8 sps:$4 sm:$0xff]  }
 0x371   : > { %v3201_v47 = vadd.f32 %v11204_v29, %v3105_v48  ;;  %3847 = vmatpush1.bf16.msra.mxu1 %v8232_v16  ;;  %v3231_v59 = vmax.f32 %v3199_v13, 0.0 }
 0x372   : > { %v3232_v53 = vmax.f32 %v3200_v21, 0.0  ;;  %3848 = vmatprep.subr.bf16.mxu1 %v8237_v27  ;;  %v8253_v27 = vld [vmem:[%s13002_s7 + $0x1d0] ss:$8 sps:$4 sm:$0xff]  }
 0x373   : > { %v3233_v26 = vmax.f32 %v3201_v47, 0.0 }
 0x374   : > { %v3286_v20 = vpack.c.bf16 %v3232_v53, %v3230_v10  ;;  %v8261_v10 = vld [vmem:[%s13002_s7 + $0x1f4] ss:$8 sps:$4 sm:$0xff]   ;;  %v8259_v53 = vld [vmem:[%s13002_s7 + $0x1f0] ss:$8 sps:$4 sm:$0xff]  }
 0x375   : > { %v3287_v2 = vpack.c.bf16 %v3233_v26, %v3231_v59  ;;  %v3109_v30 = vpop.f32.mrb[20].mxu0  ;;  %3849 = vmatpush1.bf16.msra.mxu1 %v8235_v12  ;;  %v7437_v59 = vld [vmem:[%s13003_s8 + $0x1] ss:$8 sm:$0x3] }
 0x376   : > { %v3202_v52 = vadd.f32 %v11201_v62, %v3109_v30  ;;  %v3111_v22 = vpop.f32.mrb[21].mxu0  ;;  %3850 = vmatprep.subr.bf16.mxu1 %v8240_v8  ;;  %v8264_v8 = vld [vmem:[%s13002_s7 + $0x204] ss:$8 sps:$4 sm:$0xff]   ;;  %v11338_v26 = vrot.slane %v7437_v59, %v13543_v0 }
 0x377   : > { %v3203_v25 = vadd.f32 %v11204_v29, %v3111_v22  ;;  %v3113_v42 = vpop.f32.mrb[22].mxu0  ;;  %3539 = vmatprep.mubr.bf16.mxu1 %v3287_v2 }
 0x378   : > { %v3204_v58 = vadd.f32 %v11201_v62, %v3113_v42  ;;  %v3115_v50 = vpop.f32.mrb[23].mxu0  ;;  %3540 = vmatmul.mubr.bf16.gmra.mrb[16].mxu1 %v3286_v20  ;;  %v3234_v11 = vmax.f32 %v3202_v52, 0.0  ;;  %v11341_v20 = vrot.slane %v7437_v59, %v13544_v40 }
 0x379   : > { %v3205_v56 = vadd.f32 %v11204_v29, %v3115_v50  ;;  %3851 = vmatpush1.bf16.msra.mxu1 %v8238_v17  ;;  %v3235_v57 = vmax.f32 %v3203_v25, 0.0 }
 0x37a   : > { %v3236_v24 = vmax.f32 %v3204_v58, 0.0  ;;  %3852 = vmatprep.subr.bf16.mxu1 %v8243_v34 }
 0x37b   : > { %v3237_v5 = vmax.f32 %v3205_v56, 0.0 }
 0x37c   : > { %v3288_v18 = vpack.c.bf16 %v3236_v24, %v3234_v11 }
 0x37d   : > { %v3289_v1 = vpack.c.bf16 %v3237_v5, %v3235_v57  ;;  %v3119_v60 = vpop.f32.mrb[24].mxu0  ;;  %3853 = vmatpush1.bf16.msra.mxu1 %v8241_v39  ;;  %v8262_v57 = vld [vmem:[%s13002_s7 + $0x200] ss:$8 sps:$4 sm:$0xff]  }
 0x37e   : > { %v3206_v54 = vadd.f32 %v11201_v62, %v3119_v60  ;;  %v3121_v45 = vpop.f32.mrb[25].mxu0  ;;  %3854 = vmatprep.subr.bf16.mxu1 %v8246_v28 }
 0x37f   : > { %v3207_v49 = vadd.f32 %v11204_v29, %v3121_v45  ;;  %v3123_v23 = vpop.f32.mrb[26].mxu0  ;;  %3549 = vmatprep.mubr.bf16.mxu1 %v3289_v1  ;;  %v8267_v1 = vld [vmem:[%s13002_s7 + $0x214] ss:$8 sps:$4 sm:$0xff]  }
 0x380   : > { %v3208_v15 = vadd.f32 %v11201_v62, %v3123_v23  ;;  %v3125_v33 = vpop.f32.mrb[27].mxu0  ;;  %3550 = vmatmul.mubr.bf16.gmra.mrb[20].mxu1 %v3288_v18  ;;  %v3238_v46 = vmax.f32 %v3206_v54, 0.0 }
 0x381   : > { %v3209_v19 = vadd.f32 %v11204_v29, %v3125_v33  ;;  %3855 = vmatpush1.bf16.msra.mxu1 %v8244_v38  ;;  %v3239_v44 = vmax.f32 %v3207_v49, 0.0  ;;  %v8265_v49 = vld [vmem:[%s13002_s7 + $0x210] ss:$8 sps:$4 sm:$0xff]   ;;  %v8270_v33 = vld [vmem:[%s13002_s7 + $0x224] ss:$8 sps:$4 sm:$0xff]  }
 0x382   : > { %v3240_v31 = vmax.f32 %v3208_v15, 0.0  ;;  %3856 = vmatprep.subr.bf16.mxu1 %v8249_v37 }
 0x383   : > { %v3241_v41 = vmax.f32 %v3209_v19, 0.0 }
 0x384   : > { %v3290_v36 = vpack.c.bf16 %v3240_v31, %v3238_v46 }
 0x385   : > { %v3291_v9 = vpack.c.bf16 %v3241_v41, %v3239_v44  ;;  %v3129_v7 = vpop.f32.mrb[28].mxu0  ;;  %3857 = vmatpush1.bf16.msra.mxu1 %v8247_v14  ;;  %v8268_v44 = vld [vmem:[%s13002_s7 + $0x220] ss:$8 sps:$4 sm:$0xff]  }
 0x386   : > { %v3210_v43 = vadd.f32 %v11201_v62, %v3129_v7  ;;  %v3131_v4 = vpop.f32.mrb[29].mxu0  ;;  %3858 = vmatprep.subr.bf16.mxu1 %v8252_v3 }
 0x387   : > { %v3211_v55 = vadd.f32 %v11204_v29, %v3131_v4  ;;  %v3133_v51 = vpop.f32.mrb[30].mxu0  ;;  %3559 = vmatprep.mubr.bf16.mxu1 %v3291_v9  ;;  %v8273_v9 = vld [vmem:[%s13002_s7 + $0x234] ss:$8 sps:$4 sm:$0xff]  }
 0x388   : > { %v3212_v16 = vadd.f32 %v11201_v62, %v3133_v51  ;;  %v3135_v35 = vpop.f32.mrb[31].mxu0  ;;  %3560 = vmatmul.mubr.bf16.gmra.mrb[24].mxu1 %v3290_v36  ;;  %v3242_v13 = vmax.f32 %v3210_v43, 0.0  ;;  %v8256_v62 = vld [vmem:[%s13002_s7 + $0x1e0] ss:$8 sps:$4 sm:$0xff]  }
 0x389   : > { %v3213_v61 = vadd.f32 %v11204_v29, %v3135_v35  ;;  %3859 = vmatpush1.bf16.msra.mxu1 %v8250_v6  ;;  %v3243_v21 = vmax.f32 %v3211_v55, 0.0  ;;  %v8258_v29 = vld [vmem:[%s13002_s7 + $0x1e4] ss:$8 sps:$4 sm:$0xff]   ;;  %v8271_v55 = vld [vmem:[%s13002_s7 + $0x230] ss:$8 sps:$4 sm:$0xff]  }
 0x38a   : > { %v3244_v32 = vmax.f32 %v3212_v16, 0.0  ;;  %3860 = vmatprep.subr.bf16.mxu1 %v8255_v63  ;;  %v8276_v35 = vld [vmem:[%s13002_s7 + $0x244] ss:$8 sps:$4 sm:$0xff]  }
 0x38b   : > { %v3245_v48 = vmax.f32 %v3213_v61, 0.0 }
 0x38c   : > { %v3292_v47 = vpack.c.bf16 %v3244_v32, %v3242_v13 }
 0x38d   : > { %v3293_v12 = vpack.c.bf16 %v3245_v48, %v3243_v21  ;;  %3861 = vmatpush1.bf16.msra.mxu1 %v8253_v27  ;;  %v8274_v48 = vld [vmem:[%s13002_s7 + $0x240] ss:$8 sps:$4 sm:$0xff]  }
 0x38e   : > { %3862 = vmatprep.subr.bf16.mxu1 %v8258_v29 }
 0x38f   : > { %3569 = vmatprep.mubr.bf16.mxu1 %v3293_v12 }
 0x390   : > { %3570 = vmatmul.mubr.bf16.gmra.mrb[28].mxu1 %v3292_v47 }
 0x391   : > { %3863 = vmatpush1.bf16.msra.mxu1 %v8256_v62  ;;  %v8279_v62 = vld [vmem:[%s13002_s7 + $0x254] ss:$8 sps:$4 sm:$0xff]  }
 0x392   : > { %3864 = vmatprep.subr.bf16.mxu1 %v8261_v10 }
 0x395   : > { %3865 = vmatpush1.bf16.msra.mxu1 %v8259_v53 }
 0x396   : > { %4201 = vmatprep.subr.bf16.mxu1 %v8264_v8 }
 0x42b   : > { %v3501_v2 = vpop.f32.mrb[0].mxu1 }
 0x42c   : > { %v3502_v30 = vadd.f32 %v3501_v2, %v11338_v26  ;;  %v3503_v17 = vpop.f32.mrb[1].mxu1  ;;  %v8277_v2 = vld [vmem:[%s13002_s7 + $0x250] ss:$8 sps:$4 sm:$0xff]  }
 0x42d   : > { %v3504_v52 = vadd.f32 %v3503_v17, %v11341_v20  ;;  %v3505_v22 = vpop.f32.mrb[2].mxu1 }
 0x42e   : > { %v3506_v34 = vadd.f32 %v3505_v22, %v11338_v26  ;;  %v3507_v25 = vpop.f32.mrb[3].mxu1  ;;  %v3580_v58 = vmax.f32 %v3502_v30, 0.0 }
 0x42f   : > { %v3508_v42 = vadd.f32 %v3507_v25, %v11341_v20  ;;  %v3581_v56 = vmax.f32 %v3504_v52, 0.0  ;;  %v8282_v52 = vld [vmem:[%s13002_s7 + $0x264] ss:$8 sps:$4 sm:$0xff]  }
 0x430   : > { %v3582_v50 = vmax.f32 %v3506_v34, 0.0 }
 0x431   : > { %v3583_v39 = vmax.f32 %v3508_v42, 0.0 }
 0x432   : > { %v3645_v11 = vpack.c.bf16 %v3582_v50, %v3580_v58  ;;  %v8280_v50 = vld [vmem:[%s13002_s7 + $0x260] ss:$8 sps:$4 sm:$0xff]  }
 0x433   : > { %v3646_v24 = vpack.c.bf16 %v3583_v39, %v3581_v56  ;;  %v3511_v28 = vpop.f32.mrb[4].mxu1 }
 0x434   : > { %v3512_v5 = vadd.f32 %v3511_v28, %v11338_v26  ;;  %v3513_v18 = vpop.f32.mrb[5].mxu1 }
 0x435   : > { %v3514_v60 = vadd.f32 %v3513_v18, %v11341_v20  ;;  %v3515_v38 = vpop.f32.mrb[6].mxu1  ;;  %3866 = vmatprep.mubr.bf16.mxu1 %v3646_v24 }
 0x436   : > { %v3516_v54 = vadd.f32 %v3515_v38, %v11338_v26  ;;  %v3517_v45 = vpop.f32.mrb[7].mxu1  ;;  %3867 = vmatmul.mubr.bf16.vlgmr.msra.gmra.mrb[32].mxu1 %v3645_v11  ;;  %v3584_v23 = vmax.f32 %v3512_v5, 0.0  ;;  %v8285_v11 = vld [vmem:[%s13002_s7 + $0x274] ss:$8 sps:$4 sm:$0xff]  }
 0x437   : > { %v3518_v37 = vadd.f32 %v3517_v45, %v11341_v20  ;;  %4202 = vmatpush1.bf16.msra.mxu1 %v8262_v57  ;;  %v3585_v19 = vmax.f32 %v3514_v60, 0.0 }
 0x438   : > { %v3586_v15 = vmax.f32 %v3516_v54, 0.0  ;;  %4203 = vmatprep.subr.bf16.mxu1 %v8267_v1  ;;  %v8283_v1 = vld [vmem:[%s13002_s7 + $0x270] ss:$8 sps:$4 sm:$0xff]   ;;  %v8288_v54 = vld [vmem:[%s13002_s7 + $0x284] ss:$8 sps:$4 sm:$0xff]  }
 0x439   : > { %v3587_v14 = vmax.f32 %v3518_v37, 0.0 }
 0x43a   : > { %v3647_v46 = vpack.c.bf16 %v3586_v15, %v3584_v23 }
 0x43b   : > { %v3648_v31 = vpack.c.bf16 %v3587_v14, %v3585_v19  ;;  %v3521_v3 = vpop.f32.mrb[8].mxu1  ;;  %4204 = vmatpush1.bf16.msra.mxu1 %v8265_v49 }
 0x43c   : > { %v3522_v41 = vadd.f32 %v3521_v3, %v11338_v26  ;;  %v3523_v36 = vpop.f32.mrb[9].mxu1  ;;  %4205 = vmatprep.subr.bf16.mxu1 %v8270_v33  ;;  %v8286_v33 = vld [vmem:[%s13002_s7 + $0x280] ss:$8 sps:$4 sm:$0xff]  }
 0x43d   : > { %v3524_v7 = vadd.f32 %v3523_v36, %v11341_v20  ;;  %v3525_v6 = vpop.f32.mrb[10].mxu1  ;;  %3876 = vmatprep.mubr.bf16.mxu1 %v3648_v31 }
 0x43e   : > { %v3526_v43 = vadd.f32 %v3525_v6, %v11338_v26  ;;  %v3527_v4 = vpop.f32.mrb[11].mxu1  ;;  %3877 = vmatmul.mubr.bf16.gmra.mrb[36].mxu1 %v3647_v46  ;;  %v3588_v51 = vmax.f32 %v3522_v41, 0.0  ;;  %v8291_v46 = vld [vmem:[%s13002_s7 + $0x294] ss:$8 sps:$4 sm:$0xff]  }
 0x43f   : > { %v3528_v63 = vadd.f32 %v3527_v4, %v11341_v20  ;;  %4206 = vmatpush1.bf16.msra.mxu1 %v8268_v44  ;;  %v3589_v61 = vmax.f32 %v3524_v7, 0.0 }
 0x440   : > { %v3590_v16 = vmax.f32 %v3526_v43, 0.0  ;;  %4207 = vmatprep.subr.bf16.mxu1 %v8273_v9  ;;  %v8289_v9 = vld [vmem:[%s13002_s7 + $0x290] ss:$8 sps:$4 sm:$0xff]   ;;  %v8294_v43 = vld [vmem:[%s13002_s7 + $0x2a4] ss:$8 sps:$4 sm:$0xff]  }
 0x441   : > { %v3591_v27 = vmax.f32 %v3528_v63, 0.0 }
 0x442   : > { %v3649_v13 = vpack.c.bf16 %v3590_v16, %v3588_v51 }
 0x443   : > { %v3650_v32 = vpack.c.bf16 %v3591_v27, %v3589_v61  ;;  %v3531_v21 = vpop.f32.mrb[12].mxu1  ;;  %4208 = vmatpush1.bf16.msra.mxu1 %v8271_v55 }
 0x444   : > { %v3532_v47 = vadd.f32 %v3531_v21, %v11338_v26  ;;  %v3533_v12 = vpop.f32.mrb[13].mxu1  ;;  %4209 = vmatprep.subr.bf16.mxu1 %v8276_v35  ;;  %v8292_v35 = vld [vmem:[%s13002_s7 + $0x2a0] ss:$8 sps:$4 sm:$0xff]  }
 0x445   : > { %v3534_v29 = vadd.f32 %v3533_v12, %v11341_v20  ;;  %v3535_v10 = vpop.f32.mrb[14].mxu1  ;;  %3886 = vmatprep.mubr.bf16.mxu1 %v3650_v32 }
 0x446   : > { %v3536_v53 = vadd.f32 %v3535_v10, %v11338_v26  ;;  %v3537_v8 = vpop.f32.mrb[15].mxu1  ;;  %3887 = vmatmul.mubr.bf16.gmra.mrb[40].mxu1 %v3649_v13  ;;  %v3592_v30 = vmax.f32 %v3532_v47, 0.0  ;;  %v8297_v13 = vld [vmem:[%s13002_s7 + $0x2b4] ss:$8 sps:$4 sm:$0xff]  }
 0x447   : > { %v3538_v59 = vadd.f32 %v3537_v8, %v11341_v20  ;;  %4210 = vmatpush1.bf16.msra.mxu1 %v8274_v48  ;;  %v3593_v22 = vmax.f32 %v3534_v29, 0.0 }
 0x448   : > { %v3594_v17 = vmax.f32 %v3536_v53, 0.0  ;;  %4211 = vmatprep.subr.bf16.mxu1 %v8279_v62  ;;  %v8295_v62 = vld [vmem:[%s13002_s7 + $0x2b0] ss:$8 sps:$4 sm:$0xff]   ;;  %v8300_v53 = vld [vmem:[%s13002_s7 + $0x2c4] ss:$8 sps:$4 sm:$0xff]  }
 0x449   : > { %v3595_v34 = vmax.f32 %v3538_v59, 0.0 }
 0x44a   : > { %v3651_v25 = vpack.c.bf16 %v3594_v17, %v3592_v30 }
 0x44b   : > { %v3652_v42 = vpack.c.bf16 %v3595_v34, %v3593_v22  ;;  %v3541_v58 = vpop.f32.mrb[16].mxu1  ;;  %4212 = vmatpush1.bf16.msra.mxu1 %v8277_v2 }
 0x44c   : > { %v3542_v56 = vadd.f32 %v3541_v58, %v11338_v26  ;;  %v3543_v39 = vpop.f32.mrb[17].mxu1  ;;  %4213 = vmatprep.subr.bf16.mxu1 %v8282_v52  ;;  %v8298_v52 = vld [vmem:[%s13002_s7 + $0x2c0] ss:$8 sps:$4 sm:$0xff]  }
 0x44d   : > { %v3544_v24 = vadd.f32 %v3543_v39, %v11341_v20  ;;  %v3545_v28 = vpop.f32.mrb[18].mxu1  ;;  %3896 = vmatprep.mubr.bf16.mxu1 %v3652_v42 }
 0x44e   : > { %v3546_v57 = vadd.f32 %v3545_v28, %v11338_v26  ;;  %v3547_v5 = vpop.f32.mrb[19].mxu1  ;;  %3897 = vmatmul.mubr.bf16.gmra.mrb[44].mxu1 %v3651_v25  ;;  %v3596_v60 = vmax.f32 %v3542_v56, 0.0  ;;  %v8303_v25 = vld [vmem:[%s13002_s7 + $0x2d4] ss:$8 sps:$4 sm:$0xff]  }
 0x44f   : > { %v3548_v18 = vadd.f32 %v3547_v5, %v11341_v20  ;;  %4214 = vmatpush1.bf16.msra.mxu1 %v8280_v50  ;;  %v3597_v45 = vmax.f32 %v3544_v24, 0.0 }
 0x450   : > { %v3598_v38 = vmax.f32 %v3546_v57, 0.0  ;;  %4215 = vmatprep.subr.bf16.mxu1 %v8285_v11  ;;  %v8301_v11 = vld [vmem:[%s13002_s7 + $0x2d0] ss:$8 sps:$4 sm:$0xff]  }
 0x451   : > { %v3599_v37 = vmax.f32 %v3548_v18, 0.0 }
 0x452   : > { %v3653_v49 = vpack.c.bf16 %v3598_v38, %v3596_v60  ;;  %v8309_v60 = vld [vmem:[%s13002_s7 + $0x2f4] ss:$8 sps:$4 sm:$0xff]   ;;  %v8307_v38 = vld [vmem:[%s13002_s7 + $0x2f0] ss:$8 sps:$4 sm:$0xff]  }
 0x453   : > { %v3654_v23 = vpack.c.bf16 %v3599_v37, %v3597_v45  ;;  %v3551_v15 = vpop.f32.mrb[20].mxu1  ;;  %4216 = vmatpush1.bf16.msra.mxu1 %v8283_v1  ;;  %v8312_v45 = vld [vmem:[%s13001_s6 + $0x4] ss:$16 sps:$4 sm:$0xff]   ;;  %v8315_v37 = vld [vmem:[%s13001_s6 + $0xc] ss:$16 sps:$4 sm:$0xff]  }
 0x454   : > { %v3552_v19 = vadd.f32 %v3551_v15, %v11338_v26  ;;  %v3553_v14 = vpop.f32.mrb[21].mxu1  ;;  %4217 = vmatprep.subr.bf16.mxu1 %v8288_v54  ;;  %v8310_v54 = vld [vmem:[%s13001_s6] ss:$16 sps:$4 sm:$0xff]   ;;  %4842 = vmatprep.subr.bf16.mxu0 %v8312_v45  ;;  %v8324_v15 = vld [vmem:[%s13001_s6 + $0x44] ss:$16 sps:$4 sm:$0xff]  }
 0x455   : > { %v3554_v31 = vadd.f32 %v3553_v14, %v11341_v20  ;;  %v3555_v3 = vpop.f32.mrb[22].mxu1  ;;  %3906 = vmatprep.mubr.bf16.mxu1 %v3654_v23  ;;  %4843 = vmatpush1.bf16.msra.mxu0 %v8310_v54  ;;  %v8316_v23 = vld [vmem:[%s13001_s6 + $0x20] ss:$16 sps:$4 sm:$0xff]  }
 0x456   : > { %v3556_v44 = vadd.f32 %v3555_v3, %v11338_v26  ;;  %v3557_v41 = vpop.f32.mrb[23].mxu1  ;;  %3907 = vmatmul.mubr.bf16.gmra.mrb[48].mxu1 %v3653_v49  ;;  %v3600_v7 = vmax.f32 %v3552_v19, 0.0  ;;  %v8318_v49 = vld [vmem:[%s13001_s6 + $0x24] ss:$16 sps:$4 sm:$0xff]   ;;  %v8328_v14 = vld [vmem:[%s13001_s6 + $0x60] ss:$16 sps:$4 sm:$0xff]  }
 0x457   : > { %v3558_v36 = vadd.f32 %v3557_v41, %v11341_v20  ;;  %4218 = vmatpush1.bf16.msra.mxu1 %v8286_v33  ;;  %v3601_v4 = vmax.f32 %v3554_v31, 0.0  ;;  %4844 = vmatprep.subr.bf16.mxu0 %v8318_v49  ;;  %v8322_v33 = vld [vmem:[%s13001_s6 + $0x40] ss:$16 sps:$4 sm:$0xff]   ;;  %v8330_v19 = vld [vmem:[%s13001_s6 + $0x64] ss:$16 sps:$4 sm:$0xff]  }
 0x458   : > { %v3602_v6 = vmax.f32 %v3556_v44, 0.0  ;;  %4219 = vmatprep.subr.bf16.mxu1 %v8291_v46  ;;  %v8336_v46 = vld [vmem:[%s13001_s6 + $0x84] ss:$16 sps:$4 sm:$0xff]   ;;  %v8334_v31 = vld [vmem:[%s13001_s6 + $0x80] ss:$16 sps:$4 sm:$0xff]  }
 0x459   : > { %v3603_v63 = vmax.f32 %v3558_v36, 0.0  ;;  %4845 = vmatpush1.bf16.msra.mxu0 %v8316_v23  ;;  %v8342_v3 = vld [vmem:[%s13001_s6 + $0xa4] ss:$16 sps:$4 sm:$0xff]   ;;  %v8340_v44 = vld [vmem:[%s13001_s6 + $0xa0] ss:$16 sps:$4 sm:$0xff]  }
 0x45a   : > { %v3655_v55 = vpack.c.bf16 %v3602_v6, %v3600_v7  ;;  %4846 = vmatprep.subr.bf16.mxu0 %v8324_v15  ;;  %v8348_v41 = vld [vmem:[%s13001_s6 + $0xc4] ss:$16 sps:$4 sm:$0xff]   ;;  %v8346_v36 = vld [vmem:[%s13001_s6 + $0xc0] ss:$16 sps:$4 sm:$0xff]   ;;  %v8325_v49 = vld [vmem:[%s13001_s6 + $0x48] ss:$16 sps:$4 sm:$0xff]  }
 0x45b   : > { %v3656_v51 = vpack.c.bf16 %v3603_v63, %v3601_v4  ;;  %v3561_v16 = vpop.f32.mrb[24].mxu1  ;;  %4220 = vmatpush1.bf16.msra.mxu1 %v8289_v9  ;;  %v8354_v9 = vld [vmem:[%s13001_s6 + $0xe4] ss:$16 sps:$4 sm:$0xff]   ;;  %v8352_v7 = vld [vmem:[%s13001_s6 + $0xe0] ss:$16 sps:$4 sm:$0xff]  }
 0x45c   : > { %v3562_v61 = vadd.f32 %v3561_v16, %v11338_v26  ;;  %v3563_v27 = vpop.f32.mrb[25].mxu1  ;;  %4221 = vmatprep.subr.bf16.mxu1 %v8294_v43  ;;  %v8360_v6 = vld [vmem:[%s13001_s6 + $0x104] ss:$16 sps:$4 sm:$0xff]   ;;  %v8358_v43 = vld [vmem:[%s13001_s6 + $0x100] ss:$16 sps:$4 sm:$0xff]  }
 0x45d   : > { %v3564_v32 = vadd.f32 %v3563_v27, %v11341_v20  ;;  %v3565_v21 = vpop.f32.mrb[26].mxu1  ;;  %3916 = vmatprep.mubr.bf16.mxu1 %v3656_v51  ;;  %4847 = vmatpush1.bf16.msra.mxu0 %v8322_v33  ;;  %v8366_v4 = vld [vmem:[%s13001_s6 + $0x124] ss:$16 sps:$4 sm:$0xff]   ;;  %v8364_v63 = vld [vmem:[%s13001_s6 + $0x120] ss:$16 sps:$4 sm:$0xff]  }
 0x45e   : > { %v3566_v48 = vadd.f32 %v3565_v21, %v11338_v26  ;;  %v3567_v47 = vpop.f32.mrb[27].mxu1  ;;  %3917 = vmatmul.mubr.bf16.gmra.mrb[52].mxu1 %v3655_v55  ;;  %v3604_v29 = vmax.f32 %v3562_v61, 0.0  ;;  %4848 = vmatprep.subr.bf16.mxu0 %v8330_v19  ;;  %v8372_v55 = vld [vmem:[%s13001_s6 + $0x144] ss:$16 sps:$4 sm:$0xff]   ;;  %v8370_v51 = vld [vmem:[%s13001_s6 + $0x140] ss:$16 sps:$4 sm:$0xff]  }
 0x45f   : > { %v3568_v12 = vadd.f32 %v3567_v47, %v11341_v20  ;;  %4222 = vmatpush1.bf16.msra.mxu1 %v8292_v35  ;;  %v3605_v8 = vmax.f32 %v3564_v32, 0.0  ;;  %v8378_v16 = vld [vmem:[%s13001_s6 + $0x164] ss:$16 sps:$4 sm:$0xff]   ;;  %v8376_v35 = vld [vmem:[%s13001_s6 + $0x160] ss:$16 sps:$4 sm:$0xff]  }
 0x460   : > { %v3606_v10 = vmax.f32 %v3566_v48, 0.0  ;;  %4223 = vmatprep.subr.bf16.mxu1 %v8297_v13  ;;  %v8384_v61 = vld [vmem:[%s13001_s6 + $0x184] ss:$16 sps:$4 sm:$0xff]   ;;  %v8382_v27 = vld [vmem:[%s13001_s6 + $0x180] ss:$16 sps:$4 sm:$0xff]  }
 0x461   : > { %v3607_v59 = vmax.f32 %v3568_v12, 0.0  ;;  %4849 = vmatpush1.bf16.msra.mxu0 %v8328_v14  ;;  %v8390_v13 = vld [vmem:[%s13001_s6 + $0x1a4] ss:$16 sps:$4 sm:$0xff]   ;;  %v8388_v32 = vld [vmem:[%s13001_s6 + $0x1a0] ss:$16 sps:$4 sm:$0xff]  }
 0x462   : > { %v3657_v2 = vpack.c.bf16 %v3606_v10, %v3604_v29  ;;  %4850 = vmatprep.subr.bf16.mxu0 %v8336_v46  ;;  %v7502_v21 = vld [vmem:[%s13003_s8 + $0x2] ss:$8 sm:$0x3]  ;;  %v8333_v33 = vld [vmem:[%s13001_s6 + $0x6c] ss:$16 sps:$4 sm:$0xff]  }
 0x463   : > { %v3658_v30 = vpack.c.bf16 %v3607_v59, %v3605_v8  ;;  %v3571_v17 = vpop.f32.mrb[28].mxu1  ;;  %4224 = vmatpush1.bf16.msra.mxu1 %v8295_v62  ;;  %v11559_v48 = vrot.slane %v7502_v21, %v13543_v0  ;;  %v11562_v47 = vrot.slane %v7502_v21, %v13544_v40 }
 0x464   : > { %v3572_v22 = vadd.f32 %v3571_v17, %v11338_v26  ;;  %v3573_v34 = vpop.f32.mrb[29].mxu1  ;;  %4225 = vmatprep.subr.bf16.mxu1 %v8300_v53 }
 0x465   : > { %v3574_v42 = vadd.f32 %v3573_v34, %v11341_v20  ;;  %v3575_v58 = vpop.f32.mrb[30].mxu1  ;;  %3926 = vmatprep.mubr.bf16.mxu1 %v3658_v30  ;;  %4851 = vmatpush1.bf16.msra.mxu0 %v8334_v31 }
 0x466   : > { %v3576_v50 = vadd.f32 %v3575_v58, %v11338_v26  ;;  %v3577_v56 = vpop.f32.mrb[31].mxu1  ;;  %3927 = vmatmul.mubr.bf16.gmra.mrb[56].mxu1 %v3657_v2  ;;  %v3608_v24 = vmax.f32 %v3572_v22, 0.0  ;;  %v8304_v26 = vld [vmem:[%s13002_s7 + $0x2e0] ss:$8 sps:$4 sm:$0xff]   ;;  %4852 = vmatprep.subr.bf16.mxu0 %v8342_v3 }
 0x467   : > { %v3578_v39 = vadd.f32 %v3577_v56, %v11341_v20  ;;  %4226 = vmatpush1.bf16.msra.mxu1 %v8298_v52  ;;  %v3609_v57 = vmax.f32 %v3574_v42, 0.0  ;;  %v8306_v20 = vld [vmem:[%s13002_s7 + $0x2e4] ss:$8 sps:$4 sm:$0xff]   ;;  %v8313_v58 = vld [vmem:[%s13001_s6 + $0x8] ss:$16 sps:$4 sm:$0xff]  }
 0x468   : > { %v3610_v28 = vmax.f32 %v3576_v50, 0.0  ;;  %4227 = vmatprep.subr.bf16.mxu1 %v8303_v25 }
 0x469   : > { %v3611_v5 = vmax.f32 %v3578_v39, 0.0  ;;  %4853 = vmatpush1.bf16.msra.mxu0 %v8340_v44  ;;  %v8321_v39 = vld [vmem:[%s13001_s6 + $0x2c] ss:$16 sps:$4 sm:$0xff]   ;;  %v8331_v44 = vld [vmem:[%s13001_s6 + $0x68] ss:$16 sps:$4 sm:$0xff]  }
 0x46a   : > { %v3659_v18 = vpack.c.bf16 %v3610_v28, %v3608_v24  ;;  %4854 = vmatprep.subr.bf16.mxu0 %v8348_v41 }
 0x46b   : > { %v3660_v1 = vpack.c.bf16 %v3611_v5, %v3609_v57  ;;  %4228 = vmatpush1.bf16.msra.mxu1 %v8301_v11 }
 0x46c   : > { %4229 = vmatprep.subr.bf16.mxu1 %v8306_v20  ;;  %v8327_v20 = vld [vmem:[%s13001_s6 + $0x4c] ss:$16 sps:$4 sm:$0xff]  }
 0x46d   : > { %3936 = vmatprep.mubr.bf16.mxu1 %v3660_v1  ;;  %4855 = vmatpush1.bf16.msra.mxu0 %v8346_v36 }
 0x46e   : > { %3937 = vmatmul.mubr.bf16.gmra.mrb[60].mxu1 %v3659_v18  ;;  %4856 = vmatprep.subr.bf16.mxu0 %v8354_v9  ;;  %v8319_v18 = vld [vmem:[%s13001_s6 + $0x28] ss:$16 sps:$4 sm:$0xff]   ;;  %v8339_v9 = vld [vmem:[%s13001_s6 + $0x8c] ss:$16 sps:$4 sm:$0xff]  }
 0x46f   : > { %4230 = vmatpush1.bf16.msra.mxu1 %v8304_v26 }
 0x470   : > { %4231 = vmatprep.subr.bf16.mxu1 %v8309_v60 }
 0x471   : > { %4857 = vmatpush1.bf16.msra.mxu0 %v8352_v7 }
 0x472   : > { %4858 = vmatprep.subr.bf16.mxu0 %v8360_v6 }
 0x473   : > { %4232 = vmatpush1.bf16.msra.mxu1 %v8307_v38 }
 0x474   : > { %4955 = vmatprep.subr.bf16.mxu1 %v8315_v37 }
 0x475   : > { %4859 = vmatpush1.bf16.msra.mxu0 %v8358_v43 }
 0x476   : > { %4860 = vmatprep.subr.bf16.mxu0 %v8366_v4 }
 0x479   : > { %4861 = vmatpush1.bf16.msra.mxu0 %v8364_v63 }
 0x47a   : > { %4862 = vmatprep.subr.bf16.mxu0 %v8372_v55  ;;  %v8337_v55 = vld [vmem:[%s13001_s6 + $0x88] ss:$16 sps:$4 sm:$0xff]  }
 0x47d   : > { %4863 = vmatpush1.bf16.msra.mxu0 %v8370_v51 }
 0x47e   : > { %4864 = vmatprep.subr.bf16.mxu0 %v8378_v16 }
 0x481   : > { %4865 = vmatpush1.bf16.msra.mxu0 %v8376_v35  ;;  %v8345_v35 = vld [vmem:[%s13001_s6 + $0xac] ss:$16 sps:$4 sm:$0xff]  }
 0x482   : > { %4866 = vmatprep.subr.bf16.mxu0 %v8384_v61 }
 0x485   : > { %4867 = vmatpush1.bf16.msra.mxu0 %v8382_v27 }
 0x486   : > { %4868 = vmatprep.subr.bf16.mxu0 %v8390_v13 }
 0x489   : > { %4869 = vmatpush1.bf16.msra.mxu0 %v8388_v32 }
 0x509   : > { %v3868_v12 = vpop.f32.mrb[32].mxu1 }
 0x50a   : > { %v3869_v62 = vadd.f32 %v3868_v12, %v11559_v48  ;;  %v3870_v29 = vpop.f32.mrb[33].mxu1  ;;  %v8343_v12 = vld [vmem:[%s13001_s6 + $0xa8] ss:$16 sps:$4 sm:$0xff]  }
 0x50b   : > { %v3871_v10 = vadd.f32 %v3870_v29, %v11562_v47  ;;  %v3872_v53 = vpop.f32.mrb[34].mxu1 }
 0x50c   : > { %v3873_v8 = vadd.f32 %v3872_v53, %v11559_v48  ;;  %v3874_v59 = vpop.f32.mrb[35].mxu1  ;;  %v3947_v30 = vmax.f32 %v3869_v62, 0.0 }
 0x50d   : > { %v3875_v2 = vadd.f32 %v3874_v59, %v11562_v47  ;;  %v3948_v52 = vmax.f32 %v3871_v10, 0.0  ;;  %v8351_v10 = vld [vmem:[%s13001_s6 + $0xcc] ss:$16 sps:$4 sm:$0xff]  }
 0x50e   : > { %v3949_v17 = vmax.f32 %v3873_v8, 0.0 }
 0x50f   : > { %v3950_v22 = vmax.f32 %v3875_v2, 0.0 }
 0x510   : > { %v4012_v34 = vpack.c.bf16 %v3949_v17, %v3947_v30  ;;  %v8349_v17 = vld [vmem:[%s13001_s6 + $0xc8] ss:$16 sps:$4 sm:$0xff]  }
 0x511   : > { %v4013_v25 = vpack.c.bf16 %v3950_v22, %v3948_v52  ;;  %v3878_v42 = vpop.f32.mrb[36].mxu1 }
 0x512   : > { %v3879_v50 = vadd.f32 %v3878_v42, %v11559_v48  ;;  %v3880_v56 = vpop.f32.mrb[37].mxu1 }
 0x513   : > { %v3881_v11 = vadd.f32 %v3880_v56, %v11562_v47  ;;  %v3882_v24 = vpop.f32.mrb[38].mxu1  ;;  %4233 = vmatprep.mubr.bf16.mxu1 %v4013_v25 }
 0x514   : > { %v3883_v28 = vadd.f32 %v3882_v24, %v11559_v48  ;;  %v3884_v57 = vpop.f32.mrb[39].mxu1  ;;  %4234 = vmatmul.mubr.bf16.vlgmr.msra.gmra.mrb[64].mxu1 %v4012_v34  ;;  %v3951_v1 = vmax.f32 %v3879_v50, 0.0  ;;  %v8357_v34 = vld [vmem:[%s13001_s6 + $0xec] ss:$16 sps:$4 sm:$0xff]  }
 0x515   : > { %v3885_v5 = vadd.f32 %v3884_v57, %v11562_v47  ;;  %4956 = vmatpush1.bf16.msra.mxu1 %v8313_v58  ;;  %v3952_v60 = vmax.f32 %v3881_v11, 0.0 }
 0x516   : > { %v3953_v26 = vmax.f32 %v3883_v28, 0.0  ;;  %4957 = vmatprep.subr.bf16.mxu1 %v8321_v39  ;;  %v8355_v39 = vld [vmem:[%s13001_s6 + $0xe8] ss:$16 sps:$4 sm:$0xff]   ;;  %v8363_v28 = vld [vmem:[%s13001_s6 + $0x10c] ss:$16 sps:$4 sm:$0xff]  }
 0x517   : > { %v3954_v38 = vmax.f32 %v3885_v5, 0.0 }
 0x518   : > { %v4014_v54 = vpack.c.bf16 %v3953_v26, %v3951_v1 }
 0x519   : > { %v4015_v45 = vpack.c.bf16 %v3954_v38, %v3952_v60  ;;  %v3888_v37 = vpop.f32.mrb[40].mxu1  ;;  %4958 = vmatpush1.bf16.msra.mxu1 %v8319_v18 }
 0x51a   : > { %v3889_v23 = vadd.f32 %v3888_v37, %v11559_v48  ;;  %v3890_v15 = vpop.f32.mrb[41].mxu1  ;;  %4959 = vmatprep.subr.bf16.mxu1 %v8327_v20  ;;  %v8361_v20 = vld [vmem:[%s13001_s6 + $0x108] ss:$16 sps:$4 sm:$0xff]  }
 0x51b   : > { %v3891_v19 = vadd.f32 %v3890_v15, %v11562_v47  ;;  %v3892_v14 = vpop.f32.mrb[42].mxu1  ;;  %4243 = vmatprep.mubr.bf16.mxu1 %v4015_v45 }
 0x51c   : > { %v3893_v46 = vadd.f32 %v3892_v14, %v11559_v48  ;;  %v3894_v31 = vpop.f32.mrb[43].mxu1  ;;  %4244 = vmatmul.mubr.bf16.gmra.mrb[68].mxu1 %v4014_v54  ;;  %v3955_v41 = vmax.f32 %v3889_v23, 0.0  ;;  %v8369_v54 = vld [vmem:[%s13001_s6 + $0x12c] ss:$16 sps:$4 sm:$0xff]  }
 0x51d   : > { %v3895_v3 = vadd.f32 %v3894_v31, %v11562_v47  ;;  %4960 = vmatpush1.bf16.msra.mxu1 %v8325_v49  ;;  %v3956_v7 = vmax.f32 %v3891_v19, 0.0 }
 0x51e   : > { %v3957_v36 = vmax.f32 %v3893_v46, 0.0  ;;  %4961 = vmatprep.subr.bf16.mxu1 %v8333_v33  ;;  %v8367_v33 = vld [vmem:[%s13001_s6 + $0x128] ss:$16 sps:$4 sm:$0xff]   ;;  %v8375_v46 = vld [vmem:[%s13001_s6 + $0x14c] ss:$16 sps:$4 sm:$0xff]  }
 0x51f   : > { %v3958_v6 = vmax.f32 %v3895_v3, 0.0 }
 0x520   : > { %v4016_v43 = vpack.c.bf16 %v3957_v36, %v3955_v41 }
 0x521   : > { %v4017_v4 = vpack.c.bf16 %v3958_v6, %v3956_v7  ;;  %v3898_v63 = vpop.f32.mrb[44].mxu1  ;;  %4962 = vmatpush1.bf16.msra.mxu1 %v8331_v44 }
 0x522   : > { %v3899_v51 = vadd.f32 %v3898_v63, %v11559_v48  ;;  %v3900_v16 = vpop.f32.mrb[45].mxu1  ;;  %4963 = vmatprep.subr.bf16.mxu1 %v8339_v9  ;;  %v8373_v9 = vld [vmem:[%s13001_s6 + $0x148] ss:$16 sps:$4 sm:$0xff]  }
 0x523   : > { %v3901_v61 = vadd.f32 %v3900_v16, %v11562_v47  ;;  %v3902_v27 = vpop.f32.mrb[46].mxu1  ;;  %4253 = vmatprep.mubr.bf16.mxu1 %v4017_v4 }
 0x524   : > { %v3903_v13 = vadd.f32 %v3902_v27, %v11559_v48  ;;  %v3904_v32 = vpop.f32.mrb[47].mxu1  ;;  %4254 = vmatmul.mubr.bf16.gmra.mrb[72].mxu1 %v4016_v43  ;;  %v3959_v62 = vmax.f32 %v3899_v51, 0.0  ;;  %v8381_v43 = vld [vmem:[%s13001_s6 + $0x16c] ss:$16 sps:$4 sm:$0xff]  }
 0x525   : > { %v3905_v21 = vadd.f32 %v3904_v32, %v11562_v47  ;;  %4964 = vmatpush1.bf16.msra.mxu1 %v8337_v55  ;;  %v3960_v53 = vmax.f32 %v3901_v61, 0.0 }
 0x526   : > { %v3961_v29 = vmax.f32 %v3903_v13, 0.0  ;;  %4965 = vmatprep.subr.bf16.mxu1 %v8345_v35  ;;  %v8379_v35 = vld [vmem:[%s13001_s6 + $0x168] ss:$16 sps:$4 sm:$0xff]   ;;  %v8387_v13 = vld [vmem:[%s13001_s6 + $0x18c] ss:$16 sps:$4 sm:$0xff]  }
 0x527   : > { %v3962_v8 = vmax.f32 %v3905_v21, 0.0 }
 0x528   : > { %v4018_v59 = vpack.c.bf16 %v3961_v29, %v3959_v62 }
 0x529   : > { %v4019_v2 = vpack.c.bf16 %v3962_v8, %v3960_v53  ;;  %v3908_v30 = vpop.f32.mrb[48].mxu1  ;;  %4966 = vmatpush1.bf16.msra.mxu1 %v8343_v12 }
 0x52a   : > { %v3909_v52 = vadd.f32 %v3908_v30, %v11559_v48  ;;  %v3910_v22 = vpop.f32.mrb[49].mxu1  ;;  %4967 = vmatprep.subr.bf16.mxu1 %v8351_v10  ;;  %v8385_v10 = vld [vmem:[%s13001_s6 + $0x188] ss:$16 sps:$4 sm:$0xff]  }
 0x52b   : > { %v3911_v25 = vadd.f32 %v3910_v22, %v11562_v47  ;;  %v3912_v42 = vpop.f32.mrb[50].mxu1  ;;  %4263 = vmatprep.mubr.bf16.mxu1 %v4019_v2 }
 0x52c   : > { %v3913_v58 = vadd.f32 %v3912_v42, %v11559_v48  ;;  %v3914_v50 = vpop.f32.mrb[51].mxu1  ;;  %4264 = vmatmul.mubr.bf16.gmra.mrb[76].mxu1 %v4018_v59  ;;  %v3963_v11 = vmax.f32 %v3909_v52, 0.0  ;;  %v8393_v59 = vld [vmem:[%s13001_s6 + $0x1ac] ss:$16 sps:$4 sm:$0xff]  }
 0x52d   : > { %v3915_v56 = vadd.f32 %v3914_v50, %v11562_v47  ;;  %4968 = vmatpush1.bf16.msra.mxu1 %v8349_v17  ;;  %v3964_v57 = vmax.f32 %v3911_v25, 0.0 }
 0x52e   : > { %v3965_v24 = vmax.f32 %v3913_v58, 0.0  ;;  %4969 = vmatprep.subr.bf16.mxu1 %v8357_v34  ;;  %v8391_v34 = vld [vmem:[%s13001_s6 + $0x1a8] ss:$16 sps:$4 sm:$0xff]  }
 0x52f   : > { %v3966_v5 = vmax.f32 %v3915_v56, 0.0 }
 0x530   : > { %v4020_v18 = vpack.c.bf16 %v3965_v24, %v3963_v11  ;;  %v8397_v11 = vld [vmem:[%s13001_s6 + $0x1c8] ss:$16 sps:$4 sm:$0xff]   ;;  %v8399_v24 = vld [vmem:[%s13001_s6 + $0x1cc] ss:$16 sps:$4 sm:$0xff]  }
 0x531   : > { %v4021_v1 = vpack.c.bf16 %v3966_v5, %v3964_v57  ;;  %v3918_v26 = vpop.f32.mrb[52].mxu1  ;;  %4970 = vmatpush1.bf16.msra.mxu1 %v8355_v39  ;;  %v8405_v57 = vld [vmem:[%s13001_s6 + $0x1ec] ss:$16 sps:$4 sm:$0xff]   ;;  %v8400_v5 = vld [vmem:[%s13001_s6 + $0x1e0] ss:$16 sps:$4 sm:$0xff]  }
 0x532   : > { %v3919_v60 = vadd.f32 %v3918_v26, %v11559_v48  ;;  %v3920_v38 = vpop.f32.mrb[53].mxu1  ;;  %4971 = vmatprep.subr.bf16.mxu1 %v8363_v28  ;;  %v8402_v28 = vld [vmem:[%s13001_s6 + $0x1e4] ss:$16 sps:$4 sm:$0xff]   ;;  %v7567_v26 = vld [vmem:[%s13003_s8 + $0x3] ss:$8 sm:$0x3] }
 0x533   : > { %v3921_v45 = vadd.f32 %v3920_v38, %v11562_v47  ;;  %v3922_v37 = vpop.f32.mrb[54].mxu1  ;;  %4273 = vmatprep.mubr.bf16.mxu1 %v4021_v1  ;;  %v8408_v1 = vld [vmem:[%s13002_s7 + $0x304] ss:$8 sps:$4 sm:$0xff]  }
 0x534   : > { %v3923_v49 = vadd.f32 %v3922_v37, %v11559_v48  ;;  %v3924_v23 = vpop.f32.mrb[55].mxu1  ;;  %4274 = vmatmul.mubr.bf16.gmra.mrb[80].mxu1 %v4020_v18  ;;  %v3967_v19 = vmax.f32 %v3919_v60, 0.0  ;;  %v8403_v18 = vld [vmem:[%s13001_s6 + $0x1e8] ss:$16 sps:$4 sm:$0xff]   ;;  %v11711_v60 = vrot.slane %v7567_v26, %v13544_v40 }
 0x535   : > { %v3925_v15 = vadd.f32 %v3924_v23, %v11562_v47  ;;  %4972 = vmatpush1.bf16.msra.mxu1 %v8361_v20  ;;  %v3968_v31 = vmax.f32 %v3921_v45, 0.0  ;;  %v11708_v20 = vrot.slane %v7567_v26, %v13543_v0 }
 0x536   : > { %v3969_v14 = vmax.f32 %v3923_v49, 0.0  ;;  %4973 = vmatprep.subr.bf16.mxu1 %v8369_v54 }
 0x537   : > { %v3970_v3 = vmax.f32 %v3925_v15, 0.0 }
 0x538   : > { %v4022_v44 = vpack.c.bf16 %v3969_v14, %v3967_v19 }
 0x539   : > { %v4023_v41 = vpack.c.bf16 %v3970_v3, %v3968_v31  ;;  %v3928_v36 = vpop.f32.mrb[56].mxu1  ;;  %4974 = vmatpush1.bf16.msra.mxu1 %v8367_v33 }
 0x53a   : > { %v3929_v7 = vadd.f32 %v3928_v36, %v11559_v48  ;;  %v3930_v6 = vpop.f32.mrb[57].mxu1  ;;  %4975 = vmatprep.subr.bf16.mxu1 %v8375_v46  ;;  %v8406_v36 = vld [vmem:[%s13002_s7 + $0x300] ss:$8 sps:$4 sm:$0xff]  }
 0x53b   : > { %v3931_v4 = vadd.f32 %v3930_v6, %v11562_v47  ;;  %v3932_v63 = vpop.f32.mrb[58].mxu1  ;;  %4283 = vmatprep.mubr.bf16.mxu1 %v4023_v41  ;;  %v8411_v6 = vld [vmem:[%s13002_s7 + $0x314] ss:$8 sps:$4 sm:$0xff]  }
 0x53c   : > { %v3933_v55 = vadd.f32 %v3932_v63, %v11559_v48  ;;  %v3934_v51 = vpop.f32.mrb[59].mxu1  ;;  %4284 = vmatmul.mubr.bf16.gmra.mrb[84].mxu1 %v4022_v44  ;;  %v3971_v61 = vmax.f32 %v3929_v7, 0.0 }
 0x53d   : > { %v3935_v16 = vadd.f32 %v3934_v51, %v11562_v47  ;;  %4976 = vmatpush1.bf16.msra.mxu1 %v8373_v9  ;;  %v3972_v32 = vmax.f32 %v3931_v4, 0.0 }
 0x53e   : > { %v3973_v27 = vmax.f32 %v3933_v55, 0.0  ;;  %4977 = vmatprep.subr.bf16.mxu1 %v8381_v43 }
 0x53f   : > { %v3974_v21 = vmax.f32 %v3935_v16, 0.0  ;;  %v8409_v16 = vld [vmem:[%s13002_s7 + $0x310] ss:$8 sps:$4 sm:$0xff]  }
 0x540   : > { %v4024_v12 = vpack.c.bf16 %v3973_v27, %v3971_v61  ;;  %v8414_v27 = vld [vmem:[%s13002_s7 + $0x324] ss:$8 sps:$4 sm:$0xff]  }
 0x541   : > { %v4025_v62 = vpack.c.bf16 %v3974_v21, %v3972_v32  ;;  %v3938_v29 = vpop.f32.mrb[60].mxu1  ;;  %4978 = vmatpush1.bf16.msra.mxu1 %v8379_v35 }
 0x542   : > { %v3939_v53 = vadd.f32 %v3938_v29, %v11559_v48  ;;  %v3940_v8 = vpop.f32.mrb[61].mxu1  ;;  %4979 = vmatprep.subr.bf16.mxu1 %v8387_v13  ;;  %v8412_v29 = vld [vmem:[%s13002_s7 + $0x320] ss:$8 sps:$4 sm:$0xff]  }
 0x543   : > { %v3941_v2 = vadd.f32 %v3940_v8, %v11562_v47  ;;  %v3942_v30 = vpop.f32.mrb[62].mxu1  ;;  %4293 = vmatprep.mubr.bf16.mxu1 %v4025_v62  ;;  %v8417_v8 = vld [vmem:[%s13002_s7 + $0x334] ss:$8 sps:$4 sm:$0xff]  }
 0x544   : > { %v3943_v17 = vadd.f32 %v3942_v30, %v11559_v48  ;;  %v3944_v52 = vpop.f32.mrb[63].mxu1  ;;  %4294 = vmatmul.mubr.bf16.gmra.mrb[88].mxu1 %v4024_v12  ;;  %v3975_v25 = vmax.f32 %v3939_v53, 0.0  ;;  %v8394_v48 = vld [vmem:[%s13001_s6 + $0x1c0] ss:$16 sps:$4 sm:$0xff]  }
 0x545   : > { %v3945_v22 = vadd.f32 %v3944_v52, %v11562_v47  ;;  %4980 = vmatpush1.bf16.msra.mxu1 %v8385_v10  ;;  %v3976_v58 = vmax.f32 %v3941_v2, 0.0  ;;  %v8396_v47 = vld [vmem:[%s13001_s6 + $0x1c4] ss:$16 sps:$4 sm:$0xff]  }
 0x546   : > { %v3977_v42 = vmax.f32 %v3943_v17, 0.0  ;;  %4981 = vmatprep.subr.bf16.mxu1 %v8393_v59  ;;  %4870 = vmatprep.subr.bf16.mxu0 %v8396_v47  ;;  %v8418_v47 = vld [vmem:[%s13002_s7 + $0x340] ss:$8 sps:$4 sm:$0xff]  }
 0x547   : > { %v3978_v50 = vmax.f32 %v3945_v22, 0.0  ;;  %4871 = vmatpush1.bf16.msra.mxu0 %v8394_v48  ;;  %v8415_v22 = vld [vmem:[%s13002_s7 + $0x330] ss:$8 sps:$4 sm:$0xff]  }
 0x548   : > { %v4026_v56 = vpack.c.bf16 %v3977_v42, %v3975_v25  ;;  %4872 = vmatprep.subr.bf16.mxu0 %v8402_v28  ;;  %v8420_v42 = vld [vmem:[%s13002_s7 + $0x344] ss:$8 sps:$4 sm:$0xff]   ;;  %v8423_v28 = vld [vmem:[%s13002_s7 + $0x354] ss:$8 sps:$4 sm:$0xff]  }
 0x549   : > { %v4027_v39 = vpack.c.bf16 %v3978_v50, %v3976_v58  ;;  %4982 = vmatpush1.bf16.msra.mxu1 %v8391_v34 }
 0x54a   : > { %4983 = vmatprep.subr.bf16.mxu1 %v8399_v24 }
 0x54b   : > { %4303 = vmatprep.mubr.bf16.mxu1 %v4027_v39  ;;  %4873 = vmatpush1.bf16.msra.mxu0 %v8400_v5 }
 0x54c   : > { %4304 = vmatmul.mubr.bf16.gmra.mrb[92].mxu1 %v4026_v56  ;;  %5354 = vmatprep.subr.bf16.mxu0 %v8408_v1 }
 0x54d   : > { %4984 = vmatpush1.bf16.msra.mxu1 %v8397_v11 }
 0x54e   : > { %4985 = vmatprep.subr.bf16.mxu1 %v8405_v57 }
 0x551   : > { %4986 = vmatpush1.bf16.msra.mxu1 %v8403_v18 }
 0x5e7   : > { %v4235_v38 = vpop.f32.mrb[64].mxu1 }
 0x5e8   : > { %v4236_v54 = vadd.f32 %v4235_v38, %v11708_v20  ;;  %v4237_v45 = vpop.f32.mrb[65].mxu1  ;;  %v8421_v38 = vld [vmem:[%s13002_s7 + $0x350] ss:$8 sps:$4 sm:$0xff]  }
 0x5e9   : > { %v4238_v37 = vadd.f32 %v4237_v45, %v11711_v60  ;;  %v4239_v49 = vpop.f32.mrb[66].mxu1 }
 0x5ea   : > { %v4240_v23 = vadd.f32 %v4239_v49, %v11708_v20  ;;  %v4241_v15 = vpop.f32.mrb[67].mxu1  ;;  %v4314_v19 = vmax.f32 %v4236_v54, 0.0 }
 0x5eb   : > { %v4242_v33 = vadd.f32 %v4241_v15, %v11711_v60  ;;  %v4315_v46 = vmax.f32 %v4238_v37, 0.0  ;;  %v8426_v37 = vld [vmem:[%s13002_s7 + $0x364] ss:$8 sps:$4 sm:$0xff]  }
 0x5ec   : > { %v4316_v14 = vmax.f32 %v4240_v23, 0.0 }
 0x5ed   : > { %v4317_v31 = vmax.f32 %v4242_v33, 0.0 }
 0x5ee   : > { %v4410_v3 = vpack.c.bf16 %v4316_v14, %v4314_v19  ;;  %v8424_v14 = vld [vmem:[%s13002_s7 + $0x360] ss:$8 sps:$4 sm:$0xff]  }
 0x5ef   : > { %v4411_v44 = vpack.c.bf16 %v4317_v31, %v4315_v46  ;;  %v4245_v41 = vpop.f32.mrb[68].mxu1 }
 0x5f0   : > { %v4246_v9 = vadd.f32 %v4245_v41, %v11708_v20  ;;  %v4247_v7 = vpop.f32.mrb[69].mxu1 }
 0x5f1   : > { %v4248_v43 = vadd.f32 %v4247_v7, %v11711_v60  ;;  %v4249_v4 = vpop.f32.mrb[70].mxu1  ;;  %4874 = vmatprep.mubr.bf16.mxu0 %v4411_v44  ;;  %4987 = vmatprep.mubr.bf16.mxu1 %v4411_v44 }
 0x5f2   : > { %v4250_v63 = vadd.f32 %v4249_v4, %v11708_v20  ;;  %v4251_v55 = vpop.f32.mrb[71].mxu1  ;;  %4875 = vmatmul.mubr.bf16.vlgmr.msra.gmra.mrb[32].mxu0 %v4410_v3  ;;  %4988 = vmatmul.mubr.bf16.vlgmr.msra.gmra.mrb[96].mxu1 %v4410_v3  ;;  %v4318_v35 = vmax.f32 %v4246_v9, 0.0  ;;  %v8429_v3 = vld [vmem:[%s13002_s7 + $0x374] ss:$8 sps:$4 sm:$0xff]  }
 0x5f3   : > { %v4252_v51 = vadd.f32 %v4251_v55, %v11711_v60  ;;  %5355 = vmatpush1.bf16.msra.mxu0 %v8406_v36  ;;  %v4319_v13 = vmax.f32 %v4248_v43, 0.0 }
 0x5f4   : > { %v4320_v61 = vmax.f32 %v4250_v63, 0.0  ;;  %5356 = vmatprep.subr.bf16.mxu0 %v8411_v6  ;;  %v8427_v6 = vld [vmem:[%s13002_s7 + $0x370] ss:$8 sps:$4 sm:$0xff]   ;;  %v8432_v63 = vld [vmem:[%s13002_s7 + $0x384] ss:$8 sps:$4 sm:$0xff]  }
 0x5f5   : > { %v4321_v32 = vmax.f32 %v4252_v51, 0.0 }
 0x5f6   : > { %v4412_v21 = vpack.c.bf16 %v4320_v61, %v4318_v35 }
 0x5f7   : > { %v4413_v12 = vpack.c.bf16 %v4321_v32, %v4319_v13  ;;  %v4255_v62 = vpop.f32.mrb[72].mxu1  ;;  %5357 = vmatpush1.bf16.msra.mxu0 %v8409_v16 }
 0x5f8   : > { %v4256_v10 = vadd.f32 %v4255_v62, %v11708_v20  ;;  %v4257_v53 = vpop.f32.mrb[73].mxu1  ;;  %5358 = vmatprep.subr.bf16.mxu0 %v8414_v27  ;;  %v8430_v27 = vld [vmem:[%s13002_s7 + $0x380] ss:$8 sps:$4 sm:$0xff]  }
 0x5f9   : > { %v4258_v59 = vadd.f32 %v4257_v53, %v11711_v60  ;;  %v4259_v2 = vpop.f32.mrb[74].mxu1  ;;  %4884 = vmatprep.mubr.bf16.mxu0 %v4413_v12  ;;  %4997 = vmatprep.mubr.bf16.mxu1 %v4413_v12 }
 0x5fa   : > { %v4260_v30 = vadd.f32 %v4259_v2, %v11708_v20  ;;  %v4261_v17 = vpop.f32.mrb[75].mxu1  ;;  %4885 = vmatmul.mubr.bf16.gmra.mrb[36].mxu0 %v4412_v21  ;;  %4998 = vmatmul.mubr.bf16.gmra.mrb[100].mxu1 %v4412_v21  ;;  %v4322_v34 = vmax.f32 %v4256_v10, 0.0  ;;  %v8435_v21 = vld [vmem:[%s13002_s7 + $0x394] ss:$8 sps:$4 sm:$0xff]  }
 0x5fb   : > { %v4262_v52 = vadd.f32 %v4261_v17, %v11711_v60  ;;  %5359 = vmatpush1.bf16.msra.mxu0 %v8412_v29  ;;  %v4323_v58 = vmax.f32 %v4258_v59, 0.0 }
 0x5fc   : > { %v4324_v25 = vmax.f32 %v4260_v30, 0.0  ;;  %5360 = vmatprep.subr.bf16.mxu0 %v8417_v8  ;;  %v8433_v8 = vld [vmem:[%s13002_s7 + $0x390] ss:$8 sps:$4 sm:$0xff]   ;;  %v8438_v30 = vld [vmem:[%s13002_s7 + $0x3a4] ss:$8 sps:$4 sm:$0xff]  }
 0x5fd   : > { %v4325_v50 = vmax.f32 %v4262_v52, 0.0 }
 0x5fe   : > { %v4414_v56 = vpack.c.bf16 %v4324_v25, %v4322_v34 }
 0x5ff   : > { %v4415_v39 = vpack.c.bf16 %v4325_v50, %v4323_v58  ;;  %v4265_v48 = vpop.f32.mrb[76].mxu1  ;;  %5361 = vmatpush1.bf16.msra.mxu0 %v8415_v22 }
 0x600   : > { %v4266_v11 = vadd.f32 %v4265_v48, %v11708_v20  ;;  %v4267_v24 = vpop.f32.mrb[77].mxu1  ;;  %5362 = vmatprep.subr.bf16.mxu0 %v8420_v42  ;;  %v8436_v42 = vld [vmem:[%s13002_s7 + $0x3a0] ss:$8 sps:$4 sm:$0xff]  }
 0x601   : > { %v4268_v57 = vadd.f32 %v4267_v24, %v11711_v60  ;;  %v4269_v5 = vpop.f32.mrb[78].mxu1  ;;  %4894 = vmatprep.mubr.bf16.mxu0 %v4415_v39  ;;  %5007 = vmatprep.mubr.bf16.mxu1 %v4415_v39 }
 0x602   : > { %v4270_v18 = vadd.f32 %v4269_v5, %v11708_v20  ;;  %v4271_v1 = vpop.f32.mrb[79].mxu1  ;;  %4895 = vmatmul.mubr.bf16.gmra.mrb[40].mxu0 %v4414_v56  ;;  %5008 = vmatmul.mubr.bf16.gmra.mrb[104].mxu1 %v4414_v56  ;;  %v4326_v54 = vmax.f32 %v4266_v11, 0.0  ;;  %v8441_v56 = vld [vmem:[%s13002_s7 + $0x3b4] ss:$8 sps:$4 sm:$0xff]  }
 0x603   : > { %v4272_v26 = vadd.f32 %v4271_v1, %v11711_v60  ;;  %5363 = vmatpush1.bf16.msra.mxu0 %v8418_v47  ;;  %v4327_v49 = vmax.f32 %v4268_v57, 0.0 }
 0x604   : > { %v4328_v45 = vmax.f32 %v4270_v18, 0.0  ;;  %5364 = vmatprep.subr.bf16.mxu0 %v8423_v28  ;;  %v8439_v28 = vld [vmem:[%s13002_s7 + $0x3b0] ss:$8 sps:$4 sm:$0xff]   ;;  %v8444_v18 = vld [vmem:[%s13002_s7 + $0x3c4] ss:$8 sps:$4 sm:$0xff]  }
 0x605   : > { %v4329_v23 = vmax.f32 %v4272_v26, 0.0 }
 0x606   : > { %v4416_v15 = vpack.c.bf16 %v4328_v45, %v4326_v54 }
 0x607   : > { %v4417_v33 = vpack.c.bf16 %v4329_v23, %v4327_v49  ;;  %v4275_v19 = vpop.f32.mrb[80].mxu1  ;;  %5365 = vmatpush1.bf16.msra.mxu0 %v8421_v38 }
 0x608   : > { %v4276_v46 = vadd.f32 %v4275_v19, %v11708_v20  ;;  %v4277_v31 = vpop.f32.mrb[81].mxu1  ;;  %5366 = vmatprep.subr.bf16.mxu0 %v8426_v37  ;;  %v8442_v37 = vld [vmem:[%s13002_s7 + $0x3c0] ss:$8 sps:$4 sm:$0xff]  }
 0x609   : > { %v4278_v44 = vadd.f32 %v4277_v31, %v11711_v60  ;;  %v4279_v41 = vpop.f32.mrb[82].mxu1  ;;  %4904 = vmatprep.mubr.bf16.mxu0 %v4417_v33  ;;  %5017 = vmatprep.mubr.bf16.mxu1 %v4417_v33 }
 0x60a   : > { %v4280_v36 = vadd.f32 %v4279_v41, %v11708_v20  ;;  %v4281_v9 = vpop.f32.mrb[83].mxu1  ;;  %4905 = vmatmul.mubr.bf16.gmra.mrb[44].mxu0 %v4416_v15  ;;  %5018 = vmatmul.mubr.bf16.gmra.mrb[108].mxu1 %v4416_v15  ;;  %v4330_v43 = vmax.f32 %v4276_v46, 0.0  ;;  %v8447_v15 = vld [vmem:[%s13002_s7 + $0x3d4] ss:$8 sps:$4 sm:$0xff]  }
 0x60b   : > { %v4282_v7 = vadd.f32 %v4281_v9, %v11711_v60  ;;  %5367 = vmatpush1.bf16.msra.mxu0 %v8424_v14  ;;  %v4331_v55 = vmax.f32 %v4278_v44, 0.0 }
 0x60c   : > { %v4332_v4 = vmax.f32 %v4280_v36, 0.0  ;;  %5368 = vmatprep.subr.bf16.mxu0 %v8429_v3  ;;  %v8445_v3 = vld [vmem:[%s13002_s7 + $0x3d0] ss:$8 sps:$4 sm:$0xff]  }
 0x60d   : > { %v4333_v51 = vmax.f32 %v4282_v7, 0.0 }
 0x60e   : > { %v4418_v16 = vpack.c.bf16 %v4332_v4, %v4330_v43  ;;  %v8453_v43 = vld [vmem:[%s13002_s7 + $0x3f4] ss:$8 sps:$4 sm:$0xff]   ;;  %v8451_v4 = vld [vmem:[%s13002_s7 + $0x3f0] ss:$8 sps:$4 sm:$0xff]  }
 0x60f   : > { %v4419_v35 = vpack.c.bf16 %v4333_v51, %v4331_v55  ;;  %v4285_v61 = vpop.f32.mrb[84].mxu1  ;;  %5369 = vmatpush1.bf16.msra.mxu0 %v8427_v6  ;;  %v4426_v55 = vld [vmem:[%s11845_s19] sm:$0xff]  ;;  %v4427_v51 = vld [vmem:[%s11845_s19 + $0x8] sm:$0xff] }
 0x610   : > { %v4286_v13 = vadd.f32 %v4285_v61, %v11708_v20  ;;  %v4287_v32 = vpop.f32.mrb[85].mxu1  ;;  %5370 = vmatprep.subr.bf16.mxu0 %v8432_v63  ;;  %v8456_v63 = vld [vmem:[%s13002_s7 + $0x504] ss:$8 sps:$4 sm:$0xff]   ;;  %v4458_v61 = vunpack.c.l.bf16 %v4426_v55 }
 0x611   : > { %v4288_v12 = vadd.f32 %v4287_v32, %v11711_v60  ;;  %v4289_v62 = vpop.f32.mrb[86].mxu1  ;;  %4914 = vmatprep.mubr.bf16.mxu0 %v4419_v35  ;;  %5027 = vmatprep.mubr.bf16.mxu1 %v4419_v35  ;;  %v4429_v35 = vld [vmem:[%s11845_s19 + $0x18] sm:$0xff]  ;;  %v4461_v32 = vunpack.c.h.bf16 %v4427_v51 }
 0x612   : > { %v4290_v29 = vadd.f32 %v4289_v62, %v11708_v20  ;;  %v4291_v10 = vpop.f32.mrb[87].mxu1  ;;  %4915 = vmatmul.mubr.bf16.gmra.mrb[48].mxu0 %v4418_v16  ;;  %5028 = vmatmul.mubr.bf16.gmra.mrb[112].mxu1 %v4418_v16  ;;  %v4334_v59 = vmax.f32 %v4286_v13, 0.0  ;;  %v4428_v16 = vld [vmem:[%s11845_s19 + $0x10] sm:$0xff]  ;;  %v4459_v13 = vunpack.c.h.bf16 %v4426_v55 }
 0x613   : > { %v4292_v53 = vadd.f32 %v4291_v10, %v11711_v60  ;;  %5371 = vmatpush1.bf16.msra.mxu0 %v8430_v27  ;;  %v4335_v17 = vmax.f32 %v4288_v12, 0.0  ;;  %v4460_v27 = vunpack.c.l.bf16 %v4427_v51  ;;  %v4464_v12 = vunpack.c.l.bf16 %v4429_v35 }
 0x614   : > { %v4336_v2 = vmax.f32 %v4290_v29, 0.0  ;;  %5372 = vmatprep.subr.bf16.mxu0 %v8435_v21  ;;  %v4462_v21 = vunpack.c.l.bf16 %v4428_v16  ;;  %v4463_v10 = vunpack.c.h.bf16 %v4428_v16 }
 0x615   : > { %v4337_v52 = vmax.f32 %v4292_v53, 0.0  ;;  %v4465_v53 = vunpack.c.h.bf16 %v4429_v35  ;;  %v8459_v35 = vld [vmem:[%s13002_s7 + $0x514] ss:$8 sps:$4 sm:$0xff]  }
 0x616   : > { %v4420_v22 = vpack.c.bf16 %v4336_v2, %v4334_v59 }
 0x617   : > { %v4421_v34 = vpack.c.bf16 %v4337_v52, %v4335_v17  ;;  %v4295_v25 = vpop.f32.mrb[88].mxu1  ;;  %5373 = vmatpush1.bf16.msra.mxu0 %v8433_v8  ;;  %v4430_v8 = vld [vmem:[%s11845_s19 + $0x20] sm:$0xff]  ;;  %v4431_v52 = vld [vmem:[%s11845_s19 + $0x28] sm:$0xff] }
 0x618   : > { %v4296_v58 = vadd.f32 %v4295_v25, %v11708_v20  ;;  %v4297_v50 = vpop.f32.mrb[89].mxu1  ;;  %5374 = vmatprep.subr.bf16.mxu0 %v8438_v30 }
 0x619   : > { %v4298_v39 = vadd.f32 %v4297_v50, %v11711_v60  ;;  %v4299_v48 = vpop.f32.mrb[90].mxu1  ;;  %4924 = vmatprep.mubr.bf16.mxu0 %v4421_v34  ;;  %5037 = vmatprep.mubr.bf16.mxu1 %v4421_v34 }
 0x61a   : > { %v4300_v47 = vadd.f32 %v4299_v48, %v11708_v20  ;;  %v4301_v11 = vpop.f32.mrb[91].mxu1  ;;  %4925 = vmatmul.mubr.bf16.gmra.mrb[52].mxu0 %v4420_v22  ;;  %5038 = vmatmul.mubr.bf16.gmra.mrb[116].mxu1 %v4420_v22  ;;  %v4338_v57 = vmax.f32 %v4296_v58, 0.0  ;;  %v4466_v48 = vunpack.c.l.bf16 %v4430_v8 }
 0x61b   : > { %v4302_v24 = vadd.f32 %v4301_v11, %v11711_v60  ;;  %5375 = vmatpush1.bf16.msra.mxu0 %v8436_v42  ;;  %v4339_v1 = vmax.f32 %v4298_v39, 0.0  ;;  %v8502_v11 = vld [vmem:[%s13002_s7 + $0x400] ss:$8 sps:$4 sm:$0xff]  }
 0x61c   : > { %v4340_v5 = vmax.f32 %v4300_v47, 0.0  ;;  %5376 = vmatprep.subr.bf16.mxu0 %v8441_v56  ;;  %v4467_v47 = vunpack.c.h.bf16 %v4430_v8 }
 0x61d   : > { %v4341_v26 = vmax.f32 %v4302_v24, 0.0 }
 0x61e   : > { %v4422_v38 = vpack.c.bf16 %v4340_v5, %v4338_v57  ;;  %v4468_v57 = vunpack.c.l.bf16 %v4431_v52  ;;  %v4469_v5 = vunpack.c.h.bf16 %v4431_v52 }
 0x61f   : > { %v4423_v54 = vpack.c.bf16 %v4341_v26, %v4339_v1  ;;  %v4305_v45 = vpop.f32.mrb[92].mxu1  ;;  %5377 = vmatpush1.bf16.msra.mxu0 %v8439_v28  ;;  %v4433_v1 = vld [vmem:[%s11845_s19 + $0x38] sm:$0xff]  ;;  %v8504_v26 = vld [vmem:[%s13002_s7 + $0x404] ss:$8 sps:$4 sm:$0xff]  }
 0x620   : > { %v4306_v49 = vadd.f32 %v4305_v45, %v11708_v20  ;;  %v4307_v23 = vpop.f32.mrb[93].mxu1  ;;  %5378 = vmatprep.subr.bf16.mxu0 %v8444_v18  ;;  %v4432_v18 = vld [vmem:[%s11845_s19 + $0x30] sm:$0xff]  ;;  %5721 = vmatprep.subr.bf16.mxu1 %v8504_v26  ;;  %v8460_v26 = vld [vmem:[%s13002_s7 + $0x520] ss:$8 sps:$4 sm:$0xff]  }
 0x621   : > { %v4308_v33 = vadd.f32 %v4307_v23, %v11711_v60  ;;  %v4309_v19 = vpop.f32.mrb[94].mxu1  ;;  %4934 = vmatprep.mubr.bf16.mxu0 %v4423_v54  ;;  %5047 = vmatprep.mubr.bf16.mxu1 %v4423_v54 }
 0x622   : > { %v4310_v14 = vadd.f32 %v4309_v19, %v11708_v20  ;;  %v4311_v46 = vpop.f32.mrb[95].mxu1  ;;  %4935 = vmatmul.mubr.bf16.gmra.mrb[56].mxu0 %v4422_v38  ;;  %5048 = vmatmul.mubr.bf16.gmra.mrb[120].mxu1 %v4422_v38  ;;  %v4342_v44 = vmax.f32 %v4306_v49, 0.0  ;;  %v8448_v20 = vld [vmem:[%s13002_s7 + $0x3e0] ss:$8 sps:$4 sm:$0xff]   ;;  %v8507_v49 = vld [vmem:[%s13002_s7 + $0x414] ss:$8 sps:$4 sm:$0xff]  }
 0x623   : > { %v4312_v31 = vadd.f32 %v4311_v46, %v11711_v60  ;;  %5379 = vmatpush1.bf16.msra.mxu0 %v8442_v37  ;;  %v4343_v36 = vmax.f32 %v4308_v33, 0.0  ;;  %v8450_v60 = vld [vmem:[%s13002_s7 + $0x3e4] ss:$8 sps:$4 sm:$0xff]   ;;  %5722 = vmatpush1.bf16.msra.mxu1 %v8502_v11 }
 0x624   : > { %v4344_v41 = vmax.f32 %v4310_v14, 0.0  ;;  %5380 = vmatprep.subr.bf16.mxu0 %v8447_v15  ;;  %5723 = vmatprep.subr.bf16.mxu1 %v8507_v49 }
 0x625   : > { %v4345_v9 = vmax.f32 %v4312_v31, 0.0  ;;  %v4470_v31 = vunpack.c.l.bf16 %v4432_v18 }
 0x626   : > { %v4424_v7 = vpack.c.bf16 %v4344_v41, %v4342_v44  ;;  %v8454_v44 = vld [vmem:[%s13002_s7 + $0x500] ss:$8 sps:$4 sm:$0xff]   ;;  %v8505_v41 = vld [vmem:[%s13002_s7 + $0x410] ss:$8 sps:$4 sm:$0xff]  }
 0x627   : > { %v4425_v6 = vpack.c.bf16 %v4345_v9, %v4343_v36  ;;  %5381 = vmatpush1.bf16.msra.mxu0 %v8445_v3  ;;  %v4472_v3 = vunpack.c.l.bf16 %v4433_v1  ;;  %5724 = vmatpush1.bf16.msra.mxu1 %v8505_v41  ;;  %v8465_v41 = vld [vmem:[%s13002_s7 + $0x534] ss:$8 sps:$4 sm:$0xff]  }
 0x628   : > { %5382 = vmatprep.subr.bf16.mxu0 %v8450_v60  ;;  %v4473_v60 = vunpack.c.h.bf16 %v4433_v1 }
 0x629   : > { %4944 = vmatprep.mubr.bf16.mxu0 %v4425_v6  ;;  %5057 = vmatprep.mubr.bf16.mxu1 %v4425_v6 }
 0x62a   : > { %4945 = vmatmul.mubr.bf16.gmra.mrb[60].mxu0 %v4424_v7  ;;  %5058 = vmatmul.mubr.bf16.gmra.mrb[124].mxu1 %v4424_v7 }
 0x62b   : > { %5383 = vmatpush1.bf16.msra.mxu0 %v8448_v20  ;;  %v4471_v20 = vunpack.c.h.bf16 %v4432_v18 }
 0x62c   : > { %5384 = vmatprep.subr.bf16.mxu0 %v8453_v43  ;;  %v11875_v43 = vld [vmem:[%s11845_s19 + $0x40] sm:$0xff] }
 0x62d   : > { %v4474_v8 = vunpack.c.l.bf16 %v11875_v43 }
 0x62f   : > { %5385 = vmatpush1.bf16.msra.mxu0 %v8451_v4  ;;  %v8510_v4 = vld [vmem:[%s13002_s7 + $0x424] ss:$8 sps:$4 sm:$0xff]  }
 0x630   : > { %6088 = vmatprep.subr.bf16.mxu0 %v8456_v63  ;;  %5725 = vmatprep.subr.bf16.mxu1 %v8510_v4 }
 0x6c5   : > { %v4876_v62 = vpop.f32.mrb[32].mxu0  ;;  %v4989_v29 = vpop.f32.mrb[96].mxu1 }
 0x6c6   : > { %v4877_v59 = vadd.f32 %v4876_v62, %v4458_v61  ;;  %v4990_v2 = vadd.f32 %v4989_v29, %v4460_v27  ;;  %v4878_v30 = vpop.f32.mrb[33].mxu0  ;;  %v4991_v17 = vpop.f32.mrb[97].mxu1  ;;  %v4435_v61 = vld [vmem:[%s11845_s19 + $0x48] sm:$0xff] }
 0x6c7   : > { %v4879_v22 = vadd.f32 %v4878_v30, %v4459_v13  ;;  %v4992_v34 = vadd.f32 %v4991_v17, %v4461_v32  ;;  %v4880_v25 = vpop.f32.mrb[34].mxu0  ;;  %v4993_v42 = vpop.f32.mrb[98].mxu1  ;;  %v4476_v52 = vunpack.c.l.bf16 %v4435_v61 }
 0x6c8   : > { %v4881_v58 = vadd.f32 %v4880_v25, %v4462_v21  ;;  %v4994_v50 = vadd.f32 %v4993_v42, %v4464_v12  ;;  %v4882_v56 = vpop.f32.mrb[35].mxu0  ;;  %v4995_v39 = vpop.f32.mrb[99].mxu1  ;;  %v5068_v38 = vmax.f32 %v4877_v59, 0.0  ;;  %v5070_v54 = vmax.f32 %v4990_v2, 0.0  ;;  %v8508_v2 = vld [vmem:[%s13002_s7 + $0x420] ss:$8 sps:$4 sm:$0xff]  }
 0x6c9   : > { %v4883_v24 = vadd.f32 %v4882_v56, %v4463_v10  ;;  %v4996_v28 = vadd.f32 %v4995_v39, %v4465_v53  ;;  %v5069_v23 = vmax.f32 %v4879_v22, 0.0  ;;  %v5071_v15 = vmax.f32 %v4992_v34, 0.0  ;;  %v8457_v53 = vld [vmem:[%s13002_s7 + $0x510] ss:$8 sps:$4 sm:$0xff]   ;;  %v8513_v42 = vld [vmem:[%s13002_s7 + $0x434] ss:$8 sps:$4 sm:$0xff]   ;;  %5726 = vmatpush1.bf16.msra.mxu1 %v8508_v2 }
 0x6ca   : > { %v5072_v45 = vmax.f32 %v4881_v58, 0.0  ;;  %v5074_v37 = vmax.f32 %v4994_v50, 0.0  ;;  %v4475_v59 = vunpack.c.h.bf16 %v11875_v43  ;;  %v4477_v22 = vunpack.c.h.bf16 %v4435_v61  ;;  %v4436_v34 = vld [vmem:[%s11845_s19 + $0x50] sm:$0xff]  ;;  %v4437_v25 = vld [vmem:[%s11845_s19 + $0x58] sm:$0xff]  ;;  %5727 = vmatprep.subr.bf16.mxu1 %v8513_v42  ;;  %v8514_v61 = vld [vmem:[%s13002_s7 + $0x440] ss:$8 sps:$4 sm:$0xff]  }
 0x6cb   : > { %v5073_v33 = vmax.f32 %v4883_v24, 0.0  ;;  %v5075_v19 = vmax.f32 %v4996_v28, 0.0  ;;  %v4478_v18 = vunpack.c.l.bf16 %v4436_v34  ;;  %v4480_v1 = vunpack.c.l.bf16 %v4437_v25  ;;  %v8468_v2 = vld [vmem:[%s13002_s7 + $0x544] ss:$8 sps:$4 sm:$0xff]  }
 0x6cc   : > { %v5165_v14 = vpack.c.bf16 %v5072_v45, %v5068_v38  ;;  %v11864_v46 = vpack.c.bf16 %v5074_v37, %v5070_v54  ;;  %v8511_v38 = vld [vmem:[%s13002_s7 + $0x430] ss:$8 sps:$4 sm:$0xff]  }
 0x6cd   : > { %v5166_v36 = vpack.c.bf16 %v5073_v33, %v5069_v23  ;;  %v11872_v9 = vpack.c.bf16 %v5075_v19, %v5071_v15  ;;  %v4886_v7 = vpop.f32.mrb[36].mxu0  ;;  %v4999_v6 = vpop.f32.mrb[100].mxu1  ;;  %v4479_v23 = vunpack.c.h.bf16 %v4436_v34  ;;  %v4481_v15 = vunpack.c.h.bf16 %v4437_v25  ;;  %v11911_v33 = vld [vmem:[%s11845_s19 + $0x60] sm:$0xff]  ;;  %5728 = vmatpush1.bf16.msra.mxu1 %v8511_v38 }
 0x6ce   : > { %v4887_v63 = vadd.f32 %v4886_v7, %v4466_v48  ;;  %v5000_v55 = vadd.f32 %v4999_v6, %v4468_v57  ;;  %v4888_v51 = vpop.f32.mrb[37].mxu0  ;;  %v5001_v16 = vpop.f32.mrb[101].mxu1  ;;  %v8462_v48 = vld [vmem:[%s13002_s7 + $0x524] ss:$8 sps:$4 sm:$0xff]  }
 0x6cf   : > { %v4889_v27 = vadd.f32 %v4888_v51, %v4467_v47  ;;  %v5002_v13 = vadd.f32 %v5001_v16, %v4469_v5  ;;  %v4890_v32 = vpop.f32.mrb[38].mxu0  ;;  %v5003_v21 = vpop.f32.mrb[102].mxu1  ;;  %5386 = vmatprep.mubr.bf16.mxu0 %v5166_v36  ;;  %v8516_v19 = vld [vmem:[%s13002_s7 + $0x444] ss:$8 sps:$4 sm:$0xff]   ;;  %v8463_v51 = vld [vmem:[%s13002_s7 + $0x530] ss:$8 sps:$4 sm:$0xff]   ;;  %v4482_v16 = vunpack.c.l.bf16 %v11911_v33 }
 0x6d0   : > { %v4891_v12 = vadd.f32 %v4890_v32, %v4470_v31  ;;  %v5004_v62 = vadd.f32 %v5003_v21, %v4472_v3  ;;  %v4892_v29 = vpop.f32.mrb[39].mxu0  ;;  %v5005_v10 = vpop.f32.mrb[103].mxu1  ;;  %5387 = vmatmul.mubr.bf16.vlgmr.msra.gmra.mrb[64].mxu0 %v5165_v14  ;;  %v5076_v58 = vmax.f32 %v4887_v63, 0.0  ;;  %v5078_v50 = vmax.f32 %v5000_v55, 0.0  ;;  %v4439_v36 = vld [vmem:[%s11845_s19 + $0x68] sm:$0xff]  ;;  %5729 = vmatprep.subr.bf16.mxu1 %v8516_v19 }
 0x6d1   : > { %v4893_v30 = vadd.f32 %v4892_v29, %v4471_v20  ;;  %v5006_v17 = vadd.f32 %v5005_v10, %v4473_v60  ;;  %6089 = vmatpush1.bf16.msra.mxu0 %v8454_v44  ;;  %v5077_v47 = vmax.f32 %v4889_v27, 0.0  ;;  %v5079_v11 = vmax.f32 %v5002_v13, 0.0  ;;  %v8519_v29 = vld [vmem:[%s13002_s7 + $0x454] ss:$8 sps:$4 sm:$0xff]   ;;  %5730 = vmatpush1.bf16.msra.mxu1 %v8514_v61 }
 0x6d2   : > { %v5080_v56 = vmax.f32 %v4891_v12, 0.0  ;;  %v5082_v39 = vmax.f32 %v5004_v62, 0.0  ;;  %6090 = vmatprep.subr.bf16.mxu0 %v8459_v35  ;;  %v4483_v35 = vunpack.c.h.bf16 %v11911_v33  ;;  %v4484_v32 = vunpack.c.l.bf16 %v4439_v36  ;;  %v4440_v12 = vld [vmem:[%s11845_s19 + $0x70] sm:$0xff]  ;;  %v4441_v62 = vld [vmem:[%s11845_s19 + $0x78] sm:$0xff]  ;;  %5731 = vmatprep.subr.bf16.mxu1 %v8519_v29 }
 0x6d3   : > { %v5081_v24 = vmax.f32 %v4893_v30, 0.0  ;;  %v5083_v28 = vmax.f32 %v5006_v17, 0.0  ;;  %v4485_v21 = vunpack.c.h.bf16 %v4439_v36  ;;  %v4486_v42 = vunpack.c.l.bf16 %v4440_v12 }
 0x6d4   : > { %v5167_v57 = vpack.c.bf16 %v5080_v56, %v5076_v58  ;;  %v11900_v5 = vpack.c.bf16 %v5082_v39, %v5078_v50  ;;  %v4488_v58 = vunpack.c.l.bf16 %v4441_v62  ;;  %v8466_v50 = vld [vmem:[%s13002_s7 + $0x540] ss:$8 sps:$4 sm:$0xff]   ;;  %v8517_v56 = vld [vmem:[%s13002_s7 + $0x450] ss:$8 sps:$4 sm:$0xff]  }
 0x6d5   : > { %v5168_v54 = vpack.c.bf16 %v5081_v24, %v5077_v47  ;;  %v11908_v45 = vpack.c.bf16 %v5083_v28, %v5079_v11  ;;  %v4896_v37 = vpop.f32.mrb[40].mxu0  ;;  %v5009_v49 = vpop.f32.mrb[104].mxu1  ;;  %6091 = vmatpush1.bf16.msra.mxu0 %v8457_v53  ;;  %v4487_v24 = vunpack.c.h.bf16 %v4440_v12  ;;  %v4489_v28 = vunpack.c.h.bf16 %v4441_v62  ;;  %5732 = vmatpush1.bf16.msra.mxu1 %v8517_v56 }
 0x6d6   : > { %v4897_v14 = vadd.f32 %v4896_v37, %v4474_v8  ;;  %v5010_v31 = vadd.f32 %v5009_v49, %v4476_v52  ;;  %v4898_v3 = vpop.f32.mrb[41].mxu0  ;;  %v5011_v44 = vpop.f32.mrb[105].mxu1  ;;  %6092 = vmatprep.subr.bf16.mxu0 %v8462_v48  ;;  %v8471_v37 = vld [vmem:[%s13002_s7 + $0x554] ss:$8 sps:$4 sm:$0xff]   ;;  %v4443_v49 = vld [vmem:[%s11845_s19 + $0x88] sm:$0xff] }
 0x6d7   : > { %v4899_v7 = vadd.f32 %v4898_v3, %v4475_v59  ;;  %v5012_v6 = vadd.f32 %v5011_v44, %v4477_v22  ;;  %v4900_v20 = vpop.f32.mrb[42].mxu0  ;;  %v5013_v60 = vpop.f32.mrb[106].mxu1  ;;  %5396 = vmatprep.mubr.bf16.mxu0 %v5168_v54 }
 0x6d8   : > { %v4901_v43 = vadd.f32 %v4900_v20, %v4478_v18  ;;  %v5014_v4 = vadd.f32 %v5013_v60, %v4480_v1  ;;  %v4902_v63 = vpop.f32.mrb[43].mxu0  ;;  %v5015_v55 = vpop.f32.mrb[107].mxu1  ;;  %5397 = vmatmul.mubr.bf16.gmra.mrb[68].mxu0 %v5167_v57  ;;  %v5084_v10 = vmax.f32 %v4897_v14, 0.0  ;;  %v5086_v53 = vmax.f32 %v5010_v31, 0.0  ;;  %v11947_v57 = vld [vmem:[%s11845_s19 + $0x80] sm:$0xff] }
 0x6d9   : > { %v4903_v27 = vadd.f32 %v4902_v63, %v4479_v23  ;;  %v5016_v13 = vadd.f32 %v5015_v55, %v4481_v15  ;;  %6093 = vmatpush1.bf16.msra.mxu0 %v8460_v26  ;;  %v5085_v30 = vmax.f32 %v4899_v7, 0.0  ;;  %v5087_v17 = vmax.f32 %v5012_v6, 0.0  ;;  %v8522_v18 = vld [vmem:[%s13002_s7 + $0x464] ss:$8 sps:$4 sm:$0xff]   ;;  %v8520_v6 = vld [vmem:[%s13002_s7 + $0x460] ss:$8 sps:$4 sm:$0xff]  }
 0x6da   : > { %v5088_v8 = vmax.f32 %v4901_v43, 0.0  ;;  %v5090_v59 = vmax.f32 %v5014_v4, 0.0  ;;  %6094 = vmatprep.subr.bf16.mxu0 %v8465_v41  ;;  %v8469_v41 = vld [vmem:[%s13002_s7 + $0x550] ss:$8 sps:$4 sm:$0xff]   ;;  %v4490_v36 = vunpack.c.l.bf16 %v11947_v57  ;;  %v4491_v7 = vunpack.c.h.bf16 %v11947_v57  ;;  %5733 = vmatprep.subr.bf16.mxu1 %v8522_v18 }
 0x6db   : > { %v5089_v52 = vmax.f32 %v4903_v27, 0.0  ;;  %v5091_v22 = vmax.f32 %v5016_v13, 0.0  ;;  %v4492_v43 = vunpack.c.l.bf16 %v4443_v49  ;;  %v4493_v4 = vunpack.c.h.bf16 %v4443_v49  ;;  %v4444_v63 = vld [vmem:[%s11845_s19 + $0x90] sm:$0xff]  ;;  %v4445_v55 = vld [vmem:[%s11845_s19 + $0x98] sm:$0xff]  ;;  %v8474_v13 = vld [vmem:[%s13002_s7 + $0x564] ss:$8 sps:$4 sm:$0xff]   ;;  %5734 = vmatpush1.bf16.msra.mxu1 %v8520_v6 }
 0x6dc   : > { %v5169_v34 = vpack.c.bf16 %v5088_v8, %v5084_v10  ;;  %v11936_v25 = vpack.c.bf16 %v5090_v59, %v5086_v53  ;;  %v4494_v53 = vunpack.c.l.bf16 %v4444_v63  ;;  %v4496_v8 = vunpack.c.l.bf16 %v4445_v55  ;;  %v8472_v59 = vld [vmem:[%s13002_s7 + $0x560] ss:$8 sps:$4 sm:$0xff]  }
 0x6dd   : > { %v5170_v39 = vpack.c.bf16 %v5089_v52, %v5085_v30  ;;  %v11944_v48 = vpack.c.bf16 %v5091_v22, %v5087_v17  ;;  %v4906_v47 = vpop.f32.mrb[44].mxu0  ;;  %v5019_v11 = vpop.f32.mrb[108].mxu1  ;;  %6095 = vmatpush1.bf16.msra.mxu0 %v8463_v51  ;;  %v8525_v51 = vld [vmem:[%s13002_s7 + $0x474] ss:$8 sps:$4 sm:$0xff]  }
 0x6de   : > { %v4907_v1 = vadd.f32 %v4906_v47, %v4482_v16  ;;  %v5020_v26 = vadd.f32 %v5019_v11, %v4484_v32  ;;  %v4908_v38 = vpop.f32.mrb[45].mxu0  ;;  %v5021_v54 = vpop.f32.mrb[109].mxu1  ;;  %6096 = vmatprep.subr.bf16.mxu0 %v8468_v2  ;;  %v8523_v2 = vld [vmem:[%s13002_s7 + $0x470] ss:$8 sps:$4 sm:$0xff]   ;;  %5735 = vmatprep.subr.bf16.mxu1 %v8525_v51 }
 0x6df   : > { %v4909_v23 = vadd.f32 %v4908_v38, %v4483_v35  ;;  %v5022_v15 = vadd.f32 %v5021_v54, %v4485_v21  ;;  %v4910_v33 = vpop.f32.mrb[46].mxu0  ;;  %v5023_v19 = vpop.f32.mrb[110].mxu1  ;;  %5406 = vmatprep.mubr.bf16.mxu0 %v5170_v39  ;;  %5736 = vmatpush1.bf16.msra.mxu1 %v8523_v2  ;;  %v12019_v2 = vld [vmem:[%s11845_s19 + $0xc0] sm:$0xff] }
 0x6e0   : > { %v4911_v14 = vadd.f32 %v4910_v33, %v4486_v42  ;;  %v5024_v31 = vadd.f32 %v5023_v19, %v4488_v58  ;;  %v4912_v3 = vpop.f32.mrb[47].mxu0  ;;  %v5025_v44 = vpop.f32.mrb[111].mxu1  ;;  %5407 = vmatmul.mubr.bf16.gmra.mrb[72].mxu0 %v5169_v34  ;;  %v5092_v16 = vmax.f32 %v4907_v1, 0.0  ;;  %v5094_v35 = vmax.f32 %v5020_v26, 0.0  ;;  %v11983_v58 = vld [vmem:[%s11845_s19 + $0xa0] sm:$0xff] }
 0x6e1   : > { %v4913_v20 = vadd.f32 %v4912_v3, %v4487_v24  ;;  %v5026_v60 = vadd.f32 %v5025_v44, %v4489_v28  ;;  %6097 = vmatpush1.bf16.msra.mxu0 %v8466_v50  ;;  %v5093_v32 = vmax.f32 %v4909_v23, 0.0  ;;  %v5095_v21 = vmax.f32 %v5022_v15, 0.0  ;;  %v8528_v50 = vld [vmem:[%s13002_s7 + $0x484] ss:$8 sps:$4 sm:$0xff]   ;;  %v8477_v24 = vld [vmem:[%s13002_s7 + $0x574] ss:$8 sps:$4 sm:$0xff]  }
 0x6e2   : > { %v5096_v61 = vmax.f32 %v4911_v14, 0.0  ;;  %v5098_v27 = vmax.f32 %v5024_v31, 0.0  ;;  %6098 = vmatprep.subr.bf16.mxu0 %v8471_v37  ;;  %v4495_v34 = vunpack.c.h.bf16 %v4444_v63  ;;  %v4497_v42 = vunpack.c.h.bf16 %v4445_v55  ;;  %v4447_v28 = vld [vmem:[%s11845_s19 + $0xa8] sm:$0xff]  ;;  %v8475_v23 = vld [vmem:[%s13002_s7 + $0x570] ss:$8 sps:$4 sm:$0xff]   ;;  %5737 = vmatprep.subr.bf16.mxu1 %v8528_v50 }
 0x6e3   : > { %v5097_v12 = vmax.f32 %v4913_v20, 0.0  ;;  %v5099_v62 = vmax.f32 %v5026_v60, 0.0  ;;  %v4498_v15 = vunpack.c.l.bf16 %v11983_v58  ;;  %v4499_v33 = vunpack.c.h.bf16 %v11983_v58  ;;  %v8526_v19 = vld [vmem:[%s13002_s7 + $0x480] ss:$8 sps:$4 sm:$0xff]   ;;  %v8483_v58 = vld [vmem:[%s13002_s7 + $0x594] ss:$8 sps:$4 sm:$0xff]  }
 0x6e4   : > { %v5171_v29 = vpack.c.bf16 %v5096_v61, %v5092_v16  ;;  %v11972_v10 = vpack.c.bf16 %v5098_v27, %v5094_v35  ;;  %v4500_v3 = vunpack.c.l.bf16 %v4447_v28  ;;  %v4501_v44 = vunpack.c.h.bf16 %v4447_v28  ;;  %5738 = vmatpush1.bf16.msra.mxu1 %v8526_v19  ;;  %v4451_v50 = vld [vmem:[%s11845_s19 + $0xc8] sm:$0xff]  ;;  %v4453_v19 = vld [vmem:[%s11845_s19 + $0xd8] sm:$0xff] }
 0x6e5   : > { %v5172_v30 = vpack.c.bf16 %v5097_v12, %v5093_v32  ;;  %v11980_v17 = vpack.c.bf16 %v5099_v62, %v5095_v21  ;;  %v4916_v52 = vpop.f32.mrb[48].mxu0  ;;  %v5029_v22 = vpop.f32.mrb[112].mxu1  ;;  %6099 = vmatpush1.bf16.msra.mxu0 %v8469_v41  ;;  %v4448_v41 = vld [vmem:[%s11845_s19 + $0xb0] sm:$0xff]  ;;  %v8478_v32 = vld [vmem:[%s13002_s7 + $0x580] ss:$8 sps:$4 sm:$0xff]  }
 0x6e6   : > { %v4917_v56 = vadd.f32 %v4916_v52, %v4490_v36  ;;  %v5030_v39 = vadd.f32 %v5029_v22, %v4492_v43  ;;  %v4918_v47 = vpop.f32.mrb[49].mxu0  ;;  %v5031_v11 = vpop.f32.mrb[113].mxu1  ;;  %6100 = vmatprep.subr.bf16.mxu0 %v8474_v13  ;;  %v4449_v36 = vld [vmem:[%s11845_s19 + $0xb8] sm:$0xff]  ;;  %v4502_v27 = vunpack.c.l.bf16 %v4448_v41 }
 0x6e7   : > { %v4919_v57 = vadd.f32 %v4918_v47, %v4491_v7  ;;  %v5032_v18 = vadd.f32 %v5031_v11, %v4493_v4  ;;  %v4920_v1 = vpop.f32.mrb[50].mxu0  ;;  %v5033_v26 = vpop.f32.mrb[114].mxu1  ;;  %5416 = vmatprep.mubr.bf16.mxu0 %v5172_v30  ;;  %v8531_v7 = vld [vmem:[%s13002_s7 + $0x494] ss:$8 sps:$4 sm:$0xff]   ;;  %v8480_v4 = vld [vmem:[%s13002_s7 + $0x584] ss:$8 sps:$4 sm:$0xff]   ;;  %v4504_v13 = vunpack.c.l.bf16 %v4449_v36 }
 0x6e8   : > { %v4921_v38 = vadd.f32 %v4920_v1, %v4494_v53  ;;  %v5034_v54 = vadd.f32 %v5033_v26, %v4496_v8  ;;  %v4922_v37 = vpop.f32.mrb[51].mxu0  ;;  %v5035_v49 = vpop.f32.mrb[115].mxu1  ;;  %5417 = vmatmul.mubr.bf16.gmra.mrb[76].mxu0 %v5171_v29  ;;  %v5100_v6 = vmax.f32 %v4917_v56, 0.0  ;;  %v5102_v20 = vmax.f32 %v5030_v39, 0.0  ;;  %v8529_v21 = vld [vmem:[%s13002_s7 + $0x490] ss:$8 sps:$4 sm:$0xff]   ;;  %5739 = vmatprep.subr.bf16.mxu1 %v8531_v7 }
 0x6e9   : > { %v4923_v14 = vadd.f32 %v4922_v37, %v4495_v34  ;;  %v5036_v31 = vadd.f32 %v5035_v49, %v4497_v42  ;;  %6101 = vmatpush1.bf16.msra.mxu0 %v8472_v59  ;;  %v5101_v63 = vmax.f32 %v4919_v57, 0.0  ;;  %v5103_v55 = vmax.f32 %v5032_v18, 0.0  ;;  %v8534_v30 = vld [vmem:[%s13002_s7 + $0x4a4] ss:$8 sps:$4 sm:$0xff]   ;;  %v8481_v1 = vld [vmem:[%s13002_s7 + $0x590] ss:$8 sps:$4 sm:$0xff]   ;;  %5740 = vmatpush1.bf16.msra.mxu1 %v8529_v21 }
 0x6ea   : > { %v5104_v60 = vmax.f32 %v4921_v38, 0.0  ;;  %v5106_v43 = vmax.f32 %v5034_v54, 0.0  ;;  %6102 = vmatprep.subr.bf16.mxu0 %v8477_v24  ;;  %v4503_v8 = vunpack.c.h.bf16 %v4448_v41  ;;  %v4505_v59 = vunpack.c.h.bf16 %v4449_v36  ;;  %v8532_v54 = vld [vmem:[%s13002_s7 + $0x4a0] ss:$8 sps:$4 sm:$0xff]   ;;  %5741 = vmatprep.subr.bf16.mxu1 %v8534_v30  ;;  %v8486_v36 = vld [vmem:[%s13002_s7 + $0x5a4] ss:$8 sps:$4 sm:$0xff]  }
 0x6eb   : > { %v5105_v51 = vmax.f32 %v4923_v14, 0.0  ;;  %v5107_v16 = vmax.f32 %v5036_v31, 0.0  ;;  %v4506_v26 = vunpack.c.l.bf16 %v12019_v2  ;;  %v4507_v38 = vunpack.c.h.bf16 %v12019_v2  ;;  %v8537_v14 = vld [vmem:[%s13002_s7 + $0x4b4] ss:$8 sps:$4 sm:$0xff]  }
 0x6ec   : > { %v5173_v35 = vpack.c.bf16 %v5104_v60, %v5100_v6  ;;  %v12008_v61 = vpack.c.bf16 %v5106_v43, %v5102_v20 }
 0x6ed   : > { %v5174_v12 = vpack.c.bf16 %v5105_v51, %v5101_v63  ;;  %v12016_v62 = vpack.c.bf16 %v5107_v16, %v5103_v55  ;;  %v4926_v29 = vpop.f32.mrb[52].mxu0  ;;  %v5039_v53 = vpop.f32.mrb[116].mxu1  ;;  %6103 = vmatpush1.bf16.msra.mxu0 %v8475_v23  ;;  %v4508_v23 = vunpack.c.l.bf16 %v4451_v50  ;;  %v4512_v55 = vunpack.c.l.bf16 %v4453_v19  ;;  %v8484_v51 = vld [vmem:[%s13002_s7 + $0x5a0] ss:$8 sps:$4 sm:$0xff]   ;;  %5742 = vmatpush1.bf16.msra.mxu1 %v8532_v54  ;;  %v8535_v16 = vld [vmem:[%s13002_s7 + $0x4b0] ss:$8 sps:$4 sm:$0xff]  }
 0x6ee   : > { %v4927_v52 = vadd.f32 %v4926_v29, %v4498_v15  ;;  %v5040_v22 = vadd.f32 %v5039_v53, %v4500_v3  ;;  %v4928_v34 = vpop.f32.mrb[53].mxu0  ;;  %v5041_v42 = vpop.f32.mrb[117].mxu1  ;;  %6104 = vmatprep.subr.bf16.mxu0 %v8480_v4  ;;  %v4509_v15 = vunpack.c.h.bf16 %v4451_v50  ;;  %v12055_v29 = vld [vmem:[%s11845_s19 + $0xe0] sm:$0xff]  ;;  %5743 = vmatprep.subr.bf16.mxu1 %v8537_v14 }
 0x6ef   : > { %v4929_v56 = vadd.f32 %v4928_v34, %v4499_v33  ;;  %v5042_v39 = vadd.f32 %v5041_v42, %v4501_v44  ;;  %v4930_v47 = vpop.f32.mrb[54].mxu0  ;;  %v5043_v11 = vpop.f32.mrb[118].mxu1  ;;  %5426 = vmatprep.mubr.bf16.mxu0 %v5174_v12  ;;  %v4452_v33 = vld [vmem:[%s11845_s19 + $0xd0] sm:$0xff]  ;;  %v4513_v12 = vunpack.c.h.bf16 %v4453_v19  ;;  %v8540_v53 = vld [vmem:[%s13002_s7 + $0x4c4] ss:$8 sps:$4 sm:$0xff]  }
 0x6f0   : > { %v4931_v24 = vadd.f32 %v4930_v47, %v4502_v27  ;;  %v5044_v28 = vadd.f32 %v5043_v11, %v4504_v13  ;;  %v4932_v57 = vpop.f32.mrb[55].mxu0  ;;  %v5045_v18 = vpop.f32.mrb[119].mxu1  ;;  %5427 = vmatmul.mubr.bf16.gmra.mrb[80].mxu0 %v5173_v35  ;;  %v5108_v31 = vmax.f32 %v4927_v52, 0.0  ;;  %v5110_v3 = vmax.f32 %v5040_v22, 0.0  ;;  %v8489_v52 = vld [vmem:[%s13002_s7 + $0x5b4] ss:$8 sps:$4 sm:$0xff]  }
 0x6f1   : > { %v4933_v37 = vadd.f32 %v4932_v57, %v4503_v8  ;;  %v5046_v49 = vadd.f32 %v5045_v18, %v4505_v59  ;;  %6105 = vmatpush1.bf16.msra.mxu0 %v8478_v32  ;;  %v5109_v7 = vmax.f32 %v4929_v56, 0.0  ;;  %v5111_v6 = vmax.f32 %v5042_v39, 0.0  ;;  %v4455_v22 = vld [vmem:[%s11845_s19 + $0xe8] sm:$0xff]  ;;  %5744 = vmatpush1.bf16.msra.mxu1 %v8535_v16 }
 0x6f2   : > { %v5112_v44 = vmax.f32 %v4931_v24, 0.0  ;;  %v5114_v41 = vmax.f32 %v5044_v28, 0.0  ;;  %6106 = vmatprep.subr.bf16.mxu0 %v8483_v58  ;;  %v4510_v63 = vunpack.c.l.bf16 %v4452_v33  ;;  %v4511_v21 = vunpack.c.h.bf16 %v4452_v33  ;;  %v8487_v24 = vld [vmem:[%s13002_s7 + $0x5b0] ss:$8 sps:$4 sm:$0xff]   ;;  %v8538_v18 = vld [vmem:[%s13002_s7 + $0x4c0] ss:$8 sps:$4 sm:$0xff]   ;;  %5745 = vmatprep.subr.bf16.mxu1 %v8540_v53 }
 0x6f3   : > { %v5113_v20 = vmax.f32 %v4933_v37, 0.0  ;;  %v5115_v60 = vmax.f32 %v5046_v49, 0.0  ;;  %v4514_v28 = vunpack.c.l.bf16 %v12055_v29  ;;  %v4515_v57 = vunpack.c.h.bf16 %v12055_v29  ;;  %v4456_v37 = vld [vmem:[%s11845_s19 + $0xf0] sm:$0xff]  ;;  %v4457_v49 = vld [vmem:[%s11845_s19 + $0xf8] sm:$0xff] }
 0x6f4   : > { %v5175_v43 = vpack.c.bf16 %v5112_v44, %v5108_v31  ;;  %v12044_v4 = vpack.c.bf16 %v5114_v41, %v5110_v3  ;;  %v4517_v54 = vunpack.c.h.bf16 %v4455_v22  ;;  %v8492_v31 = vld [vmem:[%s13002_s7 + $0x5c4] ss:$8 sps:$4 sm:$0xff]  }
 0x6f5   : > { %v5176_v35 = vpack.c.bf16 %v5113_v20, %v5109_v7  ;;  %v12052_v27 = vpack.c.bf16 %v5115_v60, %v5111_v6  ;;  %v4936_v13 = vpop.f32.mrb[56].mxu0  ;;  %v5049_v32 = vpop.f32.mrb[120].mxu1  ;;  %6107 = vmatpush1.bf16.msra.mxu0 %v8481_v1  ;;  %v4518_v20 = vunpack.c.l.bf16 %v4456_v37  ;;  %v4520_v60 = vunpack.c.l.bf16 %v4457_v49  ;;  %5746 = vmatpush1.bf16.msra.mxu1 %v8538_v18 }
 0x6f6   : > { %v4937_v8 = vadd.f32 %v4936_v13, %v4506_v26  ;;  %v5050_v59 = vadd.f32 %v5049_v32, %v4508_v23  ;;  %v4938_v2 = vpop.f32.mrb[57].mxu0  ;;  %v5051_v30 = vpop.f32.mrb[121].mxu1  ;;  %6108 = vmatprep.subr.bf16.mxu0 %v8486_v36  ;;  %v8543_v23 = vld [vmem:[%s13002_s7 + $0x4d4] ss:$8 sps:$4 sm:$0xff]   ;;  %v4521_v13 = vunpack.c.h.bf16 %v4457_v49  ;;  %v8490_v32 = vld [vmem:[%s13002_s7 + $0x5c0] ss:$8 sps:$4 sm:$0xff]  }
 0x6f7   : > { %v4939_v34 = vadd.f32 %v4938_v2, %v4507_v38  ;;  %v5052_v42 = vadd.f32 %v5051_v30, %v4509_v15  ;;  %v4940_v58 = vpop.f32.mrb[58].mxu0  ;;  %v5053_v50 = vpop.f32.mrb[122].mxu1  ;;  %5436 = vmatprep.mubr.bf16.mxu0 %v5176_v35  ;;  %v4516_v38 = vunpack.c.l.bf16 %v4455_v22  ;;  %v4519_v35 = vunpack.c.h.bf16 %v4456_v37  ;;  %5747 = vmatprep.subr.bf16.mxu1 %v8543_v23 }
 0x6f8   : > { %v4941_v56 = vadd.f32 %v4940_v58, %v4510_v63  ;;  %v5054_v39 = vadd.f32 %v5053_v50, %v4512_v55  ;;  %v4942_v47 = vpop.f32.mrb[59].mxu0  ;;  %v5055_v11 = vpop.f32.mrb[123].mxu1  ;;  %5437 = vmatmul.mubr.bf16.gmra.mrb[84].mxu0 %v5175_v43  ;;  %v5116_v15 = vmax.f32 %v4937_v8, 0.0  ;;  %v5118_v33 = vmax.f32 %v5050_v59, 0.0  ;;  %v8541_v43 = vld [vmem:[%s13002_s7 + $0x4d0] ss:$8 sps:$4 sm:$0xff]  }
 0x6f9   : > { %v4943_v1 = vadd.f32 %v4942_v47, %v4511_v21  ;;  %v5056_v26 = vadd.f32 %v5055_v11, %v4513_v12  ;;  %6109 = vmatpush1.bf16.msra.mxu0 %v8484_v51  ;;  %v5117_v3 = vmax.f32 %v4939_v34, 0.0  ;;  %v5119_v44 = vmax.f32 %v5052_v42, 0.0  ;;  %v8495_v8 = vld [vmem:[%s13002_s7 + $0x5d4] ss:$8 sps:$4 sm:$0xff]   ;;  %5748 = vmatpush1.bf16.msra.mxu1 %v8541_v43 }
 0x6fa   : > { %v5120_v19 = vmax.f32 %v4941_v56, 0.0  ;;  %v5122_v14 = vmax.f32 %v5054_v39, 0.0  ;;  %6110 = vmatprep.subr.bf16.mxu0 %v8489_v52  ;;  %v8493_v39 = vld [vmem:[%s13002_s7 + $0x5d0] ss:$8 sps:$4 sm:$0xff]   ;;  %v12240_v43 = vld [vmem:[%s13002_s7 + $0x694] ss:$8 sps:$4 sm:$0xff]  }
 0x6fb   : > { %v5121_v41 = vmax.f32 %v4943_v1, 0.0  ;;  %v5123_v36 = vmax.f32 %v5056_v26, 0.0 }
 0x6fc   : > { %v5177_v7 = vpack.c.bf16 %v5120_v19, %v5116_v15  ;;  %v12080_v6 = vpack.c.bf16 %v5122_v14, %v5118_v33  ;;  %v8496_v15 = vld [vmem:[%s13002_s7 + $0x5e0] ss:$8 sps:$4 sm:$0xff]   ;;  %v8501_v33 = vld [vmem:[%s13002_s7 + $0x5f4] ss:$8 sps:$4 sm:$0xff]   ;;  %v8499_v19 = vld [vmem:[%s13002_s7 + $0x5f0] ss:$8 sps:$4 sm:$0xff]  }
 0x6fd   : > { %v5178_v63 = vpack.c.bf16 %v5121_v41, %v5117_v3  ;;  %v12085_v55 = vpack.c.bf16 %v5123_v36, %v5119_v44  ;;  %v4946_v51 = vpop.f32.mrb[60].mxu0  ;;  %v5059_v16 = vpop.f32.mrb[124].mxu1  ;;  %6111 = vmatpush1.bf16.msra.mxu0 %v8487_v24  ;;  %v12182_v14 = vld [vmem:[%s13002_s7 + $0x640] ss:$8 sps:$4 sm:$0xff]   ;;  %v12192_v3 = vld [vmem:[%s13002_s7 + $0x654] ss:$8 sps:$4 sm:$0xff]  }
 0x6fe   : > { %v4947_v21 = vadd.f32 %v4946_v51, %v4514_v28  ;;  %v5060_v12 = vadd.f32 %v5059_v16, %v4516_v38  ;;  %v4948_v29 = vpop.f32.mrb[61].mxu0  ;;  %v5061_v53 = vpop.f32.mrb[125].mxu1  ;;  %6112 = vmatprep.subr.bf16.mxu0 %v8492_v31  ;;  %v12187_v31 = vld [vmem:[%s13002_s7 + $0x644] ss:$8 sps:$4 sm:$0xff]   ;;  %v12199_v44 = vld [vmem:[%s13002_s7 + $0x650] ss:$8 sps:$4 sm:$0xff]  }
 0x6ff   : > { %v4949_v59 = vadd.f32 %v4948_v29, %v4515_v57  ;;  %v5062_v2 = vadd.f32 %v5061_v53, %v4517_v54  ;;  %v4950_v30 = vpop.f32.mrb[62].mxu0  ;;  %v5063_v52 = vpop.f32.mrb[126].mxu1  ;;  %5446 = vmatprep.mubr.bf16.mxu0 %v5178_v63  ;;  %v8498_v57 = vld [vmem:[%s13002_s7 + $0x5e4] ss:$8 sps:$4 sm:$0xff]   ;;  %v12206_v41 = vld [vmem:[%s13002_s7 + $0x660] ss:$8 sps:$4 sm:$0xff]  }
 0x700   : > { %v4951_v22 = vadd.f32 %v4950_v30, %v4518_v20  ;;  %v5064_v34 = vadd.f32 %v5063_v52, %v4520_v60  ;;  %v4952_v42 = vpop.f32.mrb[63].mxu0  ;;  %v5065_v58 = vpop.f32.mrb[127].mxu1  ;;  %5447 = vmatmul.mubr.bf16.gmra.mrb[88].mxu0 %v5177_v7  ;;  %v5124_v47 = vmax.f32 %v4947_v21, 0.0  ;;  %v5126_v11 = vmax.f32 %v5060_v12, 0.0  ;;  %v12211_v36 = vld [vmem:[%s13002_s7 + $0x664] ss:$8 sps:$4 sm:$0xff]  }
 0x701   : > { %v4953_v50 = vadd.f32 %v4952_v42, %v4519_v35  ;;  %v5066_v56 = vadd.f32 %v5065_v58, %v4521_v13  ;;  %6113 = vmatpush1.bf16.msra.mxu0 %v8490_v32  ;;  %v5125_v18 = vmax.f32 %v4949_v59, 0.0  ;;  %v5127_v1 = vmax.f32 %v5062_v2, 0.0  ;;  %v12216_v7 = vld [vmem:[%s13002_s7 + $0x674] ss:$8 sps:$4 sm:$0xff]   ;;  %v12230_v20 = vld [vmem:[%s13002_s7 + $0x680] ss:$8 sps:$4 sm:$0xff]  }
 0x702   : > { %v5128_v24 = vmax.f32 %v4951_v22, 0.0  ;;  %v5130_v28 = vmax.f32 %v5064_v34, 0.0  ;;  %6114 = vmatprep.subr.bf16.mxu0 %v8495_v8  ;;  %v12235_v60 = vld [vmem:[%s13002_s7 + $0x684] ss:$8 sps:$4 sm:$0xff]   ;;  %v12247_v63 = vld [vmem:[%s13002_s7 + $0x690] ss:$8 sps:$4 sm:$0xff]  }
 0x703   : > { %v5129_v26 = vmax.f32 %v4953_v50, 0.0  ;;  %v5131_v38 = vmax.f32 %v5066_v56, 0.0  ;;  %v12259_v51 = vld [vmem:[%s13002_s7 + $0x6a4] ss:$8 sps:$4 sm:$0xff]   ;;  %v12264_v16 = vld [vmem:[%s13002_s7 + $0x6b4] ss:$8 sps:$4 sm:$0xff]  }
 0x704   : > { %v5179_v54 = vpack.c.bf16 %v5128_v24, %v5124_v47  ;;  %v5913_v37 = vpack.c.bf16 %v5130_v28, %v5126_v11  ;;  %v12271_v35 = vld [vmem:[%s13002_s7 + $0x6b0] ss:$8 sps:$4 sm:$0xff]   ;;  %v12278_v13 = vld [vmem:[%s13002_s7 + $0x6c0] ss:$8 sps:$4 sm:$0xff]   ;;  %v12283_v32 = vld [vmem:[%s13002_s7 + $0x6c4] ss:$8 sps:$4 sm:$0xff]  }
 0x705   : > { %v5180_v49 = vpack.c.bf16 %v5129_v26, %v5125_v18  ;;  %v5914_v23 = vpack.c.bf16 %v5131_v38, %v5127_v1  ;;  %6115 = vmatpush1.bf16.msra.mxu0 %v8493_v39  ;;  %v12288_v21 = vld [vmem:[%s13002_s7 + $0x6d4] ss:$8 sps:$4 sm:$0xff]   ;;  %v12295_v12 = vld [vmem:[%s13002_s7 + $0x6d0] ss:$8 sps:$4 sm:$0xff]   ;;  %v12302_v29 = vld [vmem:[%s13002_s7 + $0x6e0] ss:$8 sps:$4 sm:$0xff]  }
 0x706   : > { %6116 = vmatprep.subr.bf16.mxu0 %v8498_v57  ;;  %v12307_v53 = vld [vmem:[%s13002_s7 + $0x6e4] ss:$8 sps:$4 sm:$0xff]   ;;  %v12312_v8 = vld [vmem:[%s13002_s7 + $0x6f4] ss:$8 sps:$4 sm:$0xff]   ;;  %v12319_v59 = vld [vmem:[%s13002_s7 + $0x6f0] ss:$8 sps:$4 sm:$0xff]  }
 0x707   : > { %5456 = vmatprep.mubr.bf16.mxu0 %v5180_v49  ;;  %v7696_v2 = vld [vmem:[%s13003_s8 + $0x4] ss:$8 sm:$0x3] }
 0x708   : > { %5457 = vmatmul.mubr.bf16.gmra.mrb[92].mxu0 %v5179_v54  ;;  %v12327_v30 = vrot.slane %v7696_v2, %v13543_v0  ;;  %v12330_v52 = vrot.slane %v7696_v2, %v13544_v40 }
 0x709   : > { %6117 = vmatpush1.bf16.msra.mxu0 %v8496_v15  ;;  %6120 = vmatprep.mubr.bf16.mxu0 %v11872_v9  ;;  %v8544_v9 = vld [vmem:[%s13002_s7 + $0x4e0] ss:$8 sps:$4 sm:$0xff]  }
 0x70a   : > { %6118 = vmatprep.subr.bf16.mxu0 %v8501_v33 }
 0x70d   : > { %6119 = vmatpush1.bf16.msra.mxu0 %v8499_v19 }
 0x710   : > { %6121 = vmatmul.mubr.bf16.vlgmr.msra.gmra.mrb[96].mxu0 %v11864_v46  ;;  %v8546_v46 = vld [vmem:[%s13002_s7 + $0x4e4] ss:$8 sps:$4 sm:$0xff]  }
 0x711   : > { %6130 = vmatprep.mubr.bf16.mxu0 %v11908_v45  ;;  %5749 = vmatprep.subr.bf16.mxu1 %v8546_v46  ;;  %v8547_v45 = vld [vmem:[%s13002_s7 + $0x4f0] ss:$8 sps:$4 sm:$0xff]  }
 0x712   : > { %5750 = vmatpush1.bf16.msra.mxu1 %v8544_v9 }
 0x718   : > { %6131 = vmatmul.mubr.bf16.gmra.mrb[100].mxu0 %v11900_v5  ;;  %v8549_v5 = vld [vmem:[%s13002_s7 + $0x4f4] ss:$8 sps:$4 sm:$0xff]  }
 0x719   : > { %6140 = vmatprep.mubr.bf16.mxu0 %v11944_v48  ;;  %5751 = vmatprep.subr.bf16.mxu1 %v8549_v5  ;;  %v8552_v48 = vld [vmem:[%s13002_s7 + $0x604] ss:$8 sps:$4 sm:$0xff]  }
 0x71a   : > { %5752 = vmatpush1.bf16.msra.mxu1 %v8547_v45  ;;  %6455 = vmatprep.subr.bf16.mxu0 %v8552_v48 }
 0x71b   : > { %7947 = vmatprep.subr.bf16.mxu1 %v8552_v48 }
 0x720   : > { %6141 = vmatmul.mubr.bf16.gmra.mrb[104].mxu0 %v11936_v25  ;;  %v12134_v25 = vld [vmem:[%s13002_s7 + $0x600] ss:$8 sps:$4 sm:$0xff]  }
 0x721   : > { %6150 = vmatprep.mubr.bf16.mxu0 %v11980_v17  ;;  %6456 = vmatpush1.bf16.msra.mxu0 %v12134_v25  ;;  %v12148_v17 = vld [vmem:[%s13002_s7 + $0x610] ss:$8 sps:$4 sm:$0xff]  }
 0x728   : > { %6151 = vmatmul.mubr.bf16.gmra.mrb[108].mxu0 %v11972_v10  ;;  %v12142_v10 = vld [vmem:[%s13002_s7 + $0x614] ss:$8 sps:$4 sm:$0xff]  }
 0x729   : > { %6160 = vmatprep.mubr.bf16.mxu0 %v12016_v62  ;;  %6457 = vmatprep.subr.bf16.mxu0 %v12142_v10  ;;  %v12162_v62 = vld [vmem:[%s13002_s7 + $0x624] ss:$8 sps:$4 sm:$0xff]  }
 0x72a   : > { %6458 = vmatpush1.bf16.msra.mxu0 %v12148_v17 }
 0x72b   : > { %6459 = vmatprep.subr.bf16.mxu0 %v12162_v62 }
 0x730   : > { %6161 = vmatmul.mubr.bf16.gmra.mrb[112].mxu0 %v12008_v61  ;;  %v12157_v61 = vld [vmem:[%s13002_s7 + $0x620] ss:$8 sps:$4 sm:$0xff]  }
 0x731   : > { %6170 = vmatprep.mubr.bf16.mxu0 %v12052_v27  ;;  %v12167_v27 = vld [vmem:[%s13002_s7 + $0x634] ss:$8 sps:$4 sm:$0xff]   ;;  %6460 = vmatpush1.bf16.msra.mxu0 %v12157_v61 }
 0x732   : > { %6461 = vmatprep.subr.bf16.mxu0 %v12167_v27 }
 0x738   : > { %6171 = vmatmul.mubr.bf16.gmra.mrb[116].mxu0 %v12044_v4  ;;  %v12174_v4 = vld [vmem:[%s13002_s7 + $0x630] ss:$8 sps:$4 sm:$0xff]  }
 0x739   : > { %6180 = vmatprep.mubr.bf16.mxu0 %v12085_v55  ;;  %6462 = vmatpush1.bf16.msra.mxu0 %v12174_v4  ;;  %v12254_v55 = vld [vmem:[%s13002_s7 + $0x6a0] ss:$8 sps:$4 sm:$0xff]  }
 0x73a   : > { %6463 = vmatprep.subr.bf16.mxu0 %v12187_v31 }
 0x73d   : > { %6464 = vmatpush1.bf16.msra.mxu0 %v12182_v14 }
 0x73e   : > { %6465 = vmatprep.subr.bf16.mxu0 %v12192_v3 }
 0x740   : > { %6181 = vmatmul.mubr.bf16.gmra.mrb[120].mxu0 %v12080_v6  ;;  %v12223_v6 = vld [vmem:[%s13002_s7 + $0x670] ss:$8 sps:$4 sm:$0xff]  }
 0x741   : > { %6190 = vmatprep.mubr.bf16.mxu0 %v5914_v23  ;;  %6466 = vmatpush1.bf16.msra.mxu0 %v12199_v44 }
 0x742   : > { %6467 = vmatprep.subr.bf16.mxu0 %v12211_v36 }
 0x745   : > { %6468 = vmatpush1.bf16.msra.mxu0 %v12206_v41 }
 0x746   : > { %6469 = vmatprep.subr.bf16.mxu0 %v12216_v7 }
 0x748   : > { %6191 = vmatmul.mubr.bf16.gmra.mrb[124].mxu0 %v5913_v37 }
 0x749   : > { %6470 = vmatpush1.bf16.msra.mxu0 %v12223_v6 }
 0x74a   : > { %6471 = vmatprep.subr.bf16.mxu0 %v12235_v60 }
 0x74d   : > { %6472 = vmatpush1.bf16.msra.mxu0 %v12230_v20 }
 0x74e   : > { %6473 = vmatprep.subr.bf16.mxu0 %v12240_v43 }
 0x751   : > { %6474 = vmatpush1.bf16.msra.mxu0 %v12247_v63 }
 0x752   : > { %6475 = vmatprep.subr.bf16.mxu0 %v12259_v51 }
 0x755   : > { %6476 = vmatpush1.bf16.msra.mxu0 %v12254_v55 }
 0x756   : > { %6477 = vmatprep.subr.bf16.mxu0 %v12264_v16 }
 0x759   : > { %6478 = vmatpush1.bf16.msra.mxu0 %v12271_v35 }
 0x75a   : > { %6479 = vmatprep.subr.bf16.mxu0 %v12283_v32 }
 0x75d   : > { %6480 = vmatpush1.bf16.msra.mxu0 %v12278_v13 }
 0x75e   : > { %6481 = vmatprep.subr.bf16.mxu0 %v12288_v21 }
 0x761   : > { %6482 = vmatpush1.bf16.msra.mxu0 %v12295_v12 }
 0x762   : > { %6483 = vmatprep.subr.bf16.mxu0 %v12307_v53 }
 0x765   : > { %6484 = vmatpush1.bf16.msra.mxu0 %v12302_v29 }
 0x766   : > { %6485 = vmatprep.subr.bf16.mxu0 %v12312_v8 }
 0x769   : > { %6486 = vmatpush1.bf16.msra.mxu0 %v12319_v59 }
 0x7a3   : > { %v5388_v22 = vpop.f32.mrb[64].mxu0 }
 0x7a4   : > { %v5389_v34 = vadd.f32 %v5388_v22, %v12327_v30  ;;  %v5390_v42 = vpop.f32.mrb[65].mxu0 }
 0x7a5   : > { %v5391_v58 = vadd.f32 %v5390_v42, %v12330_v52  ;;  %v5392_v50 = vpop.f32.mrb[66].mxu0 }
 0x7a6   : > { %v5393_v56 = vadd.f32 %v5392_v50, %v12327_v30  ;;  %v5394_v39 = vpop.f32.mrb[67].mxu0  ;;  %v5467_v11 = vmax.f32 %v5389_v34, 0.0 }
 0x7a7   : > { %v5395_v47 = vadd.f32 %v5394_v39, %v12330_v52  ;;  %v5468_v28 = vmax.f32 %v5391_v58, 0.0 }
 0x7a8   : > { %v5469_v24 = vmax.f32 %v5393_v56, 0.0 }
 0x7a9   : > { %v5470_v57 = vmax.f32 %v5395_v47, 0.0 }
 0x7aa   : > { %v5532_v18 = vpack.c.bf16 %v5469_v24, %v5467_v11 }
 0x7ab   : > { %v5533_v1 = vpack.c.bf16 %v5470_v57, %v5468_v28  ;;  %v5398_v26 = vpop.f32.mrb[68].mxu0 }
 0x7ac   : > { %v5399_v38 = vadd.f32 %v5398_v26, %v12327_v30  ;;  %v5400_v54 = vpop.f32.mrb[69].mxu0 }
 0x7ad   : > { %v5401_v37 = vadd.f32 %v5400_v54, %v12330_v52  ;;  %v5402_v49 = vpop.f32.mrb[70].mxu0  ;;  %5753 = vmatprep.mubr.bf16.mxu1 %v5533_v1 }
 0x7ae   : > { %v5403_v23 = vadd.f32 %v5402_v49, %v12327_v30  ;;  %v5404_v15 = vpop.f32.mrb[71].mxu0  ;;  %5754 = vmatmul.mubr.bf16.vlgmr.msra.gmra.mrb[128].mxu1 %v5532_v18  ;;  %v5471_v19 = vmax.f32 %v5399_v38, 0.0 }
 0x7af   : > { %v5405_v33 = vadd.f32 %v5404_v15, %v12330_v52  ;;  %7963 = vmatpush1.bf16.msra.mxu1 %v12134_v25  ;;  %v5472_v46 = vmax.f32 %v5401_v37, 0.0 }
 0x7b0   : > { %v5473_v9 = vmax.f32 %v5403_v23, 0.0  ;;  %7948 = vmatprep.subr.bf16.mxu1 %v12142_v10 }
 0x7b1   : > { %v5474_v5 = vmax.f32 %v5405_v33, 0.0 }
 0x7b2   : > { %v5534_v45 = vpack.c.bf16 %v5473_v9, %v5471_v19 }
 0x7b3   : > { %v5535_v48 = vpack.c.bf16 %v5474_v5, %v5472_v46  ;;  %v5408_v2 = vpop.f32.mrb[72].mxu0  ;;  %7964 = vmatpush1.bf16.msra.mxu1 %v12148_v17 }
 0x7b4   : > { %v5409_v22 = vadd.f32 %v5408_v2, %v12327_v30  ;;  %v5410_v34 = vpop.f32.mrb[73].mxu0  ;;  %7949 = vmatprep.subr.bf16.mxu1 %v12162_v62 }
 0x7b5   : > { %v5411_v42 = vadd.f32 %v5410_v34, %v12330_v52  ;;  %v5412_v58 = vpop.f32.mrb[74].mxu0  ;;  %5763 = vmatprep.mubr.bf16.mxu1 %v5535_v48 }
 0x7b6   : > { %v5413_v25 = vadd.f32 %v5412_v58, %v12327_v30  ;;  %v5414_v50 = vpop.f32.mrb[75].mxu0  ;;  %5764 = vmatmul.mubr.bf16.gmra.mrb[132].mxu1 %v5534_v45  ;;  %v5475_v56 = vmax.f32 %v5409_v22, 0.0 }
 0x7b7   : > { %v5415_v10 = vadd.f32 %v5414_v50, %v12330_v52  ;;  %7965 = vmatpush1.bf16.msra.mxu1 %v12157_v61  ;;  %v5476_v17 = vmax.f32 %v5411_v42, 0.0 }
 0x7b8   : > { %v5477_v39 = vmax.f32 %v5413_v25, 0.0  ;;  %7950 = vmatprep.subr.bf16.mxu1 %v12167_v27 }
 0x7b9   : > { %v5478_v47 = vmax.f32 %v5415_v10, 0.0 }
 0x7ba   : > { %v5536_v11 = vpack.c.bf16 %v5477_v39, %v5475_v56 }
 0x7bb   : > { %v5537_v62 = vpack.c.bf16 %v5478_v47, %v5476_v17  ;;  %v5418_v24 = vpop.f32.mrb[76].mxu0  ;;  %7966 = vmatpush1.bf16.msra.mxu1 %v12174_v4 }
 0x7bc   : > { %v5419_v28 = vadd.f32 %v5418_v24, %v12327_v30  ;;  %v5420_v57 = vpop.f32.mrb[77].mxu0  ;;  %7951 = vmatprep.subr.bf16.mxu1 %v12187_v31 }
 0x7bd   : > { %v5421_v18 = vadd.f32 %v5420_v57, %v12330_v52  ;;  %v5422_v1 = vpop.f32.mrb[78].mxu0  ;;  %5773 = vmatprep.mubr.bf16.mxu1 %v5537_v62 }
 0x7be   : > { %v5423_v61 = vadd.f32 %v5422_v1, %v12327_v30  ;;  %v5424_v26 = vpop.f32.mrb[79].mxu0  ;;  %5774 = vmatmul.mubr.bf16.gmra.mrb[136].mxu1 %v5536_v11  ;;  %v5479_v38 = vmax.f32 %v5419_v28, 0.0 }
 0x7bf   : > { %v5425_v27 = vadd.f32 %v5424_v26, %v12330_v52  ;;  %7967 = vmatpush1.bf16.msra.mxu1 %v12182_v14  ;;  %v5480_v4 = vmax.f32 %v5421_v18, 0.0 }
 0x7c0   : > { %v5481_v54 = vmax.f32 %v5423_v61, 0.0  ;;  %7952 = vmatprep.subr.bf16.mxu1 %v12192_v3 }
 0x7c1   : > { %v5482_v37 = vmax.f32 %v5425_v27, 0.0 }
 0x7c2   : > { %v5538_v49 = vpack.c.bf16 %v5481_v54, %v5479_v38 }
 0x7c3   : > { %v5539_v31 = vpack.c.bf16 %v5482_v37, %v5480_v4  ;;  %v5428_v23 = vpop.f32.mrb[80].mxu0  ;;  %7968 = vmatpush1.bf16.msra.mxu1 %v12199_v44 }
 0x7c4   : > { %v5429_v15 = vadd.f32 %v5428_v23, %v12327_v30  ;;  %v5430_v33 = vpop.f32.mrb[81].mxu0  ;;  %7953 = vmatprep.subr.bf16.mxu1 %v12211_v36 }
 0x7c5   : > { %v5431_v19 = vadd.f32 %v5430_v33, %v12330_v52  ;;  %v5432_v9 = vpop.f32.mrb[82].mxu0  ;;  %5783 = vmatprep.mubr.bf16.mxu1 %v5539_v31 }
 0x7c6   : > { %v5433_v14 = vadd.f32 %v5432_v9, %v12327_v30  ;;  %v5434_v46 = vpop.f32.mrb[83].mxu0  ;;  %5784 = vmatmul.mubr.bf16.gmra.mrb[140].mxu1 %v5538_v49  ;;  %v5483_v5 = vmax.f32 %v5429_v15, 0.0 }
 0x7c7   : > { %v5435_v3 = vadd.f32 %v5434_v46, %v12330_v52  ;;  %7969 = vmatpush1.bf16.msra.mxu1 %v12206_v41  ;;  %v5484_v44 = vmax.f32 %v5431_v19, 0.0 }
 0x7c8   : > { %v5485_v45 = vmax.f32 %v5433_v14, 0.0  ;;  %7954 = vmatprep.subr.bf16.mxu1 %v12216_v7 }
 0x7c9   : > { %v5486_v48 = vmax.f32 %v5435_v3, 0.0 }
 0x7ca   : > { %v5540_v2 = vpack.c.bf16 %v5485_v45, %v5483_v5 }
 0x7cb   : > { %v5541_v36 = vpack.c.bf16 %v5486_v48, %v5484_v44  ;;  %v5438_v22 = vpop.f32.mrb[84].mxu0  ;;  %7970 = vmatpush1.bf16.msra.mxu1 %v12223_v6 }
 0x7cc   : > { %v5439_v34 = vadd.f32 %v5438_v22, %v12327_v30  ;;  %v5440_v42 = vpop.f32.mrb[85].mxu0  ;;  %7955 = vmatprep.subr.bf16.mxu1 %v12235_v60 }
 0x7cd   : > { %v5441_v58 = vadd.f32 %v5440_v42, %v12330_v52  ;;  %v5442_v25 = vpop.f32.mrb[86].mxu0  ;;  %5793 = vmatprep.mubr.bf16.mxu1 %v5541_v36 }
 0x7ce   : > { %v5443_v41 = vadd.f32 %v5442_v25, %v12327_v30  ;;  %v5444_v50 = vpop.f32.mrb[87].mxu0  ;;  %5794 = vmatmul.mubr.bf16.gmra.mrb[144].mxu1 %v5540_v2  ;;  %v5487_v10 = vmax.f32 %v5439_v34, 0.0 }
 0x7cf   : > { %v5445_v7 = vadd.f32 %v5444_v50, %v12330_v52  ;;  %7971 = vmatpush1.bf16.msra.mxu1 %v12230_v20  ;;  %v5488_v6 = vmax.f32 %v5441_v58, 0.0 }
 0x7d0   : > { %v5489_v56 = vmax.f32 %v5443_v41, 0.0  ;;  %7956 = vmatprep.subr.bf16.mxu1 %v12240_v43 }
 0x7d1   : > { %v5490_v39 = vmax.f32 %v5445_v7, 0.0 }
 0x7d2   : > { %v5542_v17 = vpack.c.bf16 %v5489_v56, %v5487_v10 }
 0x7d3   : > { %v5543_v60 = vpack.c.bf16 %v5490_v39, %v5488_v6  ;;  %v5448_v47 = vpop.f32.mrb[88].mxu0  ;;  %7972 = vmatpush1.bf16.msra.mxu1 %v12247_v63 }
 0x7d4   : > { %v5449_v11 = vadd.f32 %v5448_v47, %v12327_v30  ;;  %v5450_v62 = vpop.f32.mrb[89].mxu0  ;;  %7957 = vmatprep.subr.bf16.mxu1 %v12259_v51 }
 0x7d5   : > { %v5451_v24 = vadd.f32 %v5450_v62, %v12330_v52  ;;  %v5452_v28 = vpop.f32.mrb[90].mxu0  ;;  %5803 = vmatprep.mubr.bf16.mxu1 %v5543_v60 }
 0x7d6   : > { %v5453_v20 = vadd.f32 %v5452_v28, %v12327_v30  ;;  %v5454_v57 = vpop.f32.mrb[91].mxu0  ;;  %5804 = vmatmul.mubr.bf16.gmra.mrb[148].mxu1 %v5542_v17  ;;  %v5491_v18 = vmax.f32 %v5449_v11, 0.0 }
 0x7d7   : > { %v5455_v43 = vadd.f32 %v5454_v57, %v12330_v52  ;;  %7973 = vmatpush1.bf16.msra.mxu1 %v12254_v55  ;;  %v5492_v63 = vmax.f32 %v5451_v24, 0.0  ;;  %v7826_v55 = vld [vmem:[%s13003_s8 + $0x6] ss:$8 sm:$0x3] }
 0x7d8   : > { %v5493_v1 = vmax.f32 %v5453_v20, 0.0  ;;  %7958 = vmatprep.subr.bf16.mxu1 %v12264_v16  ;;  %v12397_v19 = vrot.slane %v7826_v55, %v13544_v40 }
 0x7d9   : > { %v5494_v61 = vmax.f32 %v5455_v43, 0.0 }
 0x7da   : > { %v5544_v26 = vpack.c.bf16 %v5493_v1, %v5491_v18 }
 0x7db   : > { %v5545_v51 = vpack.c.bf16 %v5494_v61, %v5492_v63  ;;  %v5458_v27 = vpop.f32.mrb[92].mxu0  ;;  %7974 = vmatpush1.bf16.msra.mxu1 %v12271_v35 }
 0x7dc   : > { %v5459_v38 = vadd.f32 %v5458_v27, %v12327_v30  ;;  %v5460_v54 = vpop.f32.mrb[93].mxu0  ;;  %7959 = vmatprep.subr.bf16.mxu1 %v12283_v32  ;;  %v12393_v32 = vrot.slane %v7826_v55, %v13543_v0 }
 0x7dd   : > { %v5461_v4 = vadd.f32 %v5460_v54, %v12330_v52  ;;  %v5462_v37 = vpop.f32.mrb[94].mxu0  ;;  %5813 = vmatprep.mubr.bf16.mxu1 %v5545_v51 }
 0x7de   : > { %v5463_v16 = vadd.f32 %v5462_v37, %v12327_v30  ;;  %v5464_v49 = vpop.f32.mrb[95].mxu0  ;;  %5814 = vmatmul.mubr.bf16.gmra.mrb[152].mxu1 %v5544_v26  ;;  %v5495_v35 = vmax.f32 %v5459_v38, 0.0 }
 0x7df   : > { %v5465_v31 = vadd.f32 %v5464_v49, %v12330_v52  ;;  %7975 = vmatpush1.bf16.msra.mxu1 %v12278_v13  ;;  %v5496_v15 = vmax.f32 %v5461_v4, 0.0 }
 0x7e0   : > { %v5497_v23 = vmax.f32 %v5463_v16, 0.0  ;;  %7960 = vmatprep.subr.bf16.mxu1 %v12288_v21 }
 0x7e1   : > { %v5498_v33 = vmax.f32 %v5465_v31, 0.0 }
 0x7e2   : > { %v5546_v9 = vpack.c.bf16 %v5497_v23, %v5495_v35 }
 0x7e3   : > { %v5547_v30 = vpack.c.bf16 %v5498_v33, %v5496_v15  ;;  %v6122_v14 = vpop.f32.mrb[96].mxu0  ;;  %7976 = vmatpush1.bf16.msra.mxu1 %v12295_v12 }
 0x7e4   : > { %v6123_v52 = vadd.f32 %v6122_v14, %v12393_v32  ;;  %v6124_v13 = vpop.f32.mrb[97].mxu0  ;;  %7961 = vmatprep.subr.bf16.mxu1 %v12307_v53 }
 0x7e5   : > { %v6125_v46 = vadd.f32 %v6124_v13, %v12397_v19  ;;  %5823 = vmatprep.mubr.bf16.mxu1 %v5547_v30  ;;  %v6126_v3 = vpop.f32.mrb[98].mxu0 }
 0x7e6   : > { %v6127_v21 = vadd.f32 %v6126_v3, %v12393_v32  ;;  %5824 = vmatmul.mubr.bf16.gmra.mrb[156].mxu1 %v5546_v9  ;;  %v6128_v5 = vpop.f32.mrb[99].mxu0  ;;  %v6201_v44 = vmax.f32 %v6123_v52, 0.0 }
 0x7e7   : > { %v6129_v45 = vadd.f32 %v6128_v5, %v12397_v19  ;;  %7977 = vmatpush1.bf16.msra.mxu1 %v12302_v29  ;;  %v6202_v12 = vmax.f32 %v6125_v46, 0.0 }
 0x7e8   : > { %v6203_v48 = vmax.f32 %v6127_v21, 0.0  ;;  %7962 = vmatprep.subr.bf16.mxu1 %v12312_v8 }
 0x7e9   : > { %v6204_v2 = vmax.f32 %v6129_v45, 0.0 }
 0x7ea   : > { %v6266_v36 = vpack.c.bf16 %v6203_v48, %v6201_v44 }
 0x7eb   : > { %v6267_v53 = vpack.c.bf16 %v6204_v2, %v6202_v12  ;;  %v6132_v22 = vpop.f32.mrb[100].mxu0  ;;  %7978 = vmatpush1.bf16.msra.mxu1 %v12319_v59 }
 0x7ec   : > { %v6133_v34 = vadd.f32 %v6132_v22, %v12393_v32  ;;  %v6134_v42 = vpop.f32.mrb[101].mxu0 }
 0x7ed   : > { %v6135_v58 = vadd.f32 %v6134_v42, %v12397_v19  ;;  %v6136_v25 = vpop.f32.mrb[102].mxu0  ;;  %6487 = vmatprep.mubr.bf16.mxu0 %v6267_v53 }
 0x7ee   : > { %v6137_v29 = vadd.f32 %v6136_v25, %v12393_v32  ;;  %v6138_v41 = vpop.f32.mrb[103].mxu0  ;;  %6488 = vmatmul.mubr.bf16.vlgmr.msra.gmra.mrb[128].mxu0 %v6266_v36  ;;  %v6205_v50 = vmax.f32 %v6133_v34, 0.0 }
 0x7ef   : > { %v6139_v8 = vadd.f32 %v6138_v41, %v12397_v19  ;;  %v6206_v10 = vmax.f32 %v6135_v58, 0.0 }
 0x7f0   : > { %v6207_v7 = vmax.f32 %v6137_v29, 0.0 }
 0x7f1   : > { %v6208_v56 = vmax.f32 %v6139_v8, 0.0 }
 0x7f2   : > { %v6268_v6 = vpack.c.bf16 %v6207_v7, %v6205_v50 }
 0x7f3   : > { %v6269_v39 = vpack.c.bf16 %v6208_v56, %v6206_v10  ;;  %v6142_v59 = vpop.f32.mrb[104].mxu0 }
 0x7f4   : > { %v6143_v17 = vadd.f32 %v6142_v59, %v12393_v32  ;;  %v6144_v60 = vpop.f32.mrb[105].mxu0 }
 0x7f5   : > { %v6145_v47 = vadd.f32 %v6144_v60, %v12397_v19  ;;  %v6146_v11 = vpop.f32.mrb[106].mxu0  ;;  %6497 = vmatprep.mubr.bf16.mxu1 %v6269_v39 }
 0x7f6   : > { %v6147_v62 = vadd.f32 %v6146_v11, %v12393_v32  ;;  %v6148_v24 = vpop.f32.mrb[107].mxu0  ;;  %6498 = vmatmul.mubr.bf16.vlgmr.msra.gmra.mrb[160].mxu1 %v6268_v6  ;;  %v6209_v20 = vmax.f32 %v6143_v17, 0.0 }
 0x7f7   : > { %v6149_v28 = vadd.f32 %v6148_v24, %v12397_v19  ;;  %v6210_v43 = vmax.f32 %v6145_v47, 0.0 }
 0x7f8   : > { %v6211_v57 = vmax.f32 %v6147_v62, 0.0 }
 0x7f9   : > { %v6212_v18 = vmax.f32 %v6149_v28, 0.0 }
 0x7fa   : > { %v6270_v1 = vpack.c.bf16 %v6211_v57, %v6209_v20 }
 0x7fb   : > { %v6271_v63 = vpack.c.bf16 %v6212_v18, %v6210_v43  ;;  %v6152_v61 = vpop.f32.mrb[108].mxu0 }
 0x7fc   : > { %v6153_v26 = vadd.f32 %v6152_v61, %v12393_v32  ;;  %v6154_v51 = vpop.f32.mrb[109].mxu0 }
 0x7fd   : > { %v6155_v27 = vadd.f32 %v6154_v51, %v12397_v19  ;;  %v6156_v38 = vpop.f32.mrb[110].mxu0  ;;  %6507 = vmatprep.mubr.bf16.mxu1 %v6271_v63 }
 0x7fe   : > { %v6157_v54 = vadd.f32 %v6156_v38, %v12393_v32  ;;  %v6158_v4 = vpop.f32.mrb[111].mxu0  ;;  %6508 = vmatmul.mubr.bf16.gmra.mrb[164].mxu1 %v6270_v1  ;;  %v6213_v55 = vmax.f32 %v6153_v26, 0.0 }
 0x7ff   : > { %v6159_v37 = vadd.f32 %v6158_v4, %v12397_v19  ;;  %v6214_v49 = vmax.f32 %v6155_v27, 0.0 }
 0x800   : > { %v6215_v16 = vmax.f32 %v6157_v54, 0.0 }
 0x801   : > { %v6216_v31 = vmax.f32 %v6159_v37, 0.0 }
 0x802   : > { %v6272_v35 = vpack.c.bf16 %v6215_v16, %v6213_v55 }
 0x803   : > { %v6273_v23 = vpack.c.bf16 %v6216_v31, %v6214_v49  ;;  %v6162_v15 = vpop.f32.mrb[112].mxu0  ;;  %v7761_v49 = vld [vmem:[%s13003_s8 + $0x5] ss:$8 sm:$0x3] }
 0x804   : > { %v6163_v33 = vadd.f32 %v6162_v15, %v12393_v32  ;;  %v6164_v9 = vpop.f32.mrb[113].mxu0  ;;  %v12440_v31 = vrot.slane %v7761_v49, %v13543_v0 }
 0x805   : > { %v6165_v30 = vadd.f32 %v6164_v9, %v12397_v19  ;;  %v6166_v14 = vpop.f32.mrb[114].mxu0  ;;  %6517 = vmatprep.mubr.bf16.mxu1 %v6273_v23  ;;  %v7926_v23 = vld [vmem:[%s13003_s8 + $0x12] ss:$8 sm:$0x3] }
 0x806   : > { %v6167_v52 = vadd.f32 %v6166_v14, %v12393_v32  ;;  %v6168_v13 = vpop.f32.mrb[115].mxu0  ;;  %6518 = vmatmul.mubr.bf16.gmra.mrb[168].mxu1 %v6272_v35  ;;  %v6217_v3 = vmax.f32 %v6163_v33, 0.0  ;;  %v7924_v35 = vld [vmem:[%s13003_s8 + $0x10] ss:$8 sm:$0x3] }
 0x807   : > { %v6169_v46 = vadd.f32 %v6168_v13, %v12397_v19  ;;  %v6218_v5 = vmax.f32 %v6165_v30, 0.0  ;;  %v12459_v14 = vrot.slane %v7924_v35, %v13543_v0 }
 0x808   : > { %v6219_v21 = vmax.f32 %v6167_v52, 0.0  ;;  %v12462_v52 = vrot.slane %v7926_v23, %v13543_v0 }
 0x809   : > { %v6220_v45 = vmax.f32 %v6169_v46, 0.0 }
 0x80a   : > { %v6274_v44 = vpack.c.bf16 %v6219_v21, %v6217_v3  ;;  %v12469_v21 = vrot.slane %v7924_v35, %v13544_v40 }
 0x80b   : > { %v6275_v48 = vpack.c.bf16 %v6220_v45, %v6218_v5  ;;  %v6172_v12 = vpop.f32.mrb[116].mxu0  ;;  %v12472_v5 = vrot.slane %v7926_v23, %v13544_v40 }
 0x80c   : > { %v6173_v2 = vadd.f32 %v6172_v12, %v12393_v32  ;;  %v6174_v36 = vpop.f32.mrb[117].mxu0 }
 0x80d   : > { %v6175_v53 = vadd.f32 %v6174_v36, %v12397_v19  ;;  %v6176_v22 = vpop.f32.mrb[118].mxu0  ;;  %6527 = vmatprep.mubr.bf16.mxu1 %v6275_v48 }
 0x80e   : > { %v6177_v34 = vadd.f32 %v6176_v22, %v12393_v32  ;;  %v6178_v42 = vpop.f32.mrb[119].mxu0  ;;  %6528 = vmatmul.mubr.bf16.gmra.mrb[172].mxu1 %v6274_v44  ;;  %v6221_v25 = vmax.f32 %v6173_v2, 0.0 }
 0x80f   : > { %v6179_v58 = vadd.f32 %v6178_v42, %v12397_v19  ;;  %v6222_v41 = vmax.f32 %v6175_v53, 0.0 }
 0x810   : > { %v6223_v29 = vmax.f32 %v6177_v34, 0.0 }
 0x811   : > { %v6224_v8 = vmax.f32 %v6179_v58, 0.0 }
 0x812   : > { %v6276_v50 = vpack.c.bf16 %v6223_v29, %v6221_v25 }
 0x813   : > { %v6277_v7 = vpack.c.bf16 %v6224_v8, %v6222_v41  ;;  %v6182_v10 = vpop.f32.mrb[120].mxu0 }
 0x814   : > { %v6183_v56 = vadd.f32 %v6182_v10, %v12393_v32  ;;  %v6184_v6 = vpop.f32.mrb[121].mxu0 }
 0x815   : > { %v6185_v39 = vadd.f32 %v6184_v6, %v12397_v19  ;;  %v6186_v59 = vpop.f32.mrb[122].mxu0  ;;  %6537 = vmatprep.mubr.bf16.mxu1 %v6277_v7 }
 0x816   : > { %v6187_v17 = vadd.f32 %v6186_v59, %v12393_v32  ;;  %v6188_v60 = vpop.f32.mrb[123].mxu0  ;;  %6538 = vmatmul.mubr.bf16.gmra.mrb[176].mxu1 %v6276_v50  ;;  %v6225_v11 = vmax.f32 %v6183_v56, 0.0 }
 0x817   : > { %v6189_v47 = vadd.f32 %v6188_v60, %v12397_v19  ;;  %v6226_v24 = vmax.f32 %v6185_v39, 0.0 }
 0x818   : > { %v6227_v62 = vmax.f32 %v6187_v17, 0.0 }
 0x819   : > { %v6228_v28 = vmax.f32 %v6189_v47, 0.0 }
 0x81a   : > { %v6278_v20 = vpack.c.bf16 %v6227_v62, %v6225_v11 }
 0x81b   : > { %v6279_v57 = vpack.c.bf16 %v6228_v28, %v6226_v24  ;;  %v6192_v43 = vpop.f32.mrb[124].mxu0 }
 0x81c   : > { %v6193_v18 = vadd.f32 %v6192_v43, %v12393_v32  ;;  %v6194_v1 = vpop.f32.mrb[125].mxu0 }
 0x81d   : > { %v6195_v63 = vadd.f32 %v6194_v1, %v12397_v19  ;;  %v6196_v61 = vpop.f32.mrb[126].mxu0  ;;  %6547 = vmatprep.mubr.bf16.mxu1 %v6279_v57 }
 0x81e   : > { %v6197_v26 = vadd.f32 %v6196_v61, %v12393_v32  ;;  %v6198_v51 = vpop.f32.mrb[127].mxu0  ;;  %6548 = vmatmul.mubr.bf16.gmra.mrb[180].mxu1 %v6278_v20  ;;  %v6229_v38 = vmax.f32 %v6193_v18, 0.0  ;;  %v7925_v32 = vld [vmem:[%s13003_s8 + $0x11] ss:$8 sm:$0x3] }
 0x81f   : > { %v6199_v27 = vadd.f32 %v6198_v51, %v12397_v19  ;;  %v6230_v4 = vmax.f32 %v6195_v63, 0.0  ;;  %v12446_v19 = vrot.slane %v7761_v49, %v13544_v40  ;;  %v12456_v30 = vrot.slane %v7925_v32, %v13543_v0 }
 0x820   : > { %v6231_v54 = vmax.f32 %v6197_v26, 0.0  ;;  %v12466_v3 = vrot.slane %v7925_v32, %v13544_v40 }
 0x821   : > { %v6232_v37 = vmax.f32 %v6199_v27, 0.0 }
 0x822   : > { %v6280_v55 = vpack.c.bf16 %v6231_v54, %v6229_v38 }
 0x823   : > { %v6281_v16 = vpack.c.bf16 %v6232_v37, %v6230_v4 }
 0x825   : > { %6557 = vmatprep.mubr.bf16.mxu1 %v6281_v16 }
 0x826   : > { %6558 = vmatmul.mubr.bf16.gmra.mrb[184].mxu1 %v6280_v55 }
 0x881   : > { %v5755_v15 = vpop.f32.mrb[128].mxu1 }
 0x882   : > { %v5756_v33 = vadd.f32 %v5755_v15, %v12440_v31  ;;  %v5757_v9 = vpop.f32.mrb[129].mxu1 }
 0x883   : > { %v5758_v13 = vadd.f32 %v5757_v9, %v12446_v19  ;;  %v5759_v46 = vpop.f32.mrb[130].mxu1 }
 0x884   : > { %v5834_v45 = vmax.f32 %v5756_v33, 0.0  ;;  %v5760_v44 = vadd.f32 %v5759_v46, %v12440_v31  ;;  %v5761_v48 = vpop.f32.mrb[131].mxu1 }
 0x885   : > { %v5835_v12 = vmax.f32 %v5758_v13, 0.0  ;;  %v5762_v2 = vadd.f32 %v5761_v48, %v12446_v19 }
 0x886   : > { %v5836_v36 = vmax.f32 %v5760_v44, 0.0  ;;  %v6706_v53 = vmul.f32 %v12456_v30, %v5834_v45  ;;  %v6613_v22 = vmul.f32 %v12459_v14, %v5834_v45  ;;  %v6799_v34 = vmul.f32 %v12462_v52, %v5834_v45 }
 0x887   : > { %v5837_v42 = vmax.f32 %v5762_v2, 0.0  ;;  %v6707_v58 = vmul.f32 %v12466_v3, %v5835_v12  ;;  %v6614_v25 = vmul.f32 %v12469_v21, %v5835_v12  ;;  %v6800_v29 = vmul.f32 %v12472_v5, %v5835_v12 }
 0x888   : > { %v6708_v41 = vmul.f32 %v12456_v30, %v5836_v36  ;;  %v6615_v8 = vmul.f32 %v12459_v14, %v5836_v36  ;;  %v6801_v50 = vmul.f32 %v12462_v52, %v5836_v36 }
 0x889   : > { %v5765_v7 = vpop.f32.mrb[132].mxu1  ;;  %v6738_v10 = vadd.f32 %v6707_v58, %v6706_v53  ;;  %v6645_v56 = vadd.f32 %v6614_v25, %v6613_v22  ;;  %v6831_v6 = vadd.f32 %v6800_v29, %v6799_v34  ;;  %v6709_v39 = vmul.f32 %v12466_v3, %v5837_v42 }
 0x88a   : > { %v5766_v59 = vadd.f32 %v5765_v7, %v12440_v31  ;;  %v5767_v17 = vpop.f32.mrb[133].mxu1  ;;  %v6616_v60 = vmul.f32 %v12469_v21, %v5837_v42  ;;  %v6802_v47 = vmul.f32 %v12472_v5, %v5837_v42 }
 0x88b   : > { %v5768_v11 = vadd.f32 %v5767_v17, %v12446_v19  ;;  %v5769_v62 = vpop.f32.mrb[134].mxu1  ;;  %6739 = vadd.xlane.f32.xlu0 %v6738_v10  ;;  %6646 = vadd.xlane.f32.xlu1 %v6645_v56  ;;  %v6741_v24 = vadd.f32 %v6709_v39, %v6708_v41 }
 0x88c   : > { %v5838_v28 = vmax.f32 %v5766_v59, 0.0  ;;  %v5770_v20 = vadd.f32 %v5769_v62, %v12440_v31  ;;  %v5771_v57 = vpop.f32.mrb[135].mxu1  ;;  %v6648_v43 = vadd.f32 %v6616_v60, %v6615_v8  ;;  %v6834_v18 = vadd.f32 %v6802_v47, %v6801_v50 }
 0x88d   : > { %v5839_v1 = vmax.f32 %v5768_v11, 0.0  ;;  %v5772_v63 = vadd.f32 %v5771_v57, %v12446_v19 }
 0x88e   : > { %v5840_v61 = vmax.f32 %v5770_v20, 0.0  ;;  %v6617_v26 = vmul.f32 %v12459_v14, %v5838_v28  ;;  %v6710_v51 = vmul.f32 %v12456_v30, %v5838_v28  ;;  %v6803_v27 = vmul.f32 %v12462_v52, %v5838_v28 }
 0x88f   : > { %v5841_v38 = vmax.f32 %v5772_v63, 0.0  ;;  %6832 = vadd.xlane.f32.xlu0 %v6831_v6  ;;  %6742 = vadd.xlane.f32.xlu1 %v6741_v24  ;;  %v6618_v54 = vmul.f32 %v12469_v21, %v5839_v1  ;;  %v6711_v4 = vmul.f32 %v12466_v3, %v5839_v1  ;;  %v6804_v37 = vmul.f32 %v12472_v5, %v5839_v1 }
 0x890   : > { %v6619_v55 = vmul.f32 %v12459_v14, %v5840_v61  ;;  %v6712_v16 = vmul.f32 %v12456_v30, %v5840_v61  ;;  %v6805_v49 = vmul.f32 %v12462_v52, %v5840_v61 }
 0x891   : > { %v5775_v32 = vpop.f32.mrb[136].mxu1  ;;  %v6651_v35 = vadd.f32 %v6618_v54, %v6617_v26  ;;  %v6620_v23 = vmul.f32 %v12469_v21, %v5841_v38  ;;  %v6744_v15 = vadd.f32 %v6711_v4, %v6710_v51  ;;  %v6713_v33 = vmul.f32 %v12466_v3, %v5841_v38 }
 0x892   : > { %v5776_v9 = vadd.f32 %v5775_v32, %v12440_v31  ;;  %v5777_v13 = vpop.f32.mrb[137].mxu1  ;;  %v6837_v46 = vadd.f32 %v6804_v37, %v6803_v27  ;;  %v6806_v45 = vmul.f32 %v12472_v5, %v5841_v38 }
 0x893   : > { %v5778_v44 = vadd.f32 %v5777_v13, %v12446_v19  ;;  %v5779_v48 = vpop.f32.mrb[138].mxu1  ;;  %6649 = vadd.xlane.f32.xlu0 %v6648_v43  ;;  %6835 = vadd.xlane.f32.xlu1 %v6834_v18  ;;  %v6654_v12 = vadd.f32 %v6620_v23, %v6619_v55  ;;  %v6747_v2 = vadd.f32 %v6713_v33, %v6712_v16 }
 0x894   : > { %v5842_v36 = vmax.f32 %v5776_v9, 0.0  ;;  %v5780_v53 = vadd.f32 %v5779_v48, %v12440_v31  ;;  %v5781_v22 = vpop.f32.mrb[139].mxu1  ;;  %v6840_v34 = vadd.f32 %v6806_v45, %v6805_v49 }
 0x895   : > { %v5843_v42 = vmax.f32 %v5778_v44, 0.0  ;;  %v5782_v58 = vadd.f32 %v5781_v22, %v12446_v19 }
 0x896   : > { %v5844_v25 = vmax.f32 %v5780_v53, 0.0  ;;  %v6621_v29 = vmul.f32 %v12459_v14, %v5842_v36  ;;  %v6714_v41 = vmul.f32 %v12456_v30, %v5842_v36  ;;  %v6807_v8 = vmul.f32 %v12462_v52, %v5842_v36 }
 0x897   : > { %v5845_v50 = vmax.f32 %v5782_v58, 0.0  ;;  %6652 = vadd.xlane.f32.xlu0 %v6651_v35  ;;  %6655 = vadd.xlane.f32.xlu1 %v6654_v12  ;;  %v6622_v7 = vmul.f32 %v12469_v21, %v5843_v42  ;;  %v6715_v10 = vmul.f32 %v12466_v3, %v5843_v42  ;;  %v6808_v56 = vmul.f32 %v12472_v5, %v5843_v42 }
 0x898   : > { %v6623_v6 = vmul.f32 %v12459_v14, %v5844_v25  ;;  %v6716_v39 = vmul.f32 %v12456_v30, %v5844_v25  ;;  %v6809_v59 = vmul.f32 %v12462_v52, %v5844_v25 }
 0x899   : > { %v5785_v17 = vpop.f32.mrb[140].mxu1  ;;  %v6657_v60 = vadd.f32 %v6622_v7, %v6621_v29  ;;  %v6624_v47 = vmul.f32 %v12469_v21, %v5845_v50  ;;  %v6750_v11 = vadd.f32 %v6715_v10, %v6714_v41  ;;  %v6717_v62 = vmul.f32 %v12466_v3, %v5845_v50 }
 0x89a   : > { %v5786_v24 = vadd.f32 %v5785_v17, %v12440_v31  ;;  %v5787_v28 = vpop.f32.mrb[141].mxu1  ;;  %v12520_v20 = vadd.f32 %v6808_v56, %v6807_v8  ;;  %v6810_v57 = vmul.f32 %v12472_v5, %v5845_v50 }
 0x89b   : > { %v5788_v43 = vadd.f32 %v5787_v28, %v12446_v19  ;;  %v5789_v18 = vpop.f32.mrb[142].mxu1  ;;  %6745 = vadd.xlane.f32.xlu0 %v6744_v15  ;;  %6748 = vadd.xlane.f32.xlu1 %v6747_v2  ;;  %v6660_v1 = vadd.f32 %v6624_v47, %v6623_v6  ;;  %v6753_v63 = vadd.f32 %v6717_v62, %v6716_v39 }
 0x89c   : > { %v5846_v61 = vmax.f32 %v5786_v24, 0.0  ;;  %v5790_v26 = vadd.f32 %v5789_v18, %v12440_v31  ;;  %v5791_v51 = vpop.f32.mrb[143].mxu1  ;;  %v6846_v27 = vadd.f32 %v6810_v57, %v6809_v59 }
 0x89d   : > { %v5847_v38 = vmax.f32 %v5788_v43, 0.0  ;;  %v5792_v54 = vadd.f32 %v5791_v51, %v12446_v19 }
 0x89e   : > { %v5848_v4 = vmax.f32 %v5790_v26, 0.0  ;;  %v6625_v37 = vmul.f32 %v12459_v14, %v5846_v61  ;;  %v6718_v55 = vmul.f32 %v12456_v30, %v5846_v61  ;;  %v6811_v16 = vmul.f32 %v12462_v52, %v5846_v61 }
 0x89f   : > { %v5849_v49 = vmax.f32 %v5792_v54, 0.0  ;;  %6838 = vadd.xlane.f32.xlu0 %v6837_v46  ;;  %6841 = vadd.xlane.f32.xlu1 %v6840_v34  ;;  %v6626_v32 = vmul.f32 %v12469_v21, %v5847_v38  ;;  %v6719_v35 = vmul.f32 %v12466_v3, %v5847_v38  ;;  %v6812_v23 = vmul.f32 %v12472_v5, %v5847_v38 }
 0x8a0   : > { %v6627_v15 = vmul.f32 %v12459_v14, %v5848_v4  ;;  %v6720_v33 = vmul.f32 %v12456_v30, %v5848_v4  ;;  %v6813_v9 = vmul.f32 %v12462_v52, %v5848_v4 }
 0x8a1   : > { %v5795_v13 = vpop.f32.mrb[144].mxu1  ;;  %v6663_v45 = vadd.f32 %v6626_v32, %v6625_v37  ;;  %v6628_v44 = vmul.f32 %v12469_v21, %v5849_v49  ;;  %v12536_v48 = vadd.f32 %v6719_v35, %v6718_v55  ;;  %v6721_v46 = vmul.f32 %v12466_v3, %v5849_v49 }
 0x8a2   : > { %v5796_v12 = vadd.f32 %v5795_v13, %v12440_v31  ;;  %v5797_v2 = vpop.f32.mrb[145].mxu1  ;;  %v12540_v36 = vadd.f32 %v6812_v23, %v6811_v16  ;;  %v6814_v53 = vmul.f32 %v12472_v5, %v5849_v49 }
 0x8a3   : > { %v5798_v22 = vadd.f32 %v5797_v2, %v12446_v19  ;;  %v5799_v34 = vpop.f32.mrb[146].mxu1  ;;  %6658 = vadd.xlane.f32.xlu0 %v6657_v60  ;;  %6661 = vadd.xlane.f32.xlu1 %v6660_v1  ;;  %v6666_v42 = vadd.f32 %v6628_v44, %v6627_v15  ;;  %v12544_v58 = vadd.f32 %v6721_v46, %v6720_v33 }
 0x8a4   : > { %v5850_v25 = vmax.f32 %v5796_v12, 0.0  ;;  %v5800_v29 = vadd.f32 %v5799_v34, %v12440_v31  ;;  %v5801_v41 = vpop.f32.mrb[147].mxu1  ;;  %v12547_v8 = vadd.f32 %v6814_v53, %v6813_v9 }
 0x8a5   : > { %v5851_v50 = vmax.f32 %v5798_v22, 0.0  ;;  %v5802_v7 = vadd.f32 %v5801_v41, %v12446_v19 }
 0x8a6   : > { %v5852_v10 = vmax.f32 %v5800_v29, 0.0  ;;  %v6629_v56 = vmul.f32 %v12459_v14, %v5850_v25  ;;  %v6722_v6 = vmul.f32 %v12456_v30, %v5850_v25  ;;  %v6815_v39 = vmul.f32 %v12462_v52, %v5850_v25 }
 0x8a7   : > { %v5853_v59 = vmax.f32 %v5802_v7, 0.0  ;;  %6751 = vadd.xlane.f32.xlu0 %v6750_v11  ;;  %6754 = vadd.xlane.f32.xlu1 %v6753_v63  ;;  %v6630_v17 = vmul.f32 %v12469_v21, %v5851_v50  ;;  %v6723_v60 = vmul.f32 %v12466_v3, %v5851_v50  ;;  %v6816_v47 = vmul.f32 %v12472_v5, %v5851_v50 }
 0x8a8   : > { %v6631_v62 = vmul.f32 %v12459_v14, %v5852_v10  ;;  %v6724_v24 = vmul.f32 %v12456_v30, %v5852_v10  ;;  %v6817_v28 = vmul.f32 %v12462_v52, %v5852_v10 }
 0x8a9   : > { %v5805_v57 = vpop.f32.mrb[148].mxu1  ;;  %v12559_v43 = vadd.f32 %v6630_v17, %v6629_v56  ;;  %v6632_v18 = vmul.f32 %v12469_v21, %v5853_v59  ;;  %v12562_v1 = vadd.f32 %v6723_v60, %v6722_v6  ;;  %v6725_v11 = vmul.f32 %v12466_v3, %v5853_v59 }
 0x8aa   : > { %v5806_v63 = vadd.f32 %v5805_v57, %v12440_v31  ;;  %v5807_v61 = vpop.f32.mrb[149].mxu1  ;;  %v12566_v26 = vadd.f32 %v6816_v47, %v6815_v39  ;;  %v6818_v51 = vmul.f32 %v12472_v5, %v5853_v59 }
 0x8ab   : > { %v5808_v38 = vadd.f32 %v5807_v61, %v12446_v19  ;;  %v5809_v54 = vpop.f32.mrb[150].mxu1  ;;  %6844 = vadd.xlane.f32.xlu0 %v12520_v20  ;;  %6847 = vadd.xlane.f32.xlu1 %v6846_v27  ;;  %v12571_v4 = vadd.f32 %v6632_v18, %v6631_v62  ;;  %v12573_v37 = vadd.f32 %v6725_v11, %v6724_v24 }
 0x8ac   : > { %v5854_v55 = vmax.f32 %v5806_v63, 0.0  ;;  %v5810_v16 = vadd.f32 %v5809_v54, %v12440_v31  ;;  %v5811_v49 = vpop.f32.mrb[151].mxu1  ;;  %v12576_v32 = vadd.f32 %v6818_v51, %v6817_v28 }
 0x8ad   : > { %v5855_v35 = vmax.f32 %v5808_v38, 0.0  ;;  %v5812_v23 = vadd.f32 %v5811_v49, %v12446_v19 }
 0x8ae   : > { %v5856_v15 = vmax.f32 %v5810_v16, 0.0  ;;  %v6633_v33 = vmul.f32 %v12459_v14, %v5854_v55  ;;  %v6726_v9 = vmul.f32 %v12456_v30, %v5854_v55  ;;  %v6819_v20 = vmul.f32 %v12462_v52, %v5854_v55 }
 0x8af   : > { %v5857_v27 = vmax.f32 %v5812_v23, 0.0  ;;  %6664 = vadd.xlane.f32.xlu0 %v6663_v45  ;;  %6667 = vadd.xlane.f32.xlu1 %v6666_v42  ;;  %v6634_v13 = vmul.f32 %v12469_v21, %v5855_v35  ;;  %v6727_v44 = vmul.f32 %v12466_v3, %v5855_v35  ;;  %v6820_v46 = vmul.f32 %v12472_v5, %v5855_v35 }
 0x8b0   : > { %v6635_v12 = vmul.f32 %v12459_v14, %v5856_v15  ;;  %v6728_v2 = vmul.f32 %v12456_v30, %v5856_v15  ;;  %v6821_v53 = vmul.f32 %v12462_v52, %v5856_v15  ;;  %v7891_v15 = vld [vmem:[%s13003_s8 + $0x7] ss:$8 sm:$0x3] }
 0x8b1   : > { %v5815_v22 = vpop.f32.mrb[152].mxu1  ;;  %v12588_v34 = vadd.f32 %v6634_v13, %v6633_v33  ;;  %v6636_v25 = vmul.f32 %v12469_v21, %v5857_v27  ;;  %v12591_v29 = vadd.f32 %v6727_v44, %v6726_v9  ;;  %v6729_v45 = vmul.f32 %v12466_v3, %v5857_v27 }
 0x8b2   : > { %v5816_v42 = vadd.f32 %v5815_v22, %v12440_v31  ;;  %v5817_v41 = vpop.f32.mrb[153].mxu1  ;;  %v12595_v50 = vadd.f32 %v6820_v46, %v6819_v20  ;;  %v6822_v7 = vmul.f32 %v12472_v5, %v5857_v27 }
 0x8b3   : > { %v5818_v10 = vadd.f32 %v5817_v41, %v12446_v19  ;;  %v5819_v56 = vpop.f32.mrb[154].mxu1  ;;  %6757 = vadd.xlane.f32.xlu0 %v12536_v48  ;;  %6760 = vadd.xlane.f32.xlu1 %v12544_v58  ;;  %v12601_v6 = vadd.f32 %v6636_v25, %v6635_v12  ;;  %v12603_v39 = vadd.f32 %v6729_v45, %v6728_v2 }
 0x8b4   : > { %v5858_v59 = vmax.f32 %v5816_v42, 0.0  ;;  %v5820_v17 = vadd.f32 %v5819_v56, %v12440_v31  ;;  %v5821_v60 = vpop.f32.mrb[155].mxu1  ;;  %v12606_v47 = vadd.f32 %v6822_v7, %v6821_v53  ;;  %v12645_v45 = vrot.slane %v7891_v15, %v13543_v0 }
 0x8b5   : > { %v5859_v62 = vmax.f32 %v5818_v10, 0.0  ;;  %v5822_v24 = vadd.f32 %v5821_v60, %v12446_v19 }
 0x8b6   : > { %v5860_v28 = vmax.f32 %v5820_v17, 0.0  ;;  %v6637_v57 = vmul.f32 %v12459_v14, %v5858_v59  ;;  %v6730_v48 = vmul.f32 %v12456_v30, %v5858_v59  ;;  %v6823_v58 = vmul.f32 %v12462_v52, %v5858_v59 }
 0x8b7   : > { %v5861_v18 = vmax.f32 %v5822_v24, 0.0  ;;  %6850 = vadd.xlane.f32.xlu0 %v12540_v36  ;;  %6853 = vadd.xlane.f32.xlu1 %v12547_v8  ;;  %v6638_v11 = vmul.f32 %v12469_v21, %v5859_v62  ;;  %v6731_v63 = vmul.f32 %v12466_v3, %v5859_v62  ;;  %v6824_v61 = vmul.f32 %v12472_v5, %v5859_v62 }
 0x8b8   : > { %v6639_v51 = vmul.f32 %v12459_v14, %v5860_v28  ;;  %v6732_v38 = vmul.f32 %v12456_v30, %v5860_v28  ;;  %v6825_v54 = vmul.f32 %v12462_v52, %v5860_v28 }
 0x8b9   : > { %v6640_v55 = vmul.f32 %v12469_v21, %v5861_v18  ;;  %v6733_v16 = vmul.f32 %v12466_v3, %v5861_v18  ;;  %v6826_v36 = vmul.f32 %v12472_v5, %v5861_v18  ;;  %v5825_v49 = vpop.f32.mrb[156].mxu1  ;;  %v12623_v8 = vadd.f32 %v6638_v11, %v6637_v57 }
 0x8ba   : > { %v5826_v35 = vadd.f32 %v5825_v49, %v12440_v31  ;;  %v5827_v23 = vpop.f32.mrb[157].mxu1  ;;  %v12629_v33 = vadd.f32 %v6731_v63, %v6730_v48  ;;  %v12631_v9 = vadd.f32 %v6824_v61, %v6823_v58 }
 0x8bb   : > { %v5828_v20 = vadd.f32 %v5827_v23, %v12446_v19  ;;  %6670 = vadd.xlane.f32.xlu0 %v12559_v43  ;;  %6673 = vadd.xlane.f32.xlu1 %v12571_v4  ;;  %v5829_v27 = vpop.f32.mrb[158].mxu1  ;;  %v12636_v13 = vadd.f32 %v6640_v55, %v6639_v51  ;;  %v12638_v44 = vadd.f32 %v6733_v16, %v6732_v38  ;;  %v7927_v43 = vld [vmem:[%s13003_s8 + $0x13] ss:$8 sm:$0x3] }
 0x8bc   : > { %v5862_v46 = vmax.f32 %v5826_v35, 0.0  ;;  %v5830_v12 = vadd.f32 %v5829_v27, %v12440_v31  ;;  %v5831_v2 = vpop.f32.mrb[159].mxu1  ;;  %v12641_v53 = vadd.f32 %v6826_v36, %v6825_v54  ;;  %v12651_v4 = vrot.slane %v7891_v15, %v13544_v40 }
 0x8bd   : > { %v5863_v22 = vmax.f32 %v5828_v20, 0.0  ;;  %v5832_v25 = vadd.f32 %v5831_v2, %v12446_v19  ;;  %v12665_v24 = vrot.slane %v7927_v43, %v13543_v0 }
 0x8be   : > { %v5864_v42 = vmax.f32 %v5830_v12, 0.0  ;;  %v6641_v41 = vmul.f32 %v12459_v14, %v5862_v46  ;;  %v6734_v31 = vmul.f32 %v12456_v30, %v5862_v46  ;;  %v6827_v7 = vmul.f32 %v12462_v52, %v5862_v46 }
 0x8bf   : > { %v5865_v10 = vmax.f32 %v5832_v25, 0.0  ;;  %6763 = vadd.xlane.f32.xlu0 %v12562_v1  ;;  %6766 = vadd.xlane.f32.xlu1 %v12573_v37  ;;  %v6642_v19 = vmul.f32 %v12469_v21, %v5863_v22  ;;  %v6735_v56 = vmul.f32 %v12466_v3, %v5863_v22  ;;  %v6828_v59 = vmul.f32 %v12472_v5, %v5863_v22 }
 0x8c0   : > { %v6643_v17 = vmul.f32 %v12459_v14, %v5864_v42  ;;  %v6736_v60 = vmul.f32 %v12456_v30, %v5864_v42  ;;  %v6829_v62 = vmul.f32 %v12462_v52, %v5864_v42  ;;  %v12674_v14 = vrot.slane %v7927_v43, %v13544_v40 }
 0x8c1   : > { %v6644_v28 = vmul.f32 %v12469_v21, %v5865_v10  ;;  %v6737_v1 = vmul.f32 %v12466_v3, %v5865_v10  ;;  %v6830_v37 = vmul.f32 %v12472_v5, %v5865_v10  ;;  %v6489_v57 = vpop.f32.mrb[128].mxu0  ;;  %v12670_v48 = vadd.f32 %v6642_v19, %v6641_v41 }
 0x8c2   : > { %v6490_v58 = vadd.f32 %v6489_v57, %v12645_v45  ;;  %v6491_v18 = vpop.f32.mrb[129].mxu0  ;;  %v12676_v30 = vadd.f32 %v6735_v56, %v6734_v31  ;;  %v12678_v52 = vadd.f32 %v6828_v59, %v6827_v7 }
 0x8c3   : > { %v6492_v11 = vadd.f32 %v6491_v18, %v12651_v4  ;;  %6856 = vadd.xlane.f32.xlu0 %v12566_v26  ;;  %6859 = vadd.xlane.f32.xlu1 %v12576_v32  ;;  %v6493_v3 = vpop.f32.mrb[130].mxu0  ;;  %v12683_v21 = vadd.f32 %v6644_v28, %v6643_v17  ;;  %v12685_v5 = vadd.f32 %v6737_v1, %v6736_v60 }
 0x8c4   : > { %v6568_v63 = vmax.f32 %v6490_v58, 0.0  ;;  %v6494_v61 = vadd.f32 %v6493_v3, %v12645_v45  ;;  %v6495_v51 = vpop.f32.mrb[131].mxu0  ;;  %v12688_v38 = vadd.f32 %v6830_v37, %v6829_v62 }
 0x8c5   : > { %v6569_v54 = vmax.f32 %v6492_v11, 0.0  ;;  %v6496_v55 = vadd.f32 %v6495_v51, %v12651_v4 }
 0x8c6   : > { %v6892_v16 = vmul.f32 %v12665_v24, %v6568_v63  ;;  %v6570_v36 = vmax.f32 %v6494_v61, 0.0 }
 0x8c7   : > { %v6893_v26 = vmul.f32 %v12674_v14, %v6569_v54  ;;  %v6571_v32 = vmax.f32 %v6496_v55, 0.0  ;;  %6676 = vadd.xlane.f32.xlu0 %v12588_v34  ;;  %6679 = vadd.xlane.f32.xlu1 %v12601_v6 }
 0x8c8   : > { %v6894_v49 = vmul.f32 %v12665_v24, %v6570_v36 }
 0x8c9   : > { %v6895_v35 = vmul.f32 %v12674_v14, %v6571_v32  ;;  %v6499_v23 = vpop.f32.mrb[160].mxu1  ;;  %v12697_v15 = vadd.f32 %v6893_v26, %v6892_v16 }
 0x8ca   : > { %v6500_v20 = vadd.f32 %v6499_v23, %v12645_v45  ;;  %v6501_v27 = vpop.f32.mrb[161].mxu1 }
 0x8cb   : > { %v6502_v46 = vadd.f32 %v6501_v27, %v12651_v4  ;;  %6769 = vadd.xlane.f32.xlu0 %v12591_v29  ;;  %6772 = vadd.xlane.f32.xlu1 %v12603_v39  ;;  %v6503_v12 = vpop.f32.mrb[162].mxu1  ;;  %v12703_v34 = vadd.f32 %v6895_v35, %v6894_v49 }
 0x8cc   : > { %v6572_v6 = vmax.f32 %v6500_v20, 0.0  ;;  %v6504_v2 = vadd.f32 %v6503_v12, %v12645_v45  ;;  %v6505_v22 = vpop.f32.mrb[163].mxu1 }
 0x8cd   : > { %v6573_v25 = vmax.f32 %v6502_v46, 0.0  ;;  %v6506_v43 = vadd.f32 %v6505_v22, %v12651_v4 }
 0x8ce   : > { %v6896_v42 = vmul.f32 %v12665_v24, %v6572_v6  ;;  %v6574_v41 = vmax.f32 %v6504_v2, 0.0 }
 0x8cf   : > { %v6897_v31 = vmul.f32 %v12674_v14, %v6573_v25  ;;  %v6575_v7 = vmax.f32 %v6506_v43, 0.0  ;;  %6862 = vadd.xlane.f32.xlu0 %v12595_v50  ;;  %6865 = vadd.xlane.f32.xlu1 %v12606_v47 }
 0x8d0   : > { %v6898_v29 = vmul.f32 %v12665_v24, %v6574_v41 }
 0x8d1   : > { %v6899_v39 = vmul.f32 %v12674_v14, %v6575_v7  ;;  %v6509_v10 = vpop.f32.mrb[164].mxu1  ;;  %v12713_v19 = vadd.f32 %v6897_v31, %v6896_v42 }
 0x8d2   : > { %v6510_v56 = vadd.f32 %v6509_v10, %v12645_v45  ;;  %v6511_v59 = vpop.f32.mrb[165].mxu1 }
 0x8d3   : > { %v6512_v17 = vadd.f32 %v6511_v59, %v12651_v4  ;;  %6682 = vadd.xlane.f32.xlu0 %v12623_v8  ;;  %6685 = vadd.xlane.f32.xlu1 %v12636_v13  ;;  %v6513_v60 = vpop.f32.mrb[166].mxu1  ;;  %v12719_v50 = vadd.f32 %v6899_v39, %v6898_v29 }
 0x8d4   : > { %v6576_v47 = vmax.f32 %v6510_v56, 0.0  ;;  %v6514_v62 = vadd.f32 %v6513_v60, %v12645_v45  ;;  %v6515_v28 = vpop.f32.mrb[167].mxu1 }
 0x8d5   : > { %v6577_v1 = vmax.f32 %v6512_v17, 0.0  ;;  %v6516_v37 = vadd.f32 %v6515_v28, %v12651_v4 }
 0x8d6   : > { %v6900_v57 = vmul.f32 %v12665_v24, %v6576_v47  ;;  %v6578_v58 = vmax.f32 %v6514_v62, 0.0 }
 0x8d7   : > { %v6901_v18 = vmul.f32 %v12674_v14, %v6577_v1  ;;  %v6579_v11 = vmax.f32 %v6516_v37, 0.0  ;;  %6775 = vadd.xlane.f32.xlu0 %v12629_v33  ;;  %6778 = vadd.xlane.f32.xlu1 %v12638_v44 }
 0x8d8   : > { %v6902_v8 = vmul.f32 %v12665_v24, %v6578_v58 }
 0x8d9   : > { %v6903_v13 = vmul.f32 %v12674_v14, %v6579_v11  ;;  %v6519_v3 = vpop.f32.mrb[168].mxu1  ;;  %v12729_v63 = vadd.f32 %v6901_v18, %v6900_v57 }
 0x8da   : > { %v6520_v61 = vadd.f32 %v6519_v3, %v12645_v45  ;;  %v6521_v51 = vpop.f32.mrb[169].mxu1 }
 0x8db   : > { %v6522_v54 = vadd.f32 %v6521_v51, %v12651_v4  ;;  %6868 = vadd.xlane.f32.xlu0 %v12631_v9  ;;  %6871 = vadd.xlane.f32.xlu1 %v12641_v53  ;;  %v6523_v55 = vpop.f32.mrb[170].mxu1  ;;  %v12735_v33 = vadd.f32 %v6903_v13, %v6902_v8 }
 0x8dc   : > { %v6580_v44 = vmax.f32 %v6520_v61, 0.0  ;;  %v6524_v16 = vadd.f32 %v6523_v55, %v12645_v45  ;;  %v6525_v36 = vpop.f32.mrb[171].mxu1 }
 0x8dd   : > { %v6581_v26 = vmax.f32 %v6522_v54, 0.0  ;;  %v6526_v32 = vadd.f32 %v6525_v36, %v12651_v4 }
 0x8de   : > { %v6904_v49 = vmul.f32 %v12665_v24, %v6580_v44  ;;  %v6582_v35 = vmax.f32 %v6524_v16, 0.0 }
 0x8df   : > { %v6905_v23 = vmul.f32 %v12674_v14, %v6581_v26  ;;  %v6583_v20 = vmax.f32 %v6526_v32, 0.0  ;;  %6691 = vadd.xlane.f32.xlu1 %v12683_v21  ;;  %6688 = vadd.xlane.f32.xlu0 %v12670_v48 }
 0x8e0   : > { %v6906_v9 = vmul.f32 %v12665_v24, %v6582_v35 }
 0x8e1   : > { %v6907_v53 = vmul.f32 %v12674_v14, %v6583_v20  ;;  %v6529_v27 = vpop.f32.mrb[172].mxu1  ;;  %v6942_v46 = vadd.f32 %v6905_v23, %v6904_v49 }
 0x8e2   : > { %v6530_v12 = vadd.f32 %v6529_v27, %v12645_v45  ;;  %v6531_v6 = vpop.f32.mrb[173].mxu1 }
 0x8e3   : > { %v6532_v2 = vadd.f32 %v6531_v6, %v12651_v4  ;;  %v6533_v22 = vpop.f32.mrb[174].mxu1  ;;  %6784 = vadd.xlane.f32.xlu1 %v12685_v5  ;;  %6781 = vadd.xlane.f32.xlu0 %v12676_v30  ;;  %v6945_v25 = vadd.f32 %v6907_v53, %v6906_v9 }
 0x8e4   : > { %v6584_v21 = vmax.f32 %v6530_v12, 0.0  ;;  %v6534_v48 = vadd.f32 %v6533_v22, %v12645_v45  ;;  %v6535_v43 = vpop.f32.mrb[175].mxu1 }
 0x8e5   : > { %v6585_v42 = vmax.f32 %v6532_v2, 0.0  ;;  %v6536_v41 = vadd.f32 %v6535_v43, %v12651_v4 }
 0x8e6   : > { %v6908_v31 = vmul.f32 %v12665_v24, %v6584_v21  ;;  %v6586_v7 = vmax.f32 %v6534_v48, 0.0 }
 0x8e7   : > { %v6909_v29 = vmul.f32 %v12674_v14, %v6585_v42  ;;  %v6587_v39 = vmax.f32 %v6536_v41, 0.0  ;;  %6877 = vadd.xlane.f32.xlu1 %v12688_v38  ;;  %6874 = vadd.xlane.f32.xlu0 %v12678_v52 }
 0x8e8   : > { %v6910_v30 = vmul.f32 %v12665_v24, %v6586_v7 }
 0x8e9   : > { %v6911_v5 = vmul.f32 %v12674_v14, %v6587_v39  ;;  %v6539_v10 = vpop.f32.mrb[176].mxu1  ;;  %v6948_v56 = vadd.f32 %v6909_v29, %v6908_v31 }
 0x8ea   : > { %v6540_v59 = vadd.f32 %v6539_v10, %v12645_v45  ;;  %v6541_v17 = vpop.f32.mrb[177].mxu1 }
 0x8eb   : > { %v6542_v60 = vadd.f32 %v6541_v17, %v12651_v4  ;;  %v6543_v47 = vpop.f32.mrb[178].mxu1  ;;  %6928 = vadd.xlane.f32.xlu1 %v12703_v34  ;;  %6925 = vadd.xlane.f32.xlu0 %v12697_v15  ;;  %v6951_v62 = vadd.f32 %v6911_v5, %v6910_v30 }
 0x8ec   : > { %v6588_v38 = vmax.f32 %v6540_v59, 0.0  ;;  %v6544_v52 = vadd.f32 %v6543_v47, %v12645_v45  ;;  %v6545_v28 = vpop.f32.mrb[179].mxu1 }
 0x8ed   : > { %v6589_v1 = vmax.f32 %v6542_v60, 0.0  ;;  %v6546_v37 = vadd.f32 %v6545_v28, %v12651_v4 }
 0x8ee   : > { %v6912_v57 = vmul.f32 %v12665_v24, %v6588_v38  ;;  %v6590_v58 = vmax.f32 %v6544_v52, 0.0 }
 0x8ef   : > { %v6913_v18 = vmul.f32 %v12674_v14, %v6589_v1  ;;  %v6591_v11 = vmax.f32 %v6546_v37, 0.0  ;;  %6934 = vadd.xlane.f32.xlu1 %v12719_v50  ;;  %6931 = vadd.xlane.f32.xlu0 %v12713_v19 }
 0x8f0   : > { %v6914_v15 = vmul.f32 %v12665_v24, %v6590_v58 }
 0x8f1   : > { %v6915_v34 = vmul.f32 %v12674_v14, %v6591_v11  ;;  %v6549_v8 = vpop.f32.mrb[180].mxu1  ;;  %v6954_v13 = vadd.f32 %v6913_v18, %v6912_v57 }
 0x8f2   : > { %v6550_v3 = vadd.f32 %v6549_v8, %v12645_v45  ;;  %v6551_v61 = vpop.f32.mrb[181].mxu1 }
 0x8f3   : > { %v6552_v51 = vadd.f32 %v6551_v61, %v12651_v4  ;;  %v6553_v54 = vpop.f32.mrb[182].mxu1  ;;  %6940 = vadd.xlane.f32.xlu1 %v12735_v33  ;;  %6937 = vadd.xlane.f32.xlu0 %v12729_v63  ;;  %v6957_v55 = vadd.f32 %v6915_v34, %v6914_v15 }
 0x8f4   : > { %v6592_v50 = vmax.f32 %v6550_v3, 0.0  ;;  %v6554_v19 = vadd.f32 %v6553_v54, %v12645_v45  ;;  %v6555_v44 = vpop.f32.mrb[183].mxu1 }
 0x8f5   : > { %v6593_v16 = vmax.f32 %v6552_v51, 0.0  ;;  %v6556_v36 = vadd.f32 %v6555_v44, %v12651_v4 }
 0x8f6   : > { %v6916_v26 = vmul.f32 %v12665_v24, %v6592_v50  ;;  %v6594_v32 = vmax.f32 %v6554_v19, 0.0 }
 0x8f7   : > { %v6917_v49 = vmul.f32 %v12674_v14, %v6593_v16  ;;  %v6595_v35 = vmax.f32 %v6556_v36, 0.0  ;;  %6946 = vadd.xlane.f32.xlu1 %v6945_v25  ;;  %6943 = vadd.xlane.f32.xlu0 %v6942_v46 }
 0x8f8   : > { %v6918_v33 = vmul.f32 %v12665_v24, %v6594_v32 }
 0x8f9   : > { %v6919_v63 = vmul.f32 %v12674_v14, %v6595_v35  ;;  %v6559_v23 = vpop.f32.mrb[184].mxu1  ;;  %v6960_v20 = vadd.f32 %v6917_v49, %v6916_v26 }
 0x8fa   : > { %v6560_v9 = vadd.f32 %v6559_v23, %v12645_v45  ;;  %v6561_v53 = vpop.f32.mrb[185].mxu1 }
 0x8fb   : > { %v6562_v27 = vadd.f32 %v6561_v53, %v12651_v4  ;;  %v6563_v12 = vpop.f32.mrb[186].mxu1  ;;  %6952 = vadd.xlane.f32.xlu1 %v6951_v62  ;;  %6949 = vadd.xlane.f32.xlu0 %v6948_v56  ;;  %v6963_v6 = vadd.f32 %v6919_v63, %v6918_v33  ;;  %v13545_v56 = vld [vmem:[#allocation5_spill] sm:$0xff] }
 0x8fc   : > { %v6596_v2 = vmax.f32 %v6560_v9, 0.0  ;;  %v6564_v22 = vadd.f32 %v6563_v12, %v12645_v45  ;;  %v6565_v25 = vpop.f32.mrb[187].mxu1 }
 0x8fd   : > { %v6597_v46 = vmax.f32 %v6562_v27, 0.0  ;;  %v6566_v21 = vadd.f32 %v6565_v25, %v12651_v4  ;;  %v12790_v4 = vld [vmem:[%s13004_s9] sm:$0x1f] }
 0x8fe   : > { %v6920_v48 = vmul.f32 %v12665_v24, %v6596_v2  ;;  %v6598_v43 = vmax.f32 %v6564_v22, 0.0  ;;  %v12794_v39 = vrot.slane %v12790_v4, %v13544_v40  ;;  %v12804_v59 = vrot.slane %v12790_v4, %v13545_v56 }
 0x8ff   : > { %v6921_v42 = vmul.f32 %v12674_v14, %v6597_v46  ;;  %v6599_v41 = vmax.f32 %v6566_v21, 0.0  ;;  %6958 = vadd.xlane.f32.xlu1 %v6957_v55  ;;  %6955 = vadd.xlane.f32.xlu0 %v6954_v13 }
 0x900   : > { %v6922_v31 = vmul.f32 %v12665_v24, %v6598_v43  ;;  %v12798_v24 = vrot.slane %v12790_v4, %v13543_v0 }
 0x901   : > { %v6923_v7 = vmul.f32 %v12674_v14, %v6599_v41  ;;  %v6966_v29 = vadd.f32 %v6921_v42, %v6920_v48 }
 0x903   : > { %6964 = vadd.xlane.f32.xlu1 %v6963_v6  ;;  %6961 = vadd.xlane.f32.xlu0 %v6960_v20  ;;  %v6969_v45 = vadd.f32 %v6923_v7, %v6922_v31 }
 0x907   : > { %6970 = vadd.xlane.f32.xlu1 %v6969_v45  ;;  %6967 = vadd.xlane.f32.xlu0 %v6966_v29 }
 0x918   : > { %v6740_v14 = vpop.xlane.xlu0 %6739  ;;  %v6647_v30 = vpop.xlane.xlu1 %6646 }
 0x919   : > { %v6997_v5 = vmul.f32 %v12794_v39, %v6740_v14  ;;  %v6977_v10 = vmul.f32 %v12798_v24, %v6647_v30 }
 0x91b   : > { %v7013_v17 = vadd.f32 %v6997_v5, %v6977_v10 }
 0x91c   : > { %v6833_v60 = vpop.xlane.xlu0 %6832  ;;  %v6743_v47 = vpop.xlane.xlu1 %6742 }
 0x91d   : > { %v7033_v40 = vmul.f32 %v12804_v59, %v6833_v60  ;;  %v6998_v52 = vmul.f32 %v12794_v39, %v6743_v47 }
 0x91f   : > { %v12807_v62 = vadd.f32 %v7033_v40, %v7013_v17 }
 0x920   : > { %v6650_v38 = vpop.xlane.xlu0 %6649  ;;  %v6836_v0 = vpop.xlane.xlu1 %6835 }
 0x921   : > { %v6978_v28 = vmul.f32 %v12798_v24, %v6650_v38  ;;  %v7034_v37 = vmul.f32 %v12804_v59, %v6836_v0 }
 0x923   : > { %v7014_v1 = vadd.f32 %v6998_v52, %v6978_v28 }
 0x924   : > { %v6653_v57 = vpop.xlane.xlu0 %6652  ;;  %v6656_v58 = vpop.xlane.xlu1 %6655 }
 0x925   : > { %v12812_v18 = vadd.f32 %v7034_v37, %v7014_v1  ;;  %v6979_v34 = vmul.f32 %v12798_v24, %v6653_v57  ;;  %v6980_v8 = vmul.f32 %v12798_v24, %v6656_v58 }
 0x928   : > { %v6746_v11 = vpop.xlane.xlu0 %6745  ;;  %v6749_v15 = vpop.xlane.xlu1 %6748 }
 0x929   : > { %v6999_v13 = vmul.f32 %v12794_v39, %v6746_v11  ;;  %v7000_v3 = vmul.f32 %v12794_v39, %v6749_v15 }
 0x92b   : > { %v7015_v61 = vadd.f32 %v6999_v13, %v6979_v34  ;;  %v7016_v51 = vadd.f32 %v7000_v3, %v6980_v8 }
 0x92c   : > { %v6839_v54 = vpop.xlane.xlu0 %6838  ;;  %v6842_v55 = vpop.xlane.xlu1 %6841 }
 0x92d   : > { %v7035_v50 = vmul.f32 %v12804_v59, %v6839_v54  ;;  %v7036_v19 = vmul.f32 %v12804_v59, %v6842_v55  ;;  %v13546_v54 = vld [vmem:[#allocation2_spill] sm:$0xff] }
 0x92e   : > { %v7067_v55 = vsub.s32 3, %v13546_v54 }
 0x92f   : > { %v12820_v44 = vadd.f32 %v7035_v50, %v7015_v61  ;;  %v12822_v16 = vadd.f32 %v7036_v19, %v7016_v51 }
 0x930   : > { %v6659_v36 = vpop.xlane.xlu0 %6658  ;;  %v6662_v26 = vpop.xlane.xlu1 %6661 }
 0x931   : > { %v6981_v35 = vmul.f32 %v12798_v24, %v6659_v36  ;;  %v6982_v33 = vmul.f32 %v12798_v24, %v6662_v26  ;;  %v12865_v36 = vrot.slane %v12790_v4, %v7067_v55 }
 0x934   : > { %v6752_v32 = vpop.xlane.xlu0 %6751  ;;  %v6755_v49 = vpop.xlane.xlu1 %6754 }
 0x935   : > { %v7001_v63 = vmul.f32 %v12794_v39, %v6752_v32  ;;  %v7002_v23 = vmul.f32 %v12794_v39, %v6755_v49 }
 0x937   : > { %v7017_v20 = vadd.f32 %v7001_v63, %v6981_v35  ;;  %v7018_v9 = vadd.f32 %v7002_v23, %v6982_v33  ;;  %v13547_v35 = vsub.s32 4, %v13546_v54 }
 0x938   : > { %v6845_v53 = vpop.xlane.xlu0 %6844  ;;  %v6848_v27 = vpop.xlane.xlu1 %6847 }
 0x939   : > { %v7037_v12 = vmul.f32 %v12804_v59, %v6845_v53  ;;  %v7038_v6 = vmul.f32 %v12804_v59, %v6848_v27  ;;  %v12873_v33 = vrot.slane %v12790_v4, %v13547_v35 }
 0x93b   : > { %v12830_v2 = vadd.f32 %v7037_v12, %v7017_v20  ;;  %v12832_v22 = vadd.f32 %v7038_v6, %v7018_v9 }
 0x93c   : > { %v6665_v25 = vpop.xlane.xlu0 %6664  ;;  %v6668_v46 = vpop.xlane.xlu1 %6667 }
 0x93d   : > { %v6983_v43 = vmul.f32 %v12798_v24, %v6665_v25  ;;  %v6984_v42 = vmul.f32 %v12798_v24, %v6668_v46 }
 0x940   : > { %v6758_v21 = vpop.xlane.xlu0 %6757  ;;  %v6761_v48 = vpop.xlane.xlu1 %6760 }
 0x941   : > { %v7003_v41 = vmul.f32 %v12794_v39, %v6758_v21  ;;  %v7004_v31 = vmul.f32 %v12794_v39, %v6761_v48 }
 0x943   : > { %v7019_v7 = vadd.f32 %v7003_v41, %v6983_v43  ;;  %v7020_v29 = vadd.f32 %v7004_v31, %v6984_v42 }
 0x944   : > { %v6851_v45 = vpop.xlane.xlu0 %6850  ;;  %v6854_v14 = vpop.xlane.xlu1 %6853 }
 0x945   : > { %v7039_v30 = vmul.f32 %v12804_v59, %v6851_v45  ;;  %v7040_v26 = vmul.f32 %v12804_v59, %v6854_v14 }
 0x947   : > { %v12839_v5 = vadd.f32 %v7039_v30, %v7019_v7  ;;  %v7056_v12 = vadd.f32 %v7040_v26, %v7020_v29 }
 0x948   : > { %v6671_v10 = vpop.xlane.xlu0 %6670  ;;  %v6674_v56 = vpop.xlane.xlu1 %6673 }
 0x949   : > { %v6985_v20 = vmul.f32 %v12798_v24, %v6671_v10  ;;  %v6986_v9 = vmul.f32 %v12798_v24, %v6674_v56 }
 0x94c   : > { %v6764_v17 = vpop.xlane.xlu0 %6763  ;;  %v6767_v60 = vpop.xlane.xlu1 %6766 }
 0x94d   : > { %v7005_v32 = vmul.f32 %v12794_v39, %v6764_v17  ;;  %v7006_v49 = vmul.f32 %v12794_v39, %v6767_v60 }
 0x94f   : > { %v7021_v6 = vadd.f32 %v7005_v32, %v6985_v20  ;;  %v7022_v25 = vadd.f32 %v7006_v49, %v6986_v9 }
 0x950   : > { %v6857_v47 = vpop.xlane.xlu0 %6856  ;;  %v6860_v40 = vpop.xlane.xlu1 %6859 }
 0x951   : > { %v7041_v4 = vmul.f32 %v12804_v59, %v6857_v47  ;;  %v7042_v48 = vmul.f32 %v12804_v59, %v6860_v40 }
 0x953   : > { %v7057_v40 = vadd.f32 %v7041_v4, %v7021_v6 }
 0x954   : > { %v6677_v38 = vpop.xlane.xlu0 %6676  ;;  %v6680_v0 = vpop.xlane.xlu1 %6679 }
 0x955   : > { %v6988_v14 = vmul.f32 %v12798_v24, %v6680_v0 }
 0x958   : > { %v6770_v52 = vpop.xlane.xlu0 %6769  ;;  %v6773_v28 = vpop.xlane.xlu1 %6772 }
 0x959   : > { %v7007_v43 = vmul.f32 %v12794_v39, %v6770_v52  ;;  %v7008_v42 = vmul.f32 %v12794_v39, %v6773_v28  ;;  %v7058_v52 = vadd.f32 %v7042_v48, %v7022_v25 }
 0x95b   : > { %v7024_v54 = vadd.f32 %v7008_v42, %v6988_v14 }
 0x95c   : > { %v6863_v1 = vpop.xlane.xlu0 %6862  ;;  %v6866_v37 = vpop.xlane.xlu1 %6865 }
 0x95d   : > { %v7043_v30 = vmul.f32 %v12804_v59, %v6863_v1  ;;  %v7044_v10 = vmul.f32 %v12804_v59, %v6866_v37 }
 0x960   : > { %v12841_v57 = vpop.xlane.xlu0 %6682  ;;  %v12843_v58 = vpop.xlane.xlu1 %6685 }
 0x964   : > { %v6776_v11 = vpop.xlane.xlu0 %6775  ;;  %v12845_v15 = vpop.xlane.xlu1 %6778 }
 0x965   : > { %v7009_v32 = vmul.f32 %v12794_v39, %v6776_v11  ;;  %v7010_v20 = vmul.f32 %v12794_v39, %v12845_v15 }
 0x968   : > { %v12847_v34 = vpop.xlane.xlu0 %6868  ;;  %v12849_v8 = vpop.xlane.xlu1 %6871 }
 0x969   : > { %v7045_v9 = vmul.f32 %v12804_v59, %v12847_v34  ;;  %v7046_v34 = vmul.f32 %v12804_v59, %v12849_v8 }
 0x96c   : > { %v12851_v13 = vpop.xlane.xlu1 %6691  ;;  %v12853_v3 = vpop.xlane.xlu0 %6688 }
 0x970   : > { %v12855_v61 = vpop.xlane.xlu1 %6784  ;;  %v12857_v51 = vpop.xlane.xlu0 %6781 }
 0x971   : > { %v7012_v42 = vmul.f32 %v12794_v39, %v12855_v61 }
 0x974   : > { %v12860_v50 = vpop.xlane.xlu1 %6877  ;;  %v12862_v19 = vpop.xlane.xlu0 %6874 }
 0x978   : > { %v6929_v63 = vpop.xlane.xlu1 %6928  ;;  %v6926_v23 = vpop.xlane.xlu0 %6925 }
 0x979   : > { %v7070_v53 = vmul.f32 %v12865_v36, %v6929_v63  ;;  %v7069_v27 = vmul.f32 %v12865_v36, %v6926_v23  ;;  %v6989_v23 = vmul.f32 %v12798_v24, %v12841_v57  ;;  %v6990_v57 = vmul.f32 %v12798_v24, %v12843_v58 }
 0x97b   : > { %v7086_v46 = vadd.f32 %v7070_v53, %v12812_v18  ;;  %v7085_v21 = vadd.f32 %v7069_v27, %v12807_v62  ;;  %v6987_v62 = vmul.f32 %v12798_v24, %v6677_v38  ;;  %v7026_v48 = vadd.f32 %v7010_v20, %v6990_v57 }
 0x97c   : > { %v6935_v41 = vpop.xlane.xlu1 %6934  ;;  %v6932_v31 = vpop.xlane.xlu0 %6931 }
 0x97d   : > { %v7106_v7 = vadd.f32 %v12873_v33, %v7086_v46  ;;  %v7105_v29 = vadd.f32 %v12873_v33, %v7085_v21  ;;  %v7072_v45 = vmul.f32 %v12865_v36, %v6935_v41  ;;  %v7071_v18 = vmul.f32 %v12865_v36, %v6932_v31 }
 0x97e   : > { %v7023_v28 = vadd.f32 %v7007_v43, %v6987_v62  ;;  %v7025_v46 = vadd.f32 %v7009_v32, %v6989_v23  ;;  %v6991_v62 = vmul.f32 %v12798_v24, %v12853_v3 }
 0x97f   : > { %v7929_v56 = vmul.f32 -1.442695, %v7106_v7  ;;  %v7928_v17 = vmul.f32 -1.442695, %v7105_v29  ;;  %v7088_v60 = vadd.f32 %v7072_v45, %v12822_v16  ;;  %v7087_v47 = vadd.f32 %v7071_v18, %v12820_v44 }
 0x980   : > { %v6941_v55 = vpop.xlane.xlu1 %6940  ;;  %v6938_v26 = vpop.xlane.xlu0 %6937  ;;  %v12898_v37 = vadd.f32 %v7043_v30, %v7023_v28  ;;  %v7060_v16 = vadd.f32 %v7044_v10, %v7024_v54  ;;  %v12919_v43 = vadd.f32 %v7045_v9, %v7025_v46  ;;  %v7062_v18 = vadd.f32 %v7046_v34, %v7026_v48 }
 0x981   : > { %8598 = vpow2.f32 %v7929_v56  ;;  %v7108_v38 = vadd.f32 %v12873_v33, %v7088_v60  ;;  %v7107_v0 = vadd.f32 %v12873_v33, %v7087_v47  ;;  %v7074_v1 = vmul.f32 %v12865_v36, %v6941_v55 }
 0x982   : > { %8600 = vpow2.f32 %v7928_v17  ;;  %v7073_v44 = vmul.f32 %v12865_v36, %v6938_v26  ;;  %v7048_v26 = vmul.f32 %v12804_v59, %v12860_v50  ;;  %v7047_v50 = vmul.f32 %v12804_v59, %v12862_v19 }
 0x983   : > { %v7931_v49 = vmul.f32 -1.442695, %v7108_v38  ;;  %v7930_v35 = vmul.f32 -1.442695, %v7107_v0  ;;  %v7090_v63 = vadd.f32 %v7074_v1, %v12832_v22 }
 0x984   : > { %v7089_v53 = vadd.f32 %v7073_v44, %v12830_v2  ;;  %v6947_v11 = vpop.xlane.xlu1 %6946  ;;  %v6944_v27 = vpop.xlane.xlu0 %6943 }
 0x985   : > { %8602 = vpow2.f32 %v7931_v49  ;;  %v7110_v6 = vadd.f32 %v12873_v33, %v7090_v63  ;;  %v7076_v25 = vmul.f32 %v12865_v36, %v6947_v11  ;;  %v7075_v22 = vmul.f32 %v12865_v36, %v6944_v27 }
 0x986   : > { %8604 = vpow2.f32 %v7930_v35  ;;  %v7109_v15 = vadd.f32 %v12873_v33, %v7089_v53 }
 0x987   : > { %v7933_v2 = vmul.f32 -1.442695, %v7110_v6  ;;  %v7092_v21 = vadd.f32 %v7076_v25, %v7056_v12  ;;  %v7091_v4 = vadd.f32 %v7075_v22, %v12839_v5  ;;  %v6992_v12 = vmul.f32 %v12798_v24, %v12851_v13 }
 0x988   : > { %v7932_v41 = vmul.f32 -1.442695, %v7109_v15  ;;  %v6953_v31 = vpop.xlane.xlu1 %6952  ;;  %v6950_v58 = vpop.xlane.xlu0 %6949  ;;  %v7011_v5 = vmul.f32 %v12794_v39, %v12857_v51 }
 0x989   : > { %8606 = vpow2.f32 %v7933_v2  ;;  %v7112_v7 = vadd.f32 %v12873_v33, %v7092_v21  ;;  %v7111_v29 = vadd.f32 %v12873_v33, %v7091_v4  ;;  %v7078_v8 = vmul.f32 %v12865_v36, %v6953_v31 }
 0x98a   : > { %8608 = vpow2.f32 %v7932_v41  ;;  %v7077_v45 = vmul.f32 %v12865_v36, %v6950_v58  ;;  %v7028_v56 = vadd.f32 %v7012_v42, %v6992_v12  ;;  %v7027_v55 = vadd.f32 %v7011_v5, %v6991_v62 }
 0x98b   : > { %v8599_v61 = vpop.eup %8598  ;;  %v7935_v14 = vmul.f32 -1.442695, %v7112_v7  ;;  %v7094_v30 = vadd.f32 %v7078_v8, %v7058_v52  ;;  %v7934_v60 = vmul.f32 -1.442695, %v7111_v29 }
 0x98c   : > { %v8601_v10 = vpop.eup %8600  ;;  %v7170_v17 = vadd.f32 1.0, %v8599_v61  ;;  %v7093_v47 = vadd.f32 %v7077_v45, %v7057_v40  ;;  %v6959_v28 = vpop.xlane.xlu1 %6958  ;;  %v7064_v11 = vadd.f32 %v7048_v26, %v7028_v56  ;;  %v7063_v2 = vadd.f32 %v7047_v50, %v7027_v55 }
 0x98d   : > { %v6956_v13 = vpop.xlane.xlu0 %6955  ;;  %v7169_v54 = vadd.f32 1.0, %v8601_v10  ;;  %8610 = vpow2.f32 %v7935_v14  ;;  %v7114_v39 = vadd.f32 %v12873_v33, %v7094_v30  ;;  %v7080_v51 = vmul.f32 %v12865_v36, %v6959_v28 }
 0x98e   : > { %8612 = vrcp.f32 %v7170_v17  ;;  %v7113_v24 = vadd.f32 %v12873_v33, %v7093_v47  ;;  %v7079_v3 = vmul.f32 %v12865_v36, %v6956_v13 }
 0x98f   : > { %v8603_v52 = vpop.eup %8602  ;;  %8614 = vrcp.f32 %v7169_v54  ;;  %v7937_v40 = vmul.f32 -1.442695, %v7114_v39  ;;  %v7096_v38 = vadd.f32 %v7080_v51, %v7060_v16 }
 0x990   : > { %v8605_v0 = vpop.eup %8604  ;;  %v7172_v1 = vadd.f32 1.0, %v8603_v52  ;;  %8616 = vpow2.f32 %v7934_v60  ;;  %v7936_v32 = vmul.f32 -1.442695, %v7113_v24  ;;  %v7095_v44 = vadd.f32 %v7079_v3, %v12898_v37  ;;  %v6965_v49 = vpop.xlane.xlu1 %6964 }
 0x991   : > { %v6962_v35 = vpop.xlane.xlu0 %6961  ;;  %v7171_v63 = vadd.f32 1.0, %v8605_v0  ;;  %8618 = vpow2.f32 %v7937_v40  ;;  %v7116_v23 = vadd.f32 %v12873_v33, %v7096_v38  ;;  %v7082_v20 = vmul.f32 %v12865_v36, %v6965_v49 }
 0x992   : > { %8620 = vrcp.f32 %v7172_v1  ;;  %v7115_v16 = vadd.f32 %v12873_v33, %v7095_v44  ;;  %v7081_v9 = vmul.f32 %v12865_v36, %v6962_v35 }
 0x993   : > { %v8607_v53 = vpop.eup %8606  ;;  %8622 = vrcp.f32 %v7171_v63  ;;  %v7939_v37 = vmul.f32 -1.442695, %v7116_v23  ;;  %v7098_v27 = vadd.f32 %v7082_v20, %v7062_v18 }
 0x994   : > { %v8609_v6 = vpop.eup %8608  ;;  %v7174_v25 = vadd.f32 1.0, %v8607_v53  ;;  %8624 = vpow2.f32 %v7936_v32  ;;  %v7938_v22 = vmul.f32 -1.442695, %v7115_v16  ;;  %v7097_v57 = vadd.f32 %v7081_v9, %v12919_v43  ;;  %v6971_v46 = vpop.xlane.xlu1 %6970 }
 0x995   : > { %v6968_v15 = vpop.xlane.xlu0 %6967  ;;  %v7173_v59 = vadd.f32 1.0, %v8609_v6  ;;  %8626 = vpow2.f32 %v7939_v37  ;;  %v7118_v19 = vadd.f32 %v12873_v33, %v7098_v27  ;;  %v7084_v34 = vmul.f32 %v12865_v36, %v6971_v46 }
 0x996   : > { %8628 = vrcp.f32 %v7174_v25  ;;  %v7117_v21 = vadd.f32 %v12873_v33, %v7097_v57  ;;  %v7083_v4 = vmul.f32 %v12865_v36, %v6968_v15 }
 0x997   : > { %v8611_v48 = vpop.eup %8610  ;;  %8630 = vrcp.f32 %v7173_v59  ;;  %v7941_v43 = vmul.f32 -1.442695, %v7118_v19  ;;  %v7100_v42 = vadd.f32 %v7084_v34, %v7064_v11 }
 0x998   : > { %v8613_v41 = vpop.eup %8612  ;;  %v7176_v31 = vadd.f32 1.0, %v8611_v48  ;;  %8632 = vpow2.f32 %v7938_v22  ;;  %v7940_v58 = vmul.f32 -1.442695, %v7117_v21  ;;  %v7099_v7 = vadd.f32 %v7083_v4, %v7063_v2 }
 0x999   : > { %v8615_v29 = vpop.eup %8614  ;;  %7219 = vst.msk [vmem:[%s12954_s18 + $0x8] sm:$0xff] %vm7217_vm0, %v8613_v41  ;;  %8634 = vpow2.f32 %v7941_v43  ;;  %v7120_v8 = vadd.f32 %v12873_v33, %v7100_v42 }
 0x99a   : > { %v8617_v12 = vpop.eup %8616  ;;  %7218 = vst.msk [vmem:[%s12954_s18] sm:$0xff] %vm7217_vm0, %v8615_v29  ;;  %8636 = vrcp.f32 %v7176_v31  ;;  %v7119_v36 = vadd.f32 %v12873_v33, %v7099_v7 }
 0x99b   : > { %v8619_v5 = vpop.eup %8618  ;;  %v7175_v45 = vadd.f32 1.0, %v8617_v12  ;;  %8638 = vpow2.f32 %v7940_v58  ;;  %v7943_v61 = vmul.f32 -1.442695, %v7120_v8 }
 0x99c   : > { %v8621_v18 = vpop.eup %8620  ;;  %v7178_v62 = vadd.f32 1.0, %v8619_v5  ;;  %v7942_v14 = vmul.f32 -1.442695, %v7119_v36 }
 0x99d   : > { %v8623_v30 = vpop.eup %8622  ;;  %7221 = vst.msk [vmem:[%s12954_s18 + $0x18] sm:$0xff] %vm7217_vm0, %v8621_v18  ;;  %8640 = vrcp.f32 %v7175_v45 }
 0x99e   : > { %v8625_v10 = vpop.eup %8624  ;;  %7220 = vst.msk [vmem:[%s12954_s18 + $0x10] sm:$0xff] %vm7217_vm0, %v8623_v30  ;;  %8642 = vrcp.f32 %v7178_v62 }
 0x99f   : > { %v8627_v56 = vpop.eup %8626  ;;  %v7177_v17 = vadd.f32 1.0, %v8625_v10  ;;  %8644 = vpow2.f32 %v7943_v61 }
 0x9a0   : > { %v8629_v33 = vpop.eup %8628  ;;  %v7180_v60 = vadd.f32 1.0, %v8627_v56  ;;  %8646 = vpow2.f32 %v7942_v14 }
 0x9a1   : > { %v8631_v47 = vpop.eup %8630  ;;  %7223 = vst.msk [vmem:[%s12954_s18 + $0x28] sm:$0xff] %vm7217_vm0, %v8629_v33  ;;  %8648 = vrcp.f32 %v7177_v17 }
 0x9a2   : > { %v8633_v28 = vpop.eup %8632  ;;  %7222 = vst.msk [vmem:[%s12954_s18 + $0x20] sm:$0xff] %vm7217_vm0, %v8631_v47  ;;  %8650 = vrcp.f32 %v7180_v60 }
 0x9a3   : > { %v8635_v13 = vpop.eup %8634  ;;  %v7179_v54 = vadd.f32 1.0, %v8633_v28 }
 0x9a4   : > { %v8637_v39 = vpop.eup %8636  ;;  %v7182_v51 = vadd.f32 1.0, %v8635_v13 }
 0x9a5   : > { %v8639_v55 = vpop.eup %8638  ;;  %7225 = vst.msk [vmem:[%s12954_s18 + $0x38] sm:$0xff] %vm7217_vm0, %v8637_v39  ;;  %8652 = vrcp.f32 %v7179_v54 }
 0x9a6   : > { %8654 = vrcp.f32 %v7182_v51  ;;  %v7181_v24 = vadd.f32 1.0, %v8639_v55 }
 0x9a7   : > { %v8641_v3 = vpop.eup %8640 }
 0x9a8   : > { %v8643_v52 = vpop.eup %8642  ;;  %7224 = vst.msk [vmem:[%s12954_s18 + $0x30] sm:$0xff] %vm7217_vm0, %v8641_v3  ;;  %8656 = vrcp.f32 %v7181_v24 }
 0x9a9   : > { %v8645_v26 = vpop.eup %8644  ;;  %7227 = vst.msk [vmem:[%s12954_s18 + $0x48] sm:$0xff] %vm7217_vm0, %v8643_v52 }
 0x9aa   : > { %v8647_v40 = vpop.eup %8646  ;;  %v7184_v38 = vadd.f32 1.0, %v8645_v26 }
 0x9ab   : > { %v8649_v0 = vpop.eup %8648  ;;  %v7183_v1 = vadd.f32 1.0, %v8647_v40 }
 0x9ac   : > { %v8651_v32 = vpop.eup %8650  ;;  %7226 = vst.msk [vmem:[%s12954_s18 + $0x40] sm:$0xff] %vm7217_vm0, %v8649_v0  ;;  %8658 = vrcp.f32 %v7184_v38 }
 0x9ad   : > { %7229 = vst.msk [vmem:[%s12954_s18 + $0x58] sm:$0xff] %vm7217_vm0, %v8651_v32  ;;  %8660 = vrcp.f32 %v7183_v1 }
 0x9af   : > { %v8653_v44 = vpop.eup %8652 }
 0x9b0   : > { %v8655_v49 = vpop.eup %8654  ;;  %7228 = vst.msk [vmem:[%s12954_s18 + $0x50] sm:$0xff] %vm7217_vm0, %v8653_v44 }
 0x9b1   : > { %7231 = vst.msk [vmem:[%s12954_s18 + $0x68] sm:$0xff] %vm7217_vm0, %v8655_v49 }
 0x9b2   : > { %v8657_v35 = vpop.eup %8656 }
 0x9b3   : > { %7230 = vst.msk [vmem:[%s12954_s18 + $0x60] sm:$0xff] %vm7217_vm0, %v8657_v35 }
 0x9b6   : > { %v8659_v63 = vpop.eup %8658 }
 0x9b7   : > { %v8661_v23 = vpop.eup %8660  ;;  %7233 = vst.msk [vmem:[%s12954_s18 + $0x78] sm:$0xff] %vm7217_vm0, %v8659_v63 }
 0x9b8   : > { %7232 = vst.msk [vmem:[%s12954_s18 + $0x70] sm:$0xff] %vm7217_vm0, %v8661_v23 }
 0x9b9 PF: > { %s20_s13 = sadd.s32 1, %s8668_s13  }
 0x9ba   : > { %p17_p4 = scmp.ge.s32.totalorder %s20_s13, 4  }
 0x9bc   :  { %19 = sbr.rel (!%p17_p4) target bundleno = 1 (0x1), region = 114 }

</bundles_post_ra>
